<compile_context>
chip_gen: v5e
topology: v5e:2x2
jax: 0.10.0
libtpu: 0.0.40
codegen_flags: <defaults>
</compile_context>

<pallas_src>
import functools

import jax
import jax.numpy as jnp
from jax.experimental import pallas as pl
from jax.experimental.pallas import tpu as pltpu

BN_EPS = 1e-5


def _round_up(x, m):
    return (x + m - 1) // m * m


# --------------------------------------------------------------------------------------
# Pallas kernels
# --------------------------------------------------------------------------------------
def _mm_bn_kernel(a_ref, b_ref, s_ref, c_ref, o_ref, *, relu):
    """out = relu?( (A @ B) * scale + bias ); accumulate directly into the resident
    output block across the K grid axis (last axis, 'arbitrary')."""
    k = pl.program_id(2)

    @pl.when(k == 0)
    def _():
        o_ref[...] = jnp.zeros_like(o_ref)

    o_ref[...] += jnp.dot(a_ref[...], b_ref[...], preferred_element_type=jnp.float32)

    @pl.when(k == pl.num_programs(2) - 1)
    def _():
        y = o_ref[...] * s_ref[...] + c_ref[...]
        if relu:
            y = jnp.maximum(y, 0.0)
        o_ref[...] = y


def _mm_bn_res_kernel(a_ref, b_ref, s_ref, c_ref, r_ref, o_ref, *, relu):
    """Same as _mm_bn_kernel but with a fused residual add in the epilogue."""
    k = pl.program_id(2)

    @pl.when(k == 0)
    def _():
        o_ref[...] = jnp.zeros_like(o_ref)

    o_ref[...] += jnp.dot(a_ref[...], b_ref[...], preferred_element_type=jnp.float32)

    @pl.when(k == pl.num_programs(2) - 1)
    def _():
        y = o_ref[...] * s_ref[...] + c_ref[...] + r_ref[...]
        if relu:
            y = jnp.maximum(y, 0.0)
        o_ref[...] = y


def _max_reduce_kernel(x_ref, o_ref):
    # x_ref: (27, tm, C) -> o_ref: (tm, C)
    o_ref[...] = jnp.max(x_ref[...], axis=0)


def _mean_reduce_kernel(x_ref, o_ref):
    # x_ref: (1, S, C) -> o_ref: (1, 1, C)
    o_ref[...] = jnp.mean(x_ref[...], axis=1, keepdims=True)


# --------------------------------------------------------------------------------------
# Matmul wrapper (tiled, bf16 operands, fused folded-BN / residual / ReLU epilogue)
# --------------------------------------------------------------------------------------
def _pick_tk(K):
    """Pick a K tile (multiple of 128) minimizing padding; prefer the largest tile."""
    cands = (512, 384, 256, 128)
    kps = [_round_up(K, t) for t in cands]
    best_kp = min(kps)
    for t, kp in zip(cands, kps):
        if kp == best_kp:
            return t, kp
    return 128, _round_up(K, 128)  # unreachable


def matmul_bn_act(a, w, scale, bias, residual=None, relu=True):
    """A:(M,K) @ W:(K,N) with fused per-output-channel scale/bias, optional residual,
    optional ReLU.  A/W go to the MXU as bf16; accumulation and epilogue are f32."""
    M, K = a.shape
    Kw, N = w.shape
    assert Kw == K

    tk, Kp = _pick_tk(K)
    nk = Kp // tk

    Mp = _round_up(M, 8)
    tm = min(Mp, 256)
    Mp = _round_up(Mp, tm)
    nm = Mp // tm

    if N <= 128:
        tn = N
    elif N % 256 == 0:
        tn = 256
    else:
        tn = 128
    assert N % tn == 0
    nn_ = N // tn

    a = a.astype(jnp.bfloat16)
    if (Mp, Kp) != (M, K):
        a = jnp.pad(a, ((0, Mp - M), (0, Kp - K)))
    w = w.astype(jnp.bfloat16)
    if Kp != K:
        w = jnp.pad(w, ((0, Kp - K), (0, 0)))
    scale = scale.reshape(1, N).astype(jnp.float32)
    bias = bias.reshape(1, N).astype(jnp.float32)

    in_specs = [
        pl.BlockSpec((tm, tk), lambda i, j, k: (i, k)),
        pl.BlockSpec((tk, tn), lambda i, j, k: (k, j)),
        pl.BlockSpec((1, tn), lambda i, j, k: (0, j)),
        pl.BlockSpec((1, tn), lambda i, j, k: (0, j)),
    ]
    operands = [a, w, scale, bias]

    if residual is None:
        kernel = functools.partial(_mm_bn_kernel, relu=relu)
    else:
        r = residual.astype(jnp.float32)
        if Mp != M:
            r = jnp.pad(r, ((0, Mp - M), (0, 0)))
        in_specs.append(pl.BlockSpec((tm, tn), lambda i, j, k: (i, j)))
        operands.append(r)
        kernel = functools.partial(_mm_bn_res_kernel, relu=relu)

    out = pl.pallas_call(
        kernel,
        out_shape=jax.ShapeDtypeStruct((Mp, N), jnp.float32),
        grid=(nm, nn_, nk),
        in_specs=in_specs,
        out_specs=pl.BlockSpec((tm, tn), lambda i, j, k: (i, j)),
        compiler_params=pltpu.CompilerParams(
            dimension_semantics=("parallel", "parallel", "arbitrary")),
    )(*operands)
    return out[:M]


# --------------------------------------------------------------------------------------
# Glue: im2col (channels-last), pooling wrappers
# --------------------------------------------------------------------------------------
def im2col_3d(x, k, stride, pad, dil):
    """x: (N, D, H, W, C) -> (N*Do*Ho*Wo, kd*kh*kw*C); feature order (kd, kh, kw, c)."""
    N, D, H, W, C = x.shape
    kd, kh, kw = k
    sd, sh, sw = stride
    pd, ph, pw = pad
    dd, dh, dw = dil
    Do = (D + 2 * pd - dd * (kd - 1) - 1) // sd + 1
    Ho = (H + 2 * ph - dh * (kh - 1) - 1) // sh + 1
    Wo = (W + 2 * pw - dw * (kw - 1) - 1) // sw + 1
    xp = jnp.pad(x, ((0, 0), (pd, pd), (ph, ph), (pw, pw), (0, 0)))
    cols = []
    for i in range(kd):
        for j in range(kh):
            for l in range(kw):
                d0, h0, w0 = i * dd, j * dh, l * dw
                cols.append(
                    xp[:,
                       d0:d0 + sd * (Do - 1) + 1:sd,
                       h0:h0 + sh * (Ho - 1) + 1:sh,
                       w0:w0 + sw * (Wo - 1) + 1:sw, :])
    patches = jnp.concatenate(cols, axis=-1)          # (N, Do, Ho, Wo, K3*C)
    return patches.reshape(N * Do * Ho * Wo, kd * kh * kw * C), (N, Do, Ho, Wo)


def maxpool3d_3x3_s2_p1(x):
    """MaxPool3d(k=3, stride=2, pad=1) on NDHWC; input is post-ReLU (>=0) so zero
    padding is safe."""
    N, D, H, W, C = x.shape
    Do = (D + 2 - 3) // 2 + 1
    Ho = (H + 2 - 3) // 2 + 1
    Wo = (W + 2 - 3) // 2 + 1
    xp = jnp.pad(x, ((0, 0), (1, 1), (1, 1), (1, 1), (0, 0)))
    pats = []
    for i in range(3):
        for j in range(3):
            for l in range(3):
                pats.append(
                    xp[:,
                       i:i + 2 * (Do - 1) + 1:2,
                       j:j + 2 * (Ho - 1) + 1:2,
                       l:l + 2 * (Wo - 1) + 1:2, :].reshape(-1, C))
    M = N * Do * Ho * Wo
    stacked = jnp.stack(pats, axis=0).astype(jnp.float32)   # (27, M, C)

    Mp = _round_up(M, 8)
    tm = min(Mp, 512)
    Mp = _round_up(Mp, tm)
    nm = Mp // tm
    if Mp != M:
        stacked = jnp.pad(stacked, ((0, 0), (0, Mp - M), (0, 0)))

    out = pl.pallas_call(
        _max_reduce_kernel,
        out_shape=jax.ShapeDtypeStruct((Mp, C), jnp.float32),
        grid=(nm,),
        in_specs=[pl.BlockSpec((27, tm, C), lambda i: (0, i, 0))],
        out_specs=pl.BlockSpec((tm, C), lambda i: (i, 0)),
        compiler_params=pltpu.CompilerParams(dimension_semantics=("parallel",)),
    )(stacked)
    return out[:M].reshape(N, Do, Ho, Wo, C)


def global_avgpool(x):
    """AdaptiveAvgPool3d((1,1,1)) on NDHWC: (N, D, H, W, C) -> (N, C)."""
    N, D, H, W, C = x.shape
    S = D * H * W
    flat = x.reshape(N, S, C).astype(jnp.float32)
    out = pl.pallas_call(
        _mean_reduce_kernel,
        out_shape=jax.ShapeDtypeStruct((N, 1, C), jnp.float32),
        grid=(N,),
        in_specs=[pl.BlockSpec((1, S, C), lambda i: (i, 0, 0))],
        out_specs=pl.BlockSpec((1, 1, C), lambda i: (i, 0, 0)),
        compiler_params=pltpu.CompilerParams(dimension_semantics=("parallel",)),
    )(flat)
    return out.reshape(N, C)


# --------------------------------------------------------------------------------------
# Parameters (deterministic synthetic init; no checkpoint loading)
# --------------------------------------------------------------------------------------
def init_params(key, num_classes):
    keys = iter(jax.random.split(key, 128))

    def conv_mat(cout, cin, k):
        fan_in = float(cin * k * k * k)
        w = jax.random.normal(next(keys), (cout, cin, k, k, k), jnp.float32) * (fan_in ** -0.5)
        # (Cout, Cin, kd, kh, kw) -> (kd*kh*kw*Cin, Cout), matching im2col feature order.
        # Pre-cast to bf16 once here (MXU operand dtype).
        return jnp.transpose(w, (2, 3, 4, 1, 0)).reshape(k * k * k * cin, cout).astype(jnp.bfloat16)

    def bn_fold(c):
        gamma = 1.0 + 0.1 * jax.random.normal(next(keys), (c,), jnp.float32)
        beta = 0.1 * jax.random.normal(next(keys), (c,), jnp.float32)
        mean = 0.1 * jax.random.normal(next(keys), (c,), jnp.float32)
        var = 1.0 + 0.1 * jnp.abs(jax.random.normal(next(keys), (c,), jnp.float32))
        scale = gamma / jnp.sqrt(var + BN_EPS)
        bias = beta - mean * scale
        return scale, bias

    def block(cin, cout, downsample):
        p = {}
        p["w1"] = conv_mat(cout, cin, 3)
        p["bn1_scale"], p["bn1_bias"] = bn_fold(cout)
        p["w2"] = conv_mat(cout, cout, 3)
        p["bn2_scale"], p["bn2_bias"] = bn_fold(cout)
        if downsample:  # shortcut_type='B': 1x1x1 conv + BN
            p["dw"] = conv_mat(cout, cin, 1)
            p["dbn_scale"], p["dbn_bias"] = bn_fold(cout)
        return p

    params = {"conv1_w": conv_mat(64, 1, 7)}
    params["bn1_scale"], params["bn1_bias"] = bn_fold(64)
    params["layer1"] = block(64, 64, downsample=False)
    params["layer2"] = block(64, 128, downsample=True)
    params["layer3"] = block(128, 256, downsample=True)
    params["layer4"] = block(256, 512, downsample=True)
    params["fc_w"] = jax.random.normal(next(keys), (512, num_classes), jnp.float32) * (512.0 ** -0.5)
    params["fc_b"] = 0.1 * jax.random.normal(next(keys), (num_classes,), jnp.float32)
    return params


# --------------------------------------------------------------------------------------
# Forward pass (activations channels-last NDHWC end-to-end)
# --------------------------------------------------------------------------------------
def basic_block(x, p, stride, dilation):
    # x: (N, D, H, W, C_in) f32
    cout = p["w1"].shape[1]
    cin = x.shape[-1]
    s3, d3, pad3 = (stride,) * 3, (dilation,) * 3, (dilation,) * 3

    a1, shp1 = im2col_3d(x, (3, 3, 3), s3, pad3, d3)
    h = matmul_bn_act(a1, p["w1"], p["bn1_scale"], p["bn1_bias"], relu=True)
    n, do, ho, wo = shp1
    h = h.reshape(n, do, ho, wo, cout)

    if "dw" in p:  # 1x1x1 conv + BN shortcut (type 'B')
        ar, _ = im2col_3d(x, (1, 1, 1), s3, (0, 0, 0), (1, 1, 1))
        res = matmul_bn_act(ar, p["dw"], p["dbn_scale"], p["dbn_bias"], relu=False)
    else:          # identity shortcut (same spatial, same channels)
        res = x.reshape(-1, cin)

    a2, shp2 = im2col_3d(h, (3, 3, 3), (1, 1, 1), pad3, d3)
    out = matmul_bn_act(a2, p["w2"], p["bn2_scale"], p["bn2_bias"],
                        residual=res, relu=True)
    n2, do2, ho2, wo2 = shp2
    return out.reshape(n2, do2, ho2, wo2, cout)


def resnet10_forward(x, params):
    # x: (N, 1, D, H, W) float32, NCDHW like the PyTorch module.
    x = jnp.transpose(x, (0, 2, 3, 4, 1))            # -> NDHWC once, kept for the whole net
    a, shp = im2col_3d(x, (7, 7, 7), (2, 2, 2), (3, 3, 3), (1, 1, 1))
    y = matmul_bn_act(a, params["conv1_w"], params["bn1_scale"], params["bn1_bias"], relu=True)
    n, do, ho, wo = shp
    y = y.reshape(n, do, ho, wo, 64)
    y = maxpool3d_3x3_s2_p1(y)

    y = basic_block(y, params["layer1"], stride=1, dilation=1)
    y = basic_block(y, params["layer2"], stride=2, dilation=1)
    y = basic_block(y, params["layer3"], stride=1, dilation=2)
    y = basic_block(y, params["layer4"], stride=1, dilation=4)

    feat = global_avgpool(y)                          # (N, 512)
    # Dropout(dropout_prob) is identity in eval mode.
    # Tiny fc (N x 512 x num_classes) stays in XLA: lane width num_classes < 128.
    # TODO(synk): training-mode dropout / batch-statistics BatchNorm not implemented.
    logits = feat @ params["fc_w"] + params["fc_b"]
    return logits


# --------------------------------------------------------------------------------------
if __name__ == "__main__":
    NUM_CLASSES = 4
    key = jax.random.PRNGKey(0)
    k_in, k_par = jax.random.split(key)
    # sample_input_D = sample_input_H = sample_input_W = 16, batch = 2, 1 input channel
    x = jax.random.normal(k_in, (2, 1, 16, 16, 16), jnp.float32)
    params = init_params(k_par, NUM_CLASSES)

    fwd = jax.jit(resnet10_forward)
    out = fwd(x, params)
    out = jax.block_until_ready(out)
    assert out.shape == (2, NUM_CLASSES) and out.dtype == jnp.float32
    print("KERNEL_OK")
</pallas_src>

<mosaic_0001>
module attributes {stable_mosaic.version = 11 : i64} {
  func.func @_mm_bn_kernel(%arg0: i32, %arg1: i32, %arg2: i32, %arg3: memref<256x384xbf16, #tpu.memory_space<vmem>>, %arg4: memref<384x64xbf16, #tpu.memory_space<vmem>>, %arg5: memref<1x64xf32, #tpu.memory_space<vmem>>, %arg6: memref<1x64xf32, #tpu.memory_space<vmem>>, %arg7: memref<256x64xf32, #tpu.memory_space<vmem>>) attributes {dimension_semantics = [#tpu.dimension_semantics<parallel>, #tpu.dimension_semantics<parallel>, #tpu.dimension_semantics<arbitrary>], iteration_bounds = array<i64: 4, 1, 1>, scalar_prefetch = 0 : i64, scratch_operands = 0 : i64, tpu.core_type = #tpu.core_type<tc>, window_params = [{transform_indices = @transform_0, window_bounds = array<i64: 256, 384>}, {transform_indices = @transform_1, window_bounds = array<i64: 384, 64>}, {transform_indices = @transform_2, window_bounds = array<i64: 1, 64>}, {transform_indices = @transform_3, window_bounds = array<i64: 1, 64>}, {transform_indices = @transform_4, window_bounds = array<i64: 256, 64>}]} {
    %c0_i32 = arith.constant 0 : i32
    %0 = arith.cmpi eq, %arg2, %c0_i32 : i32
    %1 = arith.extui %0 : i1 to i32
    %c0_i32_0 = arith.constant 0 : i32
    %2 = arith.cmpi ne, %1, %c0_i32_0 : i32
    scf.if %2 {
      %cst_10 = arith.constant 0.000000e+00 : f32
      %12 = vector.broadcast %cst_10 : f32 to vector<256x64xf32>
      %c0_11 = arith.constant 0 : index
      %c0_12 = arith.constant 0 : index
      %13 = vector.load %arg7[%c0_11, %c0_12] : memref<256x64xf32, #tpu.memory_space<vmem>>, vector<256x64xf32>
      tpu.vector_store %arg7[%c0_11, %c0_12], %12 {strides = array<i32>} : memref<256x64xf32, #tpu.memory_space<vmem>>, vector<256x64xf32>,
    } else {
    }
    %c0 = arith.constant 0 : index
    %c0_1 = arith.constant 0 : index
    %3 = vector.load %arg7[%c0, %c0_1] : memref<256x64xf32, #tpu.memory_space<vmem>>, vector<256x64xf32>
    %c0_2 = arith.constant 0 : index
    %c0_3 = arith.constant 0 : index
    %4 = vector.load %arg3[%c0_2, %c0_3] : memref<256x384xbf16, #tpu.memory_space<vmem>>, vector<256x384xbf16>
    %c0_4 = arith.constant 0 : index
    %c0_5 = arith.constant 0 : index
    %5 = vector.load %arg4[%c0_4, %c0_5] : memref<384x64xbf16, #tpu.memory_space<vmem>>, vector<384x64xbf16>
    %cst = arith.constant dense<0.000000e+00> : vector<256x64xf32>
    %6 = tpu.matmul %4, %5, %cst {dimension_numbers = #tpu.dot_dimension_numbers<[1], [0], [0], [1], [0, 0, 1, 1], [], []>} : vector<256x384xbf16>, vector<384x64xbf16>, vector<256x64xf32> -> vector<256x64xf32>
    %7 = arith.addf %3, %6 : vector<256x64xf32>
    %c0_6 = arith.constant 0 : index
    %c0_7 = arith.constant 0 : index
    %8 = vector.load %arg7[%c0_6, %c0_7] : memref<256x64xf32, #tpu.memory_space<vmem>>, vector<256x64xf32>
    tpu.vector_store %arg7[%c0_6, %c0_7], %7 {strides = array<i32>} : memref<256x64xf32, #tpu.memory_space<vmem>>, vector<256x64xf32>,
    %c0_i32_8 = arith.constant 0 : i32
    %9 = arith.cmpi eq, %arg2, %c0_i32_8 : i32
    %10 = arith.extui %9 : i1 to i32
    %c0_i32_9 = arith.constant 0 : i32
    %11 = arith.cmpi ne, %10, %c0_i32_9 : i32
    scf.if %11 {
      %c0_10 = arith.constant 0 : index
      %c0_11 = arith.constant 0 : index
      %12 = vector.load %arg7[%c0_10, %c0_11] : memref<256x64xf32, #tpu.memory_space<vmem>>, vector<256x64xf32>
      %c0_12 = arith.constant 0 : index
      %c0_13 = arith.constant 0 : index
      %13 = vector.load %arg5[%c0_12, %c0_13] : memref<1x64xf32, #tpu.memory_space<vmem>>, vector<1x64xf32>
      %14 = vector.broadcast %13 : vector<1x64xf32> to vector<256x64xf32>
      %15 = arith.mulf %12, %14 : vector<256x64xf32>
      %c0_14 = arith.constant 0 : index
      %c0_15 = arith.constant 0 : index
      %16 = vector.load %arg6[%c0_14, %c0_15] : memref<1x64xf32, #tpu.memory_space<vmem>>, vector<1x64xf32>
      %17 = vector.broadcast %16 : vector<1x64xf32> to vector<256x64xf32>
      %18 = arith.addf %15, %17 : vector<256x64xf32>
      %cst_16 = arith.constant 0.000000e+00 : f32
      %19 = vector.broadcast %cst_16 : f32 to vector<256x64xf32>
      %20 = arith.maximumf %18, %19 : vector<256x64xf32>
      %c0_17 = arith.constant 0 : index
      %c0_18 = arith.constant 0 : index
      %21 = vector.load %arg7[%c0_17, %c0_18] : memref<256x64xf32, #tpu.memory_space<vmem>>, vector<256x64xf32>
      tpu.vector_store %arg7[%c0_17, %c0_18], %20 {strides = array<i32>} : memref<256x64xf32, #tpu.memory_space<vmem>>, vector<256x64xf32>,
    } else {
    }
    return
  }
  func.func @transform_0(%arg0: i32, %arg1: i32, %arg2: i32) -> (i32, i32) {
    %c0_i32 = arith.constant 0 : i32
    return %arg0, %arg2 : i32, i32
  }
  func.func @transform_1(%arg0: i32, %arg1: i32, %arg2: i32) -> (i32, i32) {
    %c0_i32 = arith.constant 0 : i32
    return %arg2, %arg1 : i32, i32
  }
  func.func @transform_2(%arg0: i32, %arg1: i32, %arg2: i32) -> (i32, i32) {
    %c0_i32 = arith.constant 0 : i32
    %c0_i32_0 = arith.constant 0 : i32
    return %c0_i32, %arg1 : i32, i32
  }
  func.func @transform_3(%arg0: i32, %arg1: i32, %arg2: i32) -> (i32, i32) {
    %c0_i32 = arith.constant 0 : i32
    %c0_i32_0 = arith.constant 0 : i32
    return %c0_i32, %arg1 : i32, i32
  }
  func.func @transform_4(%arg0: i32, %arg1: i32, %arg2: i32) -> (i32, i32) {
    %c0_i32 = arith.constant 0 : i32
    return %arg0, %arg1 : i32, i32
  }
}

module attributes {stable_mosaic.version = 11 : i64} {
  func.func @_max_reduce_kernel(%arg0: i32, %arg1: memref<27x128x64xf32, #tpu.memory_space<vmem>>, %arg2: memref<128x64xf32, #tpu.memory_space<vmem>>) attributes {dimension_semantics = [#tpu.dimension_semantics<parallel>], iteration_bounds = array<i64: 1>, scalar_prefetch = 0 : i64, scratch_operands = 0 : i64, tpu.core_type = #tpu.core_type<tc>, window_params = [{transform_indices = @transform_0, window_bounds = array<i64: 27, 128, 64>}, {transform_indices = @transform_1, window_bounds = array<i64: 128, 64>}]} {
    %c0 = arith.constant 0 : index
    %c0_0 = arith.constant 0 : index
    %c0_1 = arith.constant 0 : index
    %0 = vector.load %arg1[%c0, %c0_0, %c0_1] : memref<27x128x64xf32, #tpu.memory_space<vmem>>, vector<27x128x64xf32>
    %cst = arith.constant dense<0xFF800000> : vector<128x64xf32>
    %1 = vector.multi_reduction <maximumf>, %0, %cst [0] : vector<27x128x64xf32> to vector<128x64xf32>
    %c0_2 = arith.constant 0 : index
    %c0_3 = arith.constant 0 : index
    %2 = vector.load %arg2[%c0_2, %c0_3] : memref<128x64xf32, #tpu.memory_space<vmem>>, vector<128x64xf32>
    tpu.vector_store %arg2[%c0_2, %c0_3], %1 {strides = array<i32>} : memref<128x64xf32, #tpu.memory_space<vmem>>, vector<128x64xf32>,
    return
  }
  func.func @transform_0(%arg0: i32) -> (i32, i32, i32) {
    %c0_i32 = arith.constant 0 : i32
    %c0_i32_0 = arith.constant 0 : i32
    %c0_i32_1 = arith.constant 0 : i32
    return %c0_i32, %arg0, %c0_i32_0 : i32, i32, i32
  }
  func.func @transform_1(%arg0: i32) -> (i32, i32) {
    %c0_i32 = arith.constant 0 : i32
    %c0_i32_0 = arith.constant 0 : i32
    return %arg0, %c0_i32 : i32, i32
  }
}

module attributes {stable_mosaic.version = 11 : i64} {
  func.func @_mm_bn_kernel(%arg0: i32, %arg1: i32, %arg2: i32, %arg3: memref<128x256xbf16, #tpu.memory_space<vmem>>, %arg4: memref<256x64xbf16, #tpu.memory_space<vmem>>, %arg5: memref<1x64xf32, #tpu.memory_space<vmem>>, %arg6: memref<1x64xf32, #tpu.memory_space<vmem>>, %arg7: memref<128x64xf32, #tpu.memory_space<vmem>>) attributes {dimension_semantics = [#tpu.dimension_semantics<parallel>, #tpu.dimension_semantics<parallel>, #tpu.dimension_semantics<arbitrary>], iteration_bounds = array<i64: 1, 1, 7>, scalar_prefetch = 0 : i64, scratch_operands = 0 : i64, tpu.core_type = #tpu.core_type<tc>, window_params = [{transform_indices = @transform_0, window_bounds = array<i64: 128, 256>}, {transform_indices = @transform_1, window_bounds = array<i64: 256, 64>}, {transform_indices = @transform_2, window_bounds = array<i64: 1, 64>}, {transform_indices = @transform_3, window_bounds = array<i64: 1, 64>}, {transform_indices = @transform_4, window_bounds = array<i64: 128, 64>}]} {
    %c0_i32 = arith.constant 0 : i32
    %0 = arith.cmpi eq, %arg2, %c0_i32 : i32
    %1 = arith.extui %0 : i1 to i32
    %c0_i32_0 = arith.constant 0 : i32
    %2 = arith.cmpi ne, %1, %c0_i32_0 : i32
    scf.if %2 {
      %cst_9 = arith.constant 0.000000e+00 : f32
      %12 = vector.broadcast %cst_9 : f32 to vector<128x64xf32>
      %c0_10 = arith.constant 0 : index
      %c0_11 = arith.constant 0 : index
      %13 = vector.load %arg7[%c0_10, %c0_11] : memref<128x64xf32, #tpu.memory_space<vmem>>, vector<128x64xf32>
      tpu.vector_store %arg7[%c0_10, %c0_11], %12 {strides = array<i32>} : memref<128x64xf32, #tpu.memory_space<vmem>>, vector<128x64xf32>,
    } else {
    }
    %c0 = arith.constant 0 : index
    %c0_1 = arith.constant 0 : index
    %3 = vector.load %arg7[%c0, %c0_1] : memref<128x64xf32, #tpu.memory_space<vmem>>, vector<128x64xf32>
    %c0_2 = arith.constant 0 : index
    %c0_3 = arith.constant 0 : index
    %4 = vector.load %arg3[%c0_2, %c0_3] : memref<128x256xbf16, #tpu.memory_space<vmem>>, vector<128x256xbf16>
    %c0_4 = arith.constant 0 : index
    %c0_5 = arith.constant 0 : index
    %5 = vector.load %arg4[%c0_4, %c0_5] : memref<256x64xbf16, #tpu.memory_space<vmem>>, vector<256x64xbf16>
    %cst = arith.constant dense<0.000000e+00> : vector<128x64xf32>
    %6 = tpu.matmul %4, %5, %cst {dimension_numbers = #tpu.dot_dimension_numbers<[1], [0], [0], [1], [0, 0, 1, 1], [], []>} : vector<128x256xbf16>, vector<256x64xbf16>, vector<128x64xf32> -> vector<128x64xf32>
    %7 = arith.addf %3, %6 : vector<128x64xf32>
    %c0_6 = arith.constant 0 : index
    %c0_7 = arith.constant 0 : index
    %8 = vector.load %arg7[%c0_6, %c0_7] : memref<128x64xf32, #tpu.memory_space<vmem>>, vector<128x64xf32>
    tpu.vector_store %arg7[%c0_6, %c0_7], %7 {strides = array<i32>} : memref<128x64xf32, #tpu.memory_space<vmem>>, vector<128x64xf32>,
    %c6_i32 = arith.constant 6 : i32
    %9 = arith.cmpi eq, %arg2, %c6_i32 : i32
    %10 = arith.extui %9 : i1 to i32
    %c0_i32_8 = arith.constant 0 : i32
    %11 = arith.cmpi ne, %10, %c0_i32_8 : i32
    scf.if %11 {
      %c0_9 = arith.constant 0 : index
      %c0_10 = arith.constant 0 : index
      %12 = vector.load %arg7[%c0_9, %c0_10] : memref<128x64xf32, #tpu.memory_space<vmem>>, vector<128x64xf32>
      %c0_11 = arith.constant 0 : index
      %c0_12 = arith.constant 0 : index
      %13 = vector.load %arg5[%c0_11, %c0_12] : memref<1x64xf32, #tpu.memory_space<vmem>>, vector<1x64xf32>
      %14 = vector.broadcast %13 : vector<1x64xf32> to vector<128x64xf32>
      %15 = arith.mulf %12, %14 : vector<128x64xf32>
      %c0_13 = arith.constant 0 : index
      %c0_14 = arith.constant 0 : index
      %16 = vector.load %arg6[%c0_13, %c0_14] : memref<1x64xf32, #tpu.memory_space<vmem>>, vector<1x64xf32>
      %17 = vector.broadcast %16 : vector<1x64xf32> to vector<128x64xf32>
      %18 = arith.addf %15, %17 : vector<128x64xf32>
      %cst_15 = arith.constant 0.000000e+00 : f32
      %19 = vector.broadcast %cst_15 : f32 to vector<128x64xf32>
      %20 = arith.maximumf %18, %19 : vector<128x64xf32>
      %c0_16 = arith.constant 0 : index
      %c0_17 = arith.constant 0 : index
      %21 = vector.load %arg7[%c0_16, %c0_17] : memref<128x64xf32, #tpu.memory_space<vmem>>, vector<128x64xf32>
      tpu.vector_store %arg7[%c0_16, %c0_17], %20 {strides = array<i32>} : memref<128x64xf32, #tpu.memory_space<vmem>>, vector<128x64xf32>,
    } else {
    }
    return
  }
  func.func @transform_0(%arg0: i32, %arg1: i32, %arg2: i32) -> (i32, i32) {
    %c0_i32 = arith.constant 0 : i32
    return %arg0, %arg2 : i32, i32
  }
  func.func @transform_1(%arg0: i32, %arg1: i32, %arg2: i32) -> (i32, i32) {
    %c0_i32 = arith.constant 0 : i32
    return %arg2, %arg1 : i32, i32
  }
  func.func @transform_2(%arg0: i32, %arg1: i32, %arg2: i32) -> (i32, i32) {
    %c0_i32 = arith.constant 0 : i32
    %c0_i32_0 = arith.constant 0 : i32
    return %c0_i32, %arg1 : i32, i32
  }
  func.func @transform_3(%arg0: i32, %arg1: i32, %arg2: i32) -> (i32, i32) {
    %c0_i32 = arith.constant 0 : i32
    %c0_i32_0 = arith.constant 0 : i32
    return %c0_i32, %arg1 : i32, i32
  }
  func.func @transform_4(%arg0: i32, %arg1: i32, %arg2: i32) -> (i32, i32) {
    %c0_i32 = arith.constant 0 : i32
    return %arg0, %arg1 : i32, i32
  }
}

module attributes {stable_mosaic.version = 11 : i64} {
  func.func @_mm_bn_res_kernel(%arg0: i32, %arg1: i32, %arg2: i32, %arg3: memref<128x256xbf16, #tpu.memory_space<vmem>>, %arg4: memref<256x64xbf16, #tpu.memory_space<vmem>>, %arg5: memref<1x64xf32, #tpu.memory_space<vmem>>, %arg6: memref<1x64xf32, #tpu.memory_space<vmem>>, %arg7: memref<128x64xf32, #tpu.memory_space<vmem>>, %arg8: memref<128x64xf32, #tpu.memory_space<vmem>>) attributes {dimension_semantics = [#tpu.dimension_semantics<parallel>, #tpu.dimension_semantics<parallel>, #tpu.dimension_semantics<arbitrary>], iteration_bounds = array<i64: 1, 1, 7>, scalar_prefetch = 0 : i64, scratch_operands = 0 : i64, tpu.core_type = #tpu.core_type<tc>, window_params = [{transform_indices = @transform_0, window_bounds = array<i64: 128, 256>}, {transform_indices = @transform_1, window_bounds = array<i64: 256, 64>}, {transform_indices = @transform_2, window_bounds = array<i64: 1, 64>}, {transform_indices = @transform_3, window_bounds = array<i64: 1, 64>}, {transform_indices = @transform_4, window_bounds = array<i64: 128, 64>}, {transform_indices = @transform_5, window_bounds = array<i64: 128, 64>}]} {
    %c0_i32 = arith.constant 0 : i32
    %0 = arith.cmpi eq, %arg2, %c0_i32 : i32
    %1 = arith.extui %0 : i1 to i32
    %c0_i32_0 = arith.constant 0 : i32
    %2 = arith.cmpi ne, %1, %c0_i32_0 : i32
    scf.if %2 {
      %cst_9 = arith.constant 0.000000e+00 : f32
      %12 = vector.broadcast %cst_9 : f32 to vector<128x64xf32>
      %c0_10 = arith.constant 0 : index
      %c0_11 = arith.constant 0 : index
      %13 = vector.load %arg8[%c0_10, %c0_11] : memref<128x64xf32, #tpu.memory_space<vmem>>, vector<128x64xf32>
      tpu.vector_store %arg8[%c0_10, %c0_11], %12 {strides = array<i32>} : memref<128x64xf32, #tpu.memory_space<vmem>>, vector<128x64xf32>,
    } else {
    }
    %c0 = arith.constant 0 : index
    %c0_1 = arith.constant 0 : index
    %3 = vector.load %arg8[%c0, %c0_1] : memref<128x64xf32, #tpu.memory_space<vmem>>, vector<128x64xf32>
    %c0_2 = arith.constant 0 : index
    %c0_3 = arith.constant 0 : index
    %4 = vector.load %arg3[%c0_2, %c0_3] : memref<128x256xbf16, #tpu.memory_space<vmem>>, vector<128x256xbf16>
    %c0_4 = arith.constant 0 : index
    %c0_5 = arith.constant 0 : index
    %5 = vector.load %arg4[%c0_4, %c0_5] : memref<256x64xbf16, #tpu.memory_space<vmem>>, vector<256x64xbf16>
    %cst = arith.constant dense<0.000000e+00> : vector<128x64xf32>
    %6 = tpu.matmul %4, %5, %cst {dimension_numbers = #tpu.dot_dimension_numbers<[1], [0], [0], [1], [0, 0, 1, 1], [], []>} : vector<128x256xbf16>, vector<256x64xbf16>, vector<128x64xf32> -> vector<128x64xf32>
    %7 = arith.addf %3, %6 : vector<128x64xf32>
    %c0_6 = arith.constant 0 : index
    %c0_7 = arith.constant 0 : index
    %8 = vector.load %arg8[%c0_6, %c0_7] : memref<128x64xf32, #tpu.memory_space<vmem>>, vector<128x64xf32>
    tpu.vector_store %arg8[%c0_6, %c0_7], %7 {strides = array<i32>} : memref<128x64xf32, #tpu.memory_space<vmem>>, vector<128x64xf32>,
    %c6_i32 = arith.constant 6 : i32
    %9 = arith.cmpi eq, %arg2, %c6_i32 : i32
    %10 = arith.extui %9 : i1 to i32
    %c0_i32_8 = arith.constant 0 : i32
    %11 = arith.cmpi ne, %10, %c0_i32_8 : i32
    scf.if %11 {
      %c0_9 = arith.constant 0 : index
      %c0_10 = arith.constant 0 : index
      %12 = vector.load %arg8[%c0_9, %c0_10] : memref<128x64xf32, #tpu.memory_space<vmem>>, vector<128x64xf32>
      %c0_11 = arith.constant 0 : index
      %c0_12 = arith.constant 0 : index
      %13 = vector.load %arg5[%c0_11, %c0_12] : memref<1x64xf32, #tpu.memory_space<vmem>>, vector<1x64xf32>
      %14 = vector.broadcast %13 : vector<1x64xf32> to vector<128x64xf32>
      %15 = arith.mulf %12, %14 : vector<128x64xf32>
      %c0_13 = arith.constant 0 : index
      %c0_14 = arith.constant 0 : index
      %16 = vector.load %arg6[%c0_13, %c0_14] : memref<1x64xf32, #tpu.memory_space<vmem>>, vector<1x64xf32>
      %17 = vector.broadcast %16 : vector<1x64xf32> to vector<128x64xf32>
      %18 = arith.addf %15, %17 : vector<128x64xf32>
      %c0_15 = arith.constant 0 : index
      %c0_16 = arith.constant 0 : index
      %19 = vector.load %arg7[%c0_15, %c0_16] : memref<128x64xf32, #tpu.memory_space<vmem>>, vector<128x64xf32>
      %20 = arith.addf %18, %19 : vector<128x64xf32>
      %cst_17 = arith.constant 0.000000e+00 : f32
      %21 = vector.broadcast %cst_17 : f32 to vector<128x64xf32>
      %22 = arith.maximumf %20, %21 : vector<128x64xf32>
      %c0_18 = arith.constant 0 : index
      %c0_19 = arith.constant 0 : index
      %23 = vector.load %arg8[%c0_18, %c0_19] : memref<128x64xf32, #tpu.memory_space<vmem>>, vector<128x64xf32>
      tpu.vector_store %arg8[%c0_18, %c0_19], %22 {strides = array<i32>} : memref<128x64xf32, #tpu.memory_space<vmem>>, vector<128x64xf32>,
    } else {
    }
    return
  }
  func.func @transform_0(%arg0: i32, %arg1: i32, %arg2: i32) -> (i32, i32) {
    %c0_i32 = arith.constant 0 : i32
    return %arg0, %arg2 : i32, i32
  }
  func.func @transform_1(%arg0: i32, %arg1: i32, %arg2: i32) -> (i32, i32) {
    %c0_i32 = arith.constant 0 : i32
    return %arg2, %arg1 : i32, i32
  }
  func.func @transform_2(%arg0: i32, %arg1: i32, %arg2: i32) -> (i32, i32) {
    %c0_i32 = arith.constant 0 : i32
    %c0_i32_0 = arith.constant 0 : i32
    return %c0_i32, %arg1 : i32, i32
  }
  func.func @transform_3(%arg0: i32, %arg1: i32, %arg2: i32) -> (i32, i32) {
    %c0_i32 = arith.constant 0 : i32
    %c0_i32_0 = arith.constant 0 : i32
    return %c0_i32, %arg1 : i32, i32
  }
  func.func @transform_4(%arg0: i32, %arg1: i32, %arg2: i32) -> (i32, i32) {
    %c0_i32 = arith.constant 0 : i32
    return %arg0, %arg1 : i32, i32
  }
  func.func @transform_5(%arg0: i32, %arg1: i32, %arg2: i32) -> (i32, i32) {
    %c0_i32 = arith.constant 0 : i32
    return %arg0, %arg1 : i32, i32
  }
}

module attributes {stable_mosaic.version = 11 : i64} {
  func.func @_mm_bn_kernel(%arg0: i32, %arg1: i32, %arg2: i32, %arg3: memref<16x256xbf16, #tpu.memory_space<vmem>>, %arg4: memref<256x128xbf16, #tpu.memory_space<vmem>>, %arg5: memref<1x128xf32, #tpu.memory_space<vmem>>, %arg6: memref<1x128xf32, #tpu.memory_space<vmem>>, %arg7: memref<16x128xf32, #tpu.memory_space<vmem>>) attributes {dimension_semantics = [#tpu.dimension_semantics<parallel>, #tpu.dimension_semantics<parallel>, #tpu.dimension_semantics<arbitrary>], iteration_bounds = array<i64: 1, 1, 7>, scalar_prefetch = 0 : i64, scratch_operands = 0 : i64, tpu.core_type = #tpu.core_type<tc>, window_params = [{transform_indices = @transform_0, window_bounds = array<i64: 16, 256>}, {transform_indices = @transform_1, window_bounds = array<i64: 256, 128>}, {transform_indices = @transform_2, window_bounds = array<i64: 1, 128>}, {transform_indices = @transform_3, window_bounds = array<i64: 1, 128>}, {transform_indices = @transform_4, window_bounds = array<i64: 16, 128>}]} {
    %c0_i32 = arith.constant 0 : i32
    %0 = arith.cmpi eq, %arg2, %c0_i32 : i32
    %1 = arith.extui %0 : i1 to i32
    %c0_i32_0 = arith.constant 0 : i32
    %2 = arith.cmpi ne, %1, %c0_i32_0 : i32
    scf.if %2 {
      %cst_9 = arith.constant 0.000000e+00 : f32
      %12 = vector.broadcast %cst_9 : f32 to vector<16x128xf32>
      %c0_10 = arith.constant 0 : index
      %c0_11 = arith.constant 0 : index
      %13 = vector.load %arg7[%c0_10, %c0_11] : memref<16x128xf32, #tpu.memory_space<vmem>>, vector<16x128xf32>
      tpu.vector_store %arg7[%c0_10, %c0_11], %12 {strides = array<i32>} : memref<16x128xf32, #tpu.memory_space<vmem>>, vector<16x128xf32>,
    } else {
    }
    %c0 = arith.constant 0 : index
    %c0_1 = arith.constant 0 : index
    %3 = vector.load %arg7[%c0, %c0_1] : memref<16x128xf32, #tpu.memory_space<vmem>>, vector<16x128xf32>
    %c0_2 = arith.constant 0 : index
    %c0_3 = arith.constant 0 : index
    %4 = vector.load %arg3[%c0_2, %c0_3] : memref<16x256xbf16, #tpu.memory_space<vmem>>, vector<16x256xbf16>
    %c0_4 = arith.constant 0 : index
    %c0_5 = arith.constant 0 : index
    %5 = vector.load %arg4[%c0_4, %c0_5] : memref<256x128xbf16, #tpu.memory_space<vmem>>, vector<256x128xbf16>
    %cst = arith.constant dense<0.000000e+00> : vector<16x128xf32>
    %6 = tpu.matmul %4, %5, %cst {dimension_numbers = #tpu.dot_dimension_numbers<[1], [0], [0], [1], [0, 0, 1, 1], [], []>} : vector<16x256xbf16>, vector<256x128xbf16>, vector<16x128xf32> -> vector<16x128xf32>
    %7 = arith.addf %3, %6 : vector<16x128xf32>
    %c0_6 = arith.constant 0 : index
    %c0_7 = arith.constant 0 : index
    %8 = vector.load %arg7[%c0_6, %c0_7] : memref<16x128xf32, #tpu.memory_space<vmem>>, vector<16x128xf32>
    tpu.vector_store %arg7[%c0_6, %c0_7], %7 {strides = array<i32>} : memref<16x128xf32, #tpu.memory_space<vmem>>, vector<16x128xf32>,
    %c6_i32 = arith.constant 6 : i32
    %9 = arith.cmpi eq, %arg2, %c6_i32 : i32
    %10 = arith.extui %9 : i1 to i32
    %c0_i32_8 = arith.constant 0 : i32
    %11 = arith.cmpi ne, %10, %c0_i32_8 : i32
    scf.if %11 {
      %c0_9 = arith.constant 0 : index
      %c0_10 = arith.constant 0 : index
      %12 = vector.load %arg7[%c0_9, %c0_10] : memref<16x128xf32, #tpu.memory_space<vmem>>, vector<16x128xf32>
      %c0_11 = arith.constant 0 : index
      %c0_12 = arith.constant 0 : index
      %13 = vector.load %arg5[%c0_11, %c0_12] : memref<1x128xf32, #tpu.memory_space<vmem>>, vector<1x128xf32>
      %14 = vector.broadcast %13 : vector<1x128xf32> to vector<16x128xf32>
      %15 = arith.mulf %12, %14 : vector<16x128xf32>
      %c0_13 = arith.constant 0 : index
      %c0_14 = arith.constant 0 : index
      %16 = vector.load %arg6[%c0_13, %c0_14] : memref<1x128xf32, #tpu.memory_space<vmem>>, vector<1x128xf32>
      %17 = vector.broadcast %16 : vector<1x128xf32> to vector<16x128xf32>
      %18 = arith.addf %15, %17 : vector<16x128xf32>
      %cst_15 = arith.constant 0.000000e+00 : f32
      %19 = vector.broadcast %cst_15 : f32 to vector<16x128xf32>
      %20 = arith.maximumf %18, %19 : vector<16x128xf32>
      %c0_16 = arith.constant 0 : index
      %c0_17 = arith.constant 0 : index
      %21 = vector.load %arg7[%c0_16, %c0_17] : memref<16x128xf32, #tpu.memory_space<vmem>>, vector<16x128xf32>
      tpu.vector_store %arg7[%c0_16, %c0_17], %20 {strides = array<i32>} : memref<16x128xf32, #tpu.memory_space<vmem>>, vector<16x128xf32>,
    } else {
    }
    return
  }
  func.func @transform_0(%arg0: i32, %arg1: i32, %arg2: i32) -> (i32, i32) {
    %c0_i32 = arith.constant 0 : i32
    return %arg0, %arg2 : i32, i32
  }
  func.func @transform_1(%arg0: i32, %arg1: i32, %arg2: i32) -> (i32, i32) {
    %c0_i32 = arith.constant 0 : i32
    return %arg2, %arg1 : i32, i32
  }
  func.func @transform_2(%arg0: i32, %arg1: i32, %arg2: i32) -> (i32, i32) {
    %c0_i32 = arith.constant 0 : i32
    %c0_i32_0 = arith.constant 0 : i32
    return %c0_i32, %arg1 : i32, i32
  }
  func.func @transform_3(%arg0: i32, %arg1: i32, %arg2: i32) -> (i32, i32) {
    %c0_i32 = arith.constant 0 : i32
    %c0_i32_0 = arith.constant 0 : i32
    return %c0_i32, %arg1 : i32, i32
  }
  func.func @transform_4(%arg0: i32, %arg1: i32, %arg2: i32) -> (i32, i32) {
    %c0_i32 = arith.constant 0 : i32
    return %arg0, %arg1 : i32, i32
  }
}

module attributes {stable_mosaic.version = 11 : i64} {
  func.func @_mm_bn_res_kernel(%arg0: i32, %arg1: i32, %arg2: i32, %arg3: memref<16x384xbf16, #tpu.memory_space<vmem>>, %arg4: memref<384x128xbf16, #tpu.memory_space<vmem>>, %arg5: memref<1x128xf32, #tpu.memory_space<vmem>>, %arg6: memref<1x128xf32, #tpu.memory_space<vmem>>, %arg7: memref<16x128xf32, #tpu.memory_space<vmem>>, %arg8: memref<16x128xf32, #tpu.memory_space<vmem>>) attributes {dimension_semantics = [#tpu.dimension_semantics<parallel>, #tpu.dimension_semantics<parallel>, #tpu.dimension_semantics<arbitrary>], iteration_bounds = array<i64: 1, 1, 9>, scalar_prefetch = 0 : i64, scratch_operands = 0 : i64, tpu.core_type = #tpu.core_type<tc>, window_params = [{transform_indices = @transform_0, window_bounds = array<i64: 16, 384>}, {transform_indices = @transform_1, window_bounds = array<i64: 384, 128>}, {transform_indices = @transform_2, window_bounds = array<i64: 1, 128>}, {transform_indices = @transform_3, window_bounds = array<i64: 1, 128>}, {transform_indices = @transform_4, window_bounds = array<i64: 16, 128>}, {transform_indices = @transform_5, window_bounds = array<i64: 16, 128>}]} {
    %c0_i32 = arith.constant 0 : i32
    %0 = arith.cmpi eq, %arg2, %c0_i32 : i32
    %1 = arith.extui %0 : i1 to i32
    %c0_i32_0 = arith.constant 0 : i32
    %2 = arith.cmpi ne, %1, %c0_i32_0 : i32
    scf.if %2 {
      %cst_9 = arith.constant 0.000000e+00 : f32
      %12 = vector.broadcast %cst_9 : f32 to vector<16x128xf32>
      %c0_10 = arith.constant 0 : index
      %c0_11 = arith.constant 0 : index
      %13 = vector.load %arg8[%c0_10, %c0_11] : memref<16x128xf32, #tpu.memory_space<vmem>>, vector<16x128xf32>
      tpu.vector_store %arg8[%c0_10, %c0_11], %12 {strides = array<i32>} : memref<16x128xf32, #tpu.memory_space<vmem>>, vector<16x128xf32>,
    } else {
    }
    %c0 = arith.constant 0 : index
    %c0_1 = arith.constant 0 : index
    %3 = vector.load %arg8[%c0, %c0_1] : memref<16x128xf32, #tpu.memory_space<vmem>>, vector<16x128xf32>
    %c0_2 = arith.constant 0 : index
    %c0_3 = arith.constant 0 : index
    %4 = vector.load %arg3[%c0_2, %c0_3] : memref<16x384xbf16, #tpu.memory_space<vmem>>, vector<16x384xbf16>
    %c0_4 = arith.constant 0 : index
    %c0_5 = arith.constant 0 : index
    %5 = vector.load %arg4[%c0_4, %c0_5] : memref<384x128xbf16, #tpu.memory_space<vmem>>, vector<384x128xbf16>
    %cst = arith.constant dense<0.000000e+00> : vector<16x128xf32>
    %6 = tpu.matmul %4, %5, %cst {dimension_numbers = #tpu.dot_dimension_numbers<[1], [0], [0], [1], [0, 0, 1, 1], [], []>} : vector<16x384xbf16>, vector<384x128xbf16>, vector<16x128xf32> -> vector<16x128xf32>
    %7 = arith.addf %3, %6 : vector<16x128xf32>
    %c0_6 = arith.constant 0 : index
    %c0_7 = arith.constant 0 : index
    %8 = vector.load %arg8[%c0_6, %c0_7] : memref<16x128xf32, #tpu.memory_space<vmem>>, vector<16x128xf32>
    tpu.vector_store %arg8[%c0_6, %c0_7], %7 {strides = array<i32>} : memref<16x128xf32, #tpu.memory_space<vmem>>, vector<16x128xf32>,
    %c8_i32 = arith.constant 8 : i32
    %9 = arith.cmpi eq, %arg2, %c8_i32 : i32
    %10 = arith.extui %9 : i1 to i32
    %c0_i32_8 = arith.constant 0 : i32
    %11 = arith.cmpi ne, %10, %c0_i32_8 : i32
    scf.if %11 {
      %c0_9 = arith.constant 0 : index
      %c0_10 = arith.constant 0 : index
      %12 = vector.load %arg8[%c0_9, %c0_10] : memref<16x128xf32, #tpu.memory_space<vmem>>, vector<16x128xf32>
      %c0_11 = arith.constant 0 : index
      %c0_12 = arith.constant 0 : index
      %13 = vector.load %arg5[%c0_11, %c0_12] : memref<1x128xf32, #tpu.memory_space<vmem>>, vector<1x128xf32>
      %14 = vector.broadcast %13 : vector<1x128xf32> to vector<16x128xf32>
      %15 = arith.mulf %12, %14 : vector<16x128xf32>
      %c0_13 = arith.constant 0 : index
      %c0_14 = arith.constant 0 : index
      %16 = vector.load %arg6[%c0_13, %c0_14] : memref<1x128xf32, #tpu.memory_space<vmem>>, vector<1x128xf32>
      %17 = vector.broadcast %16 : vector<1x128xf32> to vector<16x128xf32>
      %18 = arith.addf %15, %17 : vector<16x128xf32>
      %c0_15 = arith.constant 0 : index
      %c0_16 = arith.constant 0 : index
      %19 = vector.load %arg7[%c0_15, %c0_16] : memref<16x128xf32, #tpu.memory_space<vmem>>, vector<16x128xf32>
      %20 = arith.addf %18, %19 : vector<16x128xf32>
      %cst_17 = arith.constant 0.000000e+00 : f32
      %21 = vector.broadcast %cst_17 : f32 to vector<16x128xf32>
      %22 = arith.maximumf %20, %21 : vector<16x128xf32>
      %c0_18 = arith.constant 0 : index
      %c0_19 = arith.constant 0 : index
      %23 = vector.load %arg8[%c0_18, %c0_19] : memref<16x128xf32, #tpu.memory_space<vmem>>, vector<16x128xf32>
      tpu.vector_store %arg8[%c0_18, %c0_19], %22 {strides = array<i32>} : memref<16x128xf32, #tpu.memory_space<vmem>>, vector<16x128xf32>,
    } else {
    }
    return
  }
  func.func @transform_0(%arg0: i32, %arg1: i32, %arg2: i32) -> (i32, i32) {
    %c0_i32 = arith.constant 0 : i32
    return %arg0, %arg2 : i32, i32
  }
  func.func @transform_1(%arg0: i32, %arg1: i32, %arg2: i32) -> (i32, i32) {
    %c0_i32 = arith.constant 0 : i32
    return %arg2, %arg1 : i32, i32
  }
  func.func @transform_2(%arg0: i32, %arg1: i32, %arg2: i32) -> (i32, i32) {
    %c0_i32 = arith.constant 0 : i32
    %c0_i32_0 = arith.constant 0 : i32
    return %c0_i32, %arg1 : i32, i32
  }
  func.func @transform_3(%arg0: i32, %arg1: i32, %arg2: i32) -> (i32, i32) {
    %c0_i32 = arith.constant 0 : i32
    %c0_i32_0 = arith.constant 0 : i32
    return %c0_i32, %arg1 : i32, i32
  }
  func.func @transform_4(%arg0: i32, %arg1: i32, %arg2: i32) -> (i32, i32) {
    %c0_i32 = arith.constant 0 : i32
    return %arg0, %arg1 : i32, i32
  }
  func.func @transform_5(%arg0: i32, %arg1: i32, %arg2: i32) -> (i32, i32) {
    %c0_i32 = arith.constant 0 : i32
    return %arg0, %arg1 : i32, i32
  }
}

module attributes {stable_mosaic.version = 11 : i64} {
  func.func @_mm_bn_kernel(%arg0: i32, %arg1: i32, %arg2: i32, %arg3: memref<16x128xbf16, #tpu.memory_space<vmem>>, %arg4: memref<128x128xbf16, #tpu.memory_space<vmem>>, %arg5: memref<1x128xf32, #tpu.memory_space<vmem>>, %arg6: memref<1x128xf32, #tpu.memory_space<vmem>>, %arg7: memref<16x128xf32, #tpu.memory_space<vmem>>) attributes {dimension_semantics = [#tpu.dimension_semantics<parallel>, #tpu.dimension_semantics<parallel>, #tpu.dimension_semantics<arbitrary>], iteration_bounds = array<i64: 1, 1, 1>, scalar_prefetch = 0 : i64, scratch_operands = 0 : i64, tpu.core_type = #tpu.core_type<tc>, window_params = [{transform_indices = @transform_0, window_bounds = array<i64: 16, 128>}, {transform_indices = @transform_1, window_bounds = array<i64: 128, 128>}, {transform_indices = @transform_2, window_bounds = array<i64: 1, 128>}, {transform_indices = @transform_3, window_bounds = array<i64: 1, 128>}, {transform_indices = @transform_4, window_bounds = array<i64: 16, 128>}]} {
    %c0_i32 = arith.constant 0 : i32
    %0 = arith.cmpi eq, %arg2, %c0_i32 : i32
    %1 = arith.extui %0 : i1 to i32
    %c0_i32_0 = arith.constant 0 : i32
    %2 = arith.cmpi ne, %1, %c0_i32_0 : i32
    scf.if %2 {
      %cst_10 = arith.constant 0.000000e+00 : f32
      %12 = vector.broadcast %cst_10 : f32 to vector<16x128xf32>
      %c0_11 = arith.constant 0 : index
      %c0_12 = arith.constant 0 : index
      %13 = vector.load %arg7[%c0_11, %c0_12] : memref<16x128xf32, #tpu.memory_space<vmem>>, vector<16x128xf32>
      tpu.vector_store %arg7[%c0_11, %c0_12], %12 {strides = array<i32>} : memref<16x128xf32, #tpu.memory_space<vmem>>, vector<16x128xf32>,
    } else {
    }
    %c0 = arith.constant 0 : index
    %c0_1 = arith.constant 0 : index
    %3 = vector.load %arg7[%c0, %c0_1] : memref<16x128xf32, #tpu.memory_space<vmem>>, vector<16x128xf32>
    %c0_2 = arith.constant 0 : index
    %c0_3 = arith.constant 0 : index
    %4 = vector.load %arg3[%c0_2, %c0_3] : memref<16x128xbf16, #tpu.memory_space<vmem>>, vector<16x128xbf16>
    %c0_4 = arith.constant 0 : index
    %c0_5 = arith.constant 0 : index
    %5 = vector.load %arg4[%c0_4, %c0_5] : memref<128x128xbf16, #tpu.memory_space<vmem>>, vector<128x128xbf16>
    %cst = arith.constant dense<0.000000e+00> : vector<16x128xf32>
    %6 = tpu.matmul %4, %5, %cst {dimension_numbers = #tpu.dot_dimension_numbers<[1], [0], [0], [1], [0, 0, 1, 1], [], []>} : vector<16x128xbf16>, vector<128x128xbf16>, vector<16x128xf32> -> vector<16x128xf32>
    %7 = arith.addf %3, %6 : vector<16x128xf32>
    %c0_6 = arith.constant 0 : index
    %c0_7 = arith.constant 0 : index
    %8 = vector.load %arg7[%c0_6, %c0_7] : memref<16x128xf32, #tpu.memory_space<vmem>>, vector<16x128xf32>
    tpu.vector_store %arg7[%c0_6, %c0_7], %7 {strides = array<i32>} : memref<16x128xf32, #tpu.memory_space<vmem>>, vector<16x128xf32>,
    %c0_i32_8 = arith.constant 0 : i32
    %9 = arith.cmpi eq, %arg2, %c0_i32_8 : i32
    %10 = arith.extui %9 : i1 to i32
    %c0_i32_9 = arith.constant 0 : i32
    %11 = arith.cmpi ne, %10, %c0_i32_9 : i32
    scf.if %11 {
      %c0_10 = arith.constant 0 : index
      %c0_11 = arith.constant 0 : index
      %12 = vector.load %arg7[%c0_10, %c0_11] : memref<16x128xf32, #tpu.memory_space<vmem>>, vector<16x128xf32>
      %c0_12 = arith.constant 0 : index
      %c0_13 = arith.constant 0 : index
      %13 = vector.load %arg5[%c0_12, %c0_13] : memref<1x128xf32, #tpu.memory_space<vmem>>, vector<1x128xf32>
      %14 = vector.broadcast %13 : vector<1x128xf32> to vector<16x128xf32>
      %15 = arith.mulf %12, %14 : vector<16x128xf32>
      %c0_14 = arith.constant 0 : index
      %c0_15 = arith.constant 0 : index
      %16 = vector.load %arg6[%c0_14, %c0_15] : memref<1x128xf32, #tpu.memory_space<vmem>>, vector<1x128xf32>
      %17 = vector.broadcast %16 : vector<1x128xf32> to vector<16x128xf32>
      %18 = arith.addf %15, %17 : vector<16x128xf32>
      %c0_16 = arith.constant 0 : index
      %c0_17 = arith.constant 0 : index
      %19 = vector.load %arg7[%c0_16, %c0_17] : memref<16x128xf32, #tpu.memory_space<vmem>>, vector<16x128xf32>
      tpu.vector_store %arg7[%c0_16, %c0_17], %18 {strides = array<i32>} : memref<16x128xf32, #tpu.memory_space<vmem>>, vector<16x128xf32>,
    } else {
    }
    return
  }
  func.func @transform_0(%arg0: i32, %arg1: i32, %arg2: i32) -> (i32, i32) {
    %c0_i32 = arith.constant 0 : i32
    return %arg0, %arg2 : i32, i32
  }
  func.func @transform_1(%arg0: i32, %arg1: i32, %arg2: i32) -> (i32, i32) {
    %c0_i32 = arith.constant 0 : i32
    return %arg2, %arg1 : i32, i32
  }
  func.func @transform_2(%arg0: i32, %arg1: i32, %arg2: i32) -> (i32, i32) {
    %c0_i32 = arith.constant 0 : i32
    %c0_i32_0 = arith.constant 0 : i32
    return %c0_i32, %arg1 : i32, i32
  }
  func.func @transform_3(%arg0: i32, %arg1: i32, %arg2: i32) -> (i32, i32) {
    %c0_i32 = arith.constant 0 : i32
    %c0_i32_0 = arith.constant 0 : i32
    return %c0_i32, %arg1 : i32, i32
  }
  func.func @transform_4(%arg0: i32, %arg1: i32, %arg2: i32) -> (i32, i32) {
    %c0_i32 = arith.constant 0 : i32
    return %arg0, %arg1 : i32, i32
  }
}

module attributes {stable_mosaic.version = 11 : i64} {
  func.func @_mm_bn_kernel(%arg0: i32, %arg1: i32, %arg2: i32, %arg3: memref<16x384xbf16, #tpu.memory_space<vmem>>, %arg4: memref<384x256xbf16, #tpu.memory_space<vmem>>, %arg5: memref<1x256xf32, #tpu.memory_space<vmem>>, %arg6: memref<1x256xf32, #tpu.memory_space<vmem>>, %arg7: memref<16x256xf32, #tpu.memory_space<vmem>>) attributes {dimension_semantics = [#tpu.dimension_semantics<parallel>, #tpu.dimension_semantics<parallel>, #tpu.dimension_semantics<arbitrary>], iteration_bounds = array<i64: 1, 1, 9>, scalar_prefetch = 0 : i64, scratch_operands = 0 : i64, tpu.core_type = #tpu.core_type<tc>, window_params = [{transform_indices = @transform_0, window_bounds = array<i64: 16, 384>}, {transform_indices = @transform_1, window_bounds = array<i64: 384, 256>}, {transform_indices = @transform_2, window_bounds = array<i64: 1, 256>}, {transform_indices = @transform_3, window_bounds = array<i64: 1, 256>}, {transform_indices = @transform_4, window_bounds = array<i64: 16, 256>}]} {
    %c0_i32 = arith.constant 0 : i32
    %0 = arith.cmpi eq, %arg2, %c0_i32 : i32
    %1 = arith.extui %0 : i1 to i32
    %c0_i32_0 = arith.constant 0 : i32
    %2 = arith.cmpi ne, %1, %c0_i32_0 : i32
    scf.if %2 {
      %cst_9 = arith.constant 0.000000e+00 : f32
      %12 = vector.broadcast %cst_9 : f32 to vector<16x256xf32>
      %c0_10 = arith.constant 0 : index
      %c0_11 = arith.constant 0 : index
      %13 = vector.load %arg7[%c0_10, %c0_11] : memref<16x256xf32, #tpu.memory_space<vmem>>, vector<16x256xf32>
      tpu.vector_store %arg7[%c0_10, %c0_11], %12 {strides = array<i32>} : memref<16x256xf32, #tpu.memory_space<vmem>>, vector<16x256xf32>,
    } else {
    }
    %c0 = arith.constant 0 : index
    %c0_1 = arith.constant 0 : index
    %3 = vector.load %arg7[%c0, %c0_1] : memref<16x256xf32, #tpu.memory_space<vmem>>, vector<16x256xf32>
    %c0_2 = arith.constant 0 : index
    %c0_3 = arith.constant 0 : index
    %4 = vector.load %arg3[%c0_2, %c0_3] : memref<16x384xbf16, #tpu.memory_space<vmem>>, vector<16x384xbf16>
    %c0_4 = arith.constant 0 : index
    %c0_5 = arith.constant 0 : index
    %5 = vector.load %arg4[%c0_4, %c0_5] : memref<384x256xbf16, #tpu.memory_space<vmem>>, vector<384x256xbf16>
    %cst = arith.constant dense<0.000000e+00> : vector<16x256xf32>
    %6 = tpu.matmul %4, %5, %cst {dimension_numbers = #tpu.dot_dimension_numbers<[1], [0], [0], [1], [0, 0, 1, 1], [], []>} : vector<16x384xbf16>, vector<384x256xbf16>, vector<16x256xf32> -> vector<16x256xf32>
    %7 = arith.addf %3, %6 : vector<16x256xf32>
    %c0_6 = arith.constant 0 : index
    %c0_7 = arith.constant 0 : index
    %8 = vector.load %arg7[%c0_6, %c0_7] : memref<16x256xf32, #tpu.memory_space<vmem>>, vector<16x256xf32>
    tpu.vector_store %arg7[%c0_6, %c0_7], %7 {strides = array<i32>} : memref<16x256xf32, #tpu.memory_space<vmem>>, vector<16x256xf32>,
    %c8_i32 = arith.constant 8 : i32
    %9 = arith.cmpi eq, %arg2, %c8_i32 : i32
    %10 = arith.extui %9 : i1 to i32
    %c0_i32_8 = arith.constant 0 : i32
    %11 = arith.cmpi ne, %10, %c0_i32_8 : i32
    scf.if %11 {
      %c0_9 = arith.constant 0 : index
      %c0_10 = arith.constant 0 : index
      %12 = vector.load %arg7[%c0_9, %c0_10] : memref<16x256xf32, #tpu.memory_space<vmem>>, vector<16x256xf32>
      %c0_11 = arith.constant 0 : index
      %c0_12 = arith.constant 0 : index
      %13 = vector.load %arg5[%c0_11, %c0_12] : memref<1x256xf32, #tpu.memory_space<vmem>>, vector<1x256xf32>
      %14 = vector.broadcast %13 : vector<1x256xf32> to vector<16x256xf32>
      %15 = arith.mulf %12, %14 : vector<16x256xf32>
      %c0_13 = arith.constant 0 : index
      %c0_14 = arith.constant 0 : index
      %16 = vector.load %arg6[%c0_13, %c0_14] : memref<1x256xf32, #tpu.memory_space<vmem>>, vector<1x256xf32>
      %17 = vector.broadcast %16 : vector<1x256xf32> to vector<16x256xf32>
      %18 = arith.addf %15, %17 : vector<16x256xf32>
      %cst_15 = arith.constant 0.000000e+00 : f32
      %19 = vector.broadcast %cst_15 : f32 to vector<16x256xf32>
      %20 = arith.maximumf %18, %19 : vector<16x256xf32>
      %c0_16 = arith.constant 0 : index
      %c0_17 = arith.constant 0 : index
      %21 = vector.load %arg7[%c0_16, %c0_17] : memref<16x256xf32, #tpu.memory_space<vmem>>, vector<16x256xf32>
      tpu.vector_store %arg7[%c0_16, %c0_17], %20 {strides = array<i32>} : memref<16x256xf32, #tpu.memory_space<vmem>>, vector<16x256xf32>,
    } else {
    }
    return
  }
  func.func @transform_0(%arg0: i32, %arg1: i32, %arg2: i32) -> (i32, i32) {
    %c0_i32 = arith.constant 0 : i32
    return %arg0, %arg2 : i32, i32
  }
  func.func @transform_1(%arg0: i32, %arg1: i32, %arg2: i32) -> (i32, i32) {
    %c0_i32 = arith.constant 0 : i32
    return %arg2, %arg1 : i32, i32
  }
  func.func @transform_2(%arg0: i32, %arg1: i32, %arg2: i32) -> (i32, i32) {
    %c0_i32 = arith.constant 0 : i32
    %c0_i32_0 = arith.constant 0 : i32
    return %c0_i32, %arg1 : i32, i32
  }
  func.func @transform_3(%arg0: i32, %arg1: i32, %arg2: i32) -> (i32, i32) {
    %c0_i32 = arith.constant 0 : i32
    %c0_i32_0 = arith.constant 0 : i32
    return %c0_i32, %arg1 : i32, i32
  }
  func.func @transform_4(%arg0: i32, %arg1: i32, %arg2: i32) -> (i32, i32) {
    %c0_i32 = arith.constant 0 : i32
    return %arg0, %arg1 : i32, i32
  }
}

module attributes {stable_mosaic.version = 11 : i64} {
  func.func @_mm_bn_kernel(%arg0: i32, %arg1: i32, %arg2: i32, %arg3: memref<16x128xbf16, #tpu.memory_space<vmem>>, %arg4: memref<128x256xbf16, #tpu.memory_space<vmem>>, %arg5: memref<1x256xf32, #tpu.memory_space<vmem>>, %arg6: memref<1x256xf32, #tpu.memory_space<vmem>>, %arg7: memref<16x256xf32, #tpu.memory_space<vmem>>) attributes {dimension_semantics = [#tpu.dimension_semantics<parallel>, #tpu.dimension_semantics<parallel>, #tpu.dimension_semantics<arbitrary>], iteration_bounds = array<i64: 1, 1, 1>, scalar_prefetch = 0 : i64, scratch_operands = 0 : i64, tpu.core_type = #tpu.core_type<tc>, window_params = [{transform_indices = @transform_0, window_bounds = array<i64: 16, 128>}, {transform_indices = @transform_1, window_bounds = array<i64: 128, 256>}, {transform_indices = @transform_2, window_bounds = array<i64: 1, 256>}, {transform_indices = @transform_3, window_bounds = array<i64: 1, 256>}, {transform_indices = @transform_4, window_bounds = array<i64: 16, 256>}]} {
    %c0_i32 = arith.constant 0 : i32
    %0 = arith.cmpi eq, %arg2, %c0_i32 : i32
    %1 = arith.extui %0 : i1 to i32
    %c0_i32_0 = arith.constant 0 : i32
    %2 = arith.cmpi ne, %1, %c0_i32_0 : i32
    scf.if %2 {
      %cst_10 = arith.constant 0.000000e+00 : f32
      %12 = vector.broadcast %cst_10 : f32 to vector<16x256xf32>
      %c0_11 = arith.constant 0 : index
      %c0_12 = arith.constant 0 : index
      %13 = vector.load %arg7[%c0_11, %c0_12] : memref<16x256xf32, #tpu.memory_space<vmem>>, vector<16x256xf32>
      tpu.vector_store %arg7[%c0_11, %c0_12], %12 {strides = array<i32>} : memref<16x256xf32, #tpu.memory_space<vmem>>, vector<16x256xf32>,
    } else {
    }
    %c0 = arith.constant 0 : index
    %c0_1 = arith.constant 0 : index
    %3 = vector.load %arg7[%c0, %c0_1] : memref<16x256xf32, #tpu.memory_space<vmem>>, vector<16x256xf32>
    %c0_2 = arith.constant 0 : index
    %c0_3 = arith.constant 0 : index
    %4 = vector.load %arg3[%c0_2, %c0_3] : memref<16x128xbf16, #tpu.memory_space<vmem>>, vector<16x128xbf16>
    %c0_4 = arith.constant 0 : index
    %c0_5 = arith.constant 0 : index
    %5 = vector.load %arg4[%c0_4, %c0_5] : memref<128x256xbf16, #tpu.memory_space<vmem>>, vector<128x256xbf16>
    %cst = arith.constant dense<0.000000e+00> : vector<16x256xf32>
    %6 = tpu.matmul %4, %5, %cst {dimension_numbers = #tpu.dot_dimension_numbers<[1], [0], [0], [1], [0, 0, 1, 1], [], []>} : vector<16x128xbf16>, vector<128x256xbf16>, vector<16x256xf32> -> vector<16x256xf32>
    %7 = arith.addf %3, %6 : vector<16x256xf32>
    %c0_6 = arith.constant 0 : index
    %c0_7 = arith.constant 0 : index
    %8 = vector.load %arg7[%c0_6, %c0_7] : memref<16x256xf32, #tpu.memory_space<vmem>>, vector<16x256xf32>
    tpu.vector_store %arg7[%c0_6, %c0_7], %7 {strides = array<i32>} : memref<16x256xf32, #tpu.memory_space<vmem>>, vector<16x256xf32>,
    %c0_i32_8 = arith.constant 0 : i32
    %9 = arith.cmpi eq, %arg2, %c0_i32_8 : i32
    %10 = arith.extui %9 : i1 to i32
    %c0_i32_9 = arith.constant 0 : i32
    %11 = arith.cmpi ne, %10, %c0_i32_9 : i32
    scf.if %11 {
      %c0_10 = arith.constant 0 : index
      %c0_11 = arith.constant 0 : index
      %12 = vector.load %arg7[%c0_10, %c0_11] : memref<16x256xf32, #tpu.memory_space<vmem>>, vector<16x256xf32>
      %c0_12 = arith.constant 0 : index
      %c0_13 = arith.constant 0 : index
      %13 = vector.load %arg5[%c0_12, %c0_13] : memref<1x256xf32, #tpu.memory_space<vmem>>, vector<1x256xf32>
      %14 = vector.broadcast %13 : vector<1x256xf32> to vector<16x256xf32>
      %15 = arith.mulf %12, %14 : vector<16x256xf32>
      %c0_14 = arith.constant 0 : index
      %c0_15 = arith.constant 0 : index
      %16 = vector.load %arg6[%c0_14, %c0_15] : memref<1x256xf32, #tpu.memory_space<vmem>>, vector<1x256xf32>
      %17 = vector.broadcast %16 : vector<1x256xf32> to vector<16x256xf32>
      %18 = arith.addf %15, %17 : vector<16x256xf32>
      %c0_16 = arith.constant 0 : index
      %c0_17 = arith.constant 0 : index
      %19 = vector.load %arg7[%c0_16, %c0_17] : memref<16x256xf32, #tpu.memory_space<vmem>>, vector<16x256xf32>
      tpu.vector_store %arg7[%c0_16, %c0_17], %18 {strides = array<i32>} : memref<16x256xf32, #tpu.memory_space<vmem>>, vector<16x256xf32>,
    } else {
    }
    return
  }
  func.func @transform_0(%arg0: i32, %arg1: i32, %arg2: i32) -> (i32, i32) {
    %c0_i32 = arith.constant 0 : i32
    return %arg0, %arg2 : i32, i32
  }
  func.func @transform_1(%arg0: i32, %arg1: i32, %arg2: i32) -> (i32, i32) {
    %c0_i32 = arith.constant 0 : i32
    return %arg2, %arg1 : i32, i32
  }
  func.func @transform_2(%arg0: i32, %arg1: i32, %arg2: i32) -> (i32, i32) {
    %c0_i32 = arith.constant 0 : i32
    %c0_i32_0 = arith.constant 0 : i32
    return %c0_i32, %arg1 : i32, i32
  }
  func.func @transform_3(%arg0: i32, %arg1: i32, %arg2: i32) -> (i32, i32) {
    %c0_i32 = arith.constant 0 : i32
    %c0_i32_0 = arith.constant 0 : i32
    return %c0_i32, %arg1 : i32, i32
  }
  func.func @transform_4(%arg0: i32, %arg1: i32, %arg2: i32) -> (i32, i32) {
    %c0_i32 = arith.constant 0 : i32
    return %arg0, %arg1 : i32, i32
  }
}

module attributes {stable_mosaic.version = 11 : i64} {
  func.func @_mm_bn_res_kernel(%arg0: i32, %arg1: i32, %arg2: i32, %arg3: memref<16x384xbf16, #tpu.memory_space<vmem>>, %arg4: memref<384x256xbf16, #tpu.memory_space<vmem>>, %arg5: memref<1x256xf32, #tpu.memory_space<vmem>>, %arg6: memref<1x256xf32, #tpu.memory_space<vmem>>, %arg7: memref<16x256xf32, #tpu.memory_space<vmem>>, %arg8: memref<16x256xf32, #tpu.memory_space<vmem>>) attributes {dimension_semantics = [#tpu.dimension_semantics<parallel>, #tpu.dimension_semantics<parallel>, #tpu.dimension_semantics<arbitrary>], iteration_bounds = array<i64: 1, 1, 18>, scalar_prefetch = 0 : i64, scratch_operands = 0 : i64, tpu.core_type = #tpu.core_type<tc>, window_params = [{transform_indices = @transform_0, window_bounds = array<i64: 16, 384>}, {transform_indices = @transform_1, window_bounds = array<i64: 384, 256>}, {transform_indices = @transform_2, window_bounds = array<i64: 1, 256>}, {transform_indices = @transform_3, window_bounds = array<i64: 1, 256>}, {transform_indices = @transform_4, window_bounds = array<i64: 16, 256>}, {transform_indices = @transform_5, window_bounds = array<i64: 16, 256>}]} {
    %c0_i32 = arith.constant 0 : i32
    %0 = arith.cmpi eq, %arg2, %c0_i32 : i32
    %1 = arith.extui %0 : i1 to i32
    %c0_i32_0 = arith.constant 0 : i32
    %2 = arith.cmpi ne, %1, %c0_i32_0 : i32
    scf.if %2 {
      %cst_9 = arith.constant 0.000000e+00 : f32
      %12 = vector.broadcast %cst_9 : f32 to vector<16x256xf32>
      %c0_10 = arith.constant 0 : index
      %c0_11 = arith.constant 0 : index
      %13 = vector.load %arg8[%c0_10, %c0_11] : memref<16x256xf32, #tpu.memory_space<vmem>>, vector<16x256xf32>
      tpu.vector_store %arg8[%c0_10, %c0_11], %12 {strides = array<i32>} : memref<16x256xf32, #tpu.memory_space<vmem>>, vector<16x256xf32>,
    } else {
    }
    %c0 = arith.constant 0 : index
    %c0_1 = arith.constant 0 : index
    %3 = vector.load %arg8[%c0, %c0_1] : memref<16x256xf32, #tpu.memory_space<vmem>>, vector<16x256xf32>
    %c0_2 = arith.constant 0 : index
    %c0_3 = arith.constant 0 : index
    %4 = vector.load %arg3[%c0_2, %c0_3] : memref<16x384xbf16, #tpu.memory_space<vmem>>, vector<16x384xbf16>
    %c0_4 = arith.constant 0 : index
    %c0_5 = arith.constant 0 : index
    %5 = vector.load %arg4[%c0_4, %c0_5] : memref<384x256xbf16, #tpu.memory_space<vmem>>, vector<384x256xbf16>
    %cst = arith.constant dense<0.000000e+00> : vector<16x256xf32>
    %6 = tpu.matmul %4, %5, %cst {dimension_numbers = #tpu.dot_dimension_numbers<[1], [0], [0], [1], [0, 0, 1, 1], [], []>} : vector<16x384xbf16>, vector<384x256xbf16>, vector<16x256xf32> -> vector<16x256xf32>
    %7 = arith.addf %3, %6 : vector<16x256xf32>
    %c0_6 = arith.constant 0 : index
    %c0_7 = arith.constant 0 : index
    %8 = vector.load %arg8[%c0_6, %c0_7] : memref<16x256xf32, #tpu.memory_space<vmem>>, vector<16x256xf32>
    tpu.vector_store %arg8[%c0_6, %c0_7], %7 {strides = array<i32>} : memref<16x256xf32, #tpu.memory_space<vmem>>, vector<16x256xf32>,
    %c17_i32 = arith.constant 17 : i32
    %9 = arith.cmpi eq, %arg2, %c17_i32 : i32
    %10 = arith.extui %9 : i1 to i32
    %c0_i32_8 = arith.constant 0 : i32
    %11 = arith.cmpi ne, %10, %c0_i32_8 : i32
    scf.if %11 {
      %c0_9 = arith.constant 0 : index
      %c0_10 = arith.constant 0 : index
      %12 = vector.load %arg8[%c0_9, %c0_10] : memref<16x256xf32, #tpu.memory_space<vmem>>, vector<16x256xf32>
      %c0_11 = arith.constant 0 : index
      %c0_12 = arith.constant 0 : index
      %13 = vector.load %arg5[%c0_11, %c0_12] : memref<1x256xf32, #tpu.memory_space<vmem>>, vector<1x256xf32>
      %14 = vector.broadcast %13 : vector<1x256xf32> to vector<16x256xf32>
      %15 = arith.mulf %12, %14 : vector<16x256xf32>
      %c0_13 = arith.constant 0 : index
      %c0_14 = arith.constant 0 : index
      %16 = vector.load %arg6[%c0_13, %c0_14] : memref<1x256xf32, #tpu.memory_space<vmem>>, vector<1x256xf32>
      %17 = vector.broadcast %16 : vector<1x256xf32> to vector<16x256xf32>
      %18 = arith.addf %15, %17 : vector<16x256xf32>
      %c0_15 = arith.constant 0 : index
      %c0_16 = arith.constant 0 : index
      %19 = vector.load %arg7[%c0_15, %c0_16] : memref<16x256xf32, #tpu.memory_space<vmem>>, vector<16x256xf32>
      %20 = arith.addf %18, %19 : vector<16x256xf32>
      %cst_17 = arith.constant 0.000000e+00 : f32
      %21 = vector.broadcast %cst_17 : f32 to vector<16x256xf32>
      %22 = arith.maximumf %20, %21 : vector<16x256xf32>
      %c0_18 = arith.constant 0 : index
      %c0_19 = arith.constant 0 : index
      %23 = vector.load %arg8[%c0_18, %c0_19] : memref<16x256xf32, #tpu.memory_space<vmem>>, vector<16x256xf32>
      tpu.vector_store %arg8[%c0_18, %c0_19], %22 {strides = array<i32>} : memref<16x256xf32, #tpu.memory_space<vmem>>, vector<16x256xf32>,
    } else {
    }
    return
  }
  func.func @transform_0(%arg0: i32, %arg1: i32, %arg2: i32) -> (i32, i32) {
    %c0_i32 = arith.constant 0 : i32
    return %arg0, %arg2 : i32, i32
  }
  func.func @transform_1(%arg0: i32, %arg1: i32, %arg2: i32) -> (i32, i32) {
    %c0_i32 = arith.constant 0 : i32
    return %arg2, %arg1 : i32, i32
  }
  func.func @transform_2(%arg0: i32, %arg1: i32, %arg2: i32) -> (i32, i32) {
    %c0_i32 = arith.constant 0 : i32
    %c0_i32_0 = arith.constant 0 : i32
    return %c0_i32, %arg1 : i32, i32
  }
  func.func @transform_3(%arg0: i32, %arg1: i32, %arg2: i32) -> (i32, i32) {
    %c0_i32 = arith.constant 0 : i32
    %c0_i32_0 = arith.constant 0 : i32
    return %c0_i32, %arg1 : i32, i32
  }
  func.func @transform_4(%arg0: i32, %arg1: i32, %arg2: i32) -> (i32, i32) {
    %c0_i32 = arith.constant 0 : i32
    return %arg0, %arg1 : i32, i32
  }
  func.func @transform_5(%arg0: i32, %arg1: i32, %arg2: i32) -> (i32, i32) {
    %c0_i32 = arith.constant 0 : i32
    return %arg0, %arg1 : i32, i32
  }
}

module attributes {stable_mosaic.version = 11 : i64} {
  func.func @_mm_bn_kernel(%arg0: i32, %arg1: i32, %arg2: i32, %arg3: memref<16x384xbf16, #tpu.memory_space<vmem>>, %arg4: memref<384x256xbf16, #tpu.memory_space<vmem>>, %arg5: memref<1x256xf32, #tpu.memory_space<vmem>>, %arg6: memref<1x256xf32, #tpu.memory_space<vmem>>, %arg7: memref<16x256xf32, #tpu.memory_space<vmem>>) attributes {dimension_semantics = [#tpu.dimension_semantics<parallel>, #tpu.dimension_semantics<parallel>, #tpu.dimension_semantics<arbitrary>], iteration_bounds = array<i64: 1, 2, 18>, scalar_prefetch = 0 : i64, scratch_operands = 0 : i64, tpu.core_type = #tpu.core_type<tc>, window_params = [{transform_indices = @transform_0, window_bounds = array<i64: 16, 384>}, {transform_indices = @transform_1, window_bounds = array<i64: 384, 256>}, {transform_indices = @transform_2, window_bounds = array<i64: 1, 256>}, {transform_indices = @transform_3, window_bounds = array<i64: 1, 256>}, {transform_indices = @transform_4, window_bounds = array<i64: 16, 256>}]} {
    %c0_i32 = arith.constant 0 : i32
    %0 = arith.cmpi eq, %arg2, %c0_i32 : i32
    %1 = arith.extui %0 : i1 to i32
    %c0_i32_0 = arith.constant 0 : i32
    %2 = arith.cmpi ne, %1, %c0_i32_0 : i32
    scf.if %2 {
      %cst_9 = arith.constant 0.000000e+00 : f32
      %12 = vector.broadcast %cst_9 : f32 to vector<16x256xf32>
      %c0_10 = arith.constant 0 : index
      %c0_11 = arith.constant 0 : index
      %13 = vector.load %arg7[%c0_10, %c0_11] : memref<16x256xf32, #tpu.memory_space<vmem>>, vector<16x256xf32>
      tpu.vector_store %arg7[%c0_10, %c0_11], %12 {strides = array<i32>} : memref<16x256xf32, #tpu.memory_space<vmem>>, vector<16x256xf32>,
    } else {
    }
    %c0 = arith.constant 0 : index
    %c0_1 = arith.constant 0 : index
    %3 = vector.load %arg7[%c0, %c0_1] : memref<16x256xf32, #tpu.memory_space<vmem>>, vector<16x256xf32>
    %c0_2 = arith.constant 0 : index
    %c0_3 = arith.constant 0 : index
    %4 = vector.load %arg3[%c0_2, %c0_3] : memref<16x384xbf16, #tpu.memory_space<vmem>>, vector<16x384xbf16>
    %c0_4 = arith.constant 0 : index
    %c0_5 = arith.constant 0 : index
    %5 = vector.load %arg4[%c0_4, %c0_5] : memref<384x256xbf16, #tpu.memory_space<vmem>>, vector<384x256xbf16>
    %cst = arith.constant dense<0.000000e+00> : vector<16x256xf32>
    %6 = tpu.matmul %4, %5, %cst {dimension_numbers = #tpu.dot_dimension_numbers<[1], [0], [0], [1], [0, 0, 1, 1], [], []>} : vector<16x384xbf16>, vector<384x256xbf16>, vector<16x256xf32> -> vector<16x256xf32>
    %7 = arith.addf %3, %6 : vector<16x256xf32>
    %c0_6 = arith.constant 0 : index
    %c0_7 = arith.constant 0 : index
    %8 = vector.load %arg7[%c0_6, %c0_7] : memref<16x256xf32, #tpu.memory_space<vmem>>, vector<16x256xf32>
    tpu.vector_store %arg7[%c0_6, %c0_7], %7 {strides = array<i32>} : memref<16x256xf32, #tpu.memory_space<vmem>>, vector<16x256xf32>,
    %c17_i32 = arith.constant 17 : i32
    %9 = arith.cmpi eq, %arg2, %c17_i32 : i32
    %10 = arith.extui %9 : i1 to i32
    %c0_i32_8 = arith.constant 0 : i32
    %11 = arith.cmpi ne, %10, %c0_i32_8 : i32
    scf.if %11 {
      %c0_9 = arith.constant 0 : index
      %c0_10 = arith.constant 0 : index
      %12 = vector.load %arg7[%c0_9, %c0_10] : memref<16x256xf32, #tpu.memory_space<vmem>>, vector<16x256xf32>
      %c0_11 = arith.constant 0 : index
      %c0_12 = arith.constant 0 : index
      %13 = vector.load %arg5[%c0_11, %c0_12] : memref<1x256xf32, #tpu.memory_space<vmem>>, vector<1x256xf32>
      %14 = vector.broadcast %13 : vector<1x256xf32> to vector<16x256xf32>
      %15 = arith.mulf %12, %14 : vector<16x256xf32>
      %c0_13 = arith.constant 0 : index
      %c0_14 = arith.constant 0 : index
      %16 = vector.load %arg6[%c0_13, %c0_14] : memref<1x256xf32, #tpu.memory_space<vmem>>, vector<1x256xf32>
      %17 = vector.broadcast %16 : vector<1x256xf32> to vector<16x256xf32>
      %18 = arith.addf %15, %17 : vector<16x256xf32>
      %cst_15 = arith.constant 0.000000e+00 : f32
      %19 = vector.broadcast %cst_15 : f32 to vector<16x256xf32>
      %20 = arith.maximumf %18, %19 : vector<16x256xf32>
      %c0_16 = arith.constant 0 : index
      %c0_17 = arith.constant 0 : index
      %21 = vector.load %arg7[%c0_16, %c0_17] : memref<16x256xf32, #tpu.memory_space<vmem>>, vector<16x256xf32>
      tpu.vector_store %arg7[%c0_16, %c0_17], %20 {strides = array<i32>} : memref<16x256xf32, #tpu.memory_space<vmem>>, vector<16x256xf32>,
    } else {
    }
    return
  }
  func.func @transform_0(%arg0: i32, %arg1: i32, %arg2: i32) -> (i32, i32) {
    %c0_i32 = arith.constant 0 : i32
    return %arg0, %arg2 : i32, i32
  }
  func.func @transform_1(%arg0: i32, %arg1: i32, %arg2: i32) -> (i32, i32) {
    %c0_i32 = arith.constant 0 : i32
    return %arg2, %arg1 : i32, i32
  }
  func.func @transform_2(%arg0: i32, %arg1: i32, %arg2: i32) -> (i32, i32) {
    %c0_i32 = arith.constant 0 : i32
    %c0_i32_0 = arith.constant 0 : i32
    return %c0_i32, %arg1 : i32, i32
  }
  func.func @transform_3(%arg0: i32, %arg1: i32, %arg2: i32) -> (i32, i32) {
    %c0_i32 = arith.constant 0 : i32
    %c0_i32_0 = arith.constant 0 : i32
    return %c0_i32, %arg1 : i32, i32
  }
  func.func @transform_4(%arg0: i32, %arg1: i32, %arg2: i32) -> (i32, i32) {
    %c0_i32 = arith.constant 0 : i32
    return %arg0, %arg1 : i32, i32
  }
}

module attributes {stable_mosaic.version = 11 : i64} {
  func.func @_mm_bn_res_kernel(%arg0: i32, %arg1: i32, %arg2: i32, %arg3: memref<16x512xbf16, #tpu.memory_space<vmem>>, %arg4: memref<512x256xbf16, #tpu.memory_space<vmem>>, %arg5: memref<1x256xf32, #tpu.memory_space<vmem>>, %arg6: memref<1x256xf32, #tpu.memory_space<vmem>>, %arg7: memref<16x256xf32, #tpu.memory_space<vmem>>, %arg8: memref<16x256xf32, #tpu.memory_space<vmem>>) attributes {dimension_semantics = [#tpu.dimension_semantics<parallel>, #tpu.dimension_semantics<parallel>, #tpu.dimension_semantics<arbitrary>], iteration_bounds = array<i64: 1, 2, 27>, scalar_prefetch = 0 : i64, scratch_operands = 0 : i64, tpu.core_type = #tpu.core_type<tc>, window_params = [{transform_indices = @transform_0, window_bounds = array<i64: 16, 512>}, {transform_indices = @transform_1, window_bounds = array<i64: 512, 256>}, {transform_indices = @transform_2, window_bounds = array<i64: 1, 256>}, {transform_indices = @transform_3, window_bounds = array<i64: 1, 256>}, {transform_indices = @transform_4, window_bounds = array<i64: 16, 256>}, {transform_indices = @transform_5, window_bounds = array<i64: 16, 256>}]} {
    %c0_i32 = arith.constant 0 : i32
    %0 = arith.cmpi eq, %arg2, %c0_i32 : i32
    %1 = arith.extui %0 : i1 to i32
    %c0_i32_0 = arith.constant 0 : i32
    %2 = arith.cmpi ne, %1, %c0_i32_0 : i32
    scf.if %2 {
      %cst_9 = arith.constant 0.000000e+00 : f32
      %12 = vector.broadcast %cst_9 : f32 to vector<16x256xf32>
      %c0_10 = arith.constant 0 : index
      %c0_11 = arith.constant 0 : index
      %13 = vector.load %arg8[%c0_10, %c0_11] : memref<16x256xf32, #tpu.memory_space<vmem>>, vector<16x256xf32>
      tpu.vector_store %arg8[%c0_10, %c0_11], %12 {strides = array<i32>} : memref<16x256xf32, #tpu.memory_space<vmem>>, vector<16x256xf32>,
    } else {
    }
    %c0 = arith.constant 0 : index
    %c0_1 = arith.constant 0 : index
    %3 = vector.load %arg8[%c0, %c0_1] : memref<16x256xf32, #tpu.memory_space<vmem>>, vector<16x256xf32>
    %c0_2 = arith.constant 0 : index
    %c0_3 = arith.constant 0 : index
    %4 = vector.load %arg3[%c0_2, %c0_3] : memref<16x512xbf16, #tpu.memory_space<vmem>>, vector<16x512xbf16>
    %c0_4 = arith.constant 0 : index
    %c0_5 = arith.constant 0 : index
    %5 = vector.load %arg4[%c0_4, %c0_5] : memref<512x256xbf16, #tpu.memory_space<vmem>>, vector<512x256xbf16>
    %cst = arith.constant dense<0.000000e+00> : vector<16x256xf32>
    %6 = tpu.matmul %4, %5, %cst {dimension_numbers = #tpu.dot_dimension_numbers<[1], [0], [0], [1], [0, 0, 1, 1], [], []>} : vector<16x512xbf16>, vector<512x256xbf16>, vector<16x256xf32> -> vector<16x256xf32>
    %7 = arith.addf %3, %6 : vector<16x256xf32>
    %c0_6 = arith.constant 0 : index
    %c0_7 = arith.constant 0 : index
    %8 = vector.load %arg8[%c0_6, %c0_7] : memref<16x256xf32, #tpu.memory_space<vmem>>, vector<16x256xf32>
    tpu.vector_store %arg8[%c0_6, %c0_7], %7 {strides = array<i32>} : memref<16x256xf32, #tpu.memory_space<vmem>>, vector<16x256xf32>,
    %c26_i32 = arith.constant 26 : i32
    %9 = arith.cmpi eq, %arg2, %c26_i32 : i32
    %10 = arith.extui %9 : i1 to i32
    %c0_i32_8 = arith.constant 0 : i32
    %11 = arith.cmpi ne, %10, %c0_i32_8 : i32
    scf.if %11 {
      %c0_9 = arith.constant 0 : index
      %c0_10 = arith.constant 0 : index
      %12 = vector.load %arg8[%c0_9, %c0_10] : memref<16x256xf32, #tpu.memory_space<vmem>>, vector<16x256xf32>
      %c0_11 = arith.constant 0 : index
      %c0_12 = arith.constant 0 : index
      %13 = vector.load %arg5[%c0_11, %c0_12] : memref<1x256xf32, #tpu.memory_space<vmem>>, vector<1x256xf32>
      %14 = vector.broadcast %13 : vector<1x256xf32> to vector<16x256xf32>
      %15 = arith.mulf %12, %14 : vector<16x256xf32>
      %c0_13 = arith.constant 0 : index
      %c0_14 = arith.constant 0 : index
      %16 = vector.load %arg6[%c0_13, %c0_14] : memref<1x256xf32, #tpu.memory_space<vmem>>, vector<1x256xf32>
      %17 = vector.broadcast %16 : vector<1x256xf32> to vector<16x256xf32>
      %18 = arith.addf %15, %17 : vector<16x256xf32>
      %c0_15 = arith.constant 0 : index
      %c0_16 = arith.constant 0 : index
      %19 = vector.load %arg7[%c0_15, %c0_16] : memref<16x256xf32, #tpu.memory_space<vmem>>, vector<16x256xf32>
      %20 = arith.addf %18, %19 : vector<16x256xf32>
      %cst_17 = arith.constant 0.000000e+00 : f32
      %21 = vector.broadcast %cst_17 : f32 to vector<16x256xf32>
      %22 = arith.maximumf %20, %21 : vector<16x256xf32>
      %c0_18 = arith.constant 0 : index
      %c0_19 = arith.constant 0 : index
      %23 = vector.load %arg8[%c0_18, %c0_19] : memref<16x256xf32, #tpu.memory_space<vmem>>, vector<16x256xf32>
      tpu.vector_store %arg8[%c0_18, %c0_19], %22 {strides = array<i32>} : memref<16x256xf32, #tpu.memory_space<vmem>>, vector<16x256xf32>,
    } else {
    }
    return
  }
  func.func @transform_0(%arg0: i32, %arg1: i32, %arg2: i32) -> (i32, i32) {
    %c0_i32 = arith.constant 0 : i32
    return %arg0, %arg2 : i32, i32
  }
  func.func @transform_1(%arg0: i32, %arg1: i32, %arg2: i32) -> (i32, i32) {
    %c0_i32 = arith.constant 0 : i32
    return %arg2, %arg1 : i32, i32
  }
  func.func @transform_2(%arg0: i32, %arg1: i32, %arg2: i32) -> (i32, i32) {
    %c0_i32 = arith.constant 0 : i32
    %c0_i32_0 = arith.constant 0 : i32
    return %c0_i32, %arg1 : i32, i32
  }
  func.func @transform_3(%arg0: i32, %arg1: i32, %arg2: i32) -> (i32, i32) {
    %c0_i32 = arith.constant 0 : i32
    %c0_i32_0 = arith.constant 0 : i32
    return %c0_i32, %arg1 : i32, i32
  }
  func.func @transform_4(%arg0: i32, %arg1: i32, %arg2: i32) -> (i32, i32) {
    %c0_i32 = arith.constant 0 : i32
    return %arg0, %arg1 : i32, i32
  }
  func.func @transform_5(%arg0: i32, %arg1: i32, %arg2: i32) -> (i32, i32) {
    %c0_i32 = arith.constant 0 : i32
    return %arg0, %arg1 : i32, i32
  }
}

module attributes {stable_mosaic.version = 11 : i64} {
  func.func @_mean_reduce_kernel(%arg0: i32, %arg1: memref<1x8x512xf32, #tpu.memory_space<vmem>>, %arg2: memref<1x1x512xf32, #tpu.memory_space<vmem>>) attributes {dimension_semantics = [#tpu.dimension_semantics<parallel>], iteration_bounds = array<i64: 2>, scalar_prefetch = 0 : i64, scratch_operands = 0 : i64, tpu.core_type = #tpu.core_type<tc>, window_params = [{transform_indices = @transform_0, window_bounds = array<i64: 1, 8, 512>}, {transform_indices = @transform_1, window_bounds = array<i64: 1, 1, 512>}]} {
    %c0 = arith.constant 0 : index
    %c0_0 = arith.constant 0 : index
    %c0_1 = arith.constant 0 : index
    %0 = vector.load %arg1[%c0, %c0_0, %c0_1] : memref<1x8x512xf32, #tpu.memory_space<vmem>>, vector<1x8x512xf32>
    %cst = arith.constant dense<0.000000e+00> : vector<1x512xf32>
    %1 = vector.multi_reduction <add>, %0, %cst [1] : vector<1x8x512xf32> to vector<1x512xf32>
    %2 = vector.shape_cast %1 : vector<1x512xf32> to vector<1x1x512xf32>
    %cst_2 = arith.constant 8.000000e+00 : f32
    %3 = vector.broadcast %cst_2 : f32 to vector<1x1x512xf32>
    %4 = arith.divf %2, %3 : vector<1x1x512xf32>
    %c0_3 = arith.constant 0 : index
    %c0_4 = arith.constant 0 : index
    %c0_5 = arith.constant 0 : index
    %5 = vector.load %arg2[%c0_3, %c0_4, %c0_5] : memref<1x1x512xf32, #tpu.memory_space<vmem>>, vector<1x1x512xf32>
    tpu.vector_store %arg2[%c0_3, %c0_4, %c0_5], %4 {strides = array<i32>} : memref<1x1x512xf32, #tpu.memory_space<vmem>>, vector<1x1x512xf32>,
    return
  }
  func.func @transform_0(%arg0: i32) -> (i32, i32, i32) {
    %c0_i32 = arith.constant 0 : i32
    %c0_i32_0 = arith.constant 0 : i32
    %c0_i32_1 = arith.constant 0 : i32
    return %arg0, %c0_i32, %c0_i32_0 : i32, i32, i32
  }
  func.func @transform_1(%arg0: i32) -> (i32, i32, i32) {
    %c0_i32 = arith.constant 0 : i32
    %c0_i32_0 = arith.constant 0 : i32
    %c0_i32_1 = arith.constant 0 : i32
    return %arg0, %c0_i32, %c0_i32_0 : i32, i32, i32
  }
}

module attributes {stable_mosaic.version = 11 : i64} {
  func.func @_mm_bn_kernel(%arg0: i32, %arg1: i32, %arg2: i32, %arg3: memref<16x256xbf16, #tpu.memory_space<vmem>>, %arg4: memref<256x256xbf16, #tpu.memory_space<vmem>>, %arg5: memref<1x256xf32, #tpu.memory_space<vmem>>, %arg6: memref<1x256xf32, #tpu.memory_space<vmem>>, %arg7: memref<16x256xf32, #tpu.memory_space<vmem>>) attributes {dimension_semantics = [#tpu.dimension_semantics<parallel>, #tpu.dimension_semantics<parallel>, #tpu.dimension_semantics<arbitrary>], iteration_bounds = array<i64: 1, 2, 1>, scalar_prefetch = 0 : i64, scratch_operands = 0 : i64, tpu.core_type = #tpu.core_type<tc>, window_params = [{transform_indices = @transform_0, window_bounds = array<i64: 16, 256>}, {transform_indices = @transform_1, window_bounds = array<i64: 256, 256>}, {transform_indices = @transform_2, window_bounds = array<i64: 1, 256>}, {transform_indices = @transform_3, window_bounds = array<i64: 1, 256>}, {transform_indices = @transform_4, window_bounds = array<i64: 16, 256>}]} {
    %c0_i32 = arith.constant 0 : i32
    %0 = arith.cmpi eq, %arg2, %c0_i32 : i32
    %1 = arith.extui %0 : i1 to i32
    %c0_i32_0 = arith.constant 0 : i32
    %2 = arith.cmpi ne, %1, %c0_i32_0 : i32
    scf.if %2 {
      %cst_10 = arith.constant 0.000000e+00 : f32
      %12 = vector.broadcast %cst_10 : f32 to vector<16x256xf32>
      %c0_11 = arith.constant 0 : index
      %c0_12 = arith.constant 0 : index
      %13 = vector.load %arg7[%c0_11, %c0_12] : memref<16x256xf32, #tpu.memory_space<vmem>>, vector<16x256xf32>
      tpu.vector_store %arg7[%c0_11, %c0_12], %12 {strides = array<i32>} : memref<16x256xf32, #tpu.memory_space<vmem>>, vector<16x256xf32>,
    } else {
    }
    %c0 = arith.constant 0 : index
    %c0_1 = arith.constant 0 : index
    %3 = vector.load %arg7[%c0, %c0_1] : memref<16x256xf32, #tpu.memory_space<vmem>>, vector<16x256xf32>
    %c0_2 = arith.constant 0 : index
    %c0_3 = arith.constant 0 : index
    %4 = vector.load %arg3[%c0_2, %c0_3] : memref<16x256xbf16, #tpu.memory_space<vmem>>, vector<16x256xbf16>
    %c0_4 = arith.constant 0 : index
    %c0_5 = arith.constant 0 : index
    %5 = vector.load %arg4[%c0_4, %c0_5] : memref<256x256xbf16, #tpu.memory_space<vmem>>, vector<256x256xbf16>
    %cst = arith.constant dense<0.000000e+00> : vector<16x256xf32>
    %6 = tpu.matmul %4, %5, %cst {dimension_numbers = #tpu.dot_dimension_numbers<[1], [0], [0], [1], [0, 0, 1, 1], [], []>} : vector<16x256xbf16>, vector<256x256xbf16>, vector<16x256xf32> -> vector<16x256xf32>
    %7 = arith.addf %3, %6 : vector<16x256xf32>
    %c0_6 = arith.constant 0 : index
    %c0_7 = arith.constant 0 : index
    %8 = vector.load %arg7[%c0_6, %c0_7] : memref<16x256xf32, #tpu.memory_space<vmem>>, vector<16x256xf32>
    tpu.vector_store %arg7[%c0_6, %c0_7], %7 {strides = array<i32>} : memref<16x256xf32, #tpu.memory_space<vmem>>, vector<16x256xf32>,
    %c0_i32_8 = arith.constant 0 : i32
    %9 = arith.cmpi eq, %arg2, %c0_i32_8 : i32
    %10 = arith.extui %9 : i1 to i32
    %c0_i32_9 = arith.constant 0 : i32
    %11 = arith.cmpi ne, %10, %c0_i32_9 : i32
    scf.if %11 {
      %c0_10 = arith.constant 0 : index
      %c0_11 = arith.constant 0 : index
      %12 = vector.load %arg7[%c0_10, %c0_11] : memref<16x256xf32, #tpu.memory_space<vmem>>, vector<16x256xf32>
      %c0_12 = arith.constant 0 : index
      %c0_13 = arith.constant 0 : index
      %13 = vector.load %arg5[%c0_12, %c0_13] : memref<1x256xf32, #tpu.memory_space<vmem>>, vector<1x256xf32>
      %14 = vector.broadcast %13 : vector<1x256xf32> to vector<16x256xf32>
      %15 = arith.mulf %12, %14 : vector<16x256xf32>
      %c0_14 = arith.constant 0 : index
      %c0_15 = arith.constant 0 : index
      %16 = vector.load %arg6[%c0_14, %c0_15] : memref<1x256xf32, #tpu.memory_space<vmem>>, vector<1x256xf32>
      %17 = vector.broadcast %16 : vector<1x256xf32> to vector<16x256xf32>
      %18 = arith.addf %15, %17 : vector<16x256xf32>
      %c0_16 = arith.constant 0 : index
      %c0_17 = arith.constant 0 : index
      %19 = vector.load %arg7[%c0_16, %c0_17] : memref<16x256xf32, #tpu.memory_space<vmem>>, vector<16x256xf32>
      tpu.vector_store %arg7[%c0_16, %c0_17], %18 {strides = array<i32>} : memref<16x256xf32, #tpu.memory_space<vmem>>, vector<16x256xf32>,
    } else {
    }
    return
  }
  func.func @transform_0(%arg0: i32, %arg1: i32, %arg2: i32) -> (i32, i32) {
    %c0_i32 = arith.constant 0 : i32
    return %arg0, %arg2 : i32, i32
  }
  func.func @transform_1(%arg0: i32, %arg1: i32, %arg2: i32) -> (i32, i32) {
    %c0_i32 = arith.constant 0 : i32
    return %arg2, %arg1 : i32, i32
  }
  func.func @transform_2(%arg0: i32, %arg1: i32, %arg2: i32) -> (i32, i32) {
    %c0_i32 = arith.constant 0 : i32
    %c0_i32_0 = arith.constant 0 : i32
    return %c0_i32, %arg1 : i32, i32
  }
  func.func @transform_3(%arg0: i32, %arg1: i32, %arg2: i32) -> (i32, i32) {
    %c0_i32 = arith.constant 0 : i32
    %c0_i32_0 = arith.constant 0 : i32
    return %c0_i32, %arg1 : i32, i32
  }
  func.func @transform_4(%arg0: i32, %arg1: i32, %arg2: i32) -> (i32, i32) {
    %c0_i32 = arith.constant 0 : i32
    return %arg0, %arg1 : i32, i32
  }
}

</mosaic_0001>

<bundles_post_ra>
// kernel: resnet10_forward.14
= control target key start
LH: loop header
LB: loop body
LE: loop exit
PB: predicated region body
PF: predicated region fallthrough
CT: control target
= control target key end

     0   :  { %s1994_s15 = smov 0   ;;  %s1996_s16 = smov 0   ;;  %s2664_s0 = inlined_call_operand.vmem [shape: bf16[1024,384], index: 0, kind: input, shape index: {}]   ;;  %s2665_s1 = inlined_call_operand.vmem [shape: bf16[384,64], index: 1, kind: input, shape index: {}]   ;;  %s2666_s2 = inlined_call_operand.vmem [shape: f32[1,64], index: 2, kind: input, shape index: {}]   ;;  %s2667_s3 = inlined_call_operand.vmem [shape: f32[1,64], index: 3, kind: input, shape index: {}]   ;;  %s2668_s4 = inlined_call_operand.vmem [shape: f32[1024,64], index: 4, kind: output, shape index: {}]  }
   0x1   :  { %s1998_s17 = smov 0  }
   0x2 LB: > { %s33_s18 = sadd.s32 1, %s1962_s16  ;;  %p1525_p0 = scmp.ge.s32.totalorder %s1966_s17, 1  ;;  %s1966_s17 = sphi %s1998_s17, %s14_s17   ;;  %s1962_s16 = sphi %s1996_s16, %s2670_s16   ;;  %s1958_s15 = sphi %s1994_s15, %s2669_s15  }
   0x3   : > { %p35_p1 = scmp.ge.s32.totalorder %s33_s18, 4  ;;  %p224_p2 = scmp.lt.s32.totalorder %s1966_s17, 5 }
   0x5   : > { %s2672_s18 = smov (%p35_p1, %s33_s18), 0  ;;  %p225_p3 = pnand %p1525_p0, %p224_p2 }
   0x6   : > { %s1526_s11 = sshll.u32 (!%p225_p3), %s1958_s15, 5 }
   0x7   : > { %228 = sbr.rel (%p225_p3) target bundleno = 381 (0x17d), region = 36  ;;  %p274_p4 = scmp.lt.s32.totalorder (!%p225_p3), %s1526_s11, 127 }
   0xc   : > { %v1875_v0 = vld [vmem:[%s2665_s1 + $0x38] sm:$0xff]  ;;  %v1874_v3 = vld [vmem:[%s2665_s1 + $0x30] sm:$0xff]  ;;  %v1873_v6 = vld [vmem:[%s2665_s1 + $0x28] sm:$0xff]  ;;  %s2674_s11 = smov (!%p274_p4, %s1526_s11), 127  ;;  %vm312_vm0 = vcmask 523264  }
   0xd   : > { %v2020_v1 = vld [vmem:[%s2665_s1 + $0x78] sm:$0xff]  ;;  %889 = vmatpush.bf16.msra.mxu0 %v1875_v0  ;;  %1892 = vmatpush.bf16.msra.mxu3 %v1875_v0  ;;  %v2035_v4 = vld [vmem:[%s2665_s1 + $0x70] sm:$0xff]  ;;  %v2050_v7 = vld [vmem:[%s2665_s1 + $0x68] sm:$0xff]  ;;  %s1916_s29 = smul.u32 12, %s2674_s11  ;;  %s1529_s27 = sshll.u32 %s2674_s11, 3 }
   0xe   : > { %v2025_v2 = vld [vmem:[%s2665_s1 + $0xb8] sm:$0xff]  ;;  %978 = vmatpush.bf16.msra.mxu1 %v2020_v1  ;;  %v2040_v5 = vld [vmem:[%s2665_s1 + $0xb0] sm:$0xff]  ;;  %v2055_v8 = vld [vmem:[%s2665_s1 + $0xa8] sm:$0xff]  ;;  %s2203_s30 = scalar_lea.vmem %s2668_s4, %s1529_s27 }
   0xf   : > { %1067 = vmatpush.bf16.msra.mxu2 %v2025_v2  ;;  %v1872_v9 = vld [vmem:[%s2665_s1 + $0x20] sm:$0xff]  ;;  %v1871_v12 = vld [vmem:[%s2665_s1 + $0x18] sm:$0xff]  ;;  %v1870_v15 = vld [vmem:[%s2665_s1 + $0x10] sm:$0xff]  ;;  %s2107_s13 = scalar_lea.vmem %s2664_s0, %s1916_s29 }
  0x10   : > { %v2064_v10 = vld [vmem:[%s2665_s1 + $0x60] sm:$0xff]  ;;  %v1879_v13 = vld [vmem:[%s2665_s1 + $0x58] sm:$0xff]  ;;  %v1878_v16 = vld [vmem:[%s2665_s1 + $0x50] sm:$0xff] }
  0x11   : > { %890 = vmatpush.bf16.msra.mxu0 %v1874_v3  ;;  %1893 = vmatpush.bf16.msra.mxu3 %v1874_v3  ;;  %v2071_v11 = vld [vmem:[%s2665_s1 + $0xa0] sm:$0xff]  ;;  %v2086_v14 = vld [vmem:[%s2665_s1 + $0x98] sm:$0xff]  ;;  %v2099_v17 = vld [vmem:[%s2665_s1 + $0x90] sm:$0xff] }
  0x12   : > { %979 = vmatpush.bf16.msra.mxu1 %v2035_v4  ;;  %v1869_v18 = vld [vmem:[%s2665_s1 + $0x8] sm:$0xff]  ;;  %v1868_v21 = vld [vmem:[%s2665_s1] sm:$0xff]  ;;  %v1534_v29 = vld [vmem:[%s2107_s13 + $0xc] sm:$0xf0] }
  0x13   : > { %1068 = vmatpush.bf16.msra.mxu2 %v2040_v5  ;;  %v1877_v19 = vld [vmem:[%s2665_s1 + $0x48] sm:$0xff]  ;;  %v1876_v22 = vld [vmem:[%s2665_s1 + $0x40] sm:$0xff]  ;;  %v1822_v31 = vld [vmem:[%s2107_s13 + $0x10] sm:$0xf0] }
  0x14   : > { %v2116_v20 = vld [vmem:[%s2665_s1 + $0x88] sm:$0xff]  ;;  %v2127_v23 = vld [vmem:[%s2665_s1 + $0x80] sm:$0xff]  ;;  %v1544_v36 = vld [vmem:[%s2107_s13 + $0x18] sm:$0xf] }
  0x15   : > { %891 = vmatpush.bf16.msra.mxu0 %v1873_v6  ;;  %1894 = vmatpush.bf16.msra.mxu3 %v1873_v6  ;;  %v1532_v24 = vld [vmem:[%s2107_s13] sm:$0xf]  ;;  %v1821_v25 = vld [vmem:[%s2107_s13 + $0x8] sm:$0xf0]  ;;  %v1820_v28 = vld [vmem:[%s2107_s13 + $0x4] sm:$0xf] }
  0x16   : > { %980 = vmatpush.bf16.msra.mxu1 %v2050_v7  ;;  %v1676_v26 = vld [vmem:[%s2107_s13 + $0x120] sm:$0xf]  ;;  %v1857_v27 = vld [vmem:[%s2107_s13 + $0x128] sm:$0xf0]  ;;  %v1540_v30 = vld [vmem:[%s2107_s13 + $0x8] sm:$0xf]  ;;  %v1533_v32 = vor.u32 %v1821_v25, %v1532_v24  ;;  %v1537_v34 = vor.u32 %v1820_v28, %v1534_v29 }
  0x17   : > { %1069 = vmatpush.bf16.msra.mxu2 %v2055_v8  ;;  %v1677_v33 = vor.u32 %v1857_v27, %v1676_v26  ;;  %v1541_v35 = vor.u32 %v1822_v31, %v1540_v30  ;;  %v1824_v37 = vld [vmem:[%s2107_s13 + $0x20] sm:$0xf0]  ;;  %v1688_v38 = vld [vmem:[%s2107_s13 + $0x138] sm:$0xf]  ;;  %v1823_v40 = vld [vmem:[%s2107_s13 + $0x1c] sm:$0xf] }
  0x18   : > { %v1860_v39 = vld [vmem:[%s2107_s13 + $0x140] sm:$0xf0]  ;;  %v1546_v41 = vld [vmem:[%s2107_s13 + $0x24] sm:$0xf0]  ;;  %v1552_v42 = vld [vmem:[%s2107_s13 + $0x20] sm:$0xf]  ;;  %v1545_v44 = vor.u32 %v1824_v37, %v1544_v36 }
  0x19   : > { %892 = vmatpush.bf16.msra.mxu0 %v1872_v9  ;;  %1895 = vmatpush.bf16.msra.mxu3 %v1872_v9  ;;  %v1825_v43 = vld [vmem:[%s2107_s13 + $0x28] sm:$0xf0]  ;;  %v1689_v45 = vor.u32 %v1860_v39, %v1688_v38  ;;  %v1549_v46 = vor.u32 %v1823_v40, %v1546_v41  ;;  %v1556_v48 = vld [vmem:[%s2107_s13 + $0x30] sm:$0xf]  ;;  %v1827_v49 = vld [vmem:[%s2107_s13 + $0x38] sm:$0xf0] }
  0x1a   : > { %981 = vmatpush.bf16.msra.mxu1 %v2064_v10  ;;  %v1553_v47 = vor.u32 %v1825_v43, %v1552_v42  ;;  %v1700_v50 = vld [vmem:[%s2107_s13 + $0x150] sm:$0xf]  ;;  %v1863_v51 = vld [vmem:[%s2107_s13 + $0x158] sm:$0xf0]  ;;  %v1826_v52 = vld [vmem:[%s2107_s13 + $0x34] sm:$0xf]  ;;  %v1557_v56 = vor.u32 %v1827_v49, %v1556_v48 }
  0x1b   : > { %1070 = vmatpush.bf16.msra.mxu2 %v2071_v11  ;;  %v1558_v53 = vld [vmem:[%s2107_s13 + $0x3c] sm:$0xf0]  ;;  %v1564_v54 = vld [vmem:[%s2107_s13 + $0x38] sm:$0xf]  ;;  %v1828_v55 = vld [vmem:[%s2107_s13 + $0x40] sm:$0xf0]  ;;  %v1701_v57 = vor.u32 %v1863_v51, %v1700_v50 }
  0x1c   : > { %v1561_v58 = vor.u32 %v1826_v52, %v1558_v53  ;;  %v1565_v59 = vor.u32 %v1828_v55, %v1564_v54  ;;  %v1568_v60 = vld [vmem:[%s2107_s13 + $0x48] sm:$0xf]  ;;  %v1830_v61 = vld [vmem:[%s2107_s13 + $0x50] sm:$0xf0]  ;;  %v1829_v0 = vld [vmem:[%s2107_s13 + $0x4c] sm:$0xf] }
  0x1d   : > { %893 = vmatpush.bf16.msra.mxu0 %v1871_v12  ;;  %1896 = vmatpush.bf16.msra.mxu3 %v1871_v12  ;;  %v1712_v62 = vld [vmem:[%s2107_s13 + $0x168] sm:$0xf]  ;;  %v1866_v63 = vld [vmem:[%s2107_s13 + $0x170] sm:$0xf0]  ;;  %v1831_v3 = vld [vmem:[%s2107_s13 + $0x58] sm:$0xf0] }
  0x1e   : > { %982 = vmatpush.bf16.msra.mxu1 %v1879_v13  ;;  %v1833_v9 = vld [vmem:[%s2107_s13 + $0x68] sm:$0xf0]  ;;  %v1678_v12 = vld [vmem:[%s2107_s13 + $0x12c] sm:$0xf0]  ;;  %v1859_v24 = vld [vmem:[%s2107_s13 + $0x13c] sm:$0xf] }
  0x1f   : > { %1071 = vmatpush.bf16.msra.mxu2 %v2086_v14  ;;  %v1690_v25 = vld [vmem:[%s2107_s13 + $0x144] sm:$0xf0]  ;;  %v1600_v26 = vld [vmem:[%s2107_s13 + $0x80] sm:$0xf]  ;;  %v1837_v27 = vld [vmem:[%s2107_s13 + $0x88] sm:$0xf0] }
  0x20   : > { %v1693_v29 = vor.u32 %v1859_v24, %v1690_v25  ;;  %v1601_v31 = vor.u32 %v1837_v27, %v1600_v26  ;;  %v1702_v36 = vld [vmem:[%s2107_s13 + $0x15c] sm:$0xf0]  ;;  %v1612_v38 = vld [vmem:[%s2107_s13 + $0x98] sm:$0xf]  ;;  %v1840_v39 = vld [vmem:[%s2107_s13 + $0xa0] sm:$0xf0] }
  0x21   : > { %894 = vmatpush.bf16.msra.mxu0 %v1870_v15  ;;  %1897 = vmatpush.bf16.msra.mxu3 %v1870_v15  ;;  %v1834_v15 = vld [vmem:[%s2107_s13 + $0x70] sm:$0xf0]  ;;  %v1606_v37 = vld [vmem:[%s2107_s13 + $0x9c] sm:$0xf0]  ;;  %v1613_v43 = vor.u32 %v1840_v39, %v1612_v38  ;;  %v1618_v48 = vld [vmem:[%s2107_s13 + $0xb4] sm:$0xf0] }
  0x22   : > { %983 = vmatpush.bf16.msra.mxu1 %v1878_v16  ;;  %v1865_v49 = vld [vmem:[%s2107_s13 + $0x16c] sm:$0xf]  ;;  %v1714_v50 = vld [vmem:[%s2107_s13 + $0x174] sm:$0xf0]  ;;  %v1624_v51 = vld [vmem:[%s2107_s13 + $0xb0] sm:$0xf] }
  0x23   : > { %1072 = vmatpush.bf16.msra.mxu2 %v2099_v17  ;;  %v1843_v52 = vld [vmem:[%s2107_s13 + $0xb8] sm:$0xf0]  ;;  %v1717_v54 = vor.u32 %v1865_v49, %v1714_v50  ;;  %v1652_v49 = vld [vmem:[%s2107_s13 + $0xf0] sm:$0xf] }
  0x25   : > { %895 = vmatpush.bf16.msra.mxu0 %v1869_v18  ;;  %1898 = vmatpush.bf16.msra.mxu3 %v1869_v18 }
  0x26   : > { %984 = vmatpush.bf16.msra.mxu1 %v1877_v19 }
  0x27   : > { %1073 = vmatpush.bf16.msra.mxu2 %v2116_v20 }
  0x29   : > { %896 = vmatpush.bf16.msra.mxu0 %v1868_v21  ;;  %1899 = vmatpush.bf16.msra.mxu3 %v1868_v21  ;;  %v1836_v21 = vld [vmem:[%s2107_s13 + $0x80] sm:$0xf0] }
  0x2a   : > { %985 = vmatpush.bf16.msra.mxu1 %v1876_v22 }
  0x2b   : > { %1074 = vmatpush.bf16.msra.mxu2 %v2127_v23 }
  0x2c   : > { %897 = vmatmul.bf16.vlgmr.msra.gmra.mxu0 %v1533_v32  ;;  %957 = vmatmul.bf16.vlgmr.msra.gmra.mxu3 %v1677_v33  ;;  %v1604_v32 = vld [vmem:[%s2107_s13 + $0x90] sm:$0xf]  ;;  %v1839_v33 = vld [vmem:[%s2107_s13 + $0x98] sm:$0xf0] }
  0x2d   : > { %1900 = vmatpush.bf16.msrb.mxu3 %v2020_v1  ;;  %986 = vmatmul.bf16.vlgmr.msra.gmra.mxu1 %v1537_v34  ;;  %v1570_v1 = vld [vmem:[%s2107_s13 + $0x54] sm:$0xf0]  ;;  %v1838_v34 = vld [vmem:[%s2107_s13 + $0x94] sm:$0xf]  ;;  %v1605_v40 = vor.u32 %v1839_v33, %v1604_v32 }
  0x2e   : > { %1075 = vmatmul.bf16.vlgmr.msra.gmra.mxu2 %v1541_v35  ;;  %v1573_v6 = vor.u32 %v1829_v0, %v1570_v1  ;;  %v1862_v35 = vld [vmem:[%s2107_s13 + $0x154] sm:$0xf]  ;;  %v1609_v42 = vor.u32 %v1838_v34, %v1606_v37 }
  0x2f   : > { %v1705_v41 = vor.u32 %v1862_v35, %v1702_v36  ;;  %v1846_v0 = vld [vmem:[%s2107_s13 + $0xd0] sm:$0xf0]  ;;  %v2341_v35 = vld [vmem:[%s2667_s3] ss:$0 sm:$0xff] }
  0x31   : > { %1901 = vmatpush.bf16.msrb.mxu3 %v2035_v4  ;;  %v1569_v4 = vor.u32 %v1830_v61, %v1568_v60  ;;  %v1630_v60 = vld [vmem:[%s2107_s13 + $0xcc] sm:$0xf0]  ;;  %v1684_v61 = vld [vmem:[%s2107_s13 + $0x128] sm:$0xf] }
  0x35   : > { %1902 = vmatpush.bf16.msrb.mxu3 %v2050_v7 }
  0x39   : > { %1903 = vmatpush.bf16.msrb.mxu3 %v2064_v10  ;;  %v1832_v10 = vld [vmem:[%s2107_s13 + $0x64] sm:$0xf] }
  0x3c   : > { %902 = vmatmul.bf16.gmra.mxu0 %v1545_v44  ;;  %962 = vmatmul.bf16.gmra.mxu3 %v1689_v45  ;;  %v1968_v44 = vmov 0.0   ;;  %v1616_v45 = vld [vmem:[%s2107_s13 + $0xa8] sm:$0xf] }
  0x3d   : > { %1904 = vmatpush.bf16.msrb.mxu3 %v1879_v13  ;;  %991 = vmatmul.bf16.gmra.mxu1 %v1549_v46  ;;  %v1582_v13 = vld [vmem:[%s2107_s13 + $0x6c] sm:$0xf0]  ;;  %313 = vst.msk [vmem:[%s2203_s30] sm:$0xff] %vm312_vm0, %v1968_v44  ;;  %v1842_v46 = vld [vmem:[%s2107_s13 + $0xb0] sm:$0xf0] }
  0x3e   : > { %1080 = vmatmul.bf16.gmra.mxu2 %v1553_v47  ;;  %v1585_v18 = vor.u32 %v1832_v10, %v1582_v13  ;;  %314 = vst.msk [vmem:[%s2203_s30 + $0x8] sm:$0xff] %vm312_vm0, %v1968_v44  ;;  %v1841_v47 = vld [vmem:[%s2107_s13 + $0xac] sm:$0xf]  ;;  %v1617_v53 = vor.u32 %v1842_v46, %v1616_v45 }
  0x3f   : > { %315 = vst.msk [vmem:[%s2203_s30 + $0x10] sm:$0xff] %vm312_vm0, %v1968_v44  ;;  %v1621_v55 = vor.u32 %v1841_v47, %v1618_v48 }
  0x40   : > { %316 = vst.msk [vmem:[%s2203_s30 + $0x18] sm:$0xff] %vm312_vm0, %v1968_v44 }
  0x41   : > { %1905 = vmatpush.bf16.msrb.mxu3 %v1878_v16  ;;  %317 = vst.msk [vmem:[%s2203_s30 + $0x20] sm:$0xff] %vm312_vm0, %v1968_v44 }
  0x42   : > { %318 = vst.msk [vmem:[%s2203_s30 + $0x28] sm:$0xff] %vm312_vm0, %v1968_v44 }
  0x43   : > { %319 = vst.msk [vmem:[%s2203_s30 + $0x30] sm:$0xff] %vm312_vm0, %v1968_v44 }
  0x44   : > { %320 = vst.msk [vmem:[%s2203_s30 + $0x38] sm:$0xff] %vm312_vm0, %v1968_v44 }
  0x45   : > { %1906 = vmatpush.bf16.msrb.mxu3 %v1877_v19  ;;  %321 = vst.msk [vmem:[%s2203_s30 + $0x40] sm:$0xff] %vm312_vm0, %v1968_v44 }
  0x46   : > { %322 = vst.msk [vmem:[%s2203_s30 + $0x48] sm:$0xff] %vm312_vm0, %v1968_v44 }
  0x47   : > { %323 = vst.msk [vmem:[%s2203_s30 + $0x50] sm:$0xff] %vm312_vm0, %v1968_v44 }
  0x48   : > { %324 = vst.msk [vmem:[%s2203_s30 + $0x58] sm:$0xff] %vm312_vm0, %v1968_v44 }
  0x49   : > { %1907 = vmatpush.bf16.msrb.mxu3 %v1876_v22  ;;  %v1835_v22 = vld [vmem:[%s2107_s13 + $0x7c] sm:$0xf]  ;;  %325 = vst.msk [vmem:[%s2203_s30 + $0x60] sm:$0xff] %vm312_vm0, %v1968_v44 }
  0x4a   : > { %326 = vst.msk [vmem:[%s2203_s30 + $0x68] sm:$0xff] %vm312_vm0, %v1968_v44 }
  0x4b   : > { %327 = vst.msk [vmem:[%s2203_s30 + $0x70] sm:$0xff] %vm312_vm0, %v1968_v44 }
  0x4c   : > { %907 = vmatmul.bf16.gmra.mxu0 %v1557_v56  ;;  %967 = vmatmul.bf16.gmra.mxu3 %v1701_v57  ;;  %v1625_v56 = vor.u32 %v1843_v52, %v1624_v51  ;;  %328 = vst.msk [vmem:[%s2203_s30 + $0x78] sm:$0xff] %vm312_vm0, %v1968_v44  ;;  %v1628_v57 = vld [vmem:[%s2107_s13 + $0xc0] sm:$0xf]  ;;  %v1851_v51 = vld [vmem:[%s2107_s13 + $0xf8] sm:$0xf0] }
  0x4d   : > { %1908 = vmatpush.bf16.msra.mxu3 %v2025_v2  ;;  %996 = vmatmul.bf16.gmra.mxu1 %v1561_v58  ;;  %v1576_v2 = vld [vmem:[%s2107_s13 + $0x50] sm:$0xf]  ;;  %329 = vst.msk [vmem:[%s2203_s30 + $0x80] sm:$0xff] %vm312_vm0, %v1968_v44  ;;  %v1845_v58 = vld [vmem:[%s2107_s13 + $0xc8] sm:$0xf0] }
  0x4e   : > { %1085 = vmatmul.bf16.gmra.mxu2 %v1565_v59  ;;  %v1577_v7 = vor.u32 %v1831_v3, %v1576_v2  ;;  %330 = vst.msk [vmem:[%s2203_s30 + $0x88] sm:$0xff] %vm312_vm0, %v1968_v44  ;;  %v1844_v59 = vld [vmem:[%s2107_s13 + $0xc4] sm:$0xf]  ;;  %v1629_v1 = vor.u32 %v1845_v58, %v1628_v57  ;;  %v1850_v52 = vld [vmem:[%s2107_s13 + $0xf4] sm:$0xf] }
  0x4f   : > { %331 = vst.msk [vmem:[%s2203_s30 + $0x90] sm:$0xff] %vm312_vm0, %v1968_v44  ;;  %v1660_v57 = vld [vmem:[%s2107_s13 + $0xf8] sm:$0xf]  ;;  %v1852_v58 = vld [vmem:[%s2107_s13 + $0x100] sm:$0xf0] }
  0x50   : > { %332 = vst.msk [vmem:[%s2203_s30 + $0x98] sm:$0xff] %vm312_vm0, %v1968_v44 }
  0x51   : > { %1909 = vmatpush.bf16.msra.mxu3 %v2040_v5  ;;  %v1713_v5 = vor.u32 %v1866_v63, %v1712_v62  ;;  %333 = vst.msk [vmem:[%s2203_s30 + $0xa0] sm:$0xff] %vm312_vm0, %v1968_v44  ;;  %v1858_v62 = vld [vmem:[%s2107_s13 + $0x130] sm:$0xf0]  ;;  %v1636_v63 = vld [vmem:[%s2107_s13 + $0xc8] sm:$0xf] }
  0x52   : > { %334 = vst.msk [vmem:[%s2203_s30 + $0xa8] sm:$0xff] %vm312_vm0, %v1968_v44  ;;  %v1685_v2 = vor.u32 %v1858_v62, %v1684_v61  ;;  %v348_v62 = vld [vmem:[%s2203_s30 + $0x18] sm:$0xff] }
  0x53   : > { %335 = vst.msk [vmem:[%s2203_s30 + $0xb0] sm:$0xff] %vm312_vm0, %v1968_v44 }
  0x54   : > { %336 = vst.msk [vmem:[%s2203_s30 + $0xb8] sm:$0xff] %vm312_vm0, %v1968_v44 }
  0x55   : > { %1910 = vmatpush.bf16.msra.mxu3 %v2055_v8  ;;  %v1580_v8 = vld [vmem:[%s2107_s13 + $0x60] sm:$0xf]  ;;  %337 = vst.msk [vmem:[%s2203_s30 + $0xc0] sm:$0xff] %vm312_vm0, %v1968_v44 }
  0x56   : > { %v1581_v16 = vor.u32 %v1833_v9, %v1580_v8  ;;  %338 = vst.msk [vmem:[%s2203_s30 + $0xc8] sm:$0xff] %vm312_vm0, %v1968_v44  ;;  %v345_v9 = vld [vmem:[%s2203_s30] sm:$0xff] }
  0x57   : > { %339 = vst.msk [vmem:[%s2203_s30 + $0xd0] sm:$0xff] %vm312_vm0, %v1968_v44 }
  0x58   : > { %340 = vst.msk [vmem:[%s2203_s30 + $0xd8] sm:$0xff] %vm312_vm0, %v1968_v44 }
  0x59   : > { %1911 = vmatpush.bf16.msra.mxu3 %v2071_v11  ;;  %v1856_v11 = vld [vmem:[%s2107_s13 + $0x124] sm:$0xf]  ;;  %341 = vst.msk [vmem:[%s2203_s30 + $0xe0] sm:$0xff] %vm312_vm0, %v1968_v44 }
  0x5a   : > { %342 = vst.msk [vmem:[%s2203_s30 + $0xe8] sm:$0xff] %vm312_vm0, %v1968_v44 }
  0x5b   : > { %343 = vst.msk [vmem:[%s2203_s30 + $0xf0] sm:$0xff] %vm312_vm0, %v1968_v44 }
  0x5c   : > { %912 = vmatmul.bf16.gmra.mxu0 %v1569_v4  ;;  %972 = vmatmul.bf16.gmra.mxu3 %v1713_v5  ;;  %v1633_v4 = vor.u32 %v1844_v59, %v1630_v60  ;;  %v1637_v5 = vor.u32 %v1846_v0, %v1636_v63  ;;  %344 = vst.msk [vmem:[%s2203_s30 + $0xf8] sm:$0xff] %vm312_vm0, %v1968_v44 }
  0x5d   : > { %1912 = vmatpush.bf16.msra.mxu3 %v2086_v14  ;;  %1001 = vmatmul.bf16.gmra.mxu1 %v1573_v6  ;;  %v1588_v14 = vld [vmem:[%s2107_s13 + $0x68] sm:$0xf]  ;;  %v1653_v0 = vor.u32 %v1851_v51, %v1652_v49 }
  0x5e   : > { %1090 = vmatmul.bf16.gmra.mxu2 %v1577_v7  ;;  %v1589_v19 = vor.u32 %v1834_v15, %v1588_v14  ;;  %v1640_v15 = vld [vmem:[%s2107_s13 + $0xd8] sm:$0xf] }
  0x61   : > { %1913 = vmatpush.bf16.msra.mxu3 %v2099_v17  ;;  %v1681_v17 = vor.u32 %v1856_v11, %v1678_v12 }
  0x65   : > { %1914 = vmatpush.bf16.msra.mxu3 %v2116_v20  ;;  %v1592_v20 = vld [vmem:[%s2107_s13 + $0x78] sm:$0xf] }
  0x66   : > { %v1593_v28 = vor.u32 %v1836_v21, %v1592_v20  ;;  %v1642_v20 = vld [vmem:[%s2107_s13 + $0xe4] sm:$0xf0]  ;;  %v1648_v21 = vld [vmem:[%s2107_s13 + $0xe0] sm:$0xf] }
  0x69   : > { %1915 = vmatpush.bf16.msra.mxu3 %v2127_v23  ;;  %v1594_v23 = vld [vmem:[%s2107_s13 + $0x84] sm:$0xf0] }
  0x6a   : > { %v1597_v30 = vor.u32 %v1835_v22, %v1594_v23  ;;  %v1849_v22 = vld [vmem:[%s2107_s13 + $0xe8] sm:$0xf0] }
  0x6b   : > { %v346_v23 = vld [vmem:[%s2203_s30 + $0x8] sm:$0xff]  ;;  %v1649_v33 = vor.u32 %v1849_v22, %v1648_v21 }
  0x6c   : > { %917 = vmatmul.bf16.gmra.mxu0 %v1581_v16  ;;  %1046 = vmatmul.bf16.vlgmr.msrb.gmra.mxu3 %v1681_v17  ;;  %v1848_v16 = vld [vmem:[%s2107_s13 + $0xe0] sm:$0xf0]  ;;  %v1847_v17 = vld [vmem:[%s2107_s13 + $0xdc] sm:$0xf]  ;;  %v1664_v22 = vld [vmem:[%s2107_s13 + $0x108] sm:$0xf] }
  0x6d   : > { %1006 = vmatmul.bf16.gmra.mxu1 %v1585_v18  ;;  %v1696_v18 = vld [vmem:[%s2107_s13 + $0x140] sm:$0xf]  ;;  %v1641_v27 = vor.u32 %v1848_v16, %v1640_v15  ;;  %v1645_v32 = vor.u32 %v1847_v17, %v1642_v20 }
  0x6e   : > { %1095 = vmatmul.bf16.gmra.mxu2 %v1589_v19  ;;  %v1861_v19 = vld [vmem:[%s2107_s13 + $0x148] sm:$0xf0]  ;;  %v349_v15 = vld [vmem:[%s2203_s30 + $0x20] sm:$0xff] }
  0x7c   : > { %922 = vmatmul.bf16.gmra.mxu0 %v1593_v28  ;;  %1051 = vmatmul.bf16.gmra.mxu3 %v1693_v29  ;;  %v1697_v28 = vor.u32 %v1861_v19, %v1696_v18  ;;  %v2336_v29 = vld [vmem:[%s2666_s2] ss:$0 sm:$0xff] }
  0x7d   : > { %1011 = vmatmul.bf16.gmra.mxu1 %v1597_v30 }
  0x7e   : > { %1100 = vmatmul.bf16.gmra.mxu2 %v1601_v31 }
  0x8c   : > { %927 = vmatmul.bf16.gmra.mxu0 %v1605_v40  ;;  %1056 = vmatmul.bf16.gmra.mxu3 %v1705_v41 }
  0x8d   : > { %1016 = vmatmul.bf16.gmra.mxu1 %v1609_v42  ;;  %v347_v42 = vld [vmem:[%s2203_s30 + $0x10] sm:$0xff] }
  0x8e   : > { %1105 = vmatmul.bf16.gmra.mxu2 %v1613_v43 }
  0x9c   : > { %932 = vmatmul.bf16.gmra.mxu0 %v1617_v53  ;;  %1061 = vmatmul.bf16.gmra.mxu3 %v1717_v54  ;;  %v1708_v54 = vld [vmem:[%s2107_s13 + $0x158] sm:$0xf] }
  0x9d   : > { %1021 = vmatmul.bf16.gmra.mxu1 %v1621_v55  ;;  %v1864_v55 = vld [vmem:[%s2107_s13 + $0x160] sm:$0xf0] }
  0x9e   : > { %1110 = vmatmul.bf16.gmra.mxu2 %v1625_v56  ;;  %v1654_v56 = vld [vmem:[%s2107_s13 + $0xfc] sm:$0xf0] }
  0xa9   : > { %v898_v3 = vpop.f32.mrf.mxu0 }
  0xaa   : > { %v987_v6 = vpop.f32.mrf.mxu1 }
  0xab   : > { %v988_v7 = vadd.f32 %v987_v6, %v898_v3  ;;  %v1661_v6 = vor.u32 %v1852_v58, %v1660_v57 }
  0xac   : > { %937 = vmatmul.bf16.gmra.mxu0 %v1629_v1  ;;  %1135 = vmatmul.bf16.vlgmr.msra.gmra.mxu3 %v1685_v2  ;;  %v1709_v1 = vor.u32 %v1864_v55, %v1708_v54  ;;  %v351_v55 = vld [vmem:[%s2203_s30 + $0x30] sm:$0xff] }
  0xad   : > { %1026 = vmatmul.bf16.gmra.mxu1 %v1633_v4 }
  0xae   : > { %1115 = vmatmul.bf16.gmra.mxu2 %v1637_v5  ;;  %v1657_v5 = vor.u32 %v1850_v52, %v1654_v56 }
  0xaf   : > { %v2317_v8 = vpop.f32.mrf.mxu3 }
  0xb1   : > { %v1076_v10 = vpop.f32.mrf.mxu2  ;;  %v900_v12 = vpop.f32.mrf.mxu0 }
  0xb2   : > { %v1077_v11 = vadd.f32 %v1076_v10, %v988_v7  ;;  %v989_v13 = vpop.f32.mrf.mxu1 }
  0xb3   : > { %v990_v24 = vadd.f32 %v989_v13, %v900_v12 }
  0xb4   : > { %v1156_v14 = vadd.f32 %v1077_v11, %v345_v9 }
  0xb6   : > { %1189 = vst.msk [vmem:[%s2203_s30] sm:$0xff] %vm312_vm0, %v1156_v14 }
  0xb7   : > { %v2330_v25 = vpop.f32.mrf.mxu3 }
  0xb9   : > { %v1078_v26 = vpop.f32.mrf.mxu2  ;;  %v903_v31 = vpop.f32.mrf.mxu0 }
  0xba   : > { %v1079_v30 = vadd.f32 %v1078_v26, %v990_v24  ;;  %v992_v34 = vpop.f32.mrf.mxu1  ;;  %v1853_v26 = vld [vmem:[%s2107_s13 + $0x10c] sm:$0xf] }
  0xbb   : > { %v993_v39 = vadd.f32 %v992_v34, %v903_v31  ;;  %v1666_v31 = vld [vmem:[%s2107_s13 + $0x114] sm:$0xf0] }
  0xbc   : > { %v1157_v36 = vadd.f32 %v1079_v30, %v346_v23  ;;  %942 = vmatmul.bf16.gmra.mxu0 %v1641_v27  ;;  %1140 = vmatmul.bf16.gmra.mxu3 %v1697_v28  ;;  %v1854_v23 = vld [vmem:[%s2107_s13 + $0x110] sm:$0xf0]  ;;  %v1720_v28 = vld [vmem:[%s2107_s13 + $0x170] sm:$0xf]  ;;  %v1867_v30 = vld [vmem:[%s2107_s13 + $0x178] sm:$0xf0] }
  0xbd   : > { %v1224_v37 = vld [vmem:[%s2203_s30] sm:$0xff]  ;;  %1031 = vmatmul.bf16.gmra.mxu1 %v1645_v32  ;;  %v1672_v32 = vld [vmem:[%s2107_s13 + $0x110] sm:$0xf] }
  0xbe   : > { %v1260_v38 = vmul.f32 %v2336_v29, %v1224_v37  ;;  %1190 = vst.msk [vmem:[%s2203_s30 + $0x8] sm:$0xff] %vm312_vm0, %v1157_v36  ;;  %1120 = vmatmul.bf16.gmra.mxu2 %v1649_v33  ;;  %v1855_v33 = vld [vmem:[%s2107_s13 + $0x118] sm:$0xf0] }
  0xbf   : > { %v2348_v41 = vpop.f32.mrf.mxu3 }
  0xc0   : > { %v1296_v40 = vadd.f32 %v2341_v35, %v1260_v38  ;;  %v350_v38 = vld [vmem:[%s2203_s30 + $0x28] sm:$0xff] }
  0xc1   : > { %v1081_v43 = vpop.f32.mrf.mxu2  ;;  %v905_v46 = vpop.f32.mrf.mxu0 }
  0xc2   : > { %v1328_v44 = vmax.f32 %v1296_v40, 0.0  ;;  %v1082_v45 = vadd.f32 %v1081_v43, %v993_v39  ;;  %v994_v47 = vpop.f32.mrf.mxu1  ;;  %v1665_v40 = vor.u32 %v1854_v23, %v1664_v22 }
  0xc3   : > { %v995_v60 = vadd.f32 %v994_v47, %v905_v46  ;;  %v1669_v46 = vor.u32 %v1853_v26, %v1666_v31  ;;  %v1673_v47 = vor.u32 %v1855_v33, %v1672_v32  ;;  %v354_v32 = vld [vmem:[%s2203_s30 + $0x48] sm:$0xff] }
  0xc4   : > { %1360 = vst.msk [vmem:[%s2203_s30] sm:$0xff] %vm312_vm0, %v1328_v44  ;;  %v1158_v48 = vadd.f32 %v1082_v45, %v347_v42  ;;  %v1721_v42 = vor.u32 %v1867_v30, %v1720_v28 }
  0xc5   : > { %v1225_v50 = vld [vmem:[%s2203_s30 + $0x8] sm:$0xff] }
  0xc6   : > { %v1261_v53 = vmul.f32 %v2336_v29, %v1225_v50  ;;  %1191 = vst.msk [vmem:[%s2203_s30 + $0x10] sm:$0xff] %vm312_vm0, %v1158_v48 }
  0xc7   : > { %v2366_v61 = vpop.f32.mrf.mxu3 }
  0xc8   : > { %v1297_v59 = vadd.f32 %v2341_v35, %v1261_v53 }
  0xc9   : > { %v1083_v63 = vpop.f32.mrf.mxu2  ;;  %v908_v4 = vpop.f32.mrf.mxu0 }
  0xca   : > { %v1329_v2 = vmax.f32 %v1297_v59, 0.0  ;;  %v1084_v3 = vadd.f32 %v1083_v63, %v995_v60  ;;  %v997_v7 = vpop.f32.mrf.mxu1 }
  0xcb   : > { %v998_v12 = vadd.f32 %v997_v7, %v908_v4  ;;  %v352_v4 = vld [vmem:[%s2203_s30 + $0x38] sm:$0xff] }
  0xcc   : > { %1361 = vst.msk [vmem:[%s2203_s30 + $0x8] sm:$0xff] %vm312_vm0, %v1329_v2  ;;  %v1159_v9 = vadd.f32 %v1084_v3, %v348_v62  ;;  %947 = vmatmul.bf16.gmra.mxu0 %v1653_v0  ;;  %1145 = vmatmul.bf16.gmra.mxu3 %v1709_v1 }
  0xcd   : > { %v1226_v10 = vld [vmem:[%s2203_s30 + $0x10] sm:$0xff]  ;;  %1036 = vmatmul.bf16.gmra.mxu1 %v1657_v5 }
  0xce   : > { %v1262_v11 = vmul.f32 %v2336_v29, %v1226_v10  ;;  %1192 = vst.msk [vmem:[%s2203_s30 + $0x18] sm:$0xff] %vm312_vm0, %v1159_v9  ;;  %1125 = vmatmul.bf16.gmra.mxu2 %v1661_v6 }
  0xcf   : > { %v2376_v14 = vpop.f32.mrf.mxu3 }
  0xd0   : > { %v1298_v13 = vadd.f32 %v2341_v35, %v1262_v11 }
  0xd1   : > { %v1086_v16 = vpop.f32.mrf.mxu2  ;;  %v910_v19 = vpop.f32.mrf.mxu0 }
  0xd2   : > { %v1330_v17 = vmax.f32 %v1298_v13, 0.0  ;;  %v1087_v18 = vadd.f32 %v1086_v16, %v998_v12  ;;  %v999_v20 = vpop.f32.mrf.mxu1 }
  0xd3   : > { %v1000_v36 = vadd.f32 %v999_v20, %v910_v19 }
  0xd4   : > { %1362 = vst.msk [vmem:[%s2203_s30 + $0x10] sm:$0xff] %vm312_vm0, %v1330_v17  ;;  %v1160_v21 = vadd.f32 %v1087_v18, %v349_v15  ;;  %v353_v18 = vld [vmem:[%s2203_s30 + $0x40] sm:$0xff] }
  0xd5   : > { %v1227_v24 = vld [vmem:[%s2203_s30 + $0x18] sm:$0xff] }
  0xd6   : > { %v1263_v27 = vmul.f32 %v2336_v29, %v1227_v24  ;;  %1193 = vst.msk [vmem:[%s2203_s30 + $0x20] sm:$0xff] %vm312_vm0, %v1160_v21 }
  0xd7   : > { %v2394_v37 = vpop.f32.mrf.mxu3 }
  0xd8   : > { %v1299_v34 = vadd.f32 %v2341_v35, %v1263_v27 }
  0xd9   : > { %v1088_v39 = vpop.f32.mrf.mxu2  ;;  %v913_v45 = vpop.f32.mrf.mxu0 }
  0xda   : > { %v1331_v43 = vmax.f32 %v1299_v34, 0.0  ;;  %v1089_v44 = vadd.f32 %v1088_v39, %v1000_v36  ;;  %v1002_v48 = vpop.f32.mrf.mxu1 }
  0xdb   : > { %v1003_v52 = vadd.f32 %v1002_v48, %v913_v45 }
  0xdc   : > { %1363 = vst.msk [vmem:[%s2203_s30 + $0x18] sm:$0xff] %vm312_vm0, %v1331_v43  ;;  %v1161_v49 = vadd.f32 %v1089_v44, %v350_v38  ;;  %952 = vmatmul.bf16.gmra.mxu0 %v1665_v40  ;;  %1150 = vmatmul.bf16.gmra.mxu3 %v1721_v42 }
  0xdd   : > { %v1228_v50 = vld [vmem:[%s2203_s30 + $0x20] sm:$0xff]  ;;  %1041 = vmatmul.bf16.gmra.mxu1 %v1669_v46 }
  0xde   : > { %v1264_v51 = vmul.f32 %v2336_v29, %v1228_v50  ;;  %1194 = vst.msk [vmem:[%s2203_s30 + $0x28] sm:$0xff] %vm312_vm0, %v1161_v49  ;;  %1130 = vmatmul.bf16.gmra.mxu2 %v1673_v47  ;;  %v355_v47 = vld [vmem:[%s2203_s30 + $0x50] sm:$0xff] }
  0xdf   : > { %v2404_v54 = vpop.f32.mrf.mxu3 }
  0xe0   : > { %v1300_v53 = vadd.f32 %v2341_v35, %v1264_v51 }
  0xe1   : > { %v1091_v56 = vpop.f32.mrf.mxu2  ;;  %v915_v59 = vpop.f32.mrf.mxu0 }
  0xe2   : > { %v1332_v57 = vmax.f32 %v1300_v53, 0.0  ;;  %v1092_v58 = vadd.f32 %v1091_v56, %v1003_v52  ;;  %v1004_v60 = vpop.f32.mrf.mxu1 }
  0xe3   : > { %v1005_v2 = vadd.f32 %v1004_v60, %v915_v59  ;;  %v356_v60 = vld [vmem:[%s2203_s30 + $0x58] sm:$0xff] }
  0xe4   : > { %1364 = vst.msk [vmem:[%s2203_s30 + $0x20] sm:$0xff] %vm312_vm0, %v1332_v57  ;;  %v1162_v62 = vadd.f32 %v1092_v58, %v351_v55 }
  0xe5   : > { %v1229_v63 = vld [vmem:[%s2203_s30 + $0x28] sm:$0xff] }
  0xe6   : > { %v1265_v0 = vmul.f32 %v2336_v29, %v1229_v63  ;;  %1195 = vst.msk [vmem:[%s2203_s30 + $0x30] sm:$0xff] %vm312_vm0, %v1162_v62 }
  0xe7   : > { %v2414_v3 = vpop.f32.mrf.mxu3 }
  0xe8   : > { %v1301_v1 = vadd.f32 %v2341_v35, %v1265_v0 }
  0xe9   : > { %v1093_v5 = vpop.f32.mrf.mxu2  ;;  %v918_v9 = vpop.f32.mrf.mxu0 }
  0xea   : > { %v1333_v6 = vmax.f32 %v1301_v1, 0.0  ;;  %v1094_v7 = vadd.f32 %v1093_v5, %v1005_v2  ;;  %v1007_v10 = vpop.f32.mrf.mxu1 }
  0xeb   : > { %v1008_v15 = vadd.f32 %v1007_v10, %v918_v9 }
  0xec   : > { %1365 = vst.msk [vmem:[%s2203_s30 + $0x28] sm:$0xff] %vm312_vm0, %v1333_v6  ;;  %v1163_v11 = vadd.f32 %v1094_v7, %v352_v4 }
  0xed   : > { %v1230_v12 = vld [vmem:[%s2203_s30 + $0x30] sm:$0xff] }
  0xee   : > { %v1266_v13 = vmul.f32 %v2336_v29, %v1230_v12  ;;  %1196 = vst.msk [vmem:[%s2203_s30 + $0x38] sm:$0xff] %vm312_vm0, %v1163_v11  ;;  %v357_v11 = vld [vmem:[%s2203_s30 + $0x60] sm:$0xff] }
  0xef   : > { %v2424_v17 = vpop.f32.mrf.mxu3 }
  0xf0   : > { %v1302_v16 = vadd.f32 %v2341_v35, %v1266_v13 }
  0xf1   : > { %v1096_v19 = vpop.f32.mrf.mxu2  ;;  %v920_v22 = vpop.f32.mrf.mxu0 }
  0xf2   : > { %v1334_v20 = vmax.f32 %v1302_v16, 0.0  ;;  %v1097_v21 = vadd.f32 %v1096_v19, %v1008_v15  ;;  %v1009_v24 = vpop.f32.mrf.mxu1 }
  0xf3   : > { %v1010_v30 = vadd.f32 %v1009_v24, %v920_v22 }
  0xf4   : > { %1366 = vst.msk [vmem:[%s2203_s30 + $0x30] sm:$0xff] %vm312_vm0, %v1334_v20  ;;  %v1164_v23 = vadd.f32 %v1097_v21, %v353_v18 }
  0xf5   : > { %v1231_v26 = vld [vmem:[%s2203_s30 + $0x38] sm:$0xff] }
  0xf6   : > { %v1267_v27 = vmul.f32 %v2336_v29, %v1231_v26  ;;  %1197 = vst.msk [vmem:[%s2203_s30 + $0x40] sm:$0xff] %vm312_vm0, %v1164_v23  ;;  %v358_v26 = vld [vmem:[%s2203_s30 + $0x68] sm:$0xff] }
  0xf7   : > { %v2434_v31 = vpop.f32.mrf.mxu3 }
  0xf8   : > { %v1303_v28 = vadd.f32 %v2341_v35, %v1267_v27 }
  0xf9   : > { %v1098_v33 = vpop.f32.mrf.mxu2  ;;  %v923_v38 = vpop.f32.mrf.mxu0 }
  0xfa   : > { %v1335_v34 = vmax.f32 %v1303_v28, 0.0  ;;  %v1099_v36 = vadd.f32 %v1098_v33, %v1010_v30  ;;  %v1012_v39 = vpop.f32.mrf.mxu1 }
  0xfb   : > { %v1013_v44 = vadd.f32 %v1012_v39, %v923_v38 }
  0xfc   : > { %1367 = vst.msk [vmem:[%s2203_s30 + $0x38] sm:$0xff] %vm312_vm0, %v1335_v34  ;;  %v1165_v40 = vadd.f32 %v1099_v36, %v354_v32 }
  0xfd   : > { %v1232_v42 = vld [vmem:[%s2203_s30 + $0x40] sm:$0xff] }
  0xfe   : > { %v1268_v43 = vmul.f32 %v2336_v29, %v1232_v42  ;;  %1198 = vst.msk [vmem:[%s2203_s30 + $0x48] sm:$0xff] %vm312_vm0, %v1165_v40 }
  0xff   : > { %v2444_v46 = vpop.f32.mrf.mxu3 }
 0x100   : > { %v1304_v45 = vadd.f32 %v2341_v35, %v1268_v43  ;;  %v359_v43 = vld [vmem:[%s2203_s30 + $0x70] sm:$0xff] }
 0x101   : > { %v1101_v48 = vpop.f32.mrf.mxu2  ;;  %v925_v51 = vpop.f32.mrf.mxu0 }
 0x102   : > { %v1336_v49 = vmax.f32 %v1304_v45, 0.0  ;;  %v1102_v50 = vadd.f32 %v1101_v48, %v1013_v44  ;;  %v1014_v52 = vpop.f32.mrf.mxu1 }
 0x103   : > { %v1015_v58 = vadd.f32 %v1014_v52, %v925_v51 }
 0x104   : > { %1368 = vst.msk [vmem:[%s2203_s30 + $0x40] sm:$0xff] %vm312_vm0, %v1336_v49  ;;  %v1166_v53 = vadd.f32 %v1102_v50, %v355_v47 }
 0x105   : > { %v1233_v55 = vld [vmem:[%s2203_s30 + $0x48] sm:$0xff] }
 0x106   : > { %v1269_v56 = vmul.f32 %v2336_v29, %v1233_v55  ;;  %1199 = vst.msk [vmem:[%s2203_s30 + $0x50] sm:$0xff] %vm312_vm0, %v1166_v53 }
 0x107   : > { %v2454_v59 = vpop.f32.mrf.mxu3 }
 0x108   : > { %v1305_v57 = vadd.f32 %v2341_v35, %v1269_v56 }
 0x109   : > { %v1103_v62 = vpop.f32.mrf.mxu2  ;;  %v928_v1 = vpop.f32.mrf.mxu0 }
 0x10a   : > { %v1337_v63 = vmax.f32 %v1305_v57, 0.0  ;;  %v1104_v0 = vadd.f32 %v1103_v62, %v1015_v58  ;;  %v1017_v2 = vpop.f32.mrf.mxu1  ;;  %v360_v57 = vld [vmem:[%s2203_s30 + $0x78] sm:$0xff] }
 0x10b   : > { %v1018_v7 = vadd.f32 %v1017_v2, %v928_v1 }
 0x10c   : > { %1369 = vst.msk [vmem:[%s2203_s30 + $0x48] sm:$0xff] %vm312_vm0, %v1337_v63  ;;  %v1167_v4 = vadd.f32 %v1104_v0, %v356_v60 }
 0x10d   : > { %v1234_v5 = vld [vmem:[%s2203_s30 + $0x50] sm:$0xff] }
 0x10e   : > { %v1270_v6 = vmul.f32 %v2336_v29, %v1234_v5  ;;  %1200 = vst.msk [vmem:[%s2203_s30 + $0x58] sm:$0xff] %vm312_vm0, %v1167_v4 }
 0x10f   : > { %v2464_v10 = vpop.f32.mrf.mxu3 }
 0x110   : > { %v1306_v9 = vadd.f32 %v2341_v35, %v1270_v6  ;;  %v1048_v6 = vadd.f32 %v2424_v17, %v2317_v8  ;;  %v1050_v17 = vadd.f32 %v2434_v31, %v2330_v25 }
 0x111   : > { %v1106_v12 = vpop.f32.mrf.mxu2  ;;  %v930_v16 = vpop.f32.mrf.mxu0 }
 0x112   : > { %v1338_v13 = vmax.f32 %v1306_v9, 0.0  ;;  %v1107_v15 = vadd.f32 %v1106_v12, %v1018_v7  ;;  %v1019_v18 = vpop.f32.mrf.mxu1  ;;  %v369_v9 = vld [vmem:[%s2203_s30 + $0xc0] sm:$0xff] }
 0x113   : > { %v1020_v24 = vadd.f32 %v1019_v18, %v930_v16  ;;  %v361_v12 = vld [vmem:[%s2203_s30 + $0x80] sm:$0xff] }
 0x114   : > { %1370 = vst.msk [vmem:[%s2203_s30 + $0x50] sm:$0xff] %vm312_vm0, %v1338_v13  ;;  %v1168_v19 = vadd.f32 %v1107_v15, %v357_v11 }
 0x115   : > { %v1235_v20 = vld [vmem:[%s2203_s30 + $0x58] sm:$0xff] }
 0x116   : > { %v1271_v21 = vmul.f32 %v2336_v29, %v1235_v20  ;;  %1201 = vst.msk [vmem:[%s2203_s30 + $0x60] sm:$0xff] %vm312_vm0, %v1168_v19 }
 0x117   : > { %v2474_v23 = vpop.f32.mrf.mxu3 }
 0x118   : > { %v1307_v22 = vadd.f32 %v2341_v35, %v1271_v21 }
 0x119   : > { %v1108_v27 = vpop.f32.mrf.mxu2  ;;  %v933_v32 = vpop.f32.mrf.mxu0 }
 0x11a   : > { %v1339_v28 = vmax.f32 %v1307_v22, 0.0  ;;  %v1109_v30 = vadd.f32 %v1108_v27, %v1020_v24  ;;  %v1022_v33 = vpop.f32.mrf.mxu1 }
 0x11b   : > { %v1023_v39 = vadd.f32 %v1022_v33, %v933_v32  ;;  %v362_v32 = vld [vmem:[%s2203_s30 + $0x88] sm:$0xff] }
 0x11c   : > { %1371 = vst.msk [vmem:[%s2203_s30 + $0x58] sm:$0xff] %vm312_vm0, %v1339_v28  ;;  %v1169_v34 = vadd.f32 %v1109_v30, %v358_v26  ;;  %v370_v28 = vld [vmem:[%s2203_s30 + $0xc8] sm:$0xff] }
 0x11d   : > { %v1236_v36 = vld [vmem:[%s2203_s30 + $0x60] sm:$0xff] }
 0x11e   : > { %v1272_v38 = vmul.f32 %v2336_v29, %v1236_v36  ;;  %1202 = vst.msk [vmem:[%s2203_s30 + $0x68] sm:$0xff] %vm312_vm0, %v1169_v34 }
 0x11f   : > { %v2484_v42 = vpop.f32.mrf.mxu3 }
 0x120   : > { %v1308_v40 = vadd.f32 %v2341_v35, %v1272_v38 }
 0x121   : > { %v1111_v44 = vpop.f32.mrf.mxu2  ;;  %v935_v48 = vpop.f32.mrf.mxu0 }
 0x122   : > { %v1340_v45 = vmax.f32 %v1308_v40, 0.0  ;;  %v1112_v47 = vadd.f32 %v1111_v44, %v1023_v39  ;;  %v1024_v49 = vpop.f32.mrf.mxu1 }
 0x123   : > { %v1025_v55 = vadd.f32 %v1024_v49, %v935_v48  ;;  %v1053_v49 = vadd.f32 %v2444_v46, %v2348_v41 }
 0x124   : > { %1372 = vst.msk [vmem:[%s2203_s30 + $0x60] sm:$0xff] %vm312_vm0, %v1340_v45  ;;  %v1170_v50 = vadd.f32 %v1112_v47, %v359_v43 }
 0x125   : > { %v1237_v51 = vld [vmem:[%s2203_s30 + $0x68] sm:$0xff] }
 0x126   : > { %v1273_v52 = vmul.f32 %v2336_v29, %v1237_v51  ;;  %1203 = vst.msk [vmem:[%s2203_s30 + $0x70] sm:$0xff] %vm312_vm0, %v1170_v50 }
 0x127   : > { %v2494_v56 = vpop.f32.mrf.mxu3 }
 0x128   : > { %v1309_v53 = vadd.f32 %v2341_v35, %v1273_v52  ;;  %v371_v52 = vld [vmem:[%s2203_s30 + $0xd0] sm:$0xff] }
 0x129   : > { %v1113_v58 = vpop.f32.mrf.mxu2  ;;  %v938_v63 = vpop.f32.mrf.mxu0 }
 0x12a   : > { %v1341_v60 = vmax.f32 %v1309_v53, 0.0  ;;  %v1114_v62 = vadd.f32 %v1113_v58, %v1025_v55  ;;  %v1027_v0 = vpop.f32.mrf.mxu1 }
 0x12b   : > { %v1028_v5 = vadd.f32 %v1027_v0, %v938_v63 }
 0x12c   : > { %1373 = vst.msk [vmem:[%s2203_s30 + $0x68] sm:$0xff] %vm312_vm0, %v1341_v60  ;;  %v1171_v1 = vadd.f32 %v1114_v62, %v360_v57  ;;  %v363_v57 = vld [vmem:[%s2203_s30 + $0x90] sm:$0xff] }
 0x12d   : > { %v1238_v2 = vld [vmem:[%s2203_s30 + $0x70] sm:$0xff] }
 0x12e   : > { %v1274_v4 = vmul.f32 %v2336_v29, %v1238_v2  ;;  %1204 = vst.msk [vmem:[%s2203_s30 + $0x78] sm:$0xff] %vm312_vm0, %v1171_v1 }
 0x12f   : > { %v1136_v11 = vpop.f32.mrf.mxu3 }
 0x130   : > { %v1310_v7 = vadd.f32 %v2341_v35, %v1274_v4  ;;  %v1137_v15 = vadd.f32 %v1136_v11, %v1048_v6 }
 0x131   : > { %v1116_v13 = vpop.f32.mrf.mxu2  ;;  %v940_v19 = vpop.f32.mrf.mxu0 }
 0x132   : > { %v1342_v16 = vmax.f32 %v1310_v7, 0.0  ;;  %v1117_v18 = vadd.f32 %v1116_v13, %v1028_v5  ;;  %v1180_v20 = vadd.f32 %v1137_v15, %v369_v9  ;;  %v1029_v21 = vpop.f32.mrf.mxu1  ;;  %v1055_v7 = vadd.f32 %v2454_v59, %v2366_v61  ;;  %v372_v13 = vld [vmem:[%s2203_s30 + $0xd8] sm:$0xff] }
 0x133   : > { %v1030_v27 = vadd.f32 %v1029_v21, %v940_v19 }
 0x134   : > { %1374 = vst.msk [vmem:[%s2203_s30 + $0x70] sm:$0xff] %vm312_vm0, %v1342_v16  ;;  %v1172_v22 = vadd.f32 %v1117_v18, %v361_v12  ;;  %v364_v18 = vld [vmem:[%s2203_s30 + $0x98] sm:$0xff] }
 0x135   : > { %v1239_v24 = vld [vmem:[%s2203_s30 + $0x78] sm:$0xff]  ;;  %1213 = vst.msk [vmem:[%s2203_s30 + $0xc0] sm:$0xff] %vm312_vm0, %v1180_v20 }
 0x136   : > { %v1275_v8 = vmul.f32 %v2336_v29, %v1239_v24  ;;  %1205 = vst.msk [vmem:[%s2203_s30 + $0x80] sm:$0xff] %vm312_vm0, %v1172_v22 }
 0x137   : > { %v1138_v30 = vpop.f32.mrf.mxu3 }
 0x138   : > { %v1311_v26 = vadd.f32 %v2341_v35, %v1275_v8  ;;  %v1139_v34 = vadd.f32 %v1138_v30, %v1050_v17 }
 0x139   : > { %v1118_v33 = vpop.f32.mrf.mxu2  ;;  %v943_v39 = vpop.f32.mrf.mxu0 }
 0x13a   : > { %v1343_v36 = vmax.f32 %v1311_v26, 0.0  ;;  %v1119_v38 = vadd.f32 %v1118_v33, %v1030_v27  ;;  %v1181_v40 = vadd.f32 %v1139_v34, %v370_v28  ;;  %v1032_v43 = vpop.f32.mrf.mxu1 }
 0x13b   : > { %v1033_v48 = vadd.f32 %v1032_v43, %v943_v39 }
 0x13c   : > { %1375 = vst.msk [vmem:[%s2203_s30 + $0x78] sm:$0xff] %vm312_vm0, %v1343_v36  ;;  %v1248_v25 = vld [vmem:[%s2203_s30 + $0xc0] sm:$0xff]  ;;  %v1173_v31 = vadd.f32 %v1119_v38, %v362_v32  ;;  %v1058_v32 = vadd.f32 %v2464_v10, %v2376_v14 }
 0x13d   : > { %v1240_v44 = vld [vmem:[%s2203_s30 + $0x80] sm:$0xff]  ;;  %v1284_v45 = vmul.f32 %v2336_v29, %v1248_v25  ;;  %1214 = vst.msk [vmem:[%s2203_s30 + $0xc8] sm:$0xff] %vm312_vm0, %v1181_v40 }
 0x13e   : > { %v1276_v47 = vmul.f32 %v2336_v29, %v1240_v44  ;;  %1206 = vst.msk [vmem:[%s2203_s30 + $0x88] sm:$0xff] %vm312_vm0, %v1173_v31  ;;  %v373_v36 = vld [vmem:[%s2203_s30 + $0xe0] sm:$0xff] }
 0x13f   : > { %v1320_v50 = vadd.f32 %v2341_v35, %v1284_v45  ;;  %v1141_v53 = vpop.f32.mrf.mxu3  ;;  %v365_v40 = vld [vmem:[%s2203_s30 + $0xa0] sm:$0xff] }
 0x140   : > { %v1312_v51 = vadd.f32 %v2341_v35, %v1276_v47  ;;  %v1142_v60 = vadd.f32 %v1141_v53, %v1053_v49 }
 0x141   : > { %v1352_v55 = vmax.f32 %v1320_v50, 0.0  ;;  %v1121_v58 = vpop.f32.mrf.mxu2  ;;  %v945_v0 = vpop.f32.mrf.mxu0 }
 0x142   : > { %v1344_v62 = vmax.f32 %v1312_v51, 0.0  ;;  %v1122_v63 = vadd.f32 %v1121_v58, %v1033_v48  ;;  %v1182_v41 = vadd.f32 %v1142_v60, %v371_v52  ;;  %v1034_v46 = vpop.f32.mrf.mxu1  ;;  %v1060_v52 = vadd.f32 %v2474_v23, %v2394_v37  ;;  %v374_v58 = vld [vmem:[%s2203_s30 + $0xe8] sm:$0xff] }
 0x143   : > { %1384 = vst.msk [vmem:[%s2203_s30 + $0xc0] sm:$0xff] %vm312_vm0, %v1352_v55  ;;  %v1035_v12 = vadd.f32 %v1034_v46, %v945_v0 }
 0x144   : > { %1376 = vst.msk [vmem:[%s2203_s30 + $0x80] sm:$0xff] %vm312_vm0, %v1344_v62  ;;  %v1249_v1 = vld [vmem:[%s2203_s30 + $0xc8] sm:$0xff]  ;;  %v1174_v2 = vadd.f32 %v1122_v63, %v363_v57 }
 0x145   : > { %v1241_v4 = vld [vmem:[%s2203_s30 + $0x88] sm:$0xff]  ;;  %v1285_v5 = vmul.f32 %v2336_v29, %v1249_v1  ;;  %1215 = vst.msk [vmem:[%s2203_s30 + $0xd0] sm:$0xff] %vm312_vm0, %v1182_v41 }
 0x146   : > { %v1277_v6 = vmul.f32 %v2336_v29, %v1241_v4  ;;  %1207 = vst.msk [vmem:[%s2203_s30 + $0x90] sm:$0xff] %vm312_vm0, %v1174_v2  ;;  %v366_v63 = vld [vmem:[%s2203_s30 + $0xa8] sm:$0xff] }
 0x147   : > { %v1321_v9 = vadd.f32 %v2341_v35, %v1285_v5  ;;  %v1143_v15 = vpop.f32.mrf.mxu3 }
 0x148   : > { %v1313_v11 = vadd.f32 %v2341_v35, %v1277_v6  ;;  %v1144_v20 = vadd.f32 %v1143_v15, %v1055_v7 }
 0x149   : > { %v1353_v16 = vmax.f32 %v1321_v9, 0.0  ;;  %v1123_v19 = vpop.f32.mrf.mxu2  ;;  %v948_v24 = vpop.f32.mrf.mxu0 }
 0x14a   : > { %v1345_v21 = vmax.f32 %v1313_v11, 0.0  ;;  %v1124_v22 = vadd.f32 %v1123_v19, %v1035_v12  ;;  %v1183_v61 = vadd.f32 %v1144_v20, %v372_v13  ;;  %v1037_v59 = vpop.f32.mrf.mxu1  ;;  %v1063_v12 = vadd.f32 %v2484_v42, %v2404_v54  ;;  %v367_v20 = vld [vmem:[%s2203_s30 + $0xb0] sm:$0xff] }
 0x14b   : > { %1385 = vst.msk [vmem:[%s2203_s30 + $0xc8] sm:$0xff] %vm312_vm0, %v1353_v16  ;;  %v1038_v30 = vadd.f32 %v1037_v59, %v948_v24  ;;  %v375_v16 = vld [vmem:[%s2203_s30 + $0xf0] sm:$0xff] }
 0x14c   : > { %1377 = vst.msk [vmem:[%s2203_s30 + $0x88] sm:$0xff] %vm312_vm0, %v1345_v21  ;;  %v1250_v8 = vld [vmem:[%s2203_s30 + $0xd0] sm:$0xff]  ;;  %v1175_v17 = vadd.f32 %v1124_v22, %v364_v18 }
 0x14d   : > { %v1242_v26 = vld [vmem:[%s2203_s30 + $0x90] sm:$0xff]  ;;  %v1286_v27 = vmul.f32 %v2336_v29, %v1250_v8  ;;  %1216 = vst.msk [vmem:[%s2203_s30 + $0xd8] sm:$0xff] %vm312_vm0, %v1183_v61 }
 0x14e   : > { %v1278_v28 = vmul.f32 %v2336_v29, %v1242_v26  ;;  %1208 = vst.msk [vmem:[%s2203_s30 + $0x98] sm:$0xff] %vm312_vm0, %v1175_v17 }
 0x14f   : > { %v1322_v33 = vadd.f32 %v2341_v35, %v1286_v27  ;;  %v1146_v38 = vpop.f32.mrf.mxu3 }
 0x150   : > { %v1314_v34 = vadd.f32 %v2341_v35, %v1278_v28  ;;  %v1147_v25 = vadd.f32 %v1146_v38, %v1058_v32 }
 0x151   : > { %v1354_v39 = vmax.f32 %v1322_v33, 0.0  ;;  %v1126_v43 = vpop.f32.mrf.mxu2  ;;  %v950_v45 = vpop.f32.mrf.mxu0 }
 0x152   : > { %v1346_v31 = vmax.f32 %v1314_v34, 0.0  ;;  %v1127_v44 = vadd.f32 %v1126_v43, %v1038_v30  ;;  %v1184_v14 = vadd.f32 %v1147_v25, %v373_v36  ;;  %v1039_v10 = vpop.f32.mrf.mxu1  ;;  %v1065_v30 = vadd.f32 %v2494_v56, %v2414_v3  ;;  %v376_v36 = vld [vmem:[%s2203_s30 + $0xf8] sm:$0xff] }
 0x153   : > { %1386 = vst.msk [vmem:[%s2203_s30 + $0xd0] sm:$0xff] %vm312_vm0, %v1354_v39  ;;  %v1040_v57 = vadd.f32 %v1039_v10, %v950_v45 }
 0x154   : > { %1378 = vst.msk [vmem:[%s2203_s30 + $0x90] sm:$0xff] %vm312_vm0, %v1346_v31  ;;  %v1251_v47 = vld [vmem:[%s2203_s30 + $0xd8] sm:$0xff]  ;;  %v1176_v48 = vadd.f32 %v1127_v44, %v365_v40 }
 0x155   : > { %v1243_v49 = vld [vmem:[%s2203_s30 + $0x98] sm:$0xff]  ;;  %v1287_v50 = vmul.f32 %v2336_v29, %v1251_v47  ;;  %1217 = vst.msk [vmem:[%s2203_s30 + $0xe0] sm:$0xff] %vm312_vm0, %v1184_v14 }
 0x156   : > { %v1279_v51 = vmul.f32 %v2336_v29, %v1243_v49  ;;  %1209 = vst.msk [vmem:[%s2203_s30 + $0xa0] sm:$0xff] %vm312_vm0, %v1176_v48  ;;  %v368_v40 = vld [vmem:[%s2203_s30 + $0xb8] sm:$0xff] }
 0x157   : > { %v1323_v53 = vadd.f32 %v2341_v35, %v1287_v50  ;;  %v1148_v60 = vpop.f32.mrf.mxu3 }
 0x158   : > { %v1315_v55 = vadd.f32 %v2341_v35, %v1279_v51  ;;  %v1149_v41 = vadd.f32 %v1148_v60, %v1060_v52 }
 0x159   : > { %v1355_v62 = vmax.f32 %v1323_v53, 0.0  ;;  %v1128_v0 = vpop.f32.mrf.mxu2  ;;  %v953_v23 = vpop.f32.mrf.mxu0 }
 0x15a   : > { %v1347_v46 = vmax.f32 %v1315_v55, 0.0  ;;  %v1129_v1 = vadd.f32 %v1128_v0, %v1040_v57  ;;  %v1185_v37 = vadd.f32 %v1149_v41, %v374_v58  ;;  %v1042_v2 = vpop.f32.mrf.mxu1 }
 0x15b   : > { %1387 = vst.msk [vmem:[%s2203_s30 + $0xd8] sm:$0xff] %vm312_vm0, %v1355_v62  ;;  %v1043_v11 = vadd.f32 %v1042_v2, %v953_v23 }
 0x15c   : > { %1379 = vst.msk [vmem:[%s2203_s30 + $0x98] sm:$0xff] %vm312_vm0, %v1347_v46  ;;  %v1252_v4 = vld [vmem:[%s2203_s30 + $0xe0] sm:$0xff]  ;;  %v1177_v5 = vadd.f32 %v1129_v1, %v366_v63 }
 0x15d   : > { %v1244_v6 = vld [vmem:[%s2203_s30 + $0xa0] sm:$0xff]  ;;  %v1288_v7 = vmul.f32 %v2336_v29, %v1252_v4  ;;  %1218 = vst.msk [vmem:[%s2203_s30 + $0xe8] sm:$0xff] %vm312_vm0, %v1185_v37 }
 0x15e   : > { %v1280_v9 = vmul.f32 %v2336_v29, %v1244_v6  ;;  %1210 = vst.msk [vmem:[%s2203_s30 + $0xa8] sm:$0xff] %vm312_vm0, %v1177_v5 }
 0x15f   : > { %v1324_v13 = vadd.f32 %v2341_v35, %v1288_v7  ;;  %v1151_v18 = vpop.f32.mrf.mxu3 }
 0x160   : > { %v1316_v15 = vadd.f32 %v2341_v35, %v1280_v9  ;;  %v1152_v22 = vadd.f32 %v1151_v18, %v1063_v12 }
 0x161   : > { %v1356_v19 = vmax.f32 %v1324_v13, 0.0  ;;  %v1131_v21 = vpop.f32.mrf.mxu2  ;;  %v955_v26 = vpop.f32.mrf.mxu0 }
 0x162   : > { %v1348_v24 = vmax.f32 %v1316_v15, 0.0  ;;  %v1132_v61 = vadd.f32 %v1131_v21, %v1043_v11  ;;  %v1186_v59 = vadd.f32 %v1152_v22, %v375_v16  ;;  %v1044_v27 = vpop.f32.mrf.mxu1 }
 0x163   : > { %1388 = vst.msk [vmem:[%s2203_s30 + $0xe0] sm:$0xff] %vm312_vm0, %v1356_v19  ;;  %v1045_v34 = vadd.f32 %v1044_v27, %v955_v26 }
 0x164   : > { %1380 = vst.msk [vmem:[%s2203_s30 + $0xa0] sm:$0xff] %vm312_vm0, %v1348_v24  ;;  %v1253_v54 = vld [vmem:[%s2203_s30 + $0xe8] sm:$0xff]  ;;  %v1178_v42 = vadd.f32 %v1132_v61, %v367_v20 }
 0x165   : > { %v1245_v8 = vld [vmem:[%s2203_s30 + $0xa8] sm:$0xff]  ;;  %v1289_v17 = vmul.f32 %v2336_v29, %v1253_v54  ;;  %1219 = vst.msk [vmem:[%s2203_s30 + $0xf0] sm:$0xff] %vm312_vm0, %v1186_v59 }
 0x166   : > { %v1281_v28 = vmul.f32 %v2336_v29, %v1245_v8  ;;  %1211 = vst.msk [vmem:[%s2203_s30 + $0xb0] sm:$0xff] %vm312_vm0, %v1178_v42 }
 0x167   : > { %v1325_v32 = vadd.f32 %v2341_v35, %v1289_v17  ;;  %v1153_v38 = vpop.f32.mrf.mxu3 }
 0x168   : > { %v1317_v33 = vadd.f32 %v2341_v35, %v1281_v28  ;;  %v1154_v25 = vadd.f32 %v1153_v38, %v1065_v30 }
 0x169   : > { %v1357_v39 = vmax.f32 %v1325_v32, 0.0  ;;  %v1133_v43 = vpop.f32.mrf.mxu2 }
 0x16a   : > { %v1349_v31 = vmax.f32 %v1317_v33, 0.0  ;;  %v1134_v44 = vadd.f32 %v1133_v43, %v1045_v34  ;;  %v1187_v3 = vadd.f32 %v1154_v25, %v376_v36 }
 0x16b   : > { %1389 = vst.msk [vmem:[%s2203_s30 + $0xe8] sm:$0xff] %vm312_vm0, %v1357_v39 }
 0x16c   : > { %1381 = vst.msk [vmem:[%s2203_s30 + $0xa8] sm:$0xff] %vm312_vm0, %v1349_v31  ;;  %v1254_v56 = vld [vmem:[%s2203_s30 + $0xf0] sm:$0xff]  ;;  %v1179_v45 = vadd.f32 %v1134_v44, %v368_v40 }
 0x16d   : > { %v1246_v14 = vld [vmem:[%s2203_s30 + $0xb0] sm:$0xff]  ;;  %v1290_v10 = vmul.f32 %v2336_v29, %v1254_v56  ;;  %1220 = vst.msk [vmem:[%s2203_s30 + $0xf8] sm:$0xff] %vm312_vm0, %v1187_v3 }
 0x16e   : > { %v1282_v47 = vmul.f32 %v2336_v29, %v1246_v14  ;;  %1212 = vst.msk [vmem:[%s2203_s30 + $0xb8] sm:$0xff] %vm312_vm0, %v1179_v45 }
 0x16f   : > { %v1326_v48 = vadd.f32 %v2341_v35, %v1290_v10 }
 0x170   : > { %v1318_v49 = vadd.f32 %v2341_v35, %v1282_v47 }
 0x171   : > { %v1358_v50 = vmax.f32 %v1326_v48, 0.0 }
 0x172   : > { %v1350_v51 = vmax.f32 %v1318_v49, 0.0 }
 0x173   : > { %1390 = vst.msk [vmem:[%s2203_s30 + $0xf0] sm:$0xff] %vm312_vm0, %v1358_v50 }
 0x174   : > { %1382 = vst.msk [vmem:[%s2203_s30 + $0xb0] sm:$0xff] %vm312_vm0, %v1350_v51  ;;  %v1255_v52 = vld [vmem:[%s2203_s30 + $0xf8] sm:$0xff] }
 0x175   : > { %v1247_v53 = vld [vmem:[%s2203_s30 + $0xb8] sm:$0xff]  ;;  %v1291_v55 = vmul.f32 %v2336_v29, %v1255_v52 }
 0x176   : > { %v1283_v57 = vmul.f32 %v2336_v29, %v1247_v53 }
 0x177   : > { %v1327_v58 = vadd.f32 %v2341_v35, %v1291_v55 }
 0x178   : > { %v1319_v60 = vadd.f32 %v2341_v35, %v1283_v57 }
 0x179   : > { %v1359_v62 = vmax.f32 %v1327_v58, 0.0 }
 0x17a   : > { %v1351_v63 = vmax.f32 %v1319_v60, 0.0 }
 0x17b   : > { %1391 = vst.msk [vmem:[%s2203_s30 + $0xf8] sm:$0xff] %vm312_vm0, %v1359_v62 }
 0x17c   : > { %1383 = vst.msk [vmem:[%s2203_s30 + $0xb8] sm:$0xff] %vm312_vm0, %v1351_v63 }
 0x17d PF: > { %s14_s17 = sadd.s32 1, %s1966_s17   ;;  %s2669_s15 = smov %s1962_s16 }
 0x17e   : > { %p11_p5 = scmp.ge.s32.totalorder %s14_s17, 6   ;;  %s2670_s16 = smov %s2672_s18 }
 0x180   :  { %13 = sbr.rel (!%p11_p5) target bundleno = 2 (0x2), region = 83 }

// kernel: resnet10_forward.15
= control target key start
LH: loop header
LB: loop body
LE: loop exit
PB: predicated region body
PF: predicated region fallthrough
CT: control target
= control target key end

     0   :  { %vm440_vm0 = vcmask 523264   ;;  %s3126_s0 = inlined_call_operand.vmem [shape: f32[27,128,64], index: 0, kind: input, shape index: {}]   ;;  %s3127_s1 = inlined_call_operand.vmem [shape: f32[128,64], index: 1, kind: output, shape index: {}]  }
   0x1   :  { %v8_v0 = vld [vmem:[%s3126_s0] sm:$0xff]  ;;  %v9_v1 = vld [vmem:[%s3126_s0 + $0x8] sm:$0xff]  ;;  %v10_v3 = vld [vmem:[%s3126_s0 + $0x10] sm:$0xff] }
   0x2   :  { %v24_v2 = vld [vmem:[%s3126_s0 + $0x80] sm:$0xff]  ;;  %v25_v4 = vld [vmem:[%s3126_s0 + $0x88] sm:$0xff]  ;;  %v26_v5 = vld [vmem:[%s3126_s0 + $0x90] sm:$0xff]  ;;  %v441_v11 = vsel %vm440_vm0, %v8_v0, -inf  ;;  %v494_v13 = vsel %vm440_vm0, %v9_v1, -inf  ;;  %v547_v18 = vsel %vm440_vm0, %v10_v3, -inf }
   0x3   :  { %v40_v6 = vld [vmem:[%s3126_s0 + $0x100] sm:$0xff]  ;;  %v41_v7 = vld [vmem:[%s3126_s0 + $0x108] sm:$0xff]  ;;  %v11_v8 = vld [vmem:[%s3126_s0 + $0x18] sm:$0xff]  ;;  %v442_v12 = vsel %vm440_vm0, %v24_v2, -inf  ;;  %v495_v17 = vsel %vm440_vm0, %v25_v4, -inf  ;;  %v548_v19 = vsel %vm440_vm0, %v26_v5, -inf }
   0x4   :  { %v27_v9 = vld [vmem:[%s3126_s0 + $0x98] sm:$0xff]  ;;  %v42_v10 = vld [vmem:[%s3126_s0 + $0x110] sm:$0xff]  ;;  %v56_v14 = vld [vmem:[%s3126_s0 + $0x180] sm:$0xff]  ;;  %v443_v16 = vmax.f32 %v441_v11, %v442_v12  ;;  %v444_v22 = vsel %vm440_vm0, %v40_v6, -inf  ;;  %v496_v23 = vmax.f32 %v494_v13, %v495_v17  ;;  %v497_v24 = vsel %vm440_vm0, %v41_v7, -inf }
   0x5   :  { %v57_v15 = vld [vmem:[%s3126_s0 + $0x188] sm:$0xff]  ;;  %v43_v20 = vld [vmem:[%s3126_s0 + $0x118] sm:$0xff]  ;;  %v58_v21 = vld [vmem:[%s3126_s0 + $0x190] sm:$0xff]  ;;  %v549_v25 = vmax.f32 %v547_v18, %v548_v19  ;;  %v550_v29 = vsel %vm440_vm0, %v42_v10, -inf  ;;  %v600_v30 = vsel %vm440_vm0, %v11_v8, -inf  ;;  %v601_v31 = vsel %vm440_vm0, %v27_v9, -inf }
   0x6   :  { %v72_v26 = vld [vmem:[%s3126_s0 + $0x200] sm:$0xff]  ;;  %v73_v27 = vld [vmem:[%s3126_s0 + $0x208] sm:$0xff]  ;;  %v445_v28 = vmax.f32 %v443_v16, %v444_v22  ;;  %v59_v32 = vld [vmem:[%s3126_s0 + $0x198] sm:$0xff]  ;;  %v446_v34 = vsel %vm440_vm0, %v56_v14, -inf  ;;  %v498_v35 = vmax.f32 %v496_v23, %v497_v24  ;;  %v499_v36 = vsel %vm440_vm0, %v57_v15, -inf }
   0x7   :  { %v74_v33 = vld [vmem:[%s3126_s0 + $0x210] sm:$0xff]  ;;  %v551_v37 = vmax.f32 %v549_v25, %v550_v29  ;;  %v88_v38 = vld [vmem:[%s3126_s0 + $0x280] sm:$0xff]  ;;  %v89_v39 = vld [vmem:[%s3126_s0 + $0x288] sm:$0xff]  ;;  %v552_v41 = vsel %vm440_vm0, %v58_v21, -inf  ;;  %v602_v42 = vmax.f32 %v600_v30, %v601_v31  ;;  %v603_v43 = vsel %vm440_vm0, %v43_v20, -inf }
   0x8   :  { %v447_v40 = vmax.f32 %v445_v28, %v446_v34  ;;  %v75_v44 = vld [vmem:[%s3126_s0 + $0x218] sm:$0xff]  ;;  %v90_v45 = vld [vmem:[%s3126_s0 + $0x290] sm:$0xff]  ;;  %v448_v46 = vsel %vm440_vm0, %v72_v26, -inf  ;;  %v500_v47 = vmax.f32 %v498_v35, %v499_v36  ;;  %v501_v48 = vsel %vm440_vm0, %v73_v27, -inf  ;;  %v104_v50 = vld [vmem:[%s3126_s0 + $0x300] sm:$0xff] }
   0x9   :  { %v553_v49 = vmax.f32 %v551_v37, %v552_v41  ;;  %v105_v51 = vld [vmem:[%s3126_s0 + $0x308] sm:$0xff]  ;;  %v554_v53 = vsel %vm440_vm0, %v74_v33, -inf  ;;  %v604_v54 = vmax.f32 %v602_v42, %v603_v43  ;;  %v605_v55 = vsel %vm440_vm0, %v59_v32, -inf  ;;  %v91_v56 = vld [vmem:[%s3126_s0 + $0x298] sm:$0xff]  ;;  %v106_v57 = vld [vmem:[%s3126_s0 + $0x310] sm:$0xff] }
   0xa   :  { %v449_v52 = vmax.f32 %v447_v40, %v448_v46  ;;  %v450_v58 = vsel %vm440_vm0, %v88_v38, -inf  ;;  %v502_v59 = vmax.f32 %v500_v47, %v501_v48  ;;  %v503_v60 = vsel %vm440_vm0, %v89_v39, -inf  ;;  %v120_v62 = vld [vmem:[%s3126_s0 + $0x380] sm:$0xff]  ;;  %v121_v63 = vld [vmem:[%s3126_s0 + $0x388] sm:$0xff]  ;;  %v107_v4 = vld [vmem:[%s3126_s0 + $0x318] sm:$0xff] }
   0xb   :  { %v555_v61 = vmax.f32 %v553_v49, %v554_v53  ;;  %v556_v1 = vsel %vm440_vm0, %v90_v45, -inf  ;;  %v606_v2 = vmax.f32 %v604_v54, %v605_v55  ;;  %v607_v3 = vsel %vm440_vm0, %v75_v44, -inf  ;;  %v122_v5 = vld [vmem:[%s3126_s0 + $0x390] sm:$0xff]  ;;  %v136_v10 = vld [vmem:[%s3126_s0 + $0x400] sm:$0xff]  ;;  %v137_v11 = vld [vmem:[%s3126_s0 + $0x408] sm:$0xff] }
   0xc   :  { %v451_v0 = vmax.f32 %v449_v52, %v450_v58  ;;  %v452_v6 = vsel %vm440_vm0, %v104_v50, -inf  ;;  %v504_v7 = vmax.f32 %v502_v59, %v503_v60  ;;  %v505_v8 = vsel %vm440_vm0, %v105_v51, -inf  ;;  %v123_v16 = vld [vmem:[%s3126_s0 + $0x398] sm:$0xff]  ;;  %v138_v17 = vld [vmem:[%s3126_s0 + $0x410] sm:$0xff]  ;;  %v152_v22 = vld [vmem:[%s3126_s0 + $0x480] sm:$0xff] }
   0xd   :  { %v557_v9 = vmax.f32 %v555_v61, %v556_v1  ;;  %v558_v13 = vsel %vm440_vm0, %v106_v57, -inf  ;;  %v608_v14 = vmax.f32 %v606_v2, %v607_v3  ;;  %v609_v15 = vsel %vm440_vm0, %v91_v56, -inf  ;;  %v153_v23 = vld [vmem:[%s3126_s0 + $0x488] sm:$0xff]  ;;  %v139_v28 = vld [vmem:[%s3126_s0 + $0x418] sm:$0xff]  ;;  %v154_v29 = vld [vmem:[%s3126_s0 + $0x490] sm:$0xff] }
   0xe   :  { %v453_v12 = vmax.f32 %v451_v0, %v452_v6  ;;  %v454_v18 = vsel %vm440_vm0, %v120_v62, -inf  ;;  %v506_v19 = vmax.f32 %v504_v7, %v505_v8  ;;  %v507_v20 = vsel %vm440_vm0, %v121_v63, -inf  ;;  %v168_v34 = vld [vmem:[%s3126_s0 + $0x500] sm:$0xff]  ;;  %v169_v35 = vld [vmem:[%s3126_s0 + $0x508] sm:$0xff]  ;;  %v155_v40 = vld [vmem:[%s3126_s0 + $0x498] sm:$0xff] }
   0xf   :  { %v559_v21 = vmax.f32 %v557_v9, %v558_v13  ;;  %v560_v25 = vsel %vm440_vm0, %v122_v5, -inf  ;;  %v610_v26 = vmax.f32 %v608_v14, %v609_v15  ;;  %v611_v27 = vsel %vm440_vm0, %v107_v4, -inf  ;;  %v170_v41 = vld [vmem:[%s3126_s0 + $0x510] sm:$0xff]  ;;  %v184_v46 = vld [vmem:[%s3126_s0 + $0x580] sm:$0xff]  ;;  %v185_v47 = vld [vmem:[%s3126_s0 + $0x588] sm:$0xff] }
  0x10   :  { %v455_v24 = vmax.f32 %v453_v12, %v454_v18  ;;  %v456_v30 = vsel %vm440_vm0, %v136_v10, -inf  ;;  %v508_v31 = vmax.f32 %v506_v19, %v507_v20  ;;  %v509_v32 = vsel %vm440_vm0, %v137_v11, -inf  ;;  %v171_v52 = vld [vmem:[%s3126_s0 + $0x518] sm:$0xff]  ;;  %v186_v53 = vld [vmem:[%s3126_s0 + $0x590] sm:$0xff]  ;;  %v200_v58 = vld [vmem:[%s3126_s0 + $0x600] sm:$0xff] }
  0x11   :  { %v561_v33 = vmax.f32 %v559_v21, %v560_v25  ;;  %v562_v37 = vsel %vm440_vm0, %v138_v17, -inf  ;;  %v612_v38 = vmax.f32 %v610_v26, %v611_v27  ;;  %v613_v39 = vsel %vm440_vm0, %v123_v16, -inf  ;;  %v201_v59 = vld [vmem:[%s3126_s0 + $0x608] sm:$0xff]  ;;  %v187_v0 = vld [vmem:[%s3126_s0 + $0x598] sm:$0xff]  ;;  %v202_v1 = vld [vmem:[%s3126_s0 + $0x610] sm:$0xff] }
  0x12   :  { %v457_v36 = vmax.f32 %v455_v24, %v456_v30  ;;  %v458_v42 = vsel %vm440_vm0, %v152_v22, -inf  ;;  %v510_v43 = vmax.f32 %v508_v31, %v509_v32  ;;  %v511_v44 = vsel %vm440_vm0, %v153_v23, -inf  ;;  %v216_v6 = vld [vmem:[%s3126_s0 + $0x680] sm:$0xff]  ;;  %v217_v7 = vld [vmem:[%s3126_s0 + $0x688] sm:$0xff]  ;;  %v203_v12 = vld [vmem:[%s3126_s0 + $0x618] sm:$0xff] }
  0x13   :  { %v563_v45 = vmax.f32 %v561_v33, %v562_v37  ;;  %v564_v49 = vsel %vm440_vm0, %v154_v29, -inf  ;;  %v614_v50 = vmax.f32 %v612_v38, %v613_v39  ;;  %v615_v51 = vsel %vm440_vm0, %v139_v28, -inf  ;;  %v218_v13 = vld [vmem:[%s3126_s0 + $0x690] sm:$0xff]  ;;  %v232_v18 = vld [vmem:[%s3126_s0 + $0x700] sm:$0xff]  ;;  %v219_v23 = vld [vmem:[%s3126_s0 + $0x698] sm:$0xff] }
  0x14   :  { %v459_v48 = vmax.f32 %v457_v36, %v458_v42  ;;  %v460_v54 = vsel %vm440_vm0, %v168_v34, -inf  ;;  %v512_v55 = vmax.f32 %v510_v43, %v511_v44  ;;  %v513_v56 = vsel %vm440_vm0, %v169_v35, -inf  ;;  %v233_v24 = vld [vmem:[%s3126_s0 + $0x708] sm:$0xff]  ;;  %v234_v25 = vld [vmem:[%s3126_s0 + $0x710] sm:$0xff]  ;;  %v235_v33 = vld [vmem:[%s3126_s0 + $0x718] sm:$0xff] }
  0x15   :  { %v565_v57 = vmax.f32 %v563_v45, %v564_v49  ;;  %v566_v61 = vsel %vm440_vm0, %v170_v41, -inf  ;;  %v616_v62 = vmax.f32 %v614_v50, %v615_v51  ;;  %v617_v63 = vsel %vm440_vm0, %v155_v40, -inf  ;;  %v248_v42 = vld [vmem:[%s3126_s0 + $0x780] sm:$0xff]  ;;  %v249_v43 = vld [vmem:[%s3126_s0 + $0x788] sm:$0xff]  ;;  %v250_v44 = vld [vmem:[%s3126_s0 + $0x790] sm:$0xff] }
  0x16   :  { %v461_v60 = vmax.f32 %v459_v48, %v460_v54  ;;  %v462_v2 = vsel %vm440_vm0, %v184_v46, -inf  ;;  %v514_v3 = vmax.f32 %v512_v55, %v513_v56  ;;  %v515_v4 = vsel %vm440_vm0, %v185_v47, -inf  ;;  %v251_v47 = vld [vmem:[%s3126_s0 + $0x798] sm:$0xff]  ;;  %v12_v51 = vld [vmem:[%s3126_s0 + $0x20] sm:$0xff]  ;;  %v265_v56 = vld [vmem:[%s3126_s0 + $0x808] sm:$0xff] }
  0x17   :  { %v567_v5 = vmax.f32 %v565_v57, %v566_v61  ;;  %v568_v9 = vsel %vm440_vm0, %v186_v53, -inf  ;;  %v618_v10 = vmax.f32 %v616_v62, %v617_v63  ;;  %v619_v11 = vsel %vm440_vm0, %v171_v52, -inf  ;;  %v264_v55 = vld [vmem:[%s3126_s0 + $0x800] sm:$0xff]  ;;  %v266_v57 = vld [vmem:[%s3126_s0 + $0x810] sm:$0xff]  ;;  %v267_v62 = vld [vmem:[%s3126_s0 + $0x818] sm:$0xff] }
  0x18   :  { %v463_v8 = vmax.f32 %v461_v60, %v462_v2  ;;  %v464_v14 = vsel %vm440_vm0, %v200_v58, -inf  ;;  %v516_v15 = vmax.f32 %v514_v3, %v515_v4  ;;  %v517_v16 = vsel %vm440_vm0, %v201_v59, -inf  ;;  %v28_v60 = vld [vmem:[%s3126_s0 + $0xa0] sm:$0xff] }
  0x19   :  { %v569_v17 = vmax.f32 %v567_v5, %v568_v9  ;;  %v570_v20 = vsel %vm440_vm0, %v202_v1, -inf  ;;  %v620_v21 = vmax.f32 %v618_v10, %v619_v11  ;;  %v621_v22 = vsel %vm440_vm0, %v187_v0, -inf  ;;  %v44_v61 = vld [vmem:[%s3126_s0 + $0x120] sm:$0xff]  ;;  %v282_v9 = vld [vmem:[%s3126_s0 + $0x890] sm:$0xff] }
  0x1a   :  { %v465_v19 = vmax.f32 %v463_v8, %v464_v14  ;;  %v466_v26 = vsel %vm440_vm0, %v216_v6, -inf  ;;  %v518_v27 = vmax.f32 %v516_v15, %v517_v16  ;;  %v519_v28 = vsel %vm440_vm0, %v217_v7, -inf  ;;  %v60_v2 = vld [vmem:[%s3126_s0 + $0x1a0] sm:$0xff]  ;;  %v281_v8 = vld [vmem:[%s3126_s0 + $0x888] sm:$0xff]  ;;  %v283_v15 = vld [vmem:[%s3126_s0 + $0x898] sm:$0xff] }
  0x1b   :  { %v571_v29 = vmax.f32 %v569_v17, %v570_v20  ;;  %v572_v30 = vsel %vm440_vm0, %v218_v13, -inf  ;;  %v622_v31 = vmax.f32 %v620_v21, %v621_v22  ;;  %v623_v32 = vsel %vm440_vm0, %v203_v12, -inf  ;;  %v280_v7 = vld [vmem:[%s3126_s0 + $0x880] sm:$0xff] }
  0x1c   :  { %v467_v34 = vmax.f32 %v465_v19, %v466_v26  ;;  %v468_v35 = vsel %vm440_vm0, %v232_v18, -inf  ;;  %v520_v36 = vmax.f32 %v518_v27, %v519_v28  ;;  %v521_v38 = vsel %vm440_vm0, %v233_v24, -inf  ;;  %v76_v14 = vld [vmem:[%s3126_s0 + $0x220] sm:$0xff]  ;;  %v298_v26 = vld [vmem:[%s3126_s0 + $0x910] sm:$0xff] }
  0x1d   :  { %v573_v37 = vmax.f32 %v571_v29, %v572_v30  ;;  %v574_v39 = vsel %vm440_vm0, %v234_v25, -inf  ;;  %v624_v40 = vmax.f32 %v622_v31, %v623_v32  ;;  %v625_v41 = vsel %vm440_vm0, %v219_v23, -inf  ;;  %v296_v24 = vld [vmem:[%s3126_s0 + $0x900] sm:$0xff]  ;;  %v297_v25 = vld [vmem:[%s3126_s0 + $0x908] sm:$0xff]  ;;  %v299_v32 = vld [vmem:[%s3126_s0 + $0x918] sm:$0xff] }
  0x1e   :  { %v627_v46 = vsel %vm440_vm0, %v235_v33, -inf  ;;  %v469_v48 = vmax.f32 %v467_v34, %v468_v35  ;;  %v522_v49 = vmax.f32 %v520_v36, %v521_v38  ;;  %v470_v52 = vsel %vm440_vm0, %v248_v42, -inf  ;;  %v92_v29 = vld [vmem:[%s3126_s0 + $0x2a0] sm:$0xff]  ;;  %v313_v42 = vld [vmem:[%s3126_s0 + $0x988] sm:$0xff] }
  0x1f   :  { %v626_v45 = vmax.f32 %v624_v40, %v625_v41  ;;  %v575_v50 = vmax.f32 %v573_v37, %v574_v39  ;;  %v523_v53 = vsel %vm440_vm0, %v249_v43, -inf  ;;  %v576_v54 = vsel %vm440_vm0, %v250_v44, -inf  ;;  %v108_v37 = vld [vmem:[%s3126_s0 + $0x320] sm:$0xff]  ;;  %v314_v43 = vld [vmem:[%s3126_s0 + $0x990] sm:$0xff] }
  0x20   :  { %v629_v59 = vsel %vm440_vm0, %v251_v47, -inf  ;;  %v471_v63 = vmax.f32 %v469_v48, %v470_v52  ;;  %v524_v0 = vmax.f32 %v522_v49, %v523_v53  ;;  %v472_v3 = vsel %vm440_vm0, %v264_v55, -inf  ;;  %v312_v41 = vld [vmem:[%s3126_s0 + $0x980] sm:$0xff]  ;;  %v13_v47 = vld [vmem:[%s3126_s0 + $0x28] sm:$0xff]  ;;  %v315_v52 = vld [vmem:[%s3126_s0 + $0x998] sm:$0xff] }
  0x21   :  { %v628_v58 = vmax.f32 %v626_v45, %v627_v46  ;;  %v577_v1 = vmax.f32 %v575_v50, %v576_v54  ;;  %v525_v4 = vsel %vm440_vm0, %v265_v56, -inf  ;;  %v578_v5 = vsel %vm440_vm0, %v266_v57, -inf  ;;  %v29_v48 = vld [vmem:[%s3126_s0 + $0xa8] sm:$0xff]  ;;  %v124_v49 = vld [vmem:[%s3126_s0 + $0x3a0] sm:$0xff] }
  0x22   :  { %v653_v6 = vsel %vm440_vm0, %v12_v51, -inf  ;;  %v631_v11 = vsel %vm440_vm0, %v267_v62, -inf  ;;  %v654_v12 = vsel %vm440_vm0, %v28_v60, -inf  ;;  %v656_v13 = vsel %vm440_vm0, %v44_v61, -inf  ;;  %v140_v51 = vld [vmem:[%s3126_s0 + $0x420] sm:$0xff]  ;;  %v45_v57 = vld [vmem:[%s3126_s0 + $0x128] sm:$0xff] }
  0x23   :  { %v630_v10 = vmax.f32 %v628_v58, %v629_v59  ;;  %v473_v16 = vmax.f32 %v471_v63, %v472_v3  ;;  %v526_v17 = vmax.f32 %v524_v0, %v525_v4  ;;  %v579_v18 = vmax.f32 %v577_v1, %v578_v5  ;;  %v328_v62 = vld [vmem:[%s3126_s0 + $0xa00] sm:$0xff]  ;;  %v329_v63 = vld [vmem:[%s3126_s0 + $0xa08] sm:$0xff]  ;;  %v330_v0 = vld [vmem:[%s3126_s0 + $0xa10] sm:$0xff] }
  0x24   :  { %v655_v19 = vmax.f32 %v653_v6, %v654_v12  ;;  %v474_v20 = vsel %vm440_vm0, %v280_v7, -inf  ;;  %v527_v21 = vsel %vm440_vm0, %v281_v8, -inf  ;;  %v580_v22 = vsel %vm440_vm0, %v282_v9, -inf  ;;  %v61_v5 = vld [vmem:[%s3126_s0 + $0x1a8] sm:$0xff]  ;;  %v156_v6 = vld [vmem:[%s3126_s0 + $0x4a0] sm:$0xff]  ;;  %v331_v12 = vld [vmem:[%s3126_s0 + $0xa18] sm:$0xff] }
  0x25   :  { %v658_v23 = vsel %vm440_vm0, %v60_v2, -inf  ;;  %v632_v27 = vmax.f32 %v630_v10, %v631_v11  ;;  %v633_v30 = vsel %vm440_vm0, %v283_v15, -inf  ;;  %v660_v31 = vsel %vm440_vm0, %v76_v14, -inf  ;;  %v172_v11 = vld [vmem:[%s3126_s0 + $0x520] sm:$0xff] }
  0x26   :  { %v657_v28 = vmax.f32 %v655_v19, %v656_v13  ;;  %v475_v33 = vmax.f32 %v473_v16, %v474_v20  ;;  %v528_v34 = vmax.f32 %v526_v17, %v527_v21  ;;  %v581_v35 = vmax.f32 %v579_v18, %v580_v22  ;;  %v344_v17 = vld [vmem:[%s3126_s0 + $0xa80] sm:$0xff]  ;;  %v77_v22 = vld [vmem:[%s3126_s0 + $0x228] sm:$0xff] }
  0x27   :  { %v476_v38 = vsel %vm440_vm0, %v296_v24, -inf  ;;  %v529_v39 = vsel %vm440_vm0, %v297_v25, -inf  ;;  %v582_v40 = vsel %vm440_vm0, %v298_v26, -inf  ;;  %v634_v44 = vmax.f32 %v632_v27, %v633_v30  ;;  %v346_v24 = vld [vmem:[%s3126_s0 + $0xa90] sm:$0xff]  ;;  %v204_v30 = vld [vmem:[%s3126_s0 + $0x620] sm:$0xff] }
  0x28   :  { %v659_v36 = vmax.f32 %v657_v28, %v658_v23  ;;  %v662_v46 = vsel %vm440_vm0, %v92_v29, -inf  ;;  %v635_v50 = vsel %vm440_vm0, %v299_v32, -inf  ;;  %v477_v53 = vmax.f32 %v475_v33, %v476_v38  ;;  %v345_v23 = vld [vmem:[%s3126_s0 + $0xa88] sm:$0xff]  ;;  %v188_v29 = vld [vmem:[%s3126_s0 + $0x5a0] sm:$0xff] }
  0x29   :  { %v530_v54 = vmax.f32 %v528_v34, %v529_v39  ;;  %v583_v55 = vmax.f32 %v581_v35, %v582_v40  ;;  %v664_v56 = vsel %vm440_vm0, %v108_v37, -inf  ;;  %v478_v58 = vsel %vm440_vm0, %v312_v41, -inf  ;;  %v93_v28 = vld [vmem:[%s3126_s0 + $0x2a8] sm:$0xff]  ;;  %v220_v35 = vld [vmem:[%s3126_s0 + $0x6a0] sm:$0xff]  ;;  %v347_v37 = vld [vmem:[%s3126_s0 + $0xa98] sm:$0xff] }
  0x2a   :  { %v661_v45 = vmax.f32 %v659_v36, %v660_v31  ;;  %v531_v59 = vsel %vm440_vm0, %v313_v42, -inf  ;;  %v584_v60 = vsel %vm440_vm0, %v314_v43, -inf  ;;  %v636_v1 = vmax.f32 %v634_v44, %v635_v50  ;;  %v236_v36 = vld [vmem:[%s3126_s0 + $0x720] sm:$0xff] }
  0x2b   :  { %v666_v2 = vsel %vm440_vm0, %v124_v49, -inf  ;;  %v706_v3 = vsel %vm440_vm0, %v13_v47, -inf  ;;  %v707_v4 = vsel %vm440_vm0, %v29_v48, -inf  ;;  %v637_v7 = vsel %vm440_vm0, %v315_v52, -inf  ;;  %v361_v47 = vld [vmem:[%s3126_s0 + $0xb08] sm:$0xff]  ;;  %v362_v48 = vld [vmem:[%s3126_s0 + $0xb10] sm:$0xff] }
  0x2c   :  { %v663_v61 = vmax.f32 %v661_v45, %v662_v46  ;;  %v668_v9 = vsel %vm440_vm0, %v140_v51, -inf  ;;  %v708_v10 = vmax.f32 %v706_v3, %v707_v4  ;;  %v479_v13 = vmax.f32 %v477_v53, %v478_v58  ;;  %v360_v46 = vld [vmem:[%s3126_s0 + $0xb00] sm:$0xff] }
  0x2d   :  { %v532_v14 = vmax.f32 %v530_v54, %v531_v59  ;;  %v585_v15 = vmax.f32 %v583_v55, %v584_v60  ;;  %v709_v16 = vsel %vm440_vm0, %v45_v57, -inf  ;;  %v480_v18 = vsel %vm440_vm0, %v328_v62, -inf  ;;  %v252_v53 = vld [vmem:[%s3126_s0 + $0x7a0] sm:$0xff]  ;;  %v109_v59 = vld [vmem:[%s3126_s0 + $0x328] sm:$0xff] }
  0x2e   :  { %v665_v8 = vmax.f32 %v663_v61, %v664_v56  ;;  %v533_v19 = vsel %vm440_vm0, %v329_v63, -inf  ;;  %v586_v20 = vsel %vm440_vm0, %v330_v0, -inf  ;;  %v638_v25 = vmax.f32 %v636_v1, %v637_v7  ;;  %v268_v54 = vld [vmem:[%s3126_s0 + $0x820] sm:$0xff]  ;;  %v363_v61 = vld [vmem:[%s3126_s0 + $0xb18] sm:$0xff]  ;;  %v14_v7 = vld [vmem:[%s3126_s0 + $0x30] sm:$0xff] }
  0x2f   :  { %v670_v26 = vsel %vm440_vm0, %v156_v6, -inf  ;;  %v711_v27 = vsel %vm440_vm0, %v61_v5, -inf  ;;  %v639_v31 = vsel %vm440_vm0, %v331_v12, -inf  ;;  %v672_v33 = vsel %vm440_vm0, %v172_v11, -inf  ;;  %v284_v60 = vld [vmem:[%s3126_s0 + $0x8a0] sm:$0xff] }
  0x30   :  { %v667_v21 = vmax.f32 %v665_v8, %v666_v2  ;;  %v710_v34 = vmax.f32 %v708_v10, %v709_v16  ;;  %v481_v38 = vmax.f32 %v479_v13, %v480_v18  ;;  %v482_v39 = vsel %vm440_vm0, %v344_v17, -inf  ;;  %v125_v2 = vld [vmem:[%s3126_s0 + $0x3a8] sm:$0xff]  ;;  %v376_v8 = vld [vmem:[%s3126_s0 + $0xb80] sm:$0xff] }
  0x31   :  { %v534_v40 = vmax.f32 %v532_v14, %v533_v19  ;;  %v587_v41 = vmax.f32 %v585_v15, %v586_v20  ;;  %v535_v42 = vsel %vm440_vm0, %v345_v23, -inf  ;;  %v588_v43 = vsel %vm440_vm0, %v346_v24, -inf  ;;  %v300_v13 = vld [vmem:[%s3126_s0 + $0x920] sm:$0xff]  ;;  %v377_v14 = vld [vmem:[%s3126_s0 + $0xb88] sm:$0xff]  ;;  %v378_v15 = vld [vmem:[%s3126_s0 + $0xb90] sm:$0xff] }
  0x32   :  { %v669_v32 = vmax.f32 %v667_v21, %v668_v9  ;;  %v712_v45 = vmax.f32 %v710_v34, %v711_v27  ;;  %v640_v49 = vmax.f32 %v638_v25, %v639_v31  ;;  %v674_v50 = vsel %vm440_vm0, %v188_v29, -inf  ;;  %v30_v20 = vld [vmem:[%s3126_s0 + $0xb0] sm:$0xff]  ;;  %v141_v21 = vld [vmem:[%s3126_s0 + $0x428] sm:$0xff] }
  0x33   :  { %v676_v51 = vsel %vm440_vm0, %v204_v30, -inf  ;;  %v713_v52 = vsel %vm440_vm0, %v77_v22, -inf  ;;  %v641_v55 = vsel %vm440_vm0, %v347_v37, -inf  ;;  %v1768_v56 = vsel %vm440_vm0, %v220_v35, -inf  ;;  %v379_v22 = vld [vmem:[%s3126_s0 + $0xb98] sm:$0xff]  ;;  %v46_v31 = vld [vmem:[%s3126_s0 + $0x130] sm:$0xff] }
  0x34   :  { %v671_v44 = vmax.f32 %v669_v32, %v670_v26  ;;  %v680_v57 = vsel %vm440_vm0, %v236_v36, -inf  ;;  %v715_v58 = vsel %vm440_vm0, %v93_v28, -inf  ;;  %v483_v62 = vmax.f32 %v481_v38, %v482_v39  ;;  %v62_v36 = vld [vmem:[%s3126_s0 + $0x1b0] sm:$0xff]  ;;  %v157_v37 = vld [vmem:[%s3126_s0 + $0x4a8] sm:$0xff] }
  0x35   :  { %v536_v63 = vmax.f32 %v534_v40, %v535_v42  ;;  %v589_v0 = vmax.f32 %v587_v41, %v588_v43  ;;  %v484_v3 = vsel %vm440_vm0, %v360_v46, -inf  ;;  %v537_v4 = vsel %vm440_vm0, %v361_v47, -inf  ;;  %v392_v42 = vld [vmem:[%s3126_s0 + $0xc00] sm:$0xff]  ;;  %v393_v43 = vld [vmem:[%s3126_s0 + $0xc08] sm:$0xff] }
  0x36   :  { %v673_v1 = vmax.f32 %v671_v44, %v672_v33  ;;  %v590_v5 = vsel %vm440_vm0, %v362_v48, -inf  ;;  %v714_v6 = vmax.f32 %v712_v45, %v713_v52  ;;  %v642_v9 = vmax.f32 %v640_v49, %v641_v55  ;;  %v394_v44 = vld [vmem:[%s3126_s0 + $0xc10] sm:$0xff] }
  0x37   :  { %v1794_v11 = vsel %vm440_vm0, %v252_v53, -inf  ;;  %v1797_v12 = vsel %vm440_vm0, %v268_v54, -inf  ;;  %v643_v16 = vsel %vm440_vm0, %v363_v61, -inf  ;;  %v1810_v17 = vsel %vm440_vm0, %v284_v60, -inf  ;;  %v78_v49 = vld [vmem:[%s3126_s0 + $0x230] sm:$0xff] }
  0x38   :  { %v675_v10 = vmax.f32 %v673_v1, %v674_v50  ;;  %v716_v18 = vmax.f32 %v714_v6, %v715_v58  ;;  %v717_v19 = vsel %vm440_vm0, %v109_v59, -inf  ;;  %v485_v23 = vmax.f32 %v483_v62, %v484_v3  ;;  %v173_v50 = vld [vmem:[%s3126_s0 + $0x528] sm:$0xff]  ;;  %v316_v1 = vld [vmem:[%s3126_s0 + $0x9a0] sm:$0xff] }
  0x39   :  { %v538_v24 = vmax.f32 %v536_v63, %v537_v4  ;;  %v591_v25 = vmax.f32 %v589_v0, %v590_v5  ;;  %v719_v26 = vsel %vm440_vm0, %v125_v2, -inf  ;;  %v486_v27 = vsel %vm440_vm0, %v376_v8, -inf  ;;  %v332_v2 = vld [vmem:[%s3126_s0 + $0xa20] sm:$0xff] }
  0x3a   :  { %v539_v28 = vsel %vm440_vm0, %v377_v14, -inf  ;;  %v677_v29 = vmax.f32 %v675_v10, %v676_v51  ;;  %v759_v30 = vsel %vm440_vm0, %v14_v7, -inf  ;;  %v592_v32 = vsel %vm440_vm0, %v378_v15, -inf  ;;  %v395_v51 = vld [vmem:[%s3126_s0 + $0xc18] sm:$0xff]  ;;  %v189_v7 = vld [vmem:[%s3126_s0 + $0x5a8] sm:$0xff]  ;;  %v408_v8 = vld [vmem:[%s3126_s0 + $0xc80] sm:$0xff] }
  0x3b   :  { %v644_v33 = vmax.f32 %v642_v9, %v643_v16  ;;  %v1831_v34 = vsel %vm440_vm0, %v300_v13, -inf  ;;  %v718_v35 = vmax.f32 %v716_v18, %v717_v19  ;;  %v645_v38 = vsel %vm440_vm0, %v379_v22, -inf  ;;  %v409_v9 = vld [vmem:[%s3126_s0 + $0xc88] sm:$0xff]  ;;  %v410_v15 = vld [vmem:[%s3126_s0 + $0xc90] sm:$0xff]  ;;  %v411_v16 = vld [vmem:[%s3126_s0 + $0xc98] sm:$0xff] }
  0x3c   :  { %v679_v39 = vmax.f32 %v677_v29, %v1768_v56  ;;  %v721_v40 = vsel %vm440_vm0, %v141_v21, -inf  ;;  %v760_v41 = vsel %vm440_vm0, %v30_v20, -inf  ;;  %v487_v45 = vmax.f32 %v485_v23, %v486_v27  ;;  %v205_v22 = vld [vmem:[%s3126_s0 + $0x628] sm:$0xff]  ;;  %v110_v27 = vld [vmem:[%s3126_s0 + $0x330] sm:$0xff] }
  0x3d   :  { %v540_v46 = vmax.f32 %v538_v24, %v539_v28  ;;  %v720_v47 = vmax.f32 %v718_v35, %v719_v26  ;;  %v761_v48 = vmax.f32 %v759_v30, %v760_v41  ;;  %v488_v52 = vsel %vm440_vm0, %v392_v42, -inf }
  0x3e   :  { %v593_v53 = vmax.f32 %v591_v25, %v592_v32  ;;  %v681_v54 = vmax.f32 %v679_v39, %v680_v57  ;;  %v762_v55 = vsel %vm440_vm0, %v46_v31, -inf  ;;  %v541_v56 = vsel %vm440_vm0, %v393_v43, -inf  ;;  %v94_v57 = vld [vmem:[%s3126_s0 + $0x2b0] sm:$0xff]  ;;  %v425_v43 = vld [vmem:[%s3126_s0 + $0xd08] sm:$0xff] }
  0x3f   :  { %v594_v58 = vsel %vm440_vm0, %v394_v44, -inf  ;;  %v646_v59 = vmax.f32 %v644_v33, %v645_v38  ;;  %v723_v60 = vsel %vm440_vm0, %v157_v37, -inf  ;;  %v647_v61 = vsel %vm440_vm0, %v395_v51, -inf  ;;  %v126_v37 = vld [vmem:[%s3126_s0 + $0x3b0] sm:$0xff]  ;;  %v348_v38 = vld [vmem:[%s3126_s0 + $0xaa0] sm:$0xff] }
  0x40   :  { %v683_v62 = vmax.f32 %v681_v54, %v1794_v11  ;;  %v722_v63 = vmax.f32 %v720_v47, %v721_v40  ;;  %v764_v0 = vsel %vm440_vm0, %v62_v36, -inf  ;;  %v489_v3 = vmax.f32 %v487_v45, %v488_v52  ;;  %v426_v44 = vld [vmem:[%s3126_s0 + $0xd10] sm:$0xff]  ;;  %v427_v45 = vld [vmem:[%s3126_s0 + $0xd18] sm:$0xff] }
  0x41   :  { %v725_v4 = vsel %vm440_vm0, %v173_v50, -inf  ;;  %v763_v5 = vmax.f32 %v761_v48, %v762_v55  ;;  %v766_v6 = vsel %vm440_vm0, %v78_v49, -inf  ;;  %v542_v10 = vmax.f32 %v540_v46, %v541_v56  ;;  %v142_v49 = vld [vmem:[%s3126_s0 + $0x430] sm:$0xff]  ;;  %v237_v50 = vld [vmem:[%s3126_s0 + $0x728] sm:$0xff]  ;;  %v364_v55 = vld [vmem:[%s3126_s0 + $0xb20] sm:$0xff] }
  0x42   :  { %v595_v11 = vmax.f32 %v593_v53, %v594_v58  ;;  %v685_v13 = vmax.f32 %v683_v62, %v1797_v12  ;;  %v724_v14 = vmax.f32 %v722_v63, %v723_v60  ;;  %v490_v18 = vsel %vm440_vm0, %v408_v8, -inf  ;;  %v221_v12 = vld [vmem:[%s3126_s0 + $0x6a8] sm:$0xff]  ;;  %v174_v8 = vld [vmem:[%s3126_s0 + $0x530] sm:$0xff] }
  0x43   :  { %v543_v19 = vsel %vm440_vm0, %v409_v9, -inf  ;;  %v648_v20 = vmax.f32 %v646_v59, %v647_v61  ;;  %v765_v21 = vmax.f32 %v763_v5, %v764_v0  ;;  %v596_v23 = vsel %vm440_vm0, %v410_v15, -inf  ;;  %v158_v61 = vld [vmem:[%s3126_s0 + $0x4b0] sm:$0xff]  ;;  %v253_v62 = vld [vmem:[%s3126_s0 + $0x7a8] sm:$0xff]  ;;  %v396_v15 = vld [vmem:[%s3126_s0 + $0xc20] sm:$0xff] }
  0x44   :  { %v649_v24 = vsel %vm440_vm0, %v411_v16, -inf  ;;  %v690_v25 = vsel %vm440_vm0, %v316_v1, -inf  ;;  %v692_v26 = vsel %vm440_vm0, %v332_v2, -inf  ;;  %v491_v28 = vmax.f32 %v489_v3, %v490_v18  ;;  %v269_v2 = vld [vmem:[%s3126_s0 + $0x828] sm:$0xff]  ;;  %v380_v3 = vld [vmem:[%s3126_s0 + $0xba0] sm:$0xff] }
  0x45   :  { %v687_v29 = vmax.f32 %v685_v13, %v1810_v17  ;;  %v727_v30 = vsel %vm440_vm0, %v189_v7, -inf  ;;  %v768_v31 = vsel %vm440_vm0, %v94_v57, -inf  ;;  %v544_v32 = vmax.f32 %v542_v10, %v543_v19  ;;  %v424_v17 = vld [vmem:[%s3126_s0 + $0xd00] sm:$0xff]  ;;  %v15_v7 = vld [vmem:[%s3126_s0 + $0x38] sm:$0xff]  ;;  %v285_v9 = vld [vmem:[%s3126_s0 + $0x8a8] sm:$0xff] }
  0x46   :  { %v597_v33 = vmax.f32 %v595_v11, %v596_v23  ;;  %v726_v35 = vmax.f32 %v724_v14, %v725_v4  ;;  %v767_v36 = vmax.f32 %v765_v21, %v766_v6  ;;  %v650_v39 = vmax.f32 %v648_v20, %v649_v24  ;;  %v31_v14 = vld [vmem:[%s3126_s0 + $0xb8] sm:$0xff]  ;;  %v190_v21 = vld [vmem:[%s3126_s0 + $0x5b0] sm:$0xff] }
  0x47   :  { %v689_v40 = vmax.f32 %v687_v29, %v1831_v34  ;;  %v729_v41 = vsel %vm440_vm0, %v205_v22, -inf  ;;  %v731_v42 = vsel %vm440_vm0, %v221_v12, -inf  ;;  %v492_v46 = vsel %vm440_vm0, %v424_v17, -inf  ;;  %v47_v20 = vld [vmem:[%s3126_s0 + $0x138] sm:$0xff]  ;;  %v428_v17 = vld [vmem:[%s3126_s0 + $0xd20] sm:$0xff] }
  0x48   :  { %v728_v47 = vmax.f32 %v726_v35, %v727_v30  ;;  %v769_v34 = vmax.f32 %v767_v36, %v768_v31  ;;  %v770_v48 = vsel %vm440_vm0, %v110_v27, -inf  ;;  %v493_v51 = vmax.f32 %v491_v28, %v492_v46  ;;  %v206_v31 = vld [vmem:[%s3126_s0 + $0x630] sm:$0xff] }
  0x49   :  { %v545_v52 = vsel %vm440_vm0, %v425_v43, -inf  ;;  %v598_v53 = vsel %vm440_vm0, %v426_v44, -inf  ;;  %v651_v54 = vsel %vm440_vm0, %v427_v45, -inf  ;;  %v691_v59 = vmax.f32 %v689_v40, %v690_v25  ;;  %v63_v25 = vld [vmem:[%s3126_s0 + $0x1b8] sm:$0xff]  ;;  %v222_v43 = vld [vmem:[%s3126_s0 + $0x6b0] sm:$0xff]  ;;  %v317_v44 = vld [vmem:[%s3126_s0 + $0x9a8] sm:$0xff] }
  0x4a   :  { %v546_v56 = vmax.f32 %v544_v32, %v545_v52  ;;  %v599_v58 = vmax.f32 %v597_v33, %v598_v53  ;;  %v772_v60 = vsel %vm440_vm0, %v126_v37, -inf  ;;  %v652_v63 = vmax.f32 %v650_v39, %v651_v54  ;;  %1289 = vst.msk [vmem:[%s3127_s1] sm:$0xff] %vm440_vm0, %v493_v51  ;;  %v301_v32 = vld [vmem:[%s3126_s0 + $0x928] sm:$0xff]  ;;  %v238_v53 = vld [vmem:[%s3126_s0 + $0x730] sm:$0xff] }
  0x4b   :  { %v694_v0 = vsel %vm440_vm0, %v348_v38, -inf  ;;  %v730_v57 = vmax.f32 %v728_v47, %v729_v41  ;;  %v771_v1 = vmax.f32 %v769_v34, %v770_v48  ;;  %v693_v4 = vmax.f32 %v691_v59, %v692_v26  ;;  %v412_v26 = vld [vmem:[%s3126_s0 + $0xca0] sm:$0xff]  ;;  %v79_v38 = vld [vmem:[%s3126_s0 + $0x238] sm:$0xff]  ;;  %v333_v54 = vld [vmem:[%s3126_s0 + $0xa28] sm:$0xff] }
  0x4c   :  { %v733_v5 = vsel %vm440_vm0, %v237_v50, -inf  ;;  %v774_v6 = vsel %vm440_vm0, %v142_v49, -inf  ;;  %v696_v10 = vsel %vm440_vm0, %v364_v55, -inf  ;;  %1290 = vst.msk [vmem:[%s3127_s1 + $0x8] sm:$0xff] %vm440_vm0, %v546_v56  ;;  %v735_v18 = vsel %vm440_vm0, %v253_v62, -inf  ;;  %v95_v48 = vld [vmem:[%s3126_s0 + $0x2b8] sm:$0xff] }
  0x4d   :  { %v732_v11 = vmax.f32 %v730_v57, %v731_v42  ;;  %v773_v13 = vmax.f32 %v771_v1, %v772_v60  ;;  %v695_v16 = vmax.f32 %v693_v4, %v694_v0  ;;  %v776_v19 = vsel %vm440_vm0, %v158_v61, -inf  ;;  %1291 = vst.msk [vmem:[%s3127_s1 + $0x10] sm:$0xff] %vm440_vm0, %v599_v58  ;;  %v111_v60 = vld [vmem:[%s3126_s0 + $0x338] sm:$0xff]  ;;  %v254_v57 = vld [vmem:[%s3126_s0 + $0x7b0] sm:$0xff]  ;;  %v349_v1 = vld [vmem:[%s3126_s0 + $0xaa8] sm:$0xff] }
  0x4e   :  { %v698_v22 = vsel %vm440_vm0, %v380_v3, -inf  ;;  %v737_v23 = vsel %vm440_vm0, %v269_v2, -inf  ;;  %1292 = vst.msk [vmem:[%s3127_s1 + $0x18] sm:$0xff] %vm440_vm0, %v652_v63  ;;  %v739_v28 = vsel %vm440_vm0, %v285_v9, -inf  ;;  %v778_v29 = vsel %vm440_vm0, %v174_v8, -inf  ;;  %v365_v2 = vld [vmem:[%s3126_s0 + $0xb28] sm:$0xff] }
  0x4f   :  { %v734_v12 = vmax.f32 %v732_v11, %v733_v5  ;;  %v775_v24 = vmax.f32 %v773_v13, %v774_v6  ;;  %v697_v27 = vmax.f32 %v695_v16, %v696_v10  ;;  %v812_v30 = vsel %vm440_vm0, %v15_v7, -inf  ;;  %v127_v6 = vld [vmem:[%s3126_s0 + $0x3b8] sm:$0xff]  ;;  %v270_v7 = vld [vmem:[%s3126_s0 + $0x830] sm:$0xff]  ;;  %v16_v13 = vld [vmem:[%s3126_s0 + $0x40] sm:$0xff] }
  0x50   :  { %v700_v33 = vsel %vm440_vm0, %v396_v15, -inf  ;;  %v813_v37 = vsel %vm440_vm0, %v31_v14, -inf  ;;  %v780_v40 = vsel %vm440_vm0, %v190_v21, -inf  ;;  %v815_v42 = vsel %vm440_vm0, %v47_v20, -inf  ;;  %v32_v14 = vld [vmem:[%s3126_s0 + $0xc0] sm:$0xff]  ;;  %v143_v15 = vld [vmem:[%s3126_s0 + $0x438] sm:$0xff] }
  0x51   :  { %v736_v35 = vmax.f32 %v734_v12, %v735_v18  ;;  %v777_v36 = vmax.f32 %v775_v24, %v776_v19  ;;  %v699_v39 = vmax.f32 %v697_v27, %v698_v22  ;;  %v814_v41 = vmax.f32 %v812_v30, %v813_v37  ;;  %v48_v20 = vld [vmem:[%s3126_s0 + $0x140] sm:$0xff] }
  0x52   :  { %v702_v45 = vsel %vm440_vm0, %v412_v26, -inf  ;;  %v817_v34 = vsel %vm440_vm0, %v63_v25, -inf  ;;  %v741_v50 = vsel %vm440_vm0, %v301_v32, -inf  ;;  %v782_v51 = vsel %vm440_vm0, %v206_v31, -inf  ;;  %v64_v24 = vld [vmem:[%s3126_s0 + $0x1c0] sm:$0xff]  ;;  %v286_v25 = vld [vmem:[%s3126_s0 + $0x8b0] sm:$0xff] }
  0x53   :  { %v738_v46 = vmax.f32 %v736_v35, %v737_v23  ;;  %v779_v47 = vmax.f32 %v777_v36, %v778_v29  ;;  %v701_v49 = vmax.f32 %v699_v39, %v700_v33  ;;  %v816_v52 = vmax.f32 %v814_v41, %v815_v42  ;;  %v381_v26 = vld [vmem:[%s3126_s0 + $0xba8] sm:$0xff]  ;;  %v159_v31 = vld [vmem:[%s3126_s0 + $0x4b8] sm:$0xff]  ;;  %v80_v37 = vld [vmem:[%s3126_s0 + $0x240] sm:$0xff] }
  0x54   :  { %v704_v55 = vsel %vm440_vm0, %v428_v17, -inf  ;;  %v819_v59 = vsel %vm440_vm0, %v79_v38, -inf  ;;  %v743_v62 = vsel %vm440_vm0, %v317_v44, -inf  ;;  %v784_v63 = vsel %vm440_vm0, %v222_v43, -inf  ;;  %v302_v38 = vld [vmem:[%s3126_s0 + $0x930] sm:$0xff]  ;;  %v397_v17 = vld [vmem:[%s3126_s0 + $0xc28] sm:$0xff] }
  0x55   :  { %v740_v56 = vmax.f32 %v738_v46, %v739_v28  ;;  %v781_v58 = vmax.f32 %v779_v47, %v780_v40  ;;  %v703_v61 = vmax.f32 %v701_v49, %v702_v45  ;;  %v818_v0 = vmax.f32 %v816_v52, %v817_v34  ;;  %v175_v43 = vld [vmem:[%s3126_s0 + $0x538] sm:$0xff]  ;;  %v96_v34 = vld [vmem:[%s3126_s0 + $0x2c0] sm:$0xff]  ;;  %v413_v49 = vld [vmem:[%s3126_s0 + $0xca8] sm:$0xff] }
  0x56   :  { %v821_v5 = vsel %vm440_vm0, %v95_v48, -inf  ;;  %v745_v9 = vsel %vm440_vm0, %v333_v54, -inf  ;;  %v786_v10 = vsel %vm440_vm0, %v238_v53, -inf  ;;  %v823_v19 = vsel %vm440_vm0, %v111_v60, -inf  ;;  %v318_v48 = vld [vmem:[%s3126_s0 + $0x9b0] sm:$0xff]  ;;  %v191_v54 = vld [vmem:[%s3126_s0 + $0x5b8] sm:$0xff] }
  0x57   :  { %v742_v3 = vmax.f32 %v740_v56, %v741_v50  ;;  %v783_v4 = vmax.f32 %v781_v58, %v782_v51  ;;  %v705_v8 = vmax.f32 %v703_v61, %v704_v55  ;;  %v820_v11 = vmax.f32 %v818_v0, %v819_v59  ;;  %v112_v60 = vld [vmem:[%s3126_s0 + $0x340] sm:$0xff]  ;;  %v334_v61 = vld [vmem:[%s3126_s0 + $0xa30] sm:$0xff] }
  0x58   :  { %v747_v21 = vsel %vm440_vm0, %v349_v1, -inf  ;;  %v749_v22 = vsel %vm440_vm0, %v365_v2, -inf  ;;  %v788_v12 = vsel %vm440_vm0, %v254_v57, -inf  ;;  %v790_v29 = vsel %vm440_vm0, %v270_v7, -inf  ;;  %v207_v2 = vld [vmem:[%s3126_s0 + $0x638] sm:$0xff]  ;;  %v128_v7 = vld [vmem:[%s3126_s0 + $0x3c0] sm:$0xff] }
  0x59   :  { %v744_v16 = vmax.f32 %v742_v3, %v743_v62  ;;  %v785_v18 = vmax.f32 %v783_v4, %v784_v63  ;;  %v822_v23 = vmax.f32 %v820_v11, %v821_v5  ;;  %1293 = vst.msk [vmem:[%s3127_s1 + $0x20] sm:$0xff] %vm440_vm0, %v705_v8  ;;  %v825_v30 = vsel %vm440_vm0, %v127_v6, -inf  ;;  %v429_v62 = vld [vmem:[%s3126_s0 + $0xd28] sm:$0xff]  ;;  %v350_v8 = vld [vmem:[%s3126_s0 + $0xab0] sm:$0xff] }
  0x5a   :  { %v827_v33 = vsel %vm440_vm0, %v143_v15, -inf  ;;  %v865_v35 = vsel %vm440_vm0, %v16_v13, -inf  ;;  %v866_v36 = vsel %vm440_vm0, %v32_v14, -inf  ;;  %v868_v42 = vsel %vm440_vm0, %v48_v20, -inf  ;;  %v223_v14 = vld [vmem:[%s3126_s0 + $0x6b8] sm:$0xff]  ;;  %v144_v20 = vld [vmem:[%s3126_s0 + $0x440] sm:$0xff] }
  0x5b   :  { %v746_v27 = vmax.f32 %v744_v16, %v745_v9  ;;  %v787_v28 = vmax.f32 %v785_v18, %v786_v10  ;;  %v824_v32 = vmax.f32 %v822_v23, %v823_v19  ;;  %v867_v41 = vmax.f32 %v865_v35, %v866_v36 }
  0x5c   :  { %v751_v44 = vsel %vm440_vm0, %v381_v26, -inf  ;;  %v792_v45 = vsel %vm440_vm0, %v286_v25, -inf  ;;  %v870_v47 = vsel %vm440_vm0, %v64_v24, -inf  ;;  %v829_v52 = vsel %vm440_vm0, %v159_v31, -inf  ;;  %v160_v26 = vld [vmem:[%s3126_s0 + $0x4c0] sm:$0xff]  ;;  %v17_v31 = vld [vmem:[%s3126_s0 + $0x48] sm:$0xff] }
  0x5d   :  { %v748_v39 = vmax.f32 %v746_v27, %v747_v21  ;;  %v789_v40 = vmax.f32 %v787_v28, %v788_v12  ;;  %v826_v46 = vmax.f32 %v824_v32, %v825_v30  ;;  %v869_v53 = vmax.f32 %v867_v41, %v868_v42  ;;  %v366_v21 = vld [vmem:[%s3126_s0 + $0xb30] sm:$0xff]  ;;  %v239_v27 = vld [vmem:[%s3126_s0 + $0x738] sm:$0xff]  ;;  %v33_v32 = vld [vmem:[%s3126_s0 + $0xc8] sm:$0xff] }
  0x5e   :  { %v753_v55 = vsel %vm440_vm0, %v397_v17, -inf  ;;  %v794_v56 = vsel %vm440_vm0, %v302_v38, -inf  ;;  %v872_v59 = vsel %vm440_vm0, %v80_v37, -inf  ;;  %v831_v57 = vsel %vm440_vm0, %v175_v43, -inf  ;;  %v255_v17 = vld [vmem:[%s3126_s0 + $0x7b8] sm:$0xff]  ;;  %v65_v43 = vld [vmem:[%s3126_s0 + $0x1c8] sm:$0xff] }
  0x5f   :  { %v750_v50 = vmax.f32 %v748_v39, %v749_v22  ;;  %v791_v51 = vmax.f32 %v789_v40, %v790_v29  ;;  %v828_v58 = vmax.f32 %v826_v46, %v827_v33  ;;  %v871_v1 = vmax.f32 %v869_v53, %v870_v47  ;;  %v382_v22 = vld [vmem:[%s3126_s0 + $0xbb0] sm:$0xff]  ;;  %v49_v33 = vld [vmem:[%s3126_s0 + $0x148] sm:$0xff] }
  0x60   :  { %v755_v3 = vsel %vm440_vm0, %v413_v49, -inf  ;;  %v796_v4 = vsel %vm440_vm0, %v318_v48, -inf  ;;  %v874_v6 = vsel %vm440_vm0, %v96_v34, -inf  ;;  %v833_v11 = vsel %vm440_vm0, %v191_v54, -inf  ;;  %v271_v49 = vld [vmem:[%s3126_s0 + $0x838] sm:$0xff]  ;;  %v81_v54 = vld [vmem:[%s3126_s0 + $0x248] sm:$0xff] }
  0x61   :  { %v752_v63 = vmax.f32 %v750_v50, %v751_v44  ;;  %v793_v0 = vmax.f32 %v791_v51, %v792_v45  ;;  %v830_v5 = vmax.f32 %v828_v58, %v829_v52  ;;  %v873_v13 = vmax.f32 %v871_v1, %v872_v59  ;;  %v176_v44 = vld [vmem:[%s3126_s0 + $0x540] sm:$0xff]  ;;  %v398_v45 = vld [vmem:[%s3126_s0 + $0xc30] sm:$0xff] }
  0x62   :  { %v757_v15 = vsel %vm440_vm0, %v429_v62, -inf  ;;  %v798_v16 = vsel %vm440_vm0, %v334_v61, -inf  ;;  %v876_v19 = vsel %vm440_vm0, %v112_v60, -inf  ;;  %v835_v24 = vsel %vm440_vm0, %v207_v2, -inf  ;;  %v287_v62 = vld [vmem:[%s3126_s0 + $0x8b8] sm:$0xff]  ;;  %v97_v2 = vld [vmem:[%s3126_s0 + $0x2c8] sm:$0xff] }
  0x63   :  { %v754_v9 = vmax.f32 %v752_v63, %v753_v55  ;;  %v795_v10 = vmax.f32 %v793_v0, %v794_v56  ;;  %v832_v18 = vmax.f32 %v830_v5, %v831_v57  ;;  %v875_v25 = vmax.f32 %v873_v13, %v874_v6  ;;  %v192_v55 = vld [vmem:[%s3126_s0 + $0x5c0] sm:$0xff]  ;;  %v414_v56 = vld [vmem:[%s3126_s0 + $0xcb0] sm:$0xff] }
  0x64   :  { %v800_v28 = vsel %vm440_vm0, %v350_v8, -inf  ;;  %v878_v30 = vsel %vm440_vm0, %v128_v7, -inf  ;;  %v837_v37 = vsel %vm440_vm0, %v223_v14, -inf  ;;  %v802_v39 = vsel %vm440_vm0, %v366_v21, -inf }
  0x65   :  { %v756_v12 = vmax.f32 %v754_v9, %v755_v3  ;;  %v797_v23 = vmax.f32 %v795_v10, %v796_v4  ;;  %v834_v29 = vmax.f32 %v832_v18, %v833_v11  ;;  %v877_v38 = vmax.f32 %v875_v25, %v876_v19  ;;  %v208_v3 = vld [vmem:[%s3126_s0 + $0x640] sm:$0xff]  ;;  %v430_v4 = vld [vmem:[%s3126_s0 + $0xd30] sm:$0xff]  ;;  %v303_v9 = vld [vmem:[%s3126_s0 + $0x938] sm:$0xff] }
  0x66   :  { %v804_v40 = vsel %vm440_vm0, %v382_v22, -inf  ;;  %v880_v42 = vsel %vm440_vm0, %v144_v20, -inf  ;;  %v839_v47 = vsel %vm440_vm0, %v239_v27, -inf  ;;  %v882_v48 = vsel %vm440_vm0, %v160_v26, -inf  ;;  %v319_v18 = vld [vmem:[%s3126_s0 + $0x9b8] sm:$0xff]  ;;  %v129_v27 = vld [vmem:[%s3126_s0 + $0x3c8] sm:$0xff] }
  0x67   :  { %v758_v35 = vmax.f32 %v756_v12, %v757_v15  ;;  %v799_v36 = vmax.f32 %v797_v23, %v798_v16  ;;  %v836_v41 = vmax.f32 %v834_v29, %v835_v24  ;;  %v879_v34 = vmax.f32 %v877_v38, %v878_v30  ;;  %v113_v15 = vld [vmem:[%s3126_s0 + $0x348] sm:$0xff]  ;;  %v224_v16 = vld [vmem:[%s3126_s0 + $0x6c0] sm:$0xff]  ;;  %v335_v12 = vld [vmem:[%s3126_s0 + $0xa38] sm:$0xff] }
  0x68   :  { %v918_v51 = vsel %vm440_vm0, %v17_v31, -inf  ;;  %v919_v52 = vsel %vm440_vm0, %v33_v32, -inf  ;;  %v921_v53 = vsel %vm440_vm0, %v49_v33, -inf  ;;  %v841_v59 = vsel %vm440_vm0, %v255_v17, -inf  ;;  %v351_v29 = vld [vmem:[%s3126_s0 + $0xab8] sm:$0xff] }
  0x69   :  { %v801_v46 = vmax.f32 %v799_v36, %v800_v28  ;;  %1294 = vst.msk [vmem:[%s3127_s1 + $0x28] sm:$0xff] %vm440_vm0, %v758_v35  ;;  %v838_v50 = vmax.f32 %v836_v41, %v837_v37  ;;  %v881_v60 = vmax.f32 %v879_v34, %v880_v42  ;;  %v920_v61 = vmax.f32 %v918_v51, %v919_v52  ;;  %v240_v28 = vld [vmem:[%s3126_s0 + $0x740] sm:$0xff]  ;;  %v367_v36 = vld [vmem:[%s3126_s0 + $0xb38] sm:$0xff]  ;;  %v34_v41 = vld [vmem:[%s3126_s0 + $0xd0] sm:$0xff] }
  0x6a   :  { %v806_v63 = vsel %vm440_vm0, %v398_v45, -inf  ;;  %v884_v57 = vsel %vm440_vm0, %v176_v44, -inf  ;;  %v923_v1 = vsel %vm440_vm0, %v65_v43, -inf  ;;  %v843_v6 = vsel %vm440_vm0, %v271_v49, -inf  ;;  %v256_v35 = vld [vmem:[%s3126_s0 + $0x7c0] sm:$0xff]  ;;  %v145_v42 = vld [vmem:[%s3126_s0 + $0x448] sm:$0xff] }
  0x6b   :  { %v803_v58 = vmax.f32 %v801_v46, %v802_v39  ;;  %v840_v0 = vmax.f32 %v838_v50, %v839_v47  ;;  %v883_v7 = vmax.f32 %v881_v60, %v882_v48  ;;  %v922_v8 = vmax.f32 %v920_v61, %v921_v53  ;;  %v272_v47 = vld [vmem:[%s3126_s0 + $0x840] sm:$0xff]  ;;  %v50_v51 = vld [vmem:[%s3126_s0 + $0x150] sm:$0xff]  ;;  %v161_v53 = vld [vmem:[%s3126_s0 + $0x4c8] sm:$0xff] }
  0x6c   :  { %v808_v10 = vsel %vm440_vm0, %v414_v56, -inf  ;;  %v886_v13 = vsel %vm440_vm0, %v192_v55, -inf  ;;  %v925_v14 = vsel %vm440_vm0, %v81_v54, -inf  ;;  %v845_v20 = vsel %vm440_vm0, %v287_v62, -inf  ;;  %v66_v52 = vld [vmem:[%s3126_s0 + $0x1d0] sm:$0xff] }
  0x6d   :  { %v805_v5 = vmax.f32 %v803_v58, %v804_v40  ;;  %v842_v11 = vmax.f32 %v840_v0, %v841_v59  ;;  %v885_v21 = vmax.f32 %v883_v7, %v884_v57  ;;  %v924_v22 = vmax.f32 %v922_v8, %v923_v1  ;;  %v18_v40 = vld [vmem:[%s3126_s0 + $0x50] sm:$0xff]  ;;  %v383_v59 = vld [vmem:[%s3126_s0 + $0xbb8] sm:$0xff]  ;;  %v177_v57 = vld [vmem:[%s3126_s0 + $0x548] sm:$0xff] }
  0x6e   :  { %v810_v23 = vsel %vm440_vm0, %v430_v4, -inf  ;;  %v888_v25 = vsel %vm440_vm0, %v208_v3, -inf  ;;  %v927_v26 = vsel %vm440_vm0, %v97_v2, -inf  ;;  %v847_v31 = vsel %vm440_vm0, %v303_v9, -inf  ;;  %v82_v0 = vld [vmem:[%s3126_s0 + $0x250] sm:$0xff]  ;;  %v288_v1 = vld [vmem:[%s3126_s0 + $0x8c0] sm:$0xff] }
  0x6f   :  { %v807_v19 = vmax.f32 %v805_v5, %v806_v63  ;;  %v844_v24 = vmax.f32 %v842_v11, %v843_v6  ;;  %v887_v32 = vmax.f32 %v885_v21, %v886_v13  ;;  %v926_v33 = vmax.f32 %v924_v22, %v925_v14  ;;  %v399_v6 = vld [vmem:[%s3126_s0 + $0xc38] sm:$0xff]  ;;  %v98_v11 = vld [vmem:[%s3126_s0 + $0x2d0] sm:$0xff]  ;;  %v193_v13 = vld [vmem:[%s3126_s0 + $0x5c8] sm:$0xff] }
  0x70   :  { %v849_v38 = vsel %vm440_vm0, %v319_v18, -inf  ;;  %v890_v17 = vsel %vm440_vm0, %v224_v16, -inf  ;;  %v929_v39 = vsel %vm440_vm0, %v113_v15, -inf  ;;  %v851_v44 = vsel %vm440_vm0, %v335_v12, -inf  ;;  %v304_v14 = vld [vmem:[%s3126_s0 + $0x940] sm:$0xff] }
  0x71   :  { %v809_v30 = vmax.f32 %v807_v19, %v808_v10  ;;  %v846_v37 = vmax.f32 %v844_v24, %v845_v20  ;;  %v889_v45 = vmax.f32 %v887_v32, %v888_v25  ;;  %v928_v46 = vmax.f32 %v926_v33, %v927_v26  ;;  %v415_v20 = vld [vmem:[%s3126_s0 + $0xcb8] sm:$0xff]  ;;  %v114_v24 = vld [vmem:[%s3126_s0 + $0x350] sm:$0xff]  ;;  %v209_v25 = vld [vmem:[%s3126_s0 + $0x648] sm:$0xff] }
  0x72   :  { %v853_v48 = vsel %vm440_vm0, %v351_v29, -inf  ;;  %v892_v49 = vsel %vm440_vm0, %v240_v28, -inf  ;;  %v931_v50 = vsel %vm440_vm0, %v129_v27, -inf  ;;  %v855_v54 = vsel %vm440_vm0, %v367_v36, -inf  ;;  %v320_v26 = vld [vmem:[%s3126_s0 + $0x9c0] sm:$0xff] }
  0x73   :  { %v811_v43 = vmax.f32 %v809_v30, %v810_v23  ;;  %v848_v34 = vmax.f32 %v846_v37, %v847_v31  ;;  %v891_v55 = vmax.f32 %v889_v45, %v890_v17  ;;  %v894_v56 = vsel %vm440_vm0, %v256_v35, -inf  ;;  %v431_v31 = vld [vmem:[%s3126_s0 + $0xd38] sm:$0xff]  ;;  %v130_v37 = vld [vmem:[%s3126_s0 + $0x3d0] sm:$0xff]  ;;  %v336_v17 = vld [vmem:[%s3126_s0 + $0xa40] sm:$0xff] }
  0x74   :  { %v930_v58 = vmax.f32 %v928_v46, %v929_v39  ;;  %v933_v61 = vsel %vm440_vm0, %v145_v42, -inf  ;;  %v971_v62 = vsel %vm440_vm0, %v18_v40, -inf  ;;  %v972_v63 = vsel %vm440_vm0, %v34_v41, -inf }
  0x75   :  { %1295 = vst.msk [vmem:[%s3127_s1 + $0x30] sm:$0xff] %vm440_vm0, %v811_v43  ;;  %v850_v60 = vmax.f32 %v848_v34, %v849_v38  ;;  %v893_v2 = vmax.f32 %v891_v55, %v892_v49  ;;  %v896_v3 = vsel %vm440_vm0, %v272_v47, -inf  ;;  %v973_v5 = vmax.f32 %v971_v62, %v972_v63  ;;  %v225_v38 = vld [vmem:[%s3126_s0 + $0x6c8] sm:$0xff]  ;;  %v352_v43 = vld [vmem:[%s3126_s0 + $0xac0] sm:$0xff]  ;;  %v146_v34 = vld [vmem:[%s3126_s0 + $0x450] sm:$0xff] }
  0x76   :  { %v932_v4 = vmax.f32 %v930_v58, %v931_v50  ;;  %v935_v8 = vsel %vm440_vm0, %v161_v53, -inf  ;;  %v974_v9 = vsel %vm440_vm0, %v50_v51, -inf  ;;  %v976_v10 = vsel %vm440_vm0, %v66_v52, -inf  ;;  %v368_v49 = vld [vmem:[%s3126_s0 + $0xb40] sm:$0xff]  ;;  %v162_v62 = vld [vmem:[%s3126_s0 + $0x4d0] sm:$0xff] }
  0x77   :  { %v852_v7 = vmax.f32 %v850_v60, %v851_v44  ;;  %v857_v15 = vsel %vm440_vm0, %v383_v59, -inf  ;;  %v895_v16 = vmax.f32 %v893_v2, %v894_v56  ;;  %v975_v19 = vmax.f32 %v973_v5, %v974_v9  ;;  %v19_v60 = vld [vmem:[%s3126_s0 + $0x58] sm:$0xff]  ;;  %v384_v2 = vld [vmem:[%s3126_s0 + $0xbc0] sm:$0xff]  ;;  %v273_v9 = vld [vmem:[%s3126_s0 + $0x848] sm:$0xff] }
  0x78   :  { %v934_v18 = vmax.f32 %v932_v4, %v933_v61  ;;  %v898_v22 = vsel %vm440_vm0, %v288_v1, -inf  ;;  %v937_v12 = vsel %vm440_vm0, %v177_v57, -inf  ;;  %v978_v23 = vsel %vm440_vm0, %v82_v0, -inf  ;;  %v35_v61 = vld [vmem:[%s3126_s0 + $0xd8] sm:$0xff] }
  0x79   :  { %v854_v21 = vmax.f32 %v852_v7, %v853_v48  ;;  %v859_v27 = vsel %vm440_vm0, %v399_v6, -inf  ;;  %v897_v28 = vmax.f32 %v895_v16, %v896_v3  ;;  %v977_v30 = vmax.f32 %v975_v19, %v976_v10  ;;  %v241_v48 = vld [vmem:[%s3126_s0 + $0x748] sm:$0xff]  ;;  %v51_v7 = vld [vmem:[%s3126_s0 + $0x158] sm:$0xff] }
  0x7a   :  { %v936_v29 = vmax.f32 %v934_v18, %v935_v8  ;;  %v900_v33 = vsel %vm440_vm0, %v304_v14, -inf  ;;  %v939_v35 = vsel %vm440_vm0, %v193_v13, -inf  ;;  %v980_v36 = vsel %vm440_vm0, %v98_v11, -inf  ;;  %v178_v8 = vld [vmem:[%s3126_s0 + $0x550] sm:$0xff] }
  0x7b   :  { %v856_v32 = vmax.f32 %v854_v21, %v855_v54  ;;  %v861_v39 = vsel %vm440_vm0, %v415_v20, -inf  ;;  %v899_v40 = vmax.f32 %v897_v28, %v898_v22  ;;  %v979_v42 = vmax.f32 %v977_v30, %v978_v23  ;;  %v257_v54 = vld [vmem:[%s3126_s0 + $0x7c8] sm:$0xff]  ;;  %v194_v21 = vld [vmem:[%s3126_s0 + $0x5d0] sm:$0xff] }
  0x7c   :  { %v938_v41 = vmax.f32 %v936_v29, %v937_v12  ;;  %v902_v45 = vsel %vm440_vm0, %v320_v26, -inf  ;;  %v941_v46 = vsel %vm440_vm0, %v209_v25, -inf  ;;  %v982_v47 = vsel %vm440_vm0, %v114_v24, -inf  ;;  %v289_v22 = vld [vmem:[%s3126_s0 + $0x8c8] sm:$0xff]  ;;  %v400_v12 = vld [vmem:[%s3126_s0 + $0xc40] sm:$0xff] }
  0x7d   :  { %v858_v44 = vmax.f32 %v856_v32, %v857_v15  ;;  %v863_v50 = vsel %vm440_vm0, %v431_v31, -inf  ;;  %v901_v51 = vmax.f32 %v899_v40, %v900_v33  ;;  %v981_v53 = vmax.f32 %v979_v42, %v980_v36  ;;  %v67_v15 = vld [vmem:[%s3126_s0 + $0x1d8] sm:$0xff]  ;;  %v210_v32 = vld [vmem:[%s3126_s0 + $0x650] sm:$0xff]  ;;  %v305_v33 = vld [vmem:[%s3126_s0 + $0x948] sm:$0xff] }
  0x7e   :  { %v940_v52 = vmax.f32 %v938_v41, %v939_v35  ;;  %v904_v56 = vsel %vm440_vm0, %v336_v17, -inf  ;;  %v943_v58 = vsel %vm440_vm0, %v225_v38, -inf  ;;  %v984_v59 = vsel %vm440_vm0, %v130_v37, -inf  ;;  %v416_v35 = vld [vmem:[%s3126_s0 + $0xcc0] sm:$0xff] }
  0x7f   :  { %v860_v55 = vmax.f32 %v858_v44, %v859_v27  ;;  %v903_v63 = vmax.f32 %v901_v51, %v902_v45  ;;  %v906_v0 = vsel %vm440_vm0, %v352_v43, -inf  ;;  %v983_v1 = vmax.f32 %v981_v53, %v982_v47  ;;  %v83_v27 = vld [vmem:[%s3126_s0 + $0x258] sm:$0xff]  ;;  %v226_v44 = vld [vmem:[%s3126_s0 + $0x6d0] sm:$0xff]  ;;  %v321_v45 = vld [vmem:[%s3126_s0 + $0x9c8] sm:$0xff] }
  0x80   :  { %v942_v57 = vmax.f32 %v940_v52, %v941_v46  ;;  %v908_v4 = vsel %vm440_vm0, %v368_v49, -inf  ;;  %v945_v5 = vsel %vm440_vm0, %v241_v48, -inf  ;;  %v986_v6 = vsel %vm440_vm0, %v146_v34, -inf  ;;  %v432_v46 = vld [vmem:[%s3126_s0 + $0xd40] sm:$0xff] }
  0x81   :  { %v862_v3 = vmax.f32 %v860_v55, %v861_v39  ;;  %v905_v10 = vmax.f32 %v903_v63, %v904_v56  ;;  %v947_v13 = vsel %vm440_vm0, %v257_v54, -inf  ;;  %v985_v14 = vmax.f32 %v983_v1, %v984_v59  ;;  %v99_v39 = vld [vmem:[%s3126_s0 + $0x2d8] sm:$0xff]  ;;  %v242_v55 = vld [vmem:[%s3126_s0 + $0x750] sm:$0xff]  ;;  %v337_v56 = vld [vmem:[%s3126_s0 + $0xa48] sm:$0xff] }
  0x82   :  { %v944_v11 = vmax.f32 %v942_v57, %v943_v58  ;;  %v988_v18 = vsel %vm440_vm0, %v162_v62, -inf  ;;  %v1024_v19 = vsel %vm440_vm0, %v19_v60, -inf  ;;  %v1025_v20 = vsel %vm440_vm0, %v35_v61, -inf  ;;  %v353_v58 = vld [vmem:[%s3126_s0 + $0xac8] sm:$0xff]  ;;  %v131_v63 = vld [vmem:[%s3126_s0 + $0x3d8] sm:$0xff] }
  0x83   :  { %v864_v16 = vmax.f32 %v862_v3, %v863_v50  ;;  %v907_v23 = vmax.f32 %v905_v10, %v906_v0  ;;  %v910_v24 = vsel %vm440_vm0, %v384_v2, -inf  ;;  %v987_v26 = vmax.f32 %v985_v14, %v986_v6  ;;  %v115_v50 = vld [vmem:[%s3126_s0 + $0x358] sm:$0xff]  ;;  %v20_v10 = vld [vmem:[%s3126_s0 + $0x60] sm:$0xff] }
  0x84   :  { %v946_v25 = vmax.f32 %v944_v11, %v945_v5  ;;  %v949_v28 = vsel %vm440_vm0, %v273_v9, -inf  ;;  %v990_v29 = vsel %vm440_vm0, %v178_v8, -inf  ;;  %v1026_v30 = vmax.f32 %v1024_v19, %v1025_v20  ;;  %v147_v3 = vld [vmem:[%s3126_s0 + $0x458] sm:$0xff]  ;;  %v369_v5 = vld [vmem:[%s3126_s0 + $0xb48] sm:$0xff]  ;;  %v36_v11 = vld [vmem:[%s3126_s0 + $0xe0] sm:$0xff] }
  0x85   :  { %v1027_v31 = vsel %vm440_vm0, %v51_v7, -inf  ;;  %1296 = vst.msk [vmem:[%s3127_s1 + $0x38] sm:$0xff] %vm440_vm0, %v864_v16  ;;  %v909_v36 = vmax.f32 %v907_v23, %v908_v4  ;;  %v989_v38 = vmax.f32 %v987_v26, %v988_v18  ;;  %v1029_v17 = vsel %vm440_vm0, %v67_v15, -inf  ;;  %v258_v4 = vld [vmem:[%s3126_s0 + $0x7d0] sm:$0xff]  ;;  %v52_v18 = vld [vmem:[%s3126_s0 + $0x160] sm:$0xff] }
  0x86   :  { %v948_v37 = vmax.f32 %v946_v25, %v947_v13  ;;  %v912_v40 = vsel %vm440_vm0, %v400_v12, -inf  ;;  %v951_v41 = vsel %vm440_vm0, %v289_v22, -inf  ;;  %v992_v42 = vsel %vm440_vm0, %v194_v21, -inf  ;;  %v274_v19 = vld [vmem:[%s3126_s0 + $0x850] sm:$0xff]  ;;  %v68_v23 = vld [vmem:[%s3126_s0 + $0x1e0] sm:$0xff] }
  0x87   :  { %v1028_v43 = vmax.f32 %v1026_v30, %v1027_v31  ;;  %v911_v47 = vmax.f32 %v909_v36, %v910_v24  ;;  %v991_v48 = vmax.f32 %v989_v38, %v990_v29  ;;  %v1031_v49 = vsel %vm440_vm0, %v83_v27, -inf  ;;  %v163_v24 = vld [vmem:[%s3126_s0 + $0x4d8] sm:$0xff]  ;;  %v290_v29 = vld [vmem:[%s3126_s0 + $0x8d0] sm:$0xff]  ;;  %v385_v30 = vld [vmem:[%s3126_s0 + $0xbc8] sm:$0xff] }
  0x88   :  { %v950_v34 = vmax.f32 %v948_v37, %v949_v28  ;;  %v914_v51 = vsel %vm440_vm0, %v416_v35, -inf  ;;  %v953_v52 = vsel %vm440_vm0, %v305_v33, -inf  ;;  %v994_v53 = vsel %vm440_vm0, %v210_v32, -inf  ;;  %v84_v36 = vld [vmem:[%s3126_s0 + $0x260] sm:$0xff]  ;;  %v179_v37 = vld [vmem:[%s3126_s0 + $0x558] sm:$0xff] }
  0x89   :  { %v1030_v54 = vmax.f32 %v1028_v43, %v1029_v17  ;;  %v913_v59 = vmax.f32 %v911_v47, %v912_v40  ;;  %v993_v61 = vmax.f32 %v991_v48, %v992_v42  ;;  %v1033_v62 = vsel %vm440_vm0, %v99_v39, -inf  ;;  %v401_v42 = vld [vmem:[%s3126_s0 + $0xc48] sm:$0xff]  ;;  %v100_v47 = vld [vmem:[%s3126_s0 + $0x2e0] sm:$0xff] }
  0x8a   :  { %v952_v60 = vmax.f32 %v950_v34, %v951_v41  ;;  %v916_v0 = vsel %vm440_vm0, %v432_v46, -inf  ;;  %v955_v57 = vsel %vm440_vm0, %v321_v45, -inf  ;;  %v996_v1 = vsel %vm440_vm0, %v226_v44, -inf  ;;  %v306_v41 = vld [vmem:[%s3126_s0 + $0x950] sm:$0xff]  ;;  %v195_v34 = vld [vmem:[%s3126_s0 + $0x5d8] sm:$0xff] }
  0x8b   :  { %v1032_v2 = vmax.f32 %v1030_v54, %v1031_v49  ;;  %v915_v6 = vmax.f32 %v913_v59, %v914_v51  ;;  %v995_v8 = vmax.f32 %v993_v61, %v994_v53  ;;  %v1035_v9 = vsel %vm440_vm0, %v115_v50, -inf  ;;  %v417_v53 = vld [vmem:[%s3126_s0 + $0xcc8] sm:$0xff]  ;;  %v116_v59 = vld [vmem:[%s3126_s0 + $0x360] sm:$0xff] }
  0x8c   :  { %v954_v7 = vmax.f32 %v952_v60, %v953_v52  ;;  %v957_v13 = vsel %vm440_vm0, %v337_v56, -inf  ;;  %v959_v14 = vsel %vm440_vm0, %v353_v58, -inf  ;;  %v998_v15 = vsel %vm440_vm0, %v242_v55, -inf  ;;  %v322_v52 = vld [vmem:[%s3126_s0 + $0x9d0] sm:$0xff]  ;;  %v211_v60 = vld [vmem:[%s3126_s0 + $0x658] sm:$0xff] }
  0x8d   :  { %v1034_v16 = vmax.f32 %v1032_v2, %v1033_v62  ;;  %v917_v20 = vmax.f32 %v915_v6, %v916_v0  ;;  %v997_v22 = vmax.f32 %v995_v8, %v996_v1  ;;  %v1037_v12 = vsel %vm440_vm0, %v131_v63, -inf  ;;  %v433_v1 = vld [vmem:[%s3126_s0 + $0xd48] sm:$0xff]  ;;  %v132_v6 = vld [vmem:[%s3126_s0 + $0x3e0] sm:$0xff] }
  0x8e   :  { %v956_v21 = vmax.f32 %v954_v7, %v955_v57  ;;  %v961_v25 = vsel %vm440_vm0, %v369_v5, -inf  ;;  %v1000_v26 = vsel %vm440_vm0, %v258_v4, -inf  ;;  %v1039_v28 = vsel %vm440_vm0, %v147_v3, -inf  ;;  %v338_v57 = vld [vmem:[%s3126_s0 + $0xa50] sm:$0xff]  ;;  %v227_v7 = vld [vmem:[%s3126_s0 + $0x6d8] sm:$0xff] }
  0x8f   :  { %v1036_v27 = vmax.f32 %v1034_v16, %v1035_v9  ;;  %v999_v32 = vmax.f32 %v997_v22, %v998_v15  ;;  %v1077_v33 = vsel %vm440_vm0, %v20_v10, -inf  ;;  %v1078_v35 = vsel %vm440_vm0, %v36_v11, -inf  ;;  %1297 = vst.msk [vmem:[%s3127_s1 + $0x40] sm:$0xff] %vm440_vm0, %v917_v20  ;;  %v148_v20 = vld [vmem:[%s3126_s0 + $0x460] sm:$0xff] }
  0x90   :  { %v958_v31 = vmax.f32 %v956_v21, %v957_v13  ;;  %v1002_v38 = vsel %vm440_vm0, %v274_v19, -inf  ;;  %v1079_v39 = vmax.f32 %v1077_v33, %v1078_v35  ;;  %v1080_v40 = vsel %vm440_vm0, %v52_v18, -inf  ;;  %v354_v13 = vld [vmem:[%s3126_s0 + $0xad0] sm:$0xff]  ;;  %v243_v21 = vld [vmem:[%s3126_s0 + $0x758] sm:$0xff]  ;;  %v53_v33 = vld [vmem:[%s3126_s0 + $0x168] sm:$0xff] }
  0x91   :  { %v1038_v17 = vmax.f32 %v1036_v27, %v1037_v12  ;;  %v1001_v44 = vmax.f32 %v999_v32, %v1000_v26  ;;  %v1041_v45 = vsel %vm440_vm0, %v163_v24, -inf  ;;  %v1082_v46 = vsel %vm440_vm0, %v68_v23, -inf  ;;  %v259_v26 = vld [vmem:[%s3126_s0 + $0x7d8] sm:$0xff]  ;;  %v37_v32 = vld [vmem:[%s3126_s0 + $0xe8] sm:$0xff] }
  0x92   :  { %v960_v43 = vmax.f32 %v958_v31, %v959_v14  ;;  %v963_v48 = vsel %vm440_vm0, %v385_v30, -inf  ;;  %v1004_v49 = vsel %vm440_vm0, %v290_v29, -inf  ;;  %v1081_v51 = vmax.f32 %v1079_v39, %v1080_v40  ;;  %v370_v14 = vld [vmem:[%s3126_s0 + $0xb50] sm:$0xff]  ;;  %v21_v31 = vld [vmem:[%s3126_s0 + $0x68] sm:$0xff] }
  0x93   :  { %v1040_v50 = vmax.f32 %v1038_v17, %v1039_v28  ;;  %v1003_v55 = vmax.f32 %v1001_v44, %v1002_v38  ;;  %v1043_v56 = vsel %vm440_vm0, %v179_v37, -inf  ;;  %v1084_v58 = vsel %vm440_vm0, %v84_v36, -inf  ;;  %v386_v17 = vld [vmem:[%s3126_s0 + $0xbd0] sm:$0xff]  ;;  %v180_v44 = vld [vmem:[%s3126_s0 + $0x560] sm:$0xff] }
  0x94   :  { %v962_v54 = vmax.f32 %v960_v43, %v961_v25  ;;  %v965_v61 = vsel %vm440_vm0, %v401_v42, -inf  ;;  %v1006_v62 = vsel %vm440_vm0, %v306_v41, -inf  ;;  %v1083_v0 = vmax.f32 %v1081_v51, %v1082_v46  ;;  %v164_v25 = vld [vmem:[%s3126_s0 + $0x4e0] sm:$0xff]  ;;  %v69_v43 = vld [vmem:[%s3126_s0 + $0x1e8] sm:$0xff] }
  0x95   :  { %v1042_v63 = vmax.f32 %v1040_v50, %v1041_v45  ;;  %v1005_v3 = vmax.f32 %v1003_v55, %v1004_v49  ;;  %v1045_v4 = vsel %vm440_vm0, %v195_v34, -inf  ;;  %v1086_v5 = vsel %vm440_vm0, %v100_v47, -inf  ;;  %v275_v45 = vld [vmem:[%s3126_s0 + $0x858] sm:$0xff]  ;;  %v402_v49 = vld [vmem:[%s3126_s0 + $0xc50] sm:$0xff]  ;;  %v196_v55 = vld [vmem:[%s3126_s0 + $0x5e0] sm:$0xff] }
  0x96   :  { %v964_v2 = vmax.f32 %v962_v54, %v963_v48  ;;  %v967_v8 = vsel %vm440_vm0, %v417_v53, -inf  ;;  %v1008_v9 = vsel %vm440_vm0, %v322_v52, -inf  ;;  %v1085_v11 = vmax.f32 %v1083_v0, %v1084_v58  ;;  %v85_v54 = vld [vmem:[%s3126_s0 + $0x268] sm:$0xff] }
  0x97   :  { %v1044_v10 = vmax.f32 %v1042_v63, %v1043_v56  ;;  %v1007_v16 = vmax.f32 %v1005_v3, %v1006_v62  ;;  %v1047_v18 = vsel %vm440_vm0, %v211_v60, -inf  ;;  %v1088_v19 = vsel %vm440_vm0, %v116_v59, -inf  ;;  %v291_v56 = vld [vmem:[%s3126_s0 + $0x8d8] sm:$0xff]  ;;  %v418_v62 = vld [vmem:[%s3126_s0 + $0xcd0] sm:$0xff]  ;;  %v212_v3 = vld [vmem:[%s3126_s0 + $0x660] sm:$0xff] }
  0x98   :  { %v966_v15 = vmax.f32 %v964_v2, %v965_v61  ;;  %v969_v22 = vsel %vm440_vm0, %v433_v1, -inf  ;;  %v1010_v12 = vsel %vm440_vm0, %v338_v57, -inf  ;;  %v1087_v24 = vmax.f32 %v1085_v11, %v1086_v5  ;;  %v101_v2 = vld [vmem:[%s3126_s0 + $0x2e8] sm:$0xff] }
  0x99   :  { %v1046_v23 = vmax.f32 %v1044_v10, %v1045_v4  ;;  %v1009_v28 = vmax.f32 %v1007_v16, %v1008_v9  ;;  %v1049_v29 = vsel %vm440_vm0, %v227_v7, -inf  ;;  %v1090_v30 = vsel %vm440_vm0, %v132_v6, -inf  ;;  %v307_v4 = vld [vmem:[%s3126_s0 + $0x958] sm:$0xff]  ;;  %v434_v9 = vld [vmem:[%s3126_s0 + $0xd50] sm:$0xff]  ;;  %v228_v16 = vld [vmem:[%s3126_s0 + $0x6e0] sm:$0xff] }
  0x9a   :  { %v968_v27 = vmax.f32 %v966_v15, %v967_v8  ;;  %v1012_v35 = vsel %vm440_vm0, %v354_v13, -inf  ;;  %v1014_v36 = vsel %vm440_vm0, %v370_v14, -inf  ;;  %v1089_v38 = vmax.f32 %v1087_v24, %v1088_v19  ;;  %v117_v15 = vld [vmem:[%s3126_s0 + $0x368] sm:$0xff] }
  0x9b   :  { %v1048_v37 = vmax.f32 %v1046_v23, %v1047_v18  ;;  %v1011_v40 = vmax.f32 %v1009_v28, %v1010_v12  ;;  %v1051_v41 = vsel %vm440_vm0, %v243_v21, -inf  ;;  %v1092_v42 = vsel %vm440_vm0, %v148_v20, -inf  ;;  %v323_v18 = vld [vmem:[%s3126_s0 + $0x9d8] sm:$0xff]  ;;  %v244_v28 = vld [vmem:[%s3126_s0 + $0x760] sm:$0xff] }
  0x9c   :  { %v970_v39 = vmax.f32 %v968_v27, %v969_v22  ;;  %v1053_v47 = vsel %vm440_vm0, %v259_v26, -inf  ;;  %v1091_v34 = vmax.f32 %v1089_v38, %v1090_v30  ;;  %v1094_v48 = vsel %vm440_vm0, %v164_v25, -inf  ;;  %v339_v12 = vld [vmem:[%s3126_s0 + $0xa58] sm:$0xff]  ;;  %v133_v27 = vld [vmem:[%s3126_s0 + $0x3e8] sm:$0xff] }
  0x9d   :  { %v1050_v46 = vmax.f32 %v1048_v37, %v1049_v29  ;;  %v1013_v50 = vmax.f32 %v1011_v40, %v1012_v35  ;;  %v1130_v51 = vsel %vm440_vm0, %v21_v31, -inf  ;;  %v1131_v52 = vsel %vm440_vm0, %v37_v32, -inf  ;;  %v355_v29 = vld [vmem:[%s3126_s0 + $0xad8] sm:$0xff]  ;;  %v22_v35 = vld [vmem:[%s3126_s0 + $0x70] sm:$0xff] }
  0x9e   :  { %v1133_v53 = vsel %vm440_vm0, %v53_v33, -inf  ;;  %1298 = vst.msk [vmem:[%s3127_s1 + $0x48] sm:$0xff] %vm440_vm0, %v970_v39  ;;  %v1016_v58 = vsel %vm440_vm0, %v386_v17, -inf  ;;  %v1093_v60 = vmax.f32 %v1091_v34, %v1092_v42  ;;  %v1132_v61 = vmax.f32 %v1130_v51, %v1131_v52  ;;  %v38_v40 = vld [vmem:[%s3126_s0 + $0xf0] sm:$0xff]  ;;  %v260_v42 = vld [vmem:[%s3126_s0 + $0x7e0] sm:$0xff]  ;;  %v165_v52 = vld [vmem:[%s3126_s0 + $0x4e8] sm:$0xff] }
  0x9f   :  { %v1052_v59 = vmax.f32 %v1050_v46, %v1051_v41  ;;  %v1015_v63 = vmax.f32 %v1013_v50, %v1014_v36  ;;  %v1055_v0 = vsel %vm440_vm0, %v275_v45, -inf  ;;  %v1096_v57 = vsel %vm440_vm0, %v180_v44, -inf  ;;  %v371_v36 = vld [vmem:[%s3126_s0 + $0xb58] sm:$0xff]  ;;  %v149_v41 = vld [vmem:[%s3126_s0 + $0x468] sm:$0xff]  ;;  %v54_v51 = vld [vmem:[%s3126_s0 + $0x170] sm:$0xff] }
  0xa0   :  { %v1135_v1 = vsel %vm440_vm0, %v69_v43, -inf  ;;  %v1018_v5 = vsel %vm440_vm0, %v402_v49, -inf  ;;  %v1095_v7 = vmax.f32 %v1093_v60, %v1094_v48  ;;  %v1134_v8 = vmax.f32 %v1132_v61, %v1133_v53  ;;  %v276_v53 = vld [vmem:[%s3126_s0 + $0x860] sm:$0xff] }
  0xa1   :  { %v1054_v6 = vmax.f32 %v1052_v59, %v1053_v47  ;;  %v1017_v10 = vmax.f32 %v1015_v63, %v1016_v58  ;;  %v1057_v11 = vsel %vm440_vm0, %v291_v56, -inf  ;;  %v1098_v13 = vsel %vm440_vm0, %v196_v55, -inf  ;;  %v387_v47 = vld [vmem:[%s3126_s0 + $0xbd8] sm:$0xff]  ;;  %v70_v59 = vld [vmem:[%s3126_s0 + $0x1f0] sm:$0xff] }
  0xa2   :  { %v1137_v14 = vsel %vm440_vm0, %v85_v54, -inf  ;;  %v1020_v19 = vsel %vm440_vm0, %v418_v62, -inf  ;;  %v1097_v21 = vmax.f32 %v1095_v7, %v1096_v57  ;;  %v1136_v22 = vmax.f32 %v1134_v8, %v1135_v1  ;;  %v292_v57 = vld [vmem:[%s3126_s0 + $0x8e0] sm:$0xff]  ;;  %v403_v1 = vld [vmem:[%s3126_s0 + $0xc58] sm:$0xff] }
  0xa3   :  { %v1056_v20 = vmax.f32 %v1054_v6, %v1055_v0  ;;  %v1019_v23 = vmax.f32 %v1017_v10, %v1018_v5  ;;  %v1059_v24 = vsel %vm440_vm0, %v307_v4, -inf  ;;  %v1100_v25 = vsel %vm440_vm0, %v212_v3, -inf  ;;  %v181_v0 = vld [vmem:[%s3126_s0 + $0x568] sm:$0xff]  ;;  %v86_v6 = vld [vmem:[%s3126_s0 + $0x270] sm:$0xff] }
  0xa4   :  { %v1139_v26 = vsel %vm440_vm0, %v101_v2, -inf  ;;  %v1022_v30 = vsel %vm440_vm0, %v434_v9, -inf  ;;  %v1099_v32 = vmax.f32 %v1097_v21, %v1098_v13  ;;  %v1138_v33 = vmax.f32 %v1136_v22, %v1137_v14  ;;  %v308_v13 = vld [vmem:[%s3126_s0 + $0x960] sm:$0xff]  ;;  %v419_v14 = vld [vmem:[%s3126_s0 + $0xcd8] sm:$0xff] }
  0xa5   :  { %v1058_v31 = vmax.f32 %v1056_v20, %v1057_v11  ;;  %v1021_v37 = vmax.f32 %v1019_v23, %v1020_v19  ;;  %v1061_v38 = vsel %vm440_vm0, %v323_v18, -inf  ;;  %v1102_v17 = vsel %vm440_vm0, %v228_v16, -inf  ;;  %v197_v11 = vld [vmem:[%s3126_s0 + $0x5e8] sm:$0xff]  ;;  %v102_v20 = vld [vmem:[%s3126_s0 + $0x2f0] sm:$0xff] }
  0xa6   :  { %v1141_v39 = vsel %vm440_vm0, %v117_v15, -inf  ;;  %v1063_v44 = vsel %vm440_vm0, %v339_v12, -inf  ;;  %v1101_v45 = vmax.f32 %v1099_v32, %v1100_v25  ;;  %v1140_v46 = vmax.f32 %v1138_v33, %v1139_v26  ;;  %v324_v25 = vld [vmem:[%s3126_s0 + $0x9e0] sm:$0xff]  ;;  %v435_v26 = vld [vmem:[%s3126_s0 + $0xd58] sm:$0xff] }
  0xa7   :  { %v1060_v43 = vmax.f32 %v1058_v31, %v1059_v24  ;;  %v1023_v34 = vmax.f32 %v1021_v37, %v1022_v30  ;;  %v1065_v48 = vsel %vm440_vm0, %v355_v29, -inf  ;;  %v1104_v49 = vsel %vm440_vm0, %v244_v28, -inf  ;;  %v213_v24 = vld [vmem:[%s3126_s0 + $0x668] sm:$0xff]  ;;  %v118_v31 = vld [vmem:[%s3126_s0 + $0x370] sm:$0xff] }
  0xa8   :  { %v1143_v50 = vsel %vm440_vm0, %v133_v27, -inf  ;;  %v1067_v55 = vsel %vm440_vm0, %v371_v36, -inf  ;;  %v1103_v56 = vmax.f32 %v1101_v45, %v1102_v17  ;;  %v1142_v58 = vmax.f32 %v1140_v46, %v1141_v39  ;;  %v229_v37 = vld [vmem:[%s3126_s0 + $0x6e8] sm:$0xff]  ;;  %v356_v17 = vld [vmem:[%s3126_s0 + $0xae0] sm:$0xff] }
  0xa9   :  { %v1062_v54 = vmax.f32 %v1060_v43, %v1061_v38  ;;  %v1106_v60 = vsel %vm440_vm0, %v260_v42, -inf  ;;  %v1145_v61 = vsel %vm440_vm0, %v149_v41, -inf  ;;  %v1183_v62 = vsel %vm440_vm0, %v22_v35, -inf  ;;  %1299 = vst.msk [vmem:[%s3127_s1 + $0x50] sm:$0xff] %vm440_vm0, %v1023_v34  ;;  %v340_v38 = vld [vmem:[%s3126_s0 + $0xa60] sm:$0xff]  ;;  %v134_v43 = vld [vmem:[%s3126_s0 + $0x3f0] sm:$0xff] }
  0xaa   :  { %v1184_v63 = vsel %vm440_vm0, %v38_v40, -inf  ;;  %v1069_v3 = vsel %vm440_vm0, %v387_v47, -inf  ;;  %v1105_v4 = vmax.f32 %v1103_v56, %v1104_v49  ;;  %v1144_v5 = vmax.f32 %v1142_v58, %v1143_v50  ;;  %v245_v34 = vld [vmem:[%s3126_s0 + $0x768] sm:$0xff]  ;;  %v372_v49 = vld [vmem:[%s3126_s0 + $0xb60] sm:$0xff] }
  0xab   :  { %v1064_v2 = vmax.f32 %v1062_v54, %v1063_v44  ;;  %v1108_v7 = vsel %vm440_vm0, %v276_v53, -inf  ;;  %v1147_v8 = vsel %vm440_vm0, %v165_v52, -inf  ;;  %v1185_v9 = vmax.f32 %v1183_v62, %v1184_v63  ;;  %v150_v54 = vld [vmem:[%s3126_s0 + $0x470] sm:$0xff] }
  0xac   :  { %v1186_v10 = vsel %vm440_vm0, %v54_v51, -inf  ;;  %v1107_v16 = vmax.f32 %v1105_v4, %v1106_v60  ;;  %v1146_v18 = vmax.f32 %v1144_v5, %v1145_v61  ;;  %v1188_v19 = vsel %vm440_vm0, %v70_v59, -inf  ;;  %v23_v60 = vld [vmem:[%s3126_s0 + $0x78] sm:$0xff]  ;;  %v166_v62 = vld [vmem:[%s3126_s0 + $0x4f0] sm:$0xff] }
  0xad   :  { %v1066_v15 = vmax.f32 %v1064_v2, %v1065_v48  ;;  %v1071_v21 = vsel %vm440_vm0, %v403_v1, -inf  ;;  %v1110_v22 = vsel %vm440_vm0, %v292_v57, -inf  ;;  %v1149_v12 = vsel %vm440_vm0, %v181_v0, -inf  ;;  %v261_v48 = vld [vmem:[%s3126_s0 + $0x7e8] sm:$0xff]  ;;  %v39_v61 = vld [vmem:[%s3126_s0 + $0xf8] sm:$0xff] }
  0xae   :  { %v1187_v23 = vmax.f32 %v1185_v9, %v1186_v10  ;;  %v1109_v28 = vmax.f32 %v1107_v16, %v1108_v7  ;;  %v1148_v29 = vmax.f32 %v1146_v18, %v1147_v8  ;;  %v1190_v30 = vsel %vm440_vm0, %v86_v6, -inf  ;;  %v55_v2 = vld [vmem:[%s3126_s0 + $0x178] sm:$0xff]  ;;  %v277_v8 = vld [vmem:[%s3126_s0 + $0x868] sm:$0xff]  ;;  %v388_v9 = vld [vmem:[%s3126_s0 + $0xbe0] sm:$0xff] }
  0xaf   :  { %v1068_v27 = vmax.f32 %v1066_v15, %v1067_v55  ;;  %v1073_v32 = vsel %vm440_vm0, %v419_v14, -inf  ;;  %v1112_v33 = vsel %vm440_vm0, %v308_v13, -inf  ;;  %v1151_v35 = vsel %vm440_vm0, %v197_v11, -inf  ;;  %v71_v7 = vld [vmem:[%s3126_s0 + $0x1f8] sm:$0xff]  ;;  %v182_v15 = vld [vmem:[%s3126_s0 + $0x570] sm:$0xff] }
  0xb0   :  { %v1189_v36 = vmax.f32 %v1187_v23, %v1188_v19  ;;  %v1111_v40 = vmax.f32 %v1109_v28, %v1110_v22  ;;  %v1150_v41 = vmax.f32 %v1148_v29, %v1149_v12  ;;  %v1192_v42 = vsel %vm440_vm0, %v102_v20, -inf  ;;  %v293_v22 = vld [vmem:[%s3126_s0 + $0x8e8] sm:$0xff]  ;;  %v404_v12 = vld [vmem:[%s3126_s0 + $0xc60] sm:$0xff] }
  0xb1   :  { %v1070_v39 = vmax.f32 %v1068_v27, %v1069_v3  ;;  %v1075_v44 = vsel %vm440_vm0, %v435_v26, -inf  ;;  %v1114_v45 = vsel %vm440_vm0, %v324_v25, -inf  ;;  %v1153_v46 = vsel %vm440_vm0, %v213_v24, -inf  ;;  %v198_v27 = vld [vmem:[%s3126_s0 + $0x5f0] sm:$0xff] }
  0xb2   :  { %v1191_v47 = vmax.f32 %v1189_v36, %v1190_v30  ;;  %v1113_v51 = vmax.f32 %v1111_v40, %v1112_v33  ;;  %v1152_v52 = vmax.f32 %v1150_v41, %v1151_v35  ;;  %v1194_v53 = vsel %vm440_vm0, %v118_v31, -inf  ;;  %v309_v33 = vld [vmem:[%s3126_s0 + $0x968] sm:$0xff]  ;;  %v420_v35 = vld [vmem:[%s3126_s0 + $0xce0] sm:$0xff] }
  0xb3   :  { %v1072_v50 = vmax.f32 %v1070_v39, %v1071_v21  ;;  %v1116_v55 = vsel %vm440_vm0, %v340_v38, -inf  ;;  %v1118_v56 = vsel %vm440_vm0, %v356_v17, -inf  ;;  %v1155_v58 = vsel %vm440_vm0, %v229_v37, -inf  ;;  %v87_v21 = vld [vmem:[%s3126_s0 + $0x278] sm:$0xff]  ;;  %v214_v39 = vld [vmem:[%s3126_s0 + $0x670] sm:$0xff] }
  0xb4   :  { %v1193_v59 = vmax.f32 %v1191_v47, %v1192_v42  ;;  %v1115_v0 = vmax.f32 %v1113_v51, %v1114_v45  ;;  %v1154_v57 = vmax.f32 %v1152_v52, %v1153_v46  ;;  %v1196_v1 = vsel %vm440_vm0, %v134_v43, -inf  ;;  %v325_v45 = vld [vmem:[%s3126_s0 + $0x9e8] sm:$0xff]  ;;  %v436_v46 = vld [vmem:[%s3126_s0 + $0xd60] sm:$0xff] }
  0xb5   :  { %v1074_v63 = vmax.f32 %v1072_v50, %v1073_v32  ;;  %v1120_v3 = vsel %vm440_vm0, %v372_v49, -inf  ;;  %v1157_v4 = vsel %vm440_vm0, %v245_v34, -inf  ;;  %v1159_v5 = vsel %vm440_vm0, %v261_v48, -inf  ;;  %v103_v32 = vld [vmem:[%s3126_s0 + $0x2f8] sm:$0xff]  ;;  %v230_v50 = vld [vmem:[%s3126_s0 + $0x6f0] sm:$0xff] }
  0xb6   :  { %v1195_v6 = vmax.f32 %v1193_v59, %v1194_v53  ;;  %v1117_v11 = vmax.f32 %v1115_v0, %v1116_v55  ;;  %v1156_v13 = vmax.f32 %v1154_v57, %v1155_v58  ;;  %v1198_v14 = vsel %vm440_vm0, %v150_v54, -inf  ;;  %v135_v55 = vld [vmem:[%s3126_s0 + $0x3f8] sm:$0xff] }
  0xb7   :  { %v1076_v10 = vmax.f32 %v1074_v63, %v1075_v44  ;;  %v1200_v18 = vsel %vm440_vm0, %v166_v62, -inf  ;;  %v1236_v19 = vsel %vm440_vm0, %v23_v60, -inf  ;;  %v1237_v20 = vsel %vm440_vm0, %v39_v61, -inf  ;;  %v119_v44 = vld [vmem:[%s3126_s0 + $0x378] sm:$0xff]  ;;  %v246_v62 = vld [vmem:[%s3126_s0 + $0x770] sm:$0xff] }
  0xb8   :  { %v1197_v16 = vmax.f32 %v1195_v6, %v1196_v1  ;;  %v1119_v23 = vmax.f32 %v1117_v11, %v1118_v56  ;;  %v1158_v24 = vmax.f32 %v1156_v13, %v1157_v4  ;;  %v1238_v25 = vmax.f32 %v1236_v19, %v1237_v20  ;;  %v341_v56 = vld [vmem:[%s3126_s0 + $0xa68] sm:$0xff]  ;;  %v167_v13 = vld [vmem:[%s3126_s0 + $0x4f8] sm:$0xff]  ;;  %v278_v20 = vld [vmem:[%s3126_s0 + $0x870] sm:$0xff] }
  0xb9   :  { %v1239_v26 = vsel %vm440_vm0, %v55_v2, -inf  ;;  %1300 = vst.msk [vmem:[%s3127_s1 + $0x58] sm:$0xff] %vm440_vm0, %v1076_v10  ;;  %v1122_v28 = vsel %vm440_vm0, %v388_v9, -inf  ;;  %v1161_v29 = vsel %vm440_vm0, %v277_v8, -inf  ;;  %v1241_v31 = vsel %vm440_vm0, %v71_v7, -inf  ;;  %v151_v2 = vld [vmem:[%s3126_s0 + $0x478] sm:$0xff] }
  0xba   :  { %v1199_v30 = vmax.f32 %v1197_v16, %v1198_v14  ;;  %v1121_v36 = vmax.f32 %v1119_v23, %v1120_v3  ;;  %v1160_v37 = vmax.f32 %v1158_v24, %v1159_v5  ;;  %v1202_v38 = vsel %vm440_vm0, %v182_v15, -inf  ;;  %v357_v3 = vld [vmem:[%s3126_s0 + $0xae8] sm:$0xff]  ;;  %v262_v8 = vld [vmem:[%s3126_s0 + $0x7f0] sm:$0xff]  ;;  %v183_v23 = vld [vmem:[%s3126_s0 + $0x578] sm:$0xff] }
  0xbb   :  { %v1240_v17 = vmax.f32 %v1238_v25, %v1239_v26  ;;  %v1124_v40 = vsel %vm440_vm0, %v404_v12, -inf  ;;  %v1163_v41 = vsel %vm440_vm0, %v293_v22, -inf  ;;  %v1243_v43 = vsel %vm440_vm0, %v87_v21, -inf  ;;  %v373_v14 = vld [vmem:[%s3126_s0 + $0xb68] sm:$0xff] }
  0xbc   :  { %v1201_v42 = vmax.f32 %v1199_v30, %v1200_v18  ;;  %v1123_v47 = vmax.f32 %v1121_v36, %v1122_v28  ;;  %v1162_v34 = vmax.f32 %v1160_v37, %v1161_v29  ;;  %v1204_v48 = vsel %vm440_vm0, %v198_v27, -inf  ;;  %v389_v24 = vld [vmem:[%s3126_s0 + $0xbe8] sm:$0xff]  ;;  %v294_v28 = vld [vmem:[%s3126_s0 + $0x8f0] sm:$0xff] }
  0xbd   :  { %v1242_v49 = vmax.f32 %v1240_v17, %v1241_v31  ;;  %v1126_v51 = vsel %vm440_vm0, %v420_v35, -inf  ;;  %v1165_v52 = vsel %vm440_vm0, %v309_v33, -inf  ;;  %v1245_v54 = vsel %vm440_vm0, %v103_v32, -inf  ;;  %v199_v32 = vld [vmem:[%s3126_s0 + $0x5f8] sm:$0xff]  ;;  %v405_v33 = vld [vmem:[%s3126_s0 + $0xc68] sm:$0xff] }
  0xbe   :  { %v1203_v53 = vmax.f32 %v1201_v42, %v1202_v38  ;;  %v1125_v58 = vmax.f32 %v1123_v47, %v1124_v40  ;;  %v1164_v59 = vmax.f32 %v1162_v34, %v1163_v41  ;;  %v1206_v60 = vsel %vm440_vm0, %v214_v39, -inf  ;;  %v310_v38 = vld [vmem:[%s3126_s0 + $0x970] sm:$0xff]  ;;  %v215_v41 = vld [vmem:[%s3126_s0 + $0x678] sm:$0xff]  ;;  %v421_v42 = vld [vmem:[%s3126_s0 + $0xce8] sm:$0xff] }
  0xbf   :  { %v1244_v61 = vmax.f32 %v1242_v49, %v1243_v43  ;;  %v1128_v63 = vsel %vm440_vm0, %v436_v46, -inf  ;;  %v1167_v0 = vsel %vm440_vm0, %v325_v45, -inf  ;;  %v1247_v1 = vsel %vm440_vm0, %v119_v44, -inf  ;;  %v326_v46 = vld [vmem:[%s3126_s0 + $0x9f0] sm:$0xff]  ;;  %v231_v49 = vld [vmem:[%s3126_s0 + $0x6f8] sm:$0xff] }
  0xc0   :  { %v1205_v57 = vmax.f32 %v1203_v53, %v1204_v48  ;;  %v1127_v4 = vmax.f32 %v1125_v58, %v1126_v51  ;;  %v1166_v5 = vmax.f32 %v1164_v59, %v1165_v52  ;;  %v1208_v6 = vsel %vm440_vm0, %v230_v50, -inf  ;;  %v437_v50 = vld [vmem:[%s3126_s0 + $0xd68] sm:$0xff]  ;;  %v247_v59 = vld [vmem:[%s3126_s0 + $0x778] sm:$0xff] }
  0xc1   :  { %v1246_v7 = vmax.f32 %v1244_v61, %v1245_v54  ;;  %v1169_v9 = vsel %vm440_vm0, %v341_v56, -inf  ;;  %v1249_v11 = vsel %vm440_vm0, %v135_v55, -inf  ;;  %v1210_v18 = vsel %vm440_vm0, %v246_v62, -inf  ;;  %v342_v54 = vld [vmem:[%s3126_s0 + $0xa70] sm:$0xff] }
  0xc2   :  { %v1207_v10 = vmax.f32 %v1205_v57, %v1206_v60  ;;  %v1129_v15 = vmax.f32 %v1127_v4, %v1128_v63  ;;  %v1168_v16 = vmax.f32 %v1166_v5, %v1167_v0  ;;  %v1171_v21 = vsel %vm440_vm0, %v357_v3, -inf  ;;  %v358_v63 = vld [vmem:[%s3126_s0 + $0xaf0] sm:$0xff] }
  0xc3   :  { %v1248_v19 = vmax.f32 %v1246_v7, %v1247_v1  ;;  %v1251_v12 = vsel %vm440_vm0, %v151_v2, -inf  ;;  %v1212_v26 = vsel %vm440_vm0, %v262_v8, -inf  ;;  %v1173_v29 = vsel %vm440_vm0, %v373_v14, -inf  ;;  %v263_v2 = vld [vmem:[%s3126_s0 + $0x7f8] sm:$0xff]  ;;  %v390_v14 = vld [vmem:[%s3126_s0 + $0xbf0] sm:$0xff] }
  0xc4   :  { %v1209_v22 = vmax.f32 %v1207_v10, %v1208_v6  ;;  %v1170_v25 = vmax.f32 %v1168_v16, %v1169_v9  ;;  %1301 = vst.msk [vmem:[%s3127_s1 + $0x60] sm:$0xff] %vm440_vm0, %v1129_v15  ;;  %v1253_v31 = vsel %vm440_vm0, %v167_v13, -inf  ;;  %v1214_v36 = vsel %vm440_vm0, %v278_v20, -inf  ;;  %v374_v6 = vld [vmem:[%s3126_s0 + $0xb70] sm:$0xff]  ;;  %v279_v9 = vld [vmem:[%s3126_s0 + $0x878] sm:$0xff] }
  0xc5   :  { %v1250_v27 = vmax.f32 %v1248_v19, %v1249_v11  ;;  %v1175_v17 = vsel %vm440_vm0, %v389_v24, -inf  ;;  %v1255_v40 = vsel %vm440_vm0, %v183_v23, -inf  ;;  %v1216_v44 = vsel %vm440_vm0, %v294_v28, -inf  ;;  %v311_v23 = vld [vmem:[%s3126_s0 + $0x978] sm:$0xff] }
  0xc6   :  { %v1211_v30 = vmax.f32 %v1209_v22, %v1210_v18  ;;  %v1172_v35 = vmax.f32 %v1170_v25, %v1171_v21  ;;  %v1177_v47 = vsel %vm440_vm0, %v405_v33, -inf  ;;  %v1257_v48 = vsel %vm440_vm0, %v199_v32, -inf  ;;  %v295_v18 = vld [vmem:[%s3126_s0 + $0x8f8] sm:$0xff]  ;;  %v406_v21 = vld [vmem:[%s3126_s0 + $0xc70] sm:$0xff] }
  0xc7   :  { %v1252_v37 = vmax.f32 %v1250_v27, %v1251_v12  ;;  %v1218_v52 = vsel %vm440_vm0, %v310_v38, -inf  ;;  %v1179_v55 = vsel %vm440_vm0, %v421_v42, -inf  ;;  %v1259_v58 = vsel %vm440_vm0, %v215_v41, -inf  ;;  %v438_v32 = vld [vmem:[%s3126_s0 + $0xd70] sm:$0xff] }
  0xc8   :  { %v1213_v39 = vmax.f32 %v1211_v30, %v1212_v26  ;;  %v1174_v43 = vmax.f32 %v1172_v35, %v1173_v29  ;;  %v1220_v61 = vsel %vm440_vm0, %v326_v46, -inf  ;;  %v1181_v0 = vsel %vm440_vm0, %v437_v50, -inf  ;;  %v422_v26 = vld [vmem:[%s3126_s0 + $0xcf0] sm:$0xff]  ;;  %v327_v29 = vld [vmem:[%s3126_s0 + $0x9f8] sm:$0xff] }
  0xc9   :  { %v1254_v45 = vmax.f32 %v1252_v37, %v1253_v31  ;;  %v1261_v1 = vsel %vm440_vm0, %v231_v49, -inf  ;;  %v1222_v4 = vsel %vm440_vm0, %v342_v54, -inf  ;;  %v1263_v8 = vsel %vm440_vm0, %v247_v59, -inf  ;;  %v423_v54 = vld [vmem:[%s3126_s0 + $0xcf8] sm:$0xff] }
  0xca   :  { %v1215_v34 = vmax.f32 %v1213_v39, %v1214_v36  ;;  %v1176_v51 = vmax.f32 %v1174_v43, %v1175_v17  ;;  %v1224_v11 = vsel %vm440_vm0, %v358_v63, -inf  ;;  %v1265_v16 = vsel %vm440_vm0, %v263_v2, -inf  ;;  %v343_v36 = vld [vmem:[%s3126_s0 + $0xa78] sm:$0xff] }
  0xcb   :  { %v1256_v53 = vmax.f32 %v1254_v45, %v1255_v40  ;;  %v1226_v19 = vsel %vm440_vm0, %v374_v6, -inf  ;;  %v1267_v12 = vsel %vm440_vm0, %v279_v9, -inf  ;;  %v1228_v24 = vsel %vm440_vm0, %v390_v14, -inf  ;;  %v359_v40 = vld [vmem:[%s3126_s0 + $0xaf8] sm:$0xff] }
  0xcc   :  { %v1217_v56 = vmax.f32 %v1215_v34, %v1216_v44  ;;  %v1178_v60 = vmax.f32 %v1176_v51, %v1177_v47  ;;  %v1269_v28 = vsel %vm440_vm0, %v295_v18, -inf  ;;  %v1230_v30 = vsel %vm440_vm0, %v406_v21, -inf  ;;  %v375_v45 = vld [vmem:[%s3126_s0 + $0xb78] sm:$0xff] }
  0xcd   :  { %v1258_v62 = vmax.f32 %v1256_v53, %v1257_v48  ;;  %v1271_v35 = vsel %vm440_vm0, %v311_v23, -inf  ;;  %v1232_v37 = vsel %vm440_vm0, %v422_v26, -inf  ;;  %v1273_v39 = vsel %vm440_vm0, %v327_v29, -inf  ;;  %v391_v48 = vld [vmem:[%s3126_s0 + $0xbf8] sm:$0xff] }
  0xce   :  { %v1219_v57 = vmax.f32 %v1217_v56, %v1218_v52  ;;  %v1180_v3 = vmax.f32 %v1178_v60, %v1179_v55  ;;  %v1234_v41 = vsel %vm440_vm0, %v438_v32, -inf  ;;  %v1275_v44 = vsel %vm440_vm0, %v343_v36, -inf  ;;  %v407_v51 = vld [vmem:[%s3126_s0 + $0xc78] sm:$0xff] }
  0xcf   :  { %v1260_v5 = vmax.f32 %v1258_v62, %v1259_v58  ;;  %v1277_v34 = vsel %vm440_vm0, %v359_v40, -inf  ;;  %v1279_v50 = vsel %vm440_vm0, %v375_v45, -inf  ;;  %v1281_v53 = vsel %vm440_vm0, %v391_v48, -inf  ;;  %v439_v58 = vld [vmem:[%s3126_s0 + $0xd78] sm:$0xff] }
  0xd0   :  { %v1221_v7 = vmax.f32 %v1219_v57, %v1220_v61  ;;  %v1182_v10 = vmax.f32 %v1180_v3, %v1181_v0  ;;  %v1283_v56 = vsel %vm440_vm0, %v407_v51, -inf  ;;  %v1285_v60 = vsel %vm440_vm0, %v423_v54, -inf }
  0xd1   :  { %v1262_v13 = vmax.f32 %v1260_v5, %v1261_v1  ;;  %v1287_v62 = vsel %vm440_vm0, %v439_v58, -inf }
  0xd2   :  { %v1223_v15 = vmax.f32 %v1221_v7, %v1222_v4  ;;  %1302 = vst.msk [vmem:[%s3127_s1 + $0x68] sm:$0xff] %vm440_vm0, %v1182_v10 }
  0xd3   :  { %v1264_v20 = vmax.f32 %v1262_v13, %v1263_v8 }
  0xd4   :  { %v1225_v22 = vmax.f32 %v1223_v15, %v1224_v11 }
  0xd5   :  { %v1266_v25 = vmax.f32 %v1264_v20, %v1265_v16 }
  0xd6   :  { %v1227_v27 = vmax.f32 %v1225_v22, %v1226_v19 }
  0xd7   :  { %v1268_v31 = vmax.f32 %v1266_v25, %v1267_v12 }
  0xd8   :  { %v1229_v33 = vmax.f32 %v1227_v27, %v1228_v24 }
  0xd9   :  { %v1270_v38 = vmax.f32 %v1268_v31, %v1269_v28 }
  0xda   :  { %v1231_v17 = vmax.f32 %v1229_v33, %v1230_v30 }
  0xdb   :  { %v1272_v42 = vmax.f32 %v1270_v38, %v1271_v35 }
  0xdc   :  { %v1233_v43 = vmax.f32 %v1231_v17, %v1232_v37 }
  0xdd   :  { %v1274_v46 = vmax.f32 %v1272_v42, %v1273_v39 }
  0xde   :  { %v1235_v47 = vmax.f32 %v1233_v43, %v1234_v41 }
  0xdf   :  { %v1276_v49 = vmax.f32 %v1274_v46, %v1275_v44 }
  0xe0   :  { %1303 = vst.msk [vmem:[%s3127_s1 + $0x70] sm:$0xff] %vm440_vm0, %v1235_v47 }
  0xe1   :  { %v1278_v52 = vmax.f32 %v1276_v49, %v1277_v34 }
  0xe3   :  { %v1280_v55 = vmax.f32 %v1278_v52, %v1279_v50 }
  0xe5   :  { %v1282_v59 = vmax.f32 %v1280_v55, %v1281_v53 }
  0xe7   :  { %v1284_v61 = vmax.f32 %v1282_v59, %v1283_v56 }
  0xe9   :  { %v1286_v63 = vmax.f32 %v1284_v61, %v1285_v60 }
  0xeb   :  { %v1288_v0 = vmax.f32 %v1286_v63, %v1287_v62 }
  0xed   :  { %1304 = vst.msk [vmem:[%s3127_s1 + $0x78] sm:$0xff] %vm440_vm0, %v1288_v0 }

// kernel: resnet10_forward.16
= control target key start
LH: loop header
LB: loop body
LE: loop exit
PB: predicated region body
PF: predicated region fallthrough
CT: control target
= control target key end

     0   :  { %s1301_s15 = smov 0   ;;  %s1303_s16 = smov 0   ;;  %s1750_s0 = inlined_call_operand.vmem [shape: bf16[128,1792], index: 0, kind: input, shape index: {}]   ;;  %s1751_s1 = inlined_call_operand.vmem [shape: bf16[1792,64], index: 1, kind: input, shape index: {}]   ;;  %s1752_s2 = inlined_call_operand.vmem [shape: f32[1,64], index: 2, kind: input, shape index: {}]   ;;  %s1753_s3 = inlined_call_operand.vmem [shape: f32[1,64], index: 3, kind: input, shape index: {}]   ;;  %s1754_s4 = inlined_call_operand.vmem [shape: f32[128,64], index: 4, kind: output, shape index: {}]  }
   0x1   :  { %s1305_s17 = smov 0   ;;  %s1307_s18 = smov 0  }
   0x2   :  { %s1309_s19 = smov 0  }
   0x3 LB: > { %s26_s20 = sadd.s32 1, %s1269_s18  ;;  %p49_p1 = scmp.ne.s32.totalorder %s1261_s16, %s1257_s15  ;;  %s1273_s19 = sphi %s1309_s19, %s14_s19   ;;  %s1269_s18 = sphi %s1307_s18, %s1758_s18   ;;  %s1265_s17 = sphi %s1305_s17, %s1757_s17   ;;  %s1261_s16 = sphi %s1303_s16, %s1756_s16   ;;  %s1257_s15 = sphi %s1301_s15, %s1755_s15  }
   0x4   : > { %p27_p0 = scmp.ge.s32.totalorder %s26_s20, 7  ;;  %p50_p2 = scmp.eq.s32.totalorder %s1273_s19, 0 }
   0x5   : > { %s42_s22 = sadd.s32 1, %s1261_s16  ;;  %p1001_p5 = scmp.ge.s32.totalorder %s1273_s19, 7 }
   0x6   : > { %s1760_s20 = smov (%p27_p0, %s26_s20), 0  ;;  %p51_p3 = por %p50_p2, %p49_p1 }
   0x7   : > { %s38_s21 = ssub.s32 %s1269_s18, %s1760_s20  ;;  %195 = sbr.rel (%p1001_p5) target bundleno = 32 (0x20), region = 24 }
   0x8   : > { %p40_p4 = scmp.eq.s32.totalorder %s38_s21, 0 }
   0xa   : > { %s1336_s23 = scalar_select %p40_p4, %s1261_s16, %s42_s22  }
   0xc   : > { %198 = sbr.rel (!%p51_p3) target bundleno = 32 (0x20), region = 28  ;;  %s200_s24 = sand.u32 (%p51_p3), 1, %s1261_s16  }
   0xd   : > { %s1143_s25 = sshll.u32 (%p51_p3), %s1269_s18, 3  ;;  %s1002_s26 = sshll.u32 (%p51_p3), %s200_s24, 7 }
   0xe   : > { %s1344_s29 = scalar_lea.vmem (%p51_p3), %s1750_s0, %s1143_s25  ;;  %s202_s30 = scalar_lea.vmem (%p51_p3), [#allocation2], %s1002_s26 }
   0xf   : > { %v267_v0 = vld [vmem:[%s1344_s29] sm:$0xff] (%p51_p3)  ;;  %v269_v1 = vld [vmem:[%s1344_s29 + $0x38] sm:$0xff] (%p51_p3)  ;;  %v271_v2 = vld [vmem:[%s1344_s29 + $0x70] sm:$0xff] (%p51_p3) }
  0x10   : > { %268 = vst [vmem:[%s202_s30] sm:$0xff] (%p51_p3), %v267_v0  ;;  %v273_v3 = vld [vmem:[%s1344_s29 + $0xa8] sm:$0xff] (%p51_p3)  ;;  %v275_v4 = vld [vmem:[%s1344_s29 + $0xe0] sm:$0xff] (%p51_p3)  ;;  %v277_v5 = vld [vmem:[%s1344_s29 + $0x118] sm:$0xff] (%p51_p3) }
  0x11   : > { %270 = vst [vmem:[%s202_s30 + $0x8] sm:$0xff] %v269_v1  ;;  %v279_v6 = vld [vmem:[%s1344_s29 + $0x150] sm:$0xff]  ;;  %v281_v7 = vld [vmem:[%s1344_s29 + $0x188] sm:$0xff]  ;;  %v283_v8 = vld [vmem:[%s1344_s29 + $0x1c0] sm:$0xff] }
  0x12   : > { %272 = vst [vmem:[%s202_s30 + $0x10] sm:$0xff] %v271_v2  ;;  %v285_v9 = vld [vmem:[%s1344_s29 + $0x1f8] sm:$0xff]  ;;  %v287_v10 = vld [vmem:[%s1344_s29 + $0x230] sm:$0xff]  ;;  %v289_v11 = vld [vmem:[%s1344_s29 + $0x268] sm:$0xff] }
  0x13   : > { %274 = vst [vmem:[%s202_s30 + $0x18] sm:$0xff] %v273_v3  ;;  %v291_v12 = vld [vmem:[%s1344_s29 + $0x2a0] sm:$0xff]  ;;  %v293_v13 = vld [vmem:[%s1344_s29 + $0x2d8] sm:$0xff]  ;;  %v295_v14 = vld [vmem:[%s1344_s29 + $0x310] sm:$0xff] }
  0x14   : > { %276 = vst [vmem:[%s202_s30 + $0x20] sm:$0xff] %v275_v4  ;;  %v297_v15 = vld [vmem:[%s1344_s29 + $0x348] sm:$0xff] }
  0x15   : > { %278 = vst [vmem:[%s202_s30 + $0x28] sm:$0xff] %v277_v5 }
  0x16   : > { %280 = vst [vmem:[%s202_s30 + $0x30] sm:$0xff] %v279_v6 }
  0x17   : > { %282 = vst [vmem:[%s202_s30 + $0x38] sm:$0xff] %v281_v7 }
  0x18   : > { %284 = vst [vmem:[%s202_s30 + $0x40] sm:$0xff] %v283_v8 }
  0x19   : > { %286 = vst [vmem:[%s202_s30 + $0x48] sm:$0xff] %v285_v9 }
  0x1a   : > { %288 = vst [vmem:[%s202_s30 + $0x50] sm:$0xff] %v287_v10 }
  0x1b   : > { %290 = vst [vmem:[%s202_s30 + $0x58] sm:$0xff] %v289_v11 }
  0x1c   : > { %292 = vst [vmem:[%s202_s30 + $0x60] sm:$0xff] %v291_v12 }
  0x1d   : > { %294 = vst [vmem:[%s202_s30 + $0x68] sm:$0xff] %v293_v13 }
  0x1e   : > { %296 = vst [vmem:[%s202_s30 + $0x70] sm:$0xff] %v295_v14 }
  0x1f   : > { %298 = vst [vmem:[%s202_s30 + $0x78] sm:$0xff] %v297_v15 }
  0x20 PF: > { %p1005_p6 = scmp.ge.s32.totalorder %s1273_s19, 1  ;;  %p315_p7 = scmp.lt.s32.totalorder %s1273_s19, 8 }
  0x22   : > { %p316_p8 = pnand %p1005_p6, %p315_p7 }
  0x23   : > { %s322_s5 = sand.u32 (!%p316_p8), 1, %s1257_s15   ;;  %s1007_s6 = sshll.u32 (!%p316_p8), %s1265_s17, 5 }
  0x24   : > { %319 = sbr.rel (%p316_p8) target bundleno = 313 (0x139), region = 70  ;;  %s1006_s7 = sshll.u32 (!%p316_p8), %s322_s5, 7 }
  0x25   : > { %p367_p9 = scmp.lt.s32.totalorder (!%p316_p8), %s1007_s6, 223  ;;  %s1371_s12 = scalar_lea.vmem (!%p316_p8), [#allocation2], %s1006_s7 }
  0x26   : > { %p1009_p10 = scmp.ne.s32.totalorder (!%p316_p8), %s1265_s17, 0 }
  0x29   : > { %s1762_s6 = smov (!%p367_p9, %s1007_s6), 223  ;;  %393 = sbr.rel (%p1009_p10) target bundleno = 63 (0x3f), region = 78 }
  0x2a   : > { %s1008_s8 = sshll.u32 %s1762_s6, 2 }
  0x2b   : > { %s1369_s11 = scalar_lea.vmem %s1751_s1, %s1008_s8 }
  0x2e   : > { %vm394_vm0 = vcmask 523264   ;;  %v1275_v16 = vmov 0.0  }
  0x2f   : > { %395 = vst.msk [vmem:[%s1754_s4] sm:$0xff] %vm394_vm0, %v1275_v16 }
  0x30   : > { %396 = vst.msk [vmem:[%s1754_s4 + $0x8] sm:$0xff] %vm394_vm0, %v1275_v16 }
  0x31   : > { %397 = vst.msk [vmem:[%s1754_s4 + $0x10] sm:$0xff] %vm394_vm0, %v1275_v16 }
  0x32   : > { %398 = vst.msk [vmem:[%s1754_s4 + $0x18] sm:$0xff] %vm394_vm0, %v1275_v16 }
  0x33   : > { %399 = vst.msk [vmem:[%s1754_s4 + $0x20] sm:$0xff] %vm394_vm0, %v1275_v16 }
  0x34   : > { %400 = vst.msk [vmem:[%s1754_s4 + $0x28] sm:$0xff] %vm394_vm0, %v1275_v16 }
  0x35   : > { %401 = vst.msk [vmem:[%s1754_s4 + $0x30] sm:$0xff] %vm394_vm0, %v1275_v16 }
  0x36   : > { %402 = vst.msk [vmem:[%s1754_s4 + $0x38] sm:$0xff] %vm394_vm0, %v1275_v16 }
  0x37   : > { %403 = vst.msk [vmem:[%s1754_s4 + $0x40] sm:$0xff] %vm394_vm0, %v1275_v16 }
  0x38   : > { %404 = vst.msk [vmem:[%s1754_s4 + $0x48] sm:$0xff] %vm394_vm0, %v1275_v16 }
  0x39   : > { %405 = vst.msk [vmem:[%s1754_s4 + $0x50] sm:$0xff] %vm394_vm0, %v1275_v16 }
  0x3a   : > { %406 = vst.msk [vmem:[%s1754_s4 + $0x58] sm:$0xff] %vm394_vm0, %v1275_v16 }
  0x3b   : > { %407 = vst.msk [vmem:[%s1754_s4 + $0x60] sm:$0xff] %vm394_vm0, %v1275_v16 }
  0x3c   : > { %408 = vst.msk [vmem:[%s1754_s4 + $0x68] sm:$0xff] %vm394_vm0, %v1275_v16 }
  0x3d   : > { %409 = vst.msk [vmem:[%s1754_s4 + $0x70] sm:$0xff] %vm394_vm0, %v1275_v16 }
  0x3e   : > { %410 = vst.msk [vmem:[%s1754_s4 + $0x78] sm:$0xff] %vm394_vm0, %v1275_v16 }
  0x3f PF: > { %v1167_v17 = vld [vmem:[%s1369_s11 + $0x38] sm:$0xff]  ;;  %v1166_v19 = vld [vmem:[%s1369_s11 + $0x30] sm:$0xff]  ;;  %v1165_v21 = vld [vmem:[%s1369_s11 + $0x28] sm:$0xff]  ;;  %vm765_vm1 = vcmask 523264   ;;  %p1138_p11 = scmp.ne.s32.totalorder %s1265_s17, 6 }
  0x40   : > { %v1175_v18 = vld [vmem:[%s1369_s11 + $0x78] sm:$0xff]  ;;  %651 = vmatpush.bf16.msra.mxu0 %v1167_v17  ;;  %1176 = vmatpush.bf16.msra.mxu2 %v1167_v17  ;;  %v1174_v20 = vld [vmem:[%s1369_s11 + $0x70] sm:$0xff]  ;;  %v1173_v22 = vld [vmem:[%s1369_s11 + $0x68] sm:$0xff] }
  0x41   : > { %700 = vmatpush.bf16.msra.mxu1 %v1175_v18  ;;  %1184 = vmatpush.bf16.msra.mxu3 %v1175_v18  ;;  %v1164_v23 = vld [vmem:[%s1369_s11 + $0x20] sm:$0xff]  ;;  %v1163_v25 = vld [vmem:[%s1369_s11 + $0x18] sm:$0xff]  ;;  %v1162_v27 = vld [vmem:[%s1369_s11 + $0x10] sm:$0xff] }
  0x42   : > { %v1172_v24 = vld [vmem:[%s1369_s11 + $0x60] sm:$0xff]  ;;  %v1171_v26 = vld [vmem:[%s1369_s11 + $0x58] sm:$0xff]  ;;  %v1170_v28 = vld [vmem:[%s1369_s11 + $0x50] sm:$0xff] }
  0x43   : > { %v1161_v29 = vld [vmem:[%s1369_s11 + $0x8] sm:$0xff]  ;;  %v1160_v31 = vld [vmem:[%s1369_s11] sm:$0xff]  ;;  %v1020_v45 = vld [vmem:[%s1371_s12 + $0x10] sm:$0xf] }
  0x44   : > { %652 = vmatpush.bf16.msra.mxu0 %v1166_v19  ;;  %1177 = vmatpush.bf16.msra.mxu2 %v1166_v19  ;;  %v1169_v30 = vld [vmem:[%s1369_s11 + $0x48] sm:$0xff]  ;;  %v1168_v32 = vld [vmem:[%s1369_s11 + $0x40] sm:$0xff]  ;;  %v1147_v46 = vld [vmem:[%s1371_s12 + $0x14] sm:$0xf0] }
  0x45   : > { %701 = vmatpush.bf16.msra.mxu1 %v1174_v20  ;;  %1185 = vmatpush.bf16.msra.mxu3 %v1174_v20  ;;  %v1012_v33 = vld [vmem:[%s1371_s12] sm:$0xf]  ;;  %v1145_v34 = vld [vmem:[%s1371_s12 + $0x4] sm:$0xf0]  ;;  %v1144_v37 = vld [vmem:[%s1371_s12 + $0x4] sm:$0xf]  ;;  %v1021_v53 = vor.u32 %v1147_v46, %v1020_v45 }
  0x46   : > { %v1044_v35 = vld [vmem:[%s1371_s12 + $0x40] sm:$0xf]  ;;  %v1153_v36 = vld [vmem:[%s1371_s12 + $0x44] sm:$0xf0]  ;;  %v1014_v38 = vld [vmem:[%s1371_s12 + $0x8] sm:$0xf0]  ;;  %v1013_v41 = vor.u32 %v1145_v34, %v1012_v33 }
  0x47   : > { %v1152_v39 = vld [vmem:[%s1371_s12 + $0x44] sm:$0xf]  ;;  %v1046_v40 = vld [vmem:[%s1371_s12 + $0x48] sm:$0xf0]  ;;  %v1045_v42 = vor.u32 %v1153_v36, %v1044_v35  ;;  %v1017_v43 = vor.u32 %v1144_v37, %v1014_v38  ;;  %v1052_v47 = vld [vmem:[%s1371_s12 + $0x50] sm:$0xf] }
  0x48   : > { %653 = vmatpush.bf16.msra.mxu0 %v1165_v21  ;;  %1178 = vmatpush.bf16.msra.mxu2 %v1165_v21  ;;  %v1049_v44 = vor.u32 %v1152_v39, %v1046_v40  ;;  %v1155_v48 = vld [vmem:[%s1371_s12 + $0x54] sm:$0xf0]  ;;  %v1146_v49 = vld [vmem:[%s1371_s12 + $0x14] sm:$0xf]  ;;  %v1022_v50 = vld [vmem:[%s1371_s12 + $0x18] sm:$0xf0] }
  0x49   : > { %702 = vmatpush.bf16.msra.mxu1 %v1173_v22  ;;  %1186 = vmatpush.bf16.msra.mxu3 %v1173_v22  ;;  %v1154_v51 = vld [vmem:[%s1371_s12 + $0x54] sm:$0xf]  ;;  %v1054_v52 = vld [vmem:[%s1371_s12 + $0x58] sm:$0xf0]  ;;  %v1053_v54 = vor.u32 %v1155_v48, %v1052_v47  ;;  %v1025_v55 = vor.u32 %v1146_v49, %v1022_v50  ;;  %v1028_v57 = vld [vmem:[%s1371_s12 + $0x20] sm:$0xf] }
  0x4a   : > { %v1057_v56 = vor.u32 %v1154_v51, %v1054_v52  ;;  %v1149_v58 = vld [vmem:[%s1371_s12 + $0x24] sm:$0xf0]  ;;  %v1060_v59 = vld [vmem:[%s1371_s12 + $0x60] sm:$0xf]  ;;  %v1148_v61 = vld [vmem:[%s1371_s12 + $0x24] sm:$0xf] }
  0x4b   : > { %v1157_v60 = vld [vmem:[%s1371_s12 + $0x64] sm:$0xf0]  ;;  %v1030_v62 = vld [vmem:[%s1371_s12 + $0x28] sm:$0xf0]  ;;  %v1156_v63 = vld [vmem:[%s1371_s12 + $0x64] sm:$0xf]  ;;  %v1029_v1 = vor.u32 %v1149_v58, %v1028_v57 }
  0x4c   : > { %654 = vmatpush.bf16.msra.mxu0 %v1164_v23  ;;  %1179 = vmatpush.bf16.msra.mxu2 %v1164_v23  ;;  %v1062_v0 = vld [vmem:[%s1371_s12 + $0x68] sm:$0xf0]  ;;  %v1061_v2 = vor.u32 %v1157_v60, %v1060_v59  ;;  %v1033_v3 = vor.u32 %v1148_v61, %v1030_v62  ;;  %v1036_v5 = vld [vmem:[%s1371_s12 + $0x30] sm:$0xf]  ;;  %v1151_v6 = vld [vmem:[%s1371_s12 + $0x34] sm:$0xf0] }
  0x4d   : > { %703 = vmatpush.bf16.msra.mxu1 %v1172_v24  ;;  %1187 = vmatpush.bf16.msra.mxu3 %v1172_v24  ;;  %v1065_v4 = vor.u32 %v1156_v63, %v1062_v0  ;;  %v1068_v7 = vld [vmem:[%s1371_s12 + $0x70] sm:$0xf]  ;;  %v1159_v8 = vld [vmem:[%s1371_s12 + $0x74] sm:$0xf0]  ;;  %v1150_v9 = vld [vmem:[%s1371_s12 + $0x34] sm:$0xf]  ;;  %v1037_v13 = vor.u32 %v1151_v6, %v1036_v5 }
  0x4e   : > { %v1038_v10 = vld [vmem:[%s1371_s12 + $0x38] sm:$0xf0]  ;;  %v1158_v11 = vld [vmem:[%s1371_s12 + $0x74] sm:$0xf]  ;;  %v1069_v14 = vor.u32 %v1159_v8, %v1068_v7  ;;  %v411_v18 = vld [vmem:[%s1754_s4] sm:$0xff] }
  0x4f   : > { %v1070_v12 = vld [vmem:[%s1371_s12 + $0x78] sm:$0xf0]  ;;  %v1041_v15 = vor.u32 %v1150_v9, %v1038_v10  ;;  %v419_v23 = vld [vmem:[%s1754_s4 + $0x40] sm:$0xff]  ;;  %v420_v33 = vld [vmem:[%s1754_s4 + $0x48] sm:$0xff] }
  0x50   : > { %655 = vmatpush.bf16.msra.mxu0 %v1163_v25  ;;  %1180 = vmatpush.bf16.msra.mxu2 %v1163_v25  ;;  %v1073_v16 = vor.u32 %v1158_v11, %v1070_v12  ;;  %v413_v37 = vld [vmem:[%s1754_s4 + $0x10] sm:$0xff]  ;;  %v414_v47 = vld [vmem:[%s1754_s4 + $0x18] sm:$0xff]  ;;  %v415_v57 = vld [vmem:[%s1754_s4 + $0x20] sm:$0xff] }
  0x51   : > { %704 = vmatpush.bf16.msra.mxu1 %v1171_v26  ;;  %1188 = vmatpush.bf16.msra.mxu3 %v1171_v26  ;;  %v423_v63 = vld [vmem:[%s1754_s4 + $0x60] sm:$0xff]  ;;  %v424_v9 = vld [vmem:[%s1754_s4 + $0x68] sm:$0xff] }
  0x54   : > { %656 = vmatpush.bf16.msra.mxu0 %v1162_v27  ;;  %1181 = vmatpush.bf16.msra.mxu2 %v1162_v27  ;;  %v412_v27 = vld [vmem:[%s1754_s4 + $0x8] sm:$0xff] }
  0x55   : > { %705 = vmatpush.bf16.msra.mxu1 %v1170_v28  ;;  %1189 = vmatpush.bf16.msra.mxu3 %v1170_v28 }
  0x58   : > { %657 = vmatpush.bf16.msra.mxu0 %v1161_v29  ;;  %1182 = vmatpush.bf16.msra.mxu2 %v1161_v29 }
  0x59   : > { %706 = vmatpush.bf16.msra.mxu1 %v1169_v30  ;;  %1190 = vmatpush.bf16.msra.mxu3 %v1169_v30 }
  0x5c   : > { %658 = vmatpush.bf16.msra.mxu0 %v1160_v31  ;;  %1183 = vmatpush.bf16.msra.mxu2 %v1160_v31 }
  0x5d   : > { %707 = vmatpush.bf16.msra.mxu1 %v1168_v32  ;;  %1191 = vmatpush.bf16.msra.mxu3 %v1168_v32 }
  0x5f   : > { %659 = vmatmul.bf16.vlgmr.msra.gmra.mxu0 %v1013_v41  ;;  %679 = vmatmul.bf16.vlgmr.msra.gmra.mxu2 %v1045_v42 }
  0x60   : > { %708 = vmatmul.bf16.vlgmr.msra.gmra.mxu1 %v1017_v43  ;;  %728 = vmatmul.bf16.vlgmr.msra.gmra.mxu3 %v1049_v44  ;;  %v421_v43 = vld [vmem:[%s1754_s4 + $0x50] sm:$0xff] }
  0x6f   : > { %664 = vmatmul.bf16.gmra.mxu0 %v1021_v53  ;;  %684 = vmatmul.bf16.gmra.mxu2 %v1053_v54  ;;  %v422_v53 = vld [vmem:[%s1754_s4 + $0x58] sm:$0xff] }
  0x70   : > { %713 = vmatmul.bf16.gmra.mxu1 %v1025_v55  ;;  %733 = vmatmul.bf16.gmra.mxu3 %v1057_v56 }
  0x7f   : > { %669 = vmatmul.bf16.gmra.mxu0 %v1029_v1  ;;  %689 = vmatmul.bf16.gmra.mxu2 %v1061_v2 }
  0x80   : > { %718 = vmatmul.bf16.gmra.mxu1 %v1033_v3  ;;  %738 = vmatmul.bf16.gmra.mxu3 %v1065_v4  ;;  %v416_v3 = vld [vmem:[%s1754_s4 + $0x28] sm:$0xff] }
  0x8f   : > { %674 = vmatmul.bf16.gmra.mxu0 %v1037_v13  ;;  %694 = vmatmul.bf16.gmra.mxu2 %v1069_v14  ;;  %v417_v13 = vld [vmem:[%s1754_s4 + $0x30] sm:$0xff] }
  0x90   : > { %723 = vmatmul.bf16.gmra.mxu1 %v1041_v15  ;;  %743 = vmatmul.bf16.gmra.mxu3 %v1073_v16 }
  0xdc   : > { %v660_v17 = vpop.f32.mrf.mxu0 }
  0xdd   : > { %v709_v19 = vpop.f32.mrf.mxu1 }
  0xde   : > { %v710_v20 = vadd.f32 %v709_v19, %v660_v17  ;;  %v425_v19 = vld [vmem:[%s1754_s4 + $0x70] sm:$0xff] }
  0xe0   : > { %v749_v21 = vadd.f32 %v710_v20, %v411_v18 }
  0xe2   : > { %766 = vst.msk [vmem:[%s1754_s4] sm:$0xff] %vm765_vm1, %v749_v21  ;;  %v680_v22 = vpop.f32.mrf.mxu2 }
  0xe3   : > { %v729_v24 = vpop.f32.mrf.mxu3 }
  0xe4   : > { %v730_v25 = vadd.f32 %v729_v24, %v680_v22  ;;  %v662_v26 = vpop.f32.mrf.mxu0 }
  0xe5   : > { %v711_v28 = vpop.f32.mrf.mxu1 }
  0xe6   : > { %v757_v29 = vadd.f32 %v730_v25, %v419_v23  ;;  %v712_v30 = vadd.f32 %v711_v28, %v662_v26  ;;  %v418_v23 = vld [vmem:[%s1754_s4 + $0x38] sm:$0xff] }
  0xe8   : > { %774 = vst.msk [vmem:[%s1754_s4 + $0x40] sm:$0xff] %vm765_vm1, %v757_v29  ;;  %v750_v31 = vadd.f32 %v712_v30, %v412_v27  ;;  %v426_v29 = vld [vmem:[%s1754_s4 + $0x78] sm:$0xff] }
  0xea   : > { %767 = vst.msk [vmem:[%s1754_s4 + $0x8] sm:$0xff] %vm765_vm1, %v750_v31  ;;  %v682_v32 = vpop.f32.mrf.mxu2 }
  0xeb   : > { %v731_v34 = vpop.f32.mrf.mxu3 }
  0xec   : > { %v732_v35 = vadd.f32 %v731_v34, %v682_v32  ;;  %v665_v36 = vpop.f32.mrf.mxu0 }
  0xed   : > { %v714_v38 = vpop.f32.mrf.mxu1 }
  0xee   : > { %v758_v39 = vadd.f32 %v732_v35, %v420_v33  ;;  %v715_v40 = vadd.f32 %v714_v38, %v665_v36 }
  0xf0   : > { %775 = vst.msk [vmem:[%s1754_s4 + $0x48] sm:$0xff] %vm765_vm1, %v758_v39  ;;  %v751_v41 = vadd.f32 %v715_v40, %v413_v37 }
  0xf2   : > { %768 = vst.msk [vmem:[%s1754_s4 + $0x10] sm:$0xff] %vm765_vm1, %v751_v41  ;;  %v685_v42 = vpop.f32.mrf.mxu2 }
  0xf3   : > { %v734_v44 = vpop.f32.mrf.mxu3 }
  0xf4   : > { %v735_v45 = vadd.f32 %v734_v44, %v685_v42  ;;  %v667_v46 = vpop.f32.mrf.mxu0 }
  0xf5   : > { %v716_v48 = vpop.f32.mrf.mxu1 }
  0xf6   : > { %v759_v49 = vadd.f32 %v735_v45, %v421_v43  ;;  %v717_v50 = vadd.f32 %v716_v48, %v667_v46 }
  0xf8   : > { %776 = vst.msk [vmem:[%s1754_s4 + $0x50] sm:$0xff] %vm765_vm1, %v759_v49  ;;  %v752_v51 = vadd.f32 %v717_v50, %v414_v47 }
  0xfa   : > { %769 = vst.msk [vmem:[%s1754_s4 + $0x18] sm:$0xff] %vm765_vm1, %v752_v51  ;;  %v687_v52 = vpop.f32.mrf.mxu2 }
  0xfb   : > { %v736_v54 = vpop.f32.mrf.mxu3 }
  0xfc   : > { %v737_v55 = vadd.f32 %v736_v54, %v687_v52  ;;  %v670_v56 = vpop.f32.mrf.mxu0 }
  0xfd   : > { %v719_v58 = vpop.f32.mrf.mxu1 }
  0xfe   : > { %v760_v59 = vadd.f32 %v737_v55, %v422_v53  ;;  %v720_v60 = vadd.f32 %v719_v58, %v670_v56 }
 0x100   : > { %777 = vst.msk [vmem:[%s1754_s4 + $0x58] sm:$0xff] %vm765_vm1, %v760_v59  ;;  %v753_v61 = vadd.f32 %v720_v60, %v415_v57 }
 0x102   : > { %770 = vst.msk [vmem:[%s1754_s4 + $0x20] sm:$0xff] %vm765_vm1, %v753_v61  ;;  %v690_v62 = vpop.f32.mrf.mxu2 }
 0x103   : > { %v739_v0 = vpop.f32.mrf.mxu3 }
 0x104   : > { %v740_v1 = vadd.f32 %v739_v0, %v690_v62  ;;  %v672_v2 = vpop.f32.mrf.mxu0 }
 0x105   : > { %v721_v4 = vpop.f32.mrf.mxu1 }
 0x106   : > { %v761_v5 = vadd.f32 %v740_v1, %v423_v63  ;;  %v722_v6 = vadd.f32 %v721_v4, %v672_v2 }
 0x108   : > { %778 = vst.msk [vmem:[%s1754_s4 + $0x60] sm:$0xff] %vm765_vm1, %v761_v5  ;;  %v754_v7 = vadd.f32 %v722_v6, %v416_v3 }
 0x10a   : > { %771 = vst.msk [vmem:[%s1754_s4 + $0x28] sm:$0xff] %vm765_vm1, %v754_v7  ;;  %v692_v8 = vpop.f32.mrf.mxu2 }
 0x10b   : > { %v741_v10 = vpop.f32.mrf.mxu3 }
 0x10c   : > { %v742_v11 = vadd.f32 %v741_v10, %v692_v8  ;;  %v675_v12 = vpop.f32.mrf.mxu0 }
 0x10d   : > { %v724_v14 = vpop.f32.mrf.mxu1 }
 0x10e   : > { %v762_v15 = vadd.f32 %v742_v11, %v424_v9  ;;  %v725_v16 = vadd.f32 %v724_v14, %v675_v12 }
 0x110   : > { %779 = vst.msk [vmem:[%s1754_s4 + $0x68] sm:$0xff] %vm765_vm1, %v762_v15  ;;  %v755_v17 = vadd.f32 %v725_v16, %v417_v13 }
 0x112   : > { %772 = vst.msk [vmem:[%s1754_s4 + $0x30] sm:$0xff] %vm765_vm1, %v755_v17  ;;  %v695_v18 = vpop.f32.mrf.mxu2 }
 0x113   : > { %v744_v20 = vpop.f32.mrf.mxu3 }
 0x114   : > { %v745_v21 = vadd.f32 %v744_v20, %v695_v18  ;;  %v677_v22 = vpop.f32.mrf.mxu0 }
 0x115   : > { %v726_v24 = vpop.f32.mrf.mxu1 }
 0x116   : > { %v763_v25 = vadd.f32 %v745_v21, %v425_v19  ;;  %v727_v26 = vadd.f32 %v726_v24, %v677_v22 }
 0x118   : > { %780 = vst.msk [vmem:[%s1754_s4 + $0x70] sm:$0xff] %vm765_vm1, %v763_v25  ;;  %v756_v27 = vadd.f32 %v727_v26, %v418_v23 }
 0x11a   : > { %773 = vst.msk [vmem:[%s1754_s4 + $0x38] sm:$0xff] %vm765_vm1, %v756_v27  ;;  %v697_v28 = vpop.f32.mrf.mxu2 }
 0x11b   : > { %v746_v30 = vpop.f32.mrf.mxu3 }
 0x11c   : > { %v747_v31 = vadd.f32 %v746_v30, %v697_v28  ;;  %785 = sbr.rel (%p1138_p11) target bundleno = 313 (0x139), region = 82 }
 0x11e   : > { %v764_v32 = vadd.f32 %v747_v31, %v426_v29 }
 0x120   : > { %781 = vst.msk [vmem:[%s1754_s4 + $0x78] sm:$0xff] %vm765_vm1, %v764_v32 }
 0x121   : > { %v786_v33 = vld [vmem:[%s1754_s4] sm:$0xff]  ;;  %v787_v36 = vld [vmem:[%s1754_s4 + $0x8] sm:$0xff]  ;;  %v788_v39 = vld [vmem:[%s1754_s4 + $0x10] sm:$0xff] }
 0x122   : > { %v1233_v34 = vld [vmem:[%s1752_s2] ss:$0 sm:$0xff]  ;;  %v789_v40 = vld [vmem:[%s1754_s4 + $0x18] sm:$0xff]  ;;  %v791_v45 = vld [vmem:[%s1754_s4 + $0x28] sm:$0xff] }
 0x123   : > { %v1608_v35 = vld [vmem:[%s1753_s3] ss:$0 sm:$0xff]  ;;  %v806_v37 = vmul.f32 %v1233_v34, %v786_v33  ;;  %v807_v38 = vmul.f32 %v1233_v34, %v787_v36  ;;  %v808_v42 = vmul.f32 %v1233_v34, %v788_v39  ;;  %v809_v43 = vmul.f32 %v1233_v34, %v789_v40  ;;  %v792_v46 = vld [vmem:[%s1754_s4 + $0x30] sm:$0xff]  ;;  %v793_v47 = vld [vmem:[%s1754_s4 + $0x38] sm:$0xff] }
 0x124   : > { %v790_v41 = vld [vmem:[%s1754_s4 + $0x20] sm:$0xff]  ;;  %v811_v50 = vmul.f32 %v1233_v34, %v791_v45  ;;  %v812_v51 = vmul.f32 %v1233_v34, %v792_v46  ;;  %v813_v55 = vmul.f32 %v1233_v34, %v793_v47  ;;  %v795_v57 = vld [vmem:[%s1754_s4 + $0x48] sm:$0xff]  ;;  %v796_v62 = vld [vmem:[%s1754_s4 + $0x50] sm:$0xff] }
 0x125   : > { %v810_v44 = vmul.f32 %v1233_v34, %v790_v41  ;;  %v826_v48 = vadd.f32 %v1608_v35, %v806_v37  ;;  %v827_v49 = vadd.f32 %v1608_v35, %v807_v38  ;;  %v828_v52 = vadd.f32 %v1608_v35, %v808_v42  ;;  %v794_v56 = vld [vmem:[%s1754_s4 + $0x40] sm:$0xff]  ;;  %v797_v63 = vld [vmem:[%s1754_s4 + $0x58] sm:$0xff]  ;;  %v799_v4 = vld [vmem:[%s1754_s4 + $0x68] sm:$0xff] }
 0x126   : > { %v829_v53 = vadd.f32 %v1608_v35, %v809_v43  ;;  %v831_v60 = vadd.f32 %v1608_v35, %v811_v50  ;;  %v832_v61 = vadd.f32 %v1608_v35, %v812_v51  ;;  %v798_v0 = vld [vmem:[%s1754_s4 + $0x60] sm:$0xff]  ;;  %v833_v3 = vadd.f32 %v1608_v35, %v813_v55  ;;  %v800_v5 = vld [vmem:[%s1754_s4 + $0x70] sm:$0xff] }
 0x127   : > { %v830_v54 = vadd.f32 %v1608_v35, %v810_v44  ;;  %v842_v58 = vmax.f32 %v826_v48, 0.0  ;;  %v843_v59 = vmax.f32 %v827_v49, 0.0  ;;  %v844_v1 = vmax.f32 %v828_v52, 0.0  ;;  %v801_v10 = vld [vmem:[%s1754_s4 + $0x78] sm:$0xff] }
 0x128   : > { %v845_v2 = vmax.f32 %v829_v53, 0.0  ;;  %v847_v7 = vmax.f32 %v831_v60, 0.0  ;;  %v814_v8 = vmul.f32 %v1233_v34, %v794_v56  ;;  %v815_v9 = vmul.f32 %v1233_v34, %v795_v57 }
 0x129   : > { %858 = vst.msk [vmem:[%s1754_s4] sm:$0xff] %vm765_vm1, %v842_v58  ;;  %v846_v6 = vmax.f32 %v830_v54, 0.0  ;;  %v848_v11 = vmax.f32 %v832_v61, 0.0  ;;  %v816_v12 = vmul.f32 %v1233_v34, %v796_v62  ;;  %v817_v13 = vmul.f32 %v1233_v34, %v797_v63 }
 0x12a   : > { %859 = vst.msk [vmem:[%s1754_s4 + $0x8] sm:$0xff] %vm765_vm1, %v843_v59  ;;  %v818_v14 = vmul.f32 %v1233_v34, %v798_v0  ;;  %v834_v15 = vadd.f32 %v1608_v35, %v814_v8  ;;  %v835_v16 = vadd.f32 %v1608_v35, %v815_v9  ;;  %v819_v17 = vmul.f32 %v1233_v34, %v799_v4 }
 0x12b   : > { %860 = vst.msk [vmem:[%s1754_s4 + $0x10] sm:$0xff] %vm765_vm1, %v844_v1  ;;  %v820_v18 = vmul.f32 %v1233_v34, %v800_v5  ;;  %v849_v19 = vmax.f32 %v833_v3, 0.0  ;;  %v836_v20 = vadd.f32 %v1608_v35, %v816_v12  ;;  %v837_v21 = vadd.f32 %v1608_v35, %v817_v13 }
 0x12c   : > { %861 = vst.msk [vmem:[%s1754_s4 + $0x18] sm:$0xff] %vm765_vm1, %v845_v2  ;;  %v821_v22 = vmul.f32 %v1233_v34, %v801_v10  ;;  %v850_v23 = vmax.f32 %v834_v15, 0.0  ;;  %v838_v24 = vadd.f32 %v1608_v35, %v818_v14  ;;  %v851_v25 = vmax.f32 %v835_v16, 0.0 }
 0x12d   : > { %862 = vst.msk [vmem:[%s1754_s4 + $0x20] sm:$0xff] %vm765_vm1, %v846_v6  ;;  %v839_v26 = vadd.f32 %v1608_v35, %v819_v17  ;;  %v852_v27 = vmax.f32 %v836_v20, 0.0  ;;  %v840_v28 = vadd.f32 %v1608_v35, %v820_v18  ;;  %v853_v29 = vmax.f32 %v837_v21, 0.0 }
 0x12e   : > { %863 = vst.msk [vmem:[%s1754_s4 + $0x28] sm:$0xff] %vm765_vm1, %v847_v7  ;;  %v841_v30 = vadd.f32 %v1608_v35, %v821_v22  ;;  %v854_v31 = vmax.f32 %v838_v24, 0.0 }
 0x12f   : > { %864 = vst.msk [vmem:[%s1754_s4 + $0x30] sm:$0xff] %vm765_vm1, %v848_v11  ;;  %v855_v32 = vmax.f32 %v839_v26, 0.0  ;;  %v856_v33 = vmax.f32 %v840_v28, 0.0 }
 0x130   : > { %865 = vst.msk [vmem:[%s1754_s4 + $0x38] sm:$0xff] %vm765_vm1, %v849_v19  ;;  %v857_v34 = vmax.f32 %v841_v30, 0.0 }
 0x131   : > { %866 = vst.msk [vmem:[%s1754_s4 + $0x40] sm:$0xff] %vm765_vm1, %v850_v23 }
 0x132   : > { %867 = vst.msk [vmem:[%s1754_s4 + $0x48] sm:$0xff] %vm765_vm1, %v851_v25 }
 0x133   : > { %868 = vst.msk [vmem:[%s1754_s4 + $0x50] sm:$0xff] %vm765_vm1, %v852_v27 }
 0x134   : > { %869 = vst.msk [vmem:[%s1754_s4 + $0x58] sm:$0xff] %vm765_vm1, %v853_v29 }
 0x135   : > { %870 = vst.msk [vmem:[%s1754_s4 + $0x60] sm:$0xff] %vm765_vm1, %v854_v31 }
 0x136   : > { %871 = vst.msk [vmem:[%s1754_s4 + $0x68] sm:$0xff] %vm765_vm1, %v855_v32 }
 0x137   : > { %872 = vst.msk [vmem:[%s1754_s4 + $0x70] sm:$0xff] %vm765_vm1, %v856_v33 }
 0x138   : > { %873 = vst.msk [vmem:[%s1754_s4 + $0x78] sm:$0xff] %vm765_vm1, %v857_v34 }
 0x139 PF: > { %s14_s19 = sadd.s32 1, %s1273_s19   ;;  %s1755_s15 = smov %s1261_s16 }
 0x13a   : > { %p11_p12 = scmp.ge.s32.totalorder %s14_s19, 9   ;;  %s1756_s16 = smov %s1336_s23 }
 0x13b   : > { %s1757_s17 = smov %s1269_s18  ;;  %s1758_s18 = smov %s1760_s20 }
 0x13c   :  { %13 = sbr.rel (!%p11_p12) target bundleno = 3 (0x3), region = 126 }

// kernel: resnet10_forward.17
= control target key start
LH: loop header
LB: loop body
LE: loop exit
PB: predicated region body
PF: predicated region fallthrough
CT: control target
= control target key end

     0   :  { %s1417_s18 = smov 0   ;;  %s1419_s19 = smov 0   ;;  %s1932_s0 = inlined_call_operand.vmem [shape: bf16[128,1792], index: 0, kind: input, shape index: {}]   ;;  %s1933_s1 = inlined_call_operand.vmem [shape: bf16[1792,64], index: 1, kind: input, shape index: {}]   ;;  %s1934_s2 = inlined_call_operand.vmem [shape: f32[1,64], index: 2, kind: input, shape index: {}]   ;;  %s1935_s3 = inlined_call_operand.vmem [shape: f32[1,64], index: 3, kind: input, shape index: {}]   ;;  %s1936_s4 = inlined_call_operand.vmem [shape: f32[128,64], index: 4, kind: input, shape index: {}]   ;;  %s1937_s5 = inlined_call_operand.vmem [shape: f32[128,64], index: 5, kind: output, shape index: {}]  }
   0x1   :  { %s1421_s20 = smov 0   ;;  %s1423_s21 = smov 0  }
   0x2   :  { %s1425_s22 = smov 0  }
   0x3 LB: > { %s27_s23 = sadd.s32 1, %s1380_s21  ;;  %p50_p1 = scmp.ne.s32.totalorder %s1372_s19, %s1368_s18  ;;  %s1384_s22 = sphi %s1425_s22, %s15_s22   ;;  %s1380_s21 = sphi %s1423_s21, %s1941_s21   ;;  %s1376_s20 = sphi %s1421_s20, %s1940_s20   ;;  %s1372_s19 = sphi %s1419_s19, %s1939_s19   ;;  %s1368_s18 = sphi %s1417_s18, %s1938_s18  }
   0x4   : > { %p28_p0 = scmp.ge.s32.totalorder %s27_s23, 7  ;;  %p51_p2 = scmp.eq.s32.totalorder %s1384_s22, 0 }
   0x5   : > { %s43_s25 = sadd.s32 1, %s1372_s19  ;;  %p1112_p5 = scmp.ge.s32.totalorder %s1384_s22, 7 }
   0x6   : > { %s1943_s23 = smov (%p28_p0, %s27_s23), 0  ;;  %p52_p3 = por %p51_p2, %p50_p1 }
   0x7   : > { %s39_s24 = ssub.s32 %s1380_s21, %s1943_s23  ;;  %236 = sbr.rel (%p1112_p5) target bundleno = 32 (0x20), region = 28 }
   0x8   : > { %p41_p4 = scmp.eq.s32.totalorder %s39_s24, 0 }
   0xa   : > { %s1452_s26 = scalar_select %p41_p4, %s1372_s19, %s43_s25  }
   0xc   : > { %239 = sbr.rel (!%p52_p3) target bundleno = 32 (0x20), region = 32  ;;  %s241_s27 = sand.u32 (%p52_p3), 1, %s1372_s19  }
   0xd   : > { %s1254_s28 = sshll.u32 (%p52_p3), %s1380_s21, 3  ;;  %s1113_s29 = sshll.u32 (%p52_p3), %s241_s27, 7 }
   0xe   : > { %s1460_s7 = scalar_lea.vmem (%p52_p3), %s1932_s0, %s1254_s28  ;;  %s243_s8 = scalar_lea.vmem (%p52_p3), [#allocation2], %s1113_s29 }
   0xf   : > { %v308_v0 = vld [vmem:[%s1460_s7] sm:$0xff] (%p52_p3)  ;;  %v310_v1 = vld [vmem:[%s1460_s7 + $0x38] sm:$0xff] (%p52_p3)  ;;  %v312_v2 = vld [vmem:[%s1460_s7 + $0x70] sm:$0xff] (%p52_p3) }
  0x10   : > { %309 = vst [vmem:[%s243_s8] sm:$0xff] (%p52_p3), %v308_v0  ;;  %v314_v3 = vld [vmem:[%s1460_s7 + $0xa8] sm:$0xff] (%p52_p3)  ;;  %v316_v4 = vld [vmem:[%s1460_s7 + $0xe0] sm:$0xff] (%p52_p3)  ;;  %v318_v5 = vld [vmem:[%s1460_s7 + $0x118] sm:$0xff] (%p52_p3) }
  0x11   : > { %311 = vst [vmem:[%s243_s8 + $0x8] sm:$0xff] %v310_v1  ;;  %v320_v6 = vld [vmem:[%s1460_s7 + $0x150] sm:$0xff]  ;;  %v322_v7 = vld [vmem:[%s1460_s7 + $0x188] sm:$0xff]  ;;  %v324_v8 = vld [vmem:[%s1460_s7 + $0x1c0] sm:$0xff] }
  0x12   : > { %313 = vst [vmem:[%s243_s8 + $0x10] sm:$0xff] %v312_v2  ;;  %v326_v9 = vld [vmem:[%s1460_s7 + $0x1f8] sm:$0xff]  ;;  %v328_v10 = vld [vmem:[%s1460_s7 + $0x230] sm:$0xff]  ;;  %v330_v11 = vld [vmem:[%s1460_s7 + $0x268] sm:$0xff] }
  0x13   : > { %315 = vst [vmem:[%s243_s8 + $0x18] sm:$0xff] %v314_v3  ;;  %v332_v12 = vld [vmem:[%s1460_s7 + $0x2a0] sm:$0xff]  ;;  %v334_v13 = vld [vmem:[%s1460_s7 + $0x2d8] sm:$0xff]  ;;  %v336_v14 = vld [vmem:[%s1460_s7 + $0x310] sm:$0xff] }
  0x14   : > { %317 = vst [vmem:[%s243_s8 + $0x20] sm:$0xff] %v316_v4  ;;  %v338_v15 = vld [vmem:[%s1460_s7 + $0x348] sm:$0xff] }
  0x15   : > { %319 = vst [vmem:[%s243_s8 + $0x28] sm:$0xff] %v318_v5 }
  0x16   : > { %321 = vst [vmem:[%s243_s8 + $0x30] sm:$0xff] %v320_v6 }
  0x17   : > { %323 = vst [vmem:[%s243_s8 + $0x38] sm:$0xff] %v322_v7 }
  0x18   : > { %325 = vst [vmem:[%s243_s8 + $0x40] sm:$0xff] %v324_v8 }
  0x19   : > { %327 = vst [vmem:[%s243_s8 + $0x48] sm:$0xff] %v326_v9 }
  0x1a   : > { %329 = vst [vmem:[%s243_s8 + $0x50] sm:$0xff] %v328_v10 }
  0x1b   : > { %331 = vst [vmem:[%s243_s8 + $0x58] sm:$0xff] %v330_v11 }
  0x1c   : > { %333 = vst [vmem:[%s243_s8 + $0x60] sm:$0xff] %v332_v12 }
  0x1d   : > { %335 = vst [vmem:[%s243_s8 + $0x68] sm:$0xff] %v334_v13 }
  0x1e   : > { %337 = vst [vmem:[%s243_s8 + $0x70] sm:$0xff] %v336_v14 }
  0x1f   : > { %339 = vst [vmem:[%s243_s8 + $0x78] sm:$0xff] %v338_v15 }
  0x20 PF: > { %p1116_p6 = scmp.ge.s32.totalorder %s1384_s22, 1  ;;  %p356_p7 = scmp.lt.s32.totalorder %s1384_s22, 8 }
  0x22   : > { %p357_p8 = pnand %p1116_p6, %p356_p7 }
  0x23   : > { %s363_s9 = sand.u32 (!%p357_p8), 1, %s1368_s18   ;;  %s1118_s10 = sshll.u32 (!%p357_p8), %s1376_s20, 5 }
  0x24   : > { %360 = sbr.rel (%p357_p8) target bundleno = 315 (0x13b), region = 74  ;;  %s1117_s11 = sshll.u32 (!%p357_p8), %s363_s9, 7 }
  0x25   : > { %p418_p9 = scmp.lt.s32.totalorder (!%p357_p8), %s1118_s10, 223  ;;  %s1487_s16 = scalar_lea.vmem (!%p357_p8), [#allocation2], %s1117_s11 }
  0x26   : > { %p1120_p10 = scmp.ne.s32.totalorder (!%p357_p8), %s1376_s20, 0 }
  0x29   : > { %s1945_s10 = smov (!%p418_p9, %s1118_s10), 223  ;;  %453 = sbr.rel (%p1120_p10) target bundleno = 63 (0x3f), region = 82 }
  0x2a   : > { %s1119_s12 = sshll.u32 %s1945_s10, 2 }
  0x2b   : > { %s1485_s15 = scalar_lea.vmem %s1933_s1, %s1119_s12 }
  0x2e   : > { %vm454_vm0 = vcmask 523264   ;;  %v1386_v16 = vmov 0.0  }
  0x2f   : > { %455 = vst.msk [vmem:[%s1937_s5] sm:$0xff] %vm454_vm0, %v1386_v16 }
  0x30   : > { %456 = vst.msk [vmem:[%s1937_s5 + $0x8] sm:$0xff] %vm454_vm0, %v1386_v16 }
  0x31   : > { %457 = vst.msk [vmem:[%s1937_s5 + $0x10] sm:$0xff] %vm454_vm0, %v1386_v16 }
  0x32   : > { %458 = vst.msk [vmem:[%s1937_s5 + $0x18] sm:$0xff] %vm454_vm0, %v1386_v16 }
  0x33   : > { %459 = vst.msk [vmem:[%s1937_s5 + $0x20] sm:$0xff] %vm454_vm0, %v1386_v16 }
  0x34   : > { %460 = vst.msk [vmem:[%s1937_s5 + $0x28] sm:$0xff] %vm454_vm0, %v1386_v16 }
  0x35   : > { %461 = vst.msk [vmem:[%s1937_s5 + $0x30] sm:$0xff] %vm454_vm0, %v1386_v16 }
  0x36   : > { %462 = vst.msk [vmem:[%s1937_s5 + $0x38] sm:$0xff] %vm454_vm0, %v1386_v16 }
  0x37   : > { %463 = vst.msk [vmem:[%s1937_s5 + $0x40] sm:$0xff] %vm454_vm0, %v1386_v16 }
  0x38   : > { %464 = vst.msk [vmem:[%s1937_s5 + $0x48] sm:$0xff] %vm454_vm0, %v1386_v16 }
  0x39   : > { %465 = vst.msk [vmem:[%s1937_s5 + $0x50] sm:$0xff] %vm454_vm0, %v1386_v16 }
  0x3a   : > { %466 = vst.msk [vmem:[%s1937_s5 + $0x58] sm:$0xff] %vm454_vm0, %v1386_v16 }
  0x3b   : > { %467 = vst.msk [vmem:[%s1937_s5 + $0x60] sm:$0xff] %vm454_vm0, %v1386_v16 }
  0x3c   : > { %468 = vst.msk [vmem:[%s1937_s5 + $0x68] sm:$0xff] %vm454_vm0, %v1386_v16 }
  0x3d   : > { %469 = vst.msk [vmem:[%s1937_s5 + $0x70] sm:$0xff] %vm454_vm0, %v1386_v16 }
  0x3e   : > { %470 = vst.msk [vmem:[%s1937_s5 + $0x78] sm:$0xff] %vm454_vm0, %v1386_v16 }
  0x3f PF: > { %v1278_v17 = vld [vmem:[%s1485_s15 + $0x38] sm:$0xff]  ;;  %v1277_v19 = vld [vmem:[%s1485_s15 + $0x30] sm:$0xff]  ;;  %v1276_v21 = vld [vmem:[%s1485_s15 + $0x28] sm:$0xff]  ;;  %vm825_vm1 = vcmask 523264   ;;  %p1249_p11 = scmp.ne.s32.totalorder %s1376_s20, 6 }
  0x40   : > { %v1286_v18 = vld [vmem:[%s1485_s15 + $0x78] sm:$0xff]  ;;  %711 = vmatpush.bf16.msra.mxu0 %v1278_v17  ;;  %1287 = vmatpush.bf16.msra.mxu2 %v1278_v17  ;;  %v1285_v20 = vld [vmem:[%s1485_s15 + $0x70] sm:$0xff]  ;;  %v1284_v22 = vld [vmem:[%s1485_s15 + $0x68] sm:$0xff] }
  0x41   : > { %760 = vmatpush.bf16.msra.mxu1 %v1286_v18  ;;  %1295 = vmatpush.bf16.msra.mxu3 %v1286_v18  ;;  %v1275_v23 = vld [vmem:[%s1485_s15 + $0x20] sm:$0xff]  ;;  %v1274_v25 = vld [vmem:[%s1485_s15 + $0x18] sm:$0xff]  ;;  %v1273_v27 = vld [vmem:[%s1485_s15 + $0x10] sm:$0xff] }
  0x42   : > { %v1283_v24 = vld [vmem:[%s1485_s15 + $0x60] sm:$0xff]  ;;  %v1282_v26 = vld [vmem:[%s1485_s15 + $0x58] sm:$0xff]  ;;  %v1281_v28 = vld [vmem:[%s1485_s15 + $0x50] sm:$0xff] }
  0x43   : > { %v1272_v29 = vld [vmem:[%s1485_s15 + $0x8] sm:$0xff]  ;;  %v1271_v31 = vld [vmem:[%s1485_s15] sm:$0xff]  ;;  %v1131_v45 = vld [vmem:[%s1487_s16 + $0x10] sm:$0xf] }
  0x44   : > { %712 = vmatpush.bf16.msra.mxu0 %v1277_v19  ;;  %1288 = vmatpush.bf16.msra.mxu2 %v1277_v19  ;;  %v1280_v30 = vld [vmem:[%s1485_s15 + $0x48] sm:$0xff]  ;;  %v1279_v32 = vld [vmem:[%s1485_s15 + $0x40] sm:$0xff]  ;;  %v1258_v46 = vld [vmem:[%s1487_s16 + $0x14] sm:$0xf0] }
  0x45   : > { %761 = vmatpush.bf16.msra.mxu1 %v1285_v20  ;;  %1296 = vmatpush.bf16.msra.mxu3 %v1285_v20  ;;  %v1123_v33 = vld [vmem:[%s1487_s16] sm:$0xf]  ;;  %v1256_v34 = vld [vmem:[%s1487_s16 + $0x4] sm:$0xf0]  ;;  %v1255_v37 = vld [vmem:[%s1487_s16 + $0x4] sm:$0xf]  ;;  %v1132_v53 = vor.u32 %v1258_v46, %v1131_v45 }
  0x46   : > { %v1155_v35 = vld [vmem:[%s1487_s16 + $0x40] sm:$0xf]  ;;  %v1264_v36 = vld [vmem:[%s1487_s16 + $0x44] sm:$0xf0]  ;;  %v1125_v38 = vld [vmem:[%s1487_s16 + $0x8] sm:$0xf0]  ;;  %v1124_v41 = vor.u32 %v1256_v34, %v1123_v33 }
  0x47   : > { %v1263_v39 = vld [vmem:[%s1487_s16 + $0x44] sm:$0xf]  ;;  %v1157_v40 = vld [vmem:[%s1487_s16 + $0x48] sm:$0xf0]  ;;  %v1156_v42 = vor.u32 %v1264_v36, %v1155_v35  ;;  %v1128_v43 = vor.u32 %v1255_v37, %v1125_v38  ;;  %v1163_v47 = vld [vmem:[%s1487_s16 + $0x50] sm:$0xf] }
  0x48   : > { %713 = vmatpush.bf16.msra.mxu0 %v1276_v21  ;;  %1289 = vmatpush.bf16.msra.mxu2 %v1276_v21  ;;  %v1160_v44 = vor.u32 %v1263_v39, %v1157_v40  ;;  %v1266_v48 = vld [vmem:[%s1487_s16 + $0x54] sm:$0xf0]  ;;  %v1257_v49 = vld [vmem:[%s1487_s16 + $0x14] sm:$0xf]  ;;  %v1133_v50 = vld [vmem:[%s1487_s16 + $0x18] sm:$0xf0] }
  0x49   : > { %762 = vmatpush.bf16.msra.mxu1 %v1284_v22  ;;  %1297 = vmatpush.bf16.msra.mxu3 %v1284_v22  ;;  %v1265_v51 = vld [vmem:[%s1487_s16 + $0x54] sm:$0xf]  ;;  %v1165_v52 = vld [vmem:[%s1487_s16 + $0x58] sm:$0xf0]  ;;  %v1164_v54 = vor.u32 %v1266_v48, %v1163_v47  ;;  %v1136_v55 = vor.u32 %v1257_v49, %v1133_v50  ;;  %v1139_v57 = vld [vmem:[%s1487_s16 + $0x20] sm:$0xf] }
  0x4a   : > { %v1168_v56 = vor.u32 %v1265_v51, %v1165_v52  ;;  %v1260_v58 = vld [vmem:[%s1487_s16 + $0x24] sm:$0xf0]  ;;  %v1171_v59 = vld [vmem:[%s1487_s16 + $0x60] sm:$0xf]  ;;  %v1259_v61 = vld [vmem:[%s1487_s16 + $0x24] sm:$0xf] }
  0x4b   : > { %v1268_v60 = vld [vmem:[%s1487_s16 + $0x64] sm:$0xf0]  ;;  %v1141_v62 = vld [vmem:[%s1487_s16 + $0x28] sm:$0xf0]  ;;  %v1267_v63 = vld [vmem:[%s1487_s16 + $0x64] sm:$0xf]  ;;  %v1140_v1 = vor.u32 %v1260_v58, %v1139_v57 }
  0x4c   : > { %714 = vmatpush.bf16.msra.mxu0 %v1275_v23  ;;  %1290 = vmatpush.bf16.msra.mxu2 %v1275_v23  ;;  %v1173_v0 = vld [vmem:[%s1487_s16 + $0x68] sm:$0xf0]  ;;  %v1172_v2 = vor.u32 %v1268_v60, %v1171_v59  ;;  %v1144_v3 = vor.u32 %v1259_v61, %v1141_v62  ;;  %v1147_v5 = vld [vmem:[%s1487_s16 + $0x30] sm:$0xf]  ;;  %v1262_v6 = vld [vmem:[%s1487_s16 + $0x34] sm:$0xf0] }
  0x4d   : > { %763 = vmatpush.bf16.msra.mxu1 %v1283_v24  ;;  %1298 = vmatpush.bf16.msra.mxu3 %v1283_v24  ;;  %v1176_v4 = vor.u32 %v1267_v63, %v1173_v0  ;;  %v1179_v7 = vld [vmem:[%s1487_s16 + $0x70] sm:$0xf]  ;;  %v1270_v8 = vld [vmem:[%s1487_s16 + $0x74] sm:$0xf0]  ;;  %v1261_v9 = vld [vmem:[%s1487_s16 + $0x34] sm:$0xf]  ;;  %v1148_v13 = vor.u32 %v1262_v6, %v1147_v5 }
  0x4e   : > { %v1149_v10 = vld [vmem:[%s1487_s16 + $0x38] sm:$0xf0]  ;;  %v1269_v11 = vld [vmem:[%s1487_s16 + $0x74] sm:$0xf]  ;;  %v1180_v14 = vor.u32 %v1270_v8, %v1179_v7  ;;  %v471_v18 = vld [vmem:[%s1937_s5] sm:$0xff] }
  0x4f   : > { %v1181_v12 = vld [vmem:[%s1487_s16 + $0x78] sm:$0xf0]  ;;  %v1152_v15 = vor.u32 %v1261_v9, %v1149_v10  ;;  %v479_v23 = vld [vmem:[%s1937_s5 + $0x40] sm:$0xff]  ;;  %v480_v33 = vld [vmem:[%s1937_s5 + $0x48] sm:$0xff] }
  0x50   : > { %715 = vmatpush.bf16.msra.mxu0 %v1274_v25  ;;  %1291 = vmatpush.bf16.msra.mxu2 %v1274_v25  ;;  %v1184_v16 = vor.u32 %v1269_v11, %v1181_v12  ;;  %v473_v37 = vld [vmem:[%s1937_s5 + $0x10] sm:$0xff]  ;;  %v474_v47 = vld [vmem:[%s1937_s5 + $0x18] sm:$0xff]  ;;  %v475_v57 = vld [vmem:[%s1937_s5 + $0x20] sm:$0xff] }
  0x51   : > { %764 = vmatpush.bf16.msra.mxu1 %v1282_v26  ;;  %1299 = vmatpush.bf16.msra.mxu3 %v1282_v26  ;;  %v483_v63 = vld [vmem:[%s1937_s5 + $0x60] sm:$0xff]  ;;  %v484_v9 = vld [vmem:[%s1937_s5 + $0x68] sm:$0xff] }
  0x54   : > { %716 = vmatpush.bf16.msra.mxu0 %v1273_v27  ;;  %1292 = vmatpush.bf16.msra.mxu2 %v1273_v27  ;;  %v472_v27 = vld [vmem:[%s1937_s5 + $0x8] sm:$0xff] }
  0x55   : > { %765 = vmatpush.bf16.msra.mxu1 %v1281_v28  ;;  %1300 = vmatpush.bf16.msra.mxu3 %v1281_v28 }
  0x58   : > { %717 = vmatpush.bf16.msra.mxu0 %v1272_v29  ;;  %1293 = vmatpush.bf16.msra.mxu2 %v1272_v29 }
  0x59   : > { %766 = vmatpush.bf16.msra.mxu1 %v1280_v30  ;;  %1301 = vmatpush.bf16.msra.mxu3 %v1280_v30 }
  0x5c   : > { %718 = vmatpush.bf16.msra.mxu0 %v1271_v31  ;;  %1294 = vmatpush.bf16.msra.mxu2 %v1271_v31 }
  0x5d   : > { %767 = vmatpush.bf16.msra.mxu1 %v1279_v32  ;;  %1302 = vmatpush.bf16.msra.mxu3 %v1279_v32 }
  0x5f   : > { %719 = vmatmul.bf16.vlgmr.msra.gmra.mxu0 %v1124_v41  ;;  %739 = vmatmul.bf16.vlgmr.msra.gmra.mxu2 %v1156_v42 }
  0x60   : > { %768 = vmatmul.bf16.vlgmr.msra.gmra.mxu1 %v1128_v43  ;;  %788 = vmatmul.bf16.vlgmr.msra.gmra.mxu3 %v1160_v44  ;;  %v481_v43 = vld [vmem:[%s1937_s5 + $0x50] sm:$0xff] }
  0x6f   : > { %724 = vmatmul.bf16.gmra.mxu0 %v1132_v53  ;;  %744 = vmatmul.bf16.gmra.mxu2 %v1164_v54  ;;  %v482_v53 = vld [vmem:[%s1937_s5 + $0x58] sm:$0xff] }
  0x70   : > { %773 = vmatmul.bf16.gmra.mxu1 %v1136_v55  ;;  %793 = vmatmul.bf16.gmra.mxu3 %v1168_v56 }
  0x7f   : > { %729 = vmatmul.bf16.gmra.mxu0 %v1140_v1  ;;  %749 = vmatmul.bf16.gmra.mxu2 %v1172_v2 }
  0x80   : > { %778 = vmatmul.bf16.gmra.mxu1 %v1144_v3  ;;  %798 = vmatmul.bf16.gmra.mxu3 %v1176_v4  ;;  %v476_v3 = vld [vmem:[%s1937_s5 + $0x28] sm:$0xff] }
  0x8f   : > { %734 = vmatmul.bf16.gmra.mxu0 %v1148_v13  ;;  %754 = vmatmul.bf16.gmra.mxu2 %v1180_v14  ;;  %v477_v13 = vld [vmem:[%s1937_s5 + $0x30] sm:$0xff] }
  0x90   : > { %783 = vmatmul.bf16.gmra.mxu1 %v1152_v15  ;;  %803 = vmatmul.bf16.gmra.mxu3 %v1184_v16 }
  0xdc   : > { %v720_v17 = vpop.f32.mrf.mxu0 }
  0xdd   : > { %v769_v19 = vpop.f32.mrf.mxu1 }
  0xde   : > { %v770_v20 = vadd.f32 %v769_v19, %v720_v17  ;;  %v485_v19 = vld [vmem:[%s1937_s5 + $0x70] sm:$0xff] }
  0xe0   : > { %v809_v21 = vadd.f32 %v770_v20, %v471_v18 }
  0xe2   : > { %826 = vst.msk [vmem:[%s1937_s5] sm:$0xff] %vm825_vm1, %v809_v21  ;;  %v740_v22 = vpop.f32.mrf.mxu2 }
  0xe3   : > { %v789_v24 = vpop.f32.mrf.mxu3 }
  0xe4   : > { %v790_v25 = vadd.f32 %v789_v24, %v740_v22  ;;  %v722_v26 = vpop.f32.mrf.mxu0 }
  0xe5   : > { %v771_v28 = vpop.f32.mrf.mxu1 }
  0xe6   : > { %v817_v29 = vadd.f32 %v790_v25, %v479_v23  ;;  %v772_v30 = vadd.f32 %v771_v28, %v722_v26  ;;  %v478_v23 = vld [vmem:[%s1937_s5 + $0x38] sm:$0xff] }
  0xe8   : > { %834 = vst.msk [vmem:[%s1937_s5 + $0x40] sm:$0xff] %vm825_vm1, %v817_v29  ;;  %v810_v31 = vadd.f32 %v772_v30, %v472_v27  ;;  %v486_v29 = vld [vmem:[%s1937_s5 + $0x78] sm:$0xff] }
  0xea   : > { %827 = vst.msk [vmem:[%s1937_s5 + $0x8] sm:$0xff] %vm825_vm1, %v810_v31  ;;  %v742_v32 = vpop.f32.mrf.mxu2 }
  0xeb   : > { %v791_v34 = vpop.f32.mrf.mxu3 }
  0xec   : > { %v792_v35 = vadd.f32 %v791_v34, %v742_v32  ;;  %v725_v36 = vpop.f32.mrf.mxu0 }
  0xed   : > { %v774_v38 = vpop.f32.mrf.mxu1 }
  0xee   : > { %v818_v39 = vadd.f32 %v792_v35, %v480_v33  ;;  %v775_v40 = vadd.f32 %v774_v38, %v725_v36 }
  0xf0   : > { %835 = vst.msk [vmem:[%s1937_s5 + $0x48] sm:$0xff] %vm825_vm1, %v818_v39  ;;  %v811_v41 = vadd.f32 %v775_v40, %v473_v37 }
  0xf2   : > { %828 = vst.msk [vmem:[%s1937_s5 + $0x10] sm:$0xff] %vm825_vm1, %v811_v41  ;;  %v745_v42 = vpop.f32.mrf.mxu2 }
  0xf3   : > { %v794_v44 = vpop.f32.mrf.mxu3 }
  0xf4   : > { %v795_v45 = vadd.f32 %v794_v44, %v745_v42  ;;  %v727_v46 = vpop.f32.mrf.mxu0 }
  0xf5   : > { %v776_v48 = vpop.f32.mrf.mxu1 }
  0xf6   : > { %v819_v49 = vadd.f32 %v795_v45, %v481_v43  ;;  %v777_v50 = vadd.f32 %v776_v48, %v727_v46 }
  0xf8   : > { %836 = vst.msk [vmem:[%s1937_s5 + $0x50] sm:$0xff] %vm825_vm1, %v819_v49  ;;  %v812_v51 = vadd.f32 %v777_v50, %v474_v47 }
  0xfa   : > { %829 = vst.msk [vmem:[%s1937_s5 + $0x18] sm:$0xff] %vm825_vm1, %v812_v51  ;;  %v747_v52 = vpop.f32.mrf.mxu2 }
  0xfb   : > { %v796_v54 = vpop.f32.mrf.mxu3 }
  0xfc   : > { %v797_v55 = vadd.f32 %v796_v54, %v747_v52  ;;  %v730_v56 = vpop.f32.mrf.mxu0 }
  0xfd   : > { %v779_v58 = vpop.f32.mrf.mxu1 }
  0xfe   : > { %v820_v59 = vadd.f32 %v797_v55, %v482_v53  ;;  %v780_v60 = vadd.f32 %v779_v58, %v730_v56 }
 0x100   : > { %837 = vst.msk [vmem:[%s1937_s5 + $0x58] sm:$0xff] %vm825_vm1, %v820_v59  ;;  %v813_v61 = vadd.f32 %v780_v60, %v475_v57 }
 0x102   : > { %830 = vst.msk [vmem:[%s1937_s5 + $0x20] sm:$0xff] %vm825_vm1, %v813_v61  ;;  %v750_v62 = vpop.f32.mrf.mxu2 }
 0x103   : > { %v799_v0 = vpop.f32.mrf.mxu3 }
 0x104   : > { %v800_v1 = vadd.f32 %v799_v0, %v750_v62  ;;  %v732_v2 = vpop.f32.mrf.mxu0 }
 0x105   : > { %v781_v4 = vpop.f32.mrf.mxu1 }
 0x106   : > { %v821_v5 = vadd.f32 %v800_v1, %v483_v63  ;;  %v782_v6 = vadd.f32 %v781_v4, %v732_v2 }
 0x108   : > { %838 = vst.msk [vmem:[%s1937_s5 + $0x60] sm:$0xff] %vm825_vm1, %v821_v5  ;;  %v814_v7 = vadd.f32 %v782_v6, %v476_v3 }
 0x10a   : > { %831 = vst.msk [vmem:[%s1937_s5 + $0x28] sm:$0xff] %vm825_vm1, %v814_v7  ;;  %v752_v8 = vpop.f32.mrf.mxu2 }
 0x10b   : > { %v801_v10 = vpop.f32.mrf.mxu3 }
 0x10c   : > { %v802_v11 = vadd.f32 %v801_v10, %v752_v8  ;;  %v735_v12 = vpop.f32.mrf.mxu0 }
 0x10d   : > { %v784_v14 = vpop.f32.mrf.mxu1 }
 0x10e   : > { %v822_v15 = vadd.f32 %v802_v11, %v484_v9  ;;  %v785_v16 = vadd.f32 %v784_v14, %v735_v12 }
 0x110   : > { %839 = vst.msk [vmem:[%s1937_s5 + $0x68] sm:$0xff] %vm825_vm1, %v822_v15  ;;  %v815_v17 = vadd.f32 %v785_v16, %v477_v13 }
 0x112   : > { %832 = vst.msk [vmem:[%s1937_s5 + $0x30] sm:$0xff] %vm825_vm1, %v815_v17  ;;  %v755_v18 = vpop.f32.mrf.mxu2 }
 0x113   : > { %v804_v20 = vpop.f32.mrf.mxu3 }
 0x114   : > { %v805_v21 = vadd.f32 %v804_v20, %v755_v18  ;;  %v737_v22 = vpop.f32.mrf.mxu0 }
 0x115   : > { %v786_v24 = vpop.f32.mrf.mxu1 }
 0x116   : > { %v823_v25 = vadd.f32 %v805_v21, %v485_v19  ;;  %v787_v26 = vadd.f32 %v786_v24, %v737_v22 }
 0x118   : > { %840 = vst.msk [vmem:[%s1937_s5 + $0x70] sm:$0xff] %vm825_vm1, %v823_v25  ;;  %v816_v27 = vadd.f32 %v787_v26, %v478_v23 }
 0x11a   : > { %833 = vst.msk [vmem:[%s1937_s5 + $0x38] sm:$0xff] %vm825_vm1, %v816_v27  ;;  %v757_v28 = vpop.f32.mrf.mxu2 }
 0x11b   : > { %v806_v30 = vpop.f32.mrf.mxu3 }
 0x11c   : > { %v807_v31 = vadd.f32 %v806_v30, %v757_v28  ;;  %845 = sbr.rel (%p1249_p11) target bundleno = 315 (0x13b), region = 86 }
 0x11e   : > { %v824_v32 = vadd.f32 %v807_v31, %v486_v29 }
 0x120   : > { %841 = vst.msk [vmem:[%s1937_s5 + $0x78] sm:$0xff] %vm825_vm1, %v824_v32 }
 0x121   : > { %v846_v33 = vld [vmem:[%s1937_s5] sm:$0xff]  ;;  %v847_v37 = vld [vmem:[%s1937_s5 + $0x8] sm:$0xff]  ;;  %v848_v38 = vld [vmem:[%s1937_s5 + $0x10] sm:$0xff] }
 0x122   : > { %v1721_v34 = vld [vmem:[%s1934_s2] ss:$0 sm:$0xff]  ;;  %v903_v41 = vld [vmem:[%s1936_s4 + $0x8] sm:$0xff]  ;;  %v849_v43 = vld [vmem:[%s1937_s5 + $0x18] sm:$0xff] }
 0x123   : > { %v1726_v35 = vld [vmem:[%s1935_s3] ss:$0 sm:$0xff]  ;;  %v866_v36 = vmul.f32 %v1721_v34, %v846_v33  ;;  %v867_v40 = vmul.f32 %v1721_v34, %v847_v37  ;;  %v868_v42 = vmul.f32 %v1721_v34, %v848_v38  ;;  %v904_v45 = vld [vmem:[%s1936_s4 + $0x10] sm:$0xff]  ;;  %v869_v46 = vmul.f32 %v1721_v34, %v849_v43  ;;  %v851_v48 = vld [vmem:[%s1937_s5 + $0x28] sm:$0xff] }
 0x124   : > { %v902_v39 = vld [vmem:[%s1936_s4] sm:$0xff]  ;;  %v905_v51 = vld [vmem:[%s1936_s4 + $0x18] sm:$0xff]  ;;  %v871_v53 = vmul.f32 %v1721_v34, %v851_v48  ;;  %v852_v54 = vld [vmem:[%s1937_s5 + $0x30] sm:$0xff] }
 0x125   : > { %v886_v44 = vadd.f32 %v1726_v35, %v866_v36  ;;  %v850_v47 = vld [vmem:[%s1937_s5 + $0x20] sm:$0xff]  ;;  %v887_v49 = vadd.f32 %v1726_v35, %v867_v40  ;;  %v888_v50 = vadd.f32 %v1726_v35, %v868_v42  ;;  %v889_v56 = vadd.f32 %v1726_v35, %v869_v46  ;;  %v907_v58 = vld [vmem:[%s1936_s4 + $0x28] sm:$0xff]  ;;  %v853_v60 = vld [vmem:[%s1937_s5 + $0x38] sm:$0xff] }
 0x126   : > { %v870_v52 = vmul.f32 %v1721_v34, %v850_v47  ;;  %v906_v57 = vld [vmem:[%s1936_s4 + $0x20] sm:$0xff]  ;;  %v872_v59 = vmul.f32 %v1721_v34, %v852_v54  ;;  %v891_v0 = vadd.f32 %v1726_v35, %v871_v53  ;;  %v908_v1 = vld [vmem:[%s1936_s4 + $0x30] sm:$0xff]  ;;  %v873_v6 = vmul.f32 %v1721_v34, %v853_v60  ;;  %v855_v7 = vld [vmem:[%s1937_s5 + $0x48] sm:$0xff] }
 0x127   : > { %v918_v55 = vadd.f32 %v902_v39, %v886_v44  ;;  %v919_v61 = vadd.f32 %v903_v41, %v887_v49  ;;  %v920_v62 = vadd.f32 %v904_v45, %v888_v50  ;;  %v854_v2 = vld [vmem:[%s1937_s5 + $0x40] sm:$0xff]  ;;  %v921_v4 = vadd.f32 %v905_v51, %v889_v56  ;;  %v856_v8 = vld [vmem:[%s1937_s5 + $0x50] sm:$0xff]  ;;  %v909_v13 = vld [vmem:[%s1936_s4 + $0x38] sm:$0xff] }
 0x128   : > { %v890_v63 = vadd.f32 %v1726_v35, %v870_v52  ;;  %v892_v5 = vadd.f32 %v1726_v35, %v872_v59  ;;  %v923_v12 = vadd.f32 %v907_v58, %v891_v0  ;;  %v857_v14 = vld [vmem:[%s1937_s5 + $0x58] sm:$0xff]  ;;  %v893_v17 = vadd.f32 %v1726_v35, %v873_v6  ;;  %v858_v19 = vld [vmem:[%s1937_s5 + $0x60] sm:$0xff]  ;;  %v859_v20 = vld [vmem:[%s1937_s5 + $0x68] sm:$0xff] }
 0x129   : > { %v934_v3 = vmax.f32 %v918_v55, 0.0  ;;  %v935_v9 = vmax.f32 %v919_v61, 0.0  ;;  %v936_v10 = vmax.f32 %v920_v62, 0.0  ;;  %v937_v15 = vmax.f32 %v921_v4, 0.0  ;;  %v910_v23 = vld [vmem:[%s1936_s4 + $0x40] sm:$0xff]  ;;  %v860_v26 = vld [vmem:[%s1937_s5 + $0x70] sm:$0xff] }
 0x12a   : > { %v922_v11 = vadd.f32 %v906_v57, %v890_v63  ;;  %v924_v16 = vadd.f32 %v908_v1, %v892_v5  ;;  %v874_v18 = vmul.f32 %v1721_v34, %v854_v2  ;;  %v939_v22 = vmax.f32 %v923_v12, 0.0  ;;  %v911_v30 = vld [vmem:[%s1936_s4 + $0x48] sm:$0xff]  ;;  %v912_v31 = vld [vmem:[%s1936_s4 + $0x50] sm:$0xff]  ;;  %v913_v37 = vld [vmem:[%s1936_s4 + $0x58] sm:$0xff] }
 0x12b   : > { %950 = vst.msk [vmem:[%s1937_s5] sm:$0xff] %vm825_vm1, %v934_v3  ;;  %v875_v24 = vmul.f32 %v1721_v34, %v855_v7  ;;  %v876_v25 = vmul.f32 %v1721_v34, %v856_v8  ;;  %v925_v28 = vadd.f32 %v909_v13, %v893_v17  ;;  %v877_v32 = vmul.f32 %v1721_v34, %v857_v14  ;;  %v861_v40 = vld [vmem:[%s1937_s5 + $0x78] sm:$0xff]  ;;  %v914_v44 = vld [vmem:[%s1936_s4 + $0x60] sm:$0xff]  ;;  %v915_v45 = vld [vmem:[%s1936_s4 + $0x68] sm:$0xff] }
 0x12c   : > { %951 = vst.msk [vmem:[%s1937_s5 + $0x8] sm:$0xff] %vm825_vm1, %v935_v9  ;;  %v938_v21 = vmax.f32 %v922_v11, 0.0  ;;  %v940_v27 = vmax.f32 %v924_v16, 0.0  ;;  %v894_v29 = vadd.f32 %v1726_v35, %v874_v18  ;;  %v878_v38 = vmul.f32 %v1721_v34, %v858_v19  ;;  %v916_v51 = vld [vmem:[%s1936_s4 + $0x70] sm:$0xff]  ;;  %v917_v60 = vld [vmem:[%s1936_s4 + $0x78] sm:$0xff] }
 0x12d   : > { %952 = vst.msk [vmem:[%s1937_s5 + $0x10] sm:$0xff] %vm825_vm1, %v936_v10  ;;  %v895_v33 = vadd.f32 %v1726_v35, %v875_v24  ;;  %v896_v36 = vadd.f32 %v1726_v35, %v876_v25  ;;  %v879_v39 = vmul.f32 %v1721_v34, %v859_v20  ;;  %v941_v41 = vmax.f32 %v925_v28, 0.0 }
 0x12e   : > { %953 = vst.msk [vmem:[%s1937_s5 + $0x18] sm:$0xff] %vm825_vm1, %v937_v15  ;;  %v926_v42 = vadd.f32 %v910_v23, %v894_v29  ;;  %v897_v43 = vadd.f32 %v1726_v35, %v877_v32  ;;  %v880_v46 = vmul.f32 %v1721_v34, %v860_v26  ;;  %v898_v49 = vadd.f32 %v1726_v35, %v878_v38 }
 0x12f   : > { %954 = vst.msk [vmem:[%s1937_s5 + $0x20] sm:$0xff] %vm825_vm1, %v938_v21  ;;  %v927_v47 = vadd.f32 %v911_v30, %v895_v33  ;;  %v928_v48 = vadd.f32 %v912_v31, %v896_v36  ;;  %v899_v50 = vadd.f32 %v1726_v35, %v879_v39  ;;  %v881_v55 = vmul.f32 %v1721_v34, %v861_v40 }
 0x130   : > { %955 = vst.msk [vmem:[%s1937_s5 + $0x28] sm:$0xff] %vm825_vm1, %v939_v22  ;;  %v942_v52 = vmax.f32 %v926_v42, 0.0  ;;  %v929_v53 = vadd.f32 %v913_v37, %v897_v43  ;;  %v900_v54 = vadd.f32 %v1726_v35, %v880_v46  ;;  %v930_v58 = vadd.f32 %v914_v44, %v898_v49 }
 0x131   : > { %956 = vst.msk [vmem:[%s1937_s5 + $0x30] sm:$0xff] %vm825_vm1, %v940_v27  ;;  %v943_v56 = vmax.f32 %v927_v47, 0.0  ;;  %v944_v57 = vmax.f32 %v928_v48, 0.0  ;;  %v931_v59 = vadd.f32 %v915_v45, %v899_v50  ;;  %v901_v62 = vadd.f32 %v1726_v35, %v881_v55 }
 0x132   : > { %957 = vst.msk [vmem:[%s1937_s5 + $0x38] sm:$0xff] %vm825_vm1, %v941_v41  ;;  %v945_v61 = vmax.f32 %v929_v53, 0.0  ;;  %v932_v34 = vadd.f32 %v916_v51, %v900_v54  ;;  %v946_v63 = vmax.f32 %v930_v58, 0.0 }
 0x133   : > { %958 = vst.msk [vmem:[%s1937_s5 + $0x40] sm:$0xff] %vm825_vm1, %v942_v52  ;;  %v947_v0 = vmax.f32 %v931_v59, 0.0  ;;  %v933_v2 = vadd.f32 %v917_v60, %v901_v62 }
 0x134   : > { %959 = vst.msk [vmem:[%s1937_s5 + $0x48] sm:$0xff] %vm825_vm1, %v943_v56  ;;  %v948_v1 = vmax.f32 %v932_v34, 0.0 }
 0x135   : > { %960 = vst.msk [vmem:[%s1937_s5 + $0x50] sm:$0xff] %vm825_vm1, %v944_v57  ;;  %v949_v35 = vmax.f32 %v933_v2, 0.0 }
 0x136   : > { %961 = vst.msk [vmem:[%s1937_s5 + $0x58] sm:$0xff] %vm825_vm1, %v945_v61 }
 0x137   : > { %962 = vst.msk [vmem:[%s1937_s5 + $0x60] sm:$0xff] %vm825_vm1, %v946_v63 }
 0x138   : > { %963 = vst.msk [vmem:[%s1937_s5 + $0x68] sm:$0xff] %vm825_vm1, %v947_v0 }
 0x139   : > { %964 = vst.msk [vmem:[%s1937_s5 + $0x70] sm:$0xff] %vm825_vm1, %v948_v1 }
 0x13a   : > { %965 = vst.msk [vmem:[%s1937_s5 + $0x78] sm:$0xff] %vm825_vm1, %v949_v35 }
 0x13b PF: > { %s15_s22 = sadd.s32 1, %s1384_s22   ;;  %s1938_s18 = smov %s1372_s19 }
 0x13c   : > { %p12_p12 = scmp.ge.s32.totalorder %s15_s22, 9   ;;  %s1939_s19 = smov %s1452_s26 }
 0x13d   : > { %s1940_s20 = smov %s1380_s21  ;;  %s1941_s21 = smov %s1943_s23 }
 0x13e   :  { %14 = sbr.rel (!%p12_p12) target bundleno = 3 (0x3), region = 133 }

// kernel: resnet10_forward.18
= control target key start
LH: loop header
LB: loop body
LE: loop exit
PB: predicated region body
PF: predicated region fallthrough
CT: control target
= control target key end

     0   :  { %s877_s15 = smov 0   ;;  %s879_s16 = smov 0   ;;  %s1004_s0 = inlined_call_operand.vmem [shape: bf16[16,1792], index: 0, kind: input, shape index: {}]   ;;  %s1005_s1 = inlined_call_operand.vmem [shape: bf16[1792,128], index: 1, kind: input, shape index: {}]   ;;  %s1006_s2 = inlined_call_operand.vmem [shape: f32[1,128], index: 2, kind: input, shape index: {}]   ;;  %s1007_s3 = inlined_call_operand.vmem [shape: f32[1,128], index: 3, kind: input, shape index: {}]   ;;  %s1008_s4 = inlined_call_operand.vmem [shape: f32[16,128], index: 4, kind: output, shape index: {}]  }
   0x1   :  { %s881_s17 = smov 0   ;;  %s883_s18 = smov 0  }
   0x2   :  { %s885_s19 = smov 0  }
   0x3 LB: > { %s26_s20 = sadd.s32 1, %s845_s18  ;;  %p49_p1 = scmp.ne.s32.totalorder %s837_s16, %s833_s15  ;;  %s849_s19 = sphi %s885_s19, %s14_s19   ;;  %s845_s18 = sphi %s883_s18, %s1012_s18   ;;  %s841_s17 = sphi %s881_s17, %s1011_s17   ;;  %s837_s16 = sphi %s879_s16, %s1010_s16   ;;  %s833_s15 = sphi %s877_s15, %s1009_s15  }
   0x4   : > { %p27_p0 = scmp.ge.s32.totalorder %s26_s20, 7  ;;  %p50_p2 = scmp.eq.s32.totalorder %s849_s19, 0 }
   0x5   : > { %s42_s22 = sadd.s32 1, %s837_s16  ;;  %p663_p5 = scmp.ge.s32.totalorder %s849_s19, 7 }
   0x6   : > { %s1014_s20 = smov (%p27_p0, %s26_s20), 0  ;;  %p51_p3 = por %p50_p2, %p49_p1 }
   0x7   : > { %s38_s21 = ssub.s32 %s845_s18, %s1014_s20  ;;  %195 = sbr.rel (%p663_p5) target bundleno = 18 (0x12), region = 24 }
   0x8   : > { %p40_p4 = scmp.eq.s32.totalorder %s38_s21, 0 }
   0xa   : > { %s912_s23 = scalar_select %p40_p4, %s837_s16, %s42_s22  }
   0xc   : > { %198 = sbr.rel (!%p51_p3) target bundleno = 18 (0x12), region = 28  ;;  %s200_s24 = sand.u32 (%p51_p3), 1, %s837_s16  }
   0xd   : > { %s749_s25 = sshll.u32 (%p51_p3), %s845_s18, 3  ;;  %s664_s26 = sshll.u32 (%p51_p3), %s200_s24, 4 }
   0xe   : > { %s208_s29 = scalar_lea.vmem (%p51_p3), %s1004_s0, %s749_s25  ;;  %s202_s30 = scalar_lea.vmem (%p51_p3), [#allocation2], %s664_s26 }
   0xf   : > { %v239_v0 = vld [vmem:[%s208_s29] sm:$0xff] (%p51_p3)  ;;  %v241_v1 = vld [vmem:[%s208_s29 + $0x38] sm:$0xff] (%p51_p3) }
  0x10   : > { %240 = vst [vmem:[%s202_s30] sm:$0xff] (%p51_p3), %v239_v0 }
  0x11   : > { %242 = vst [vmem:[%s202_s30 + $0x8] sm:$0xff] %v241_v1 }
  0x12 PF: > { %p667_p6 = scmp.ge.s32.totalorder %s849_s19, 1  ;;  %p259_p7 = scmp.lt.s32.totalorder %s849_s19, 8 }
  0x14   : > { %p260_p8 = pnand %p667_p6, %p259_p7 }
  0x15   : > { %s266_s5 = sand.u32 (!%p260_p8), 1, %s833_s15   ;;  %s669_s6 = sshll.u32 (!%p260_p8), %s841_s17, 5 }
  0x16   : > { %263 = sbr.rel (%p260_p8) target bundleno = 221 (0xdd), region = 70  ;;  %s668_s7 = sshll.u32 (!%p260_p8), %s266_s5, 4 }
  0x17   : > { %p311_p9 = scmp.lt.s32.totalorder (!%p260_p8), %s669_s6, 223  ;;  %s929_s12 = scalar_lea.vmem (!%p260_p8), [#allocation2], %s668_s7 }
  0x18   : > { %p671_p10 = scmp.ne.s32.totalorder (!%p260_p8), %s841_s17, 0 }
  0x1b   : > { %s1016_s6 = smov (!%p311_p9, %s669_s6), 223  ;;  %337 = sbr.rel (%p671_p10) target bundleno = 35 (0x23), region = 78 }
  0x1c   : > { %s670_s8 = sshll.u32 %s1016_s6, 2 }
  0x1d   : > { %s927_s11 = scalar_lea.vmem %s1005_s1, %s670_s8 }
  0x20   : > { %v851_v2 = vmov 0.0  }
  0x21   : > { %338 = vst [vmem:[%s1008_s4] sm:$0xff] %v851_v2 }
  0x22   : > { %339 = vst [vmem:[%s1008_s4 + $0x8] sm:$0xff] %v851_v2 }
  0x23 PF: > { %v759_v3 = vld [vmem:[%s927_s11 + $0x38] sm:$0xff]  ;;  %v758_v5 = vld [vmem:[%s927_s11 + $0x30] sm:$0xff]  ;;  %v757_v7 = vld [vmem:[%s927_s11 + $0x28] sm:$0xff]  ;;  %p744_p11 = scmp.ne.s32.totalorder %s841_s17, 6 }
  0x24   : > { %v767_v4 = vld [vmem:[%s927_s11 + $0x78] sm:$0xff]  ;;  %482 = vmatpush.bf16.msra.mxu0 %v759_v3  ;;  %v766_v6 = vld [vmem:[%s927_s11 + $0x70] sm:$0xff]  ;;  %v765_v8 = vld [vmem:[%s927_s11 + $0x68] sm:$0xff] }
  0x25   : > { %496 = vmatpush.bf16.msra.mxu1 %v767_v4  ;;  %v756_v9 = vld [vmem:[%s927_s11 + $0x20] sm:$0xff]  ;;  %v755_v11 = vld [vmem:[%s927_s11 + $0x18] sm:$0xff]  ;;  %v754_v13 = vld [vmem:[%s927_s11 + $0x10] sm:$0xff] }
  0x26   : > { %v764_v10 = vld [vmem:[%s927_s11 + $0x60] sm:$0xff]  ;;  %v763_v12 = vld [vmem:[%s927_s11 + $0x58] sm:$0xff]  ;;  %v762_v14 = vld [vmem:[%s927_s11 + $0x50] sm:$0xff] }
  0x27   : > { %v753_v15 = vld [vmem:[%s927_s11 + $0x8] sm:$0xff]  ;;  %v752_v17 = vld [vmem:[%s927_s11] sm:$0xff] }
  0x28   : > { %483 = vmatpush.bf16.msra.mxu0 %v758_v5  ;;  %v761_v16 = vld [vmem:[%s927_s11 + $0x48] sm:$0xff]  ;;  %v760_v18 = vld [vmem:[%s927_s11 + $0x40] sm:$0xff] }
  0x29   : > { %497 = vmatpush.bf16.msra.mxu1 %v766_v6  ;;  %v674_v19 = vld [vmem:[%s929_s12] sm:$0xf]  ;;  %v751_v20 = vld [vmem:[%s929_s12 + $0x4] sm:$0xf0]  ;;  %v750_v21 = vld [vmem:[%s929_s12 + $0x4] sm:$0xf] }
  0x2a   : > { %v676_v22 = vld [vmem:[%s929_s12 + $0x8] sm:$0xf0]  ;;  %v675_v23 = vor.u32 %v751_v20, %v674_v19  ;;  %v340_v26 = vld [vmem:[%s1008_s4] sm:$0xff] }
  0x2b   : > { %v679_v24 = vor.u32 %v750_v21, %v676_v22  ;;  %v341_v31 = vld [vmem:[%s1008_s4 + $0x8] sm:$0xff] }
  0x2c   : > { %484 = vmatpush.bf16.msra.mxu0 %v757_v7 }
  0x2d   : > { %498 = vmatpush.bf16.msra.mxu1 %v765_v8 }
  0x30   : > { %485 = vmatpush.bf16.msra.mxu0 %v756_v9 }
  0x31   : > { %499 = vmatpush.bf16.msra.mxu1 %v764_v10 }
  0x34   : > { %486 = vmatpush.bf16.msra.mxu0 %v755_v11 }
  0x35   : > { %500 = vmatpush.bf16.msra.mxu1 %v763_v12 }
  0x38   : > { %487 = vmatpush.bf16.msra.mxu0 %v754_v13 }
  0x39   : > { %501 = vmatpush.bf16.msra.mxu1 %v762_v14 }
  0x3c   : > { %488 = vmatpush.bf16.msra.mxu0 %v753_v15 }
  0x3d   : > { %502 = vmatpush.bf16.msra.mxu1 %v761_v16 }
  0x40   : > { %489 = vmatpush.bf16.msra.mxu0 %v752_v17 }
  0x41   : > { %503 = vmatpush.bf16.msra.mxu1 %v760_v18 }
  0x43   : > { %490 = vmatmul.bf16.vlgmr.msra.gmra.mxu0 %v675_v23 }
  0x44   : > { %504 = vmatmul.bf16.vlgmr.msra.gmra.mxu1 %v679_v24 }
  0xc0   : > { %v491_v25 = vpop.f32.mrf.mxu0 }
  0xc1   : > { %v505_v27 = vpop.f32.mrf.mxu1 }
  0xc2   : > { %v506_v28 = vadd.f32 %v505_v27, %v491_v25 }
  0xc4   : > { %v510_v29 = vadd.f32 %v506_v28, %v340_v26 }
  0xc6   : > { %512 = vst [vmem:[%s1008_s4] sm:$0xff] %v510_v29 }
  0xc8   : > { %v493_v30 = vpop.f32.mrf.mxu0 }
  0xc9   : > { %v507_v32 = vpop.f32.mrf.mxu1 }
  0xca   : > { %v508_v33 = vadd.f32 %v507_v32, %v493_v30  ;;  %517 = sbr.rel (%p744_p11) target bundleno = 221 (0xdd), region = 82 }
  0xcc   : > { %v511_v34 = vadd.f32 %v508_v33, %v341_v31 }
  0xce   : > { %513 = vst [vmem:[%s1008_s4 + $0x8] sm:$0xff] %v511_v34 }
  0xcf   : > { %v518_v35 = vld [vmem:[%s1008_s4] sm:$0xff] }
  0xd0   : > { %v809_v36 = vld [vmem:[%s1006_s2] ss:$0 sm:$0xff] }
  0xd1   : > { %v810_v37 = vld [vmem:[%s1007_s3] ss:$0 sm:$0xff]  ;;  %v524_v39 = vmul.f32 %v809_v36, %v518_v35 }
  0xd3   : > { %v530_v41 = vadd.f32 %v810_v37, %v524_v39 }
  0xd5   : > { %v519_v38 = vld [vmem:[%s1008_s4 + $0x8] sm:$0xff]  ;;  %v532_v43 = vmax.f32 %v530_v41, 0.0 }
  0xd6   : > { %v525_v40 = vmul.f32 %v809_v36, %v519_v38 }
  0xd7   : > { %534 = vst [vmem:[%s1008_s4] sm:$0xff] %v532_v43 }
  0xd8   : > { %v531_v42 = vadd.f32 %v810_v37, %v525_v40 }
  0xda   : > { %v533_v44 = vmax.f32 %v531_v42, 0.0 }
  0xdc   : > { %535 = vst [vmem:[%s1008_s4 + $0x8] sm:$0xff] %v533_v44 }
  0xdd PF: > { %s14_s19 = sadd.s32 1, %s849_s19   ;;  %s1009_s15 = smov %s837_s16 }
  0xde   : > { %p11_p12 = scmp.ge.s32.totalorder %s14_s19, 9   ;;  %s1010_s16 = smov %s912_s23 }
  0xdf   : > { %s1011_s17 = smov %s845_s18  ;;  %s1012_s18 = smov %s1014_s20 }
  0xe0   :  { %13 = sbr.rel (!%p11_p12) target bundleno = 3 (0x3), region = 126 }

// kernel: resnet10_forward.20
= control target key start
LH: loop header
LB: loop body
LE: loop exit
PB: predicated region body
PF: predicated region fallthrough
CT: control target
= control target key end

     0   :  { %10 = vsyncpa [#allocation4], 0  ;;  %s1153_s18 = smov 0   ;;  %s1155_s19 = smov 0   ;;  %s1321_s0 = inlined_call_operand.vmem [shape: bf16[16,3456], index: 0, kind: input, shape index: {}]   ;;  %s1322_s1 = inlined_call_operand.vmem [shape: bf16[3456,128], index: 1, kind: input, shape index: {}]   ;;  %s1323_s2 = inlined_call_operand.vmem [shape: f32[1,128], index: 2, kind: input, shape index: {}]   ;;  %s1324_s3 = inlined_call_operand.hbm [shape: f32[1,128], index: 3, kind: input, shape index: {}]   ;;  %s1325_s4 = inlined_call_operand.vmem [shape: f32[16,128], index: 4, kind: input, shape index: {}]   ;;  %s1326_s5 = inlined_call_operand.vmem [shape: f32[16,128], index: 5, kind: output, shape index: {}]  }
   0x1   :  { %s1157_s20 = smov 0   ;;  %s1159_s21 = smov 0  }
   0x2   :  { %s1161_s22 = smov 0  }
   0x3 LB: > { %s835_s23 = sadd.s32 4294967295, %s1119_s22   ;;  %s28_s24 = sadd.s32 1, %s1115_s21  ;;  %s1119_s22 = sphi %s1161_s22, %s16_s22   ;;  %s1115_s21 = sphi %s1159_s21, %s1333_s21   ;;  %s1111_s20 = sphi %s1157_s20, %s1332_s20   ;;  %s1107_s19 = sphi %s1155_s19, %s1331_s19   ;;  %s1103_s18 = sphi %s1153_s18, %s1330_s18  }
   0x4   : > { %p29_p0 = scmp.ge.s32.totalorder %s28_s24, 9  ;;  %s44_s25 = sadd.s32 1, %s1107_s19 }
   0x5   : > { %p51_p1 = scmp.ne.s32.totalorder %s1107_s19, %s1103_s18  ;;  %p52_p2 = scmp.eq.s32.totalorder %s1119_s22, 0 }
   0x6   : > { %s1335_s24 = smov (%p29_p0, %s28_s24), 0  ;;  %p836_p4 = scmp.ge.s32.totalorder %s1119_s22, 1 }
   0x7   : > { %p1186_p3 = por %p52_p2, %p51_p1  ;;  %s40_s27 = ssub.s32 %s1115_s21, %s1335_s24 }
   0x8   : > { %p204_p5 = scmp.lt.s32.totalorder %s1119_s22, 10  ;;  %p42_p6 = scmp.eq.s32.totalorder %s40_s27, 0 }
   0x9   : > { %p1198_p8 = scmp.eq.s32.totalorder %s835_s23, 0  ;;  %s223_s8 = sshll.u32 %s1324_s3, 4  ;;  %s224_s8 = int_to_ptr.hbm [resolvable:$true] %s223_s8 }
   0xa   : > { %p1194_p7 = pnand %p836_p4, %p204_p5  ;;  %s1121_s9 = smov [#allocation3]  }
   0xb   : > { %s1203_s30 = scalar_select %p42_p6, %s1107_s19, %s44_s25  }
   0xc   : > { %p997_p9 = pneg %p1194_p7  ;;  %s225_s10 = sshll.u32 %s1121_s9, 4  ;;  %s226_s10 = int_to_ptr.vmem [resolvable:$true] %s225_s10 }
   0xd   : > { %p840_p11 = scmp.ge.s32.totalorder %s1119_s22, 9 }
   0xe   : > { %p998_p10 = pnand %p1198_p8, %p997_p9 }
   0xf   : > { %244 = sbr.rel (%p840_p11) target bundleno = 29 (0x1d), region = 28 }
  0x10   : > { %1000 = dma.hbm_to_vmem [thread:$0]  (!%p998_p10), %s224_s8, 16, %s226_s10, [#allocation4]  }
  0x14   : > { %247 = sbr.rel (!%p1186_p3) target bundleno = 29 (0x1d), region = 32  ;;  %s249_s11 = sand.u32 (%p1186_p3), 1, %s1107_s19  }
  0x15   : > { %s963_s12 = smul.u32 (%p1186_p3), 12, %s1115_s21 }
  0x16   : > { %s991_s13 = smul.u32 (%p1186_p3), 24, %s249_s11 }
  0x17   : > { %s257_s16 = scalar_lea.vmem (%p1186_p3), %s1321_s0, %s963_s12 }
  0x18   : > { %v272_v0 = vld [vmem:[%s257_s16] sm:$0xff] (%p1186_p3)  ;;  %v274_v1 = vld [vmem:[%s257_s16 + $0x6c] sm:$0xff] (%p1186_p3)  ;;  %v842_v2 = vld [vmem:[%s257_s16 + $0x8] sm:$0xf] (%p1186_p3)  ;;  %s251_s17 = scalar_lea.vmem (%p1186_p3), [#allocation2], %s991_s13 }
  0x19   : > { %273 = vst [vmem:[%s251_s17] sm:$0xff] %v272_v0  ;;  %v844_v3 = vld [vmem:[%s257_s16 + $0x74] sm:$0xf] }
  0x1a   : > { %275 = vst [vmem:[%s251_s17 + $0xc] sm:$0xff] %v274_v1 }
  0x1b   : > { %843 = vst [vmem:[%s251_s17 + $0x8] sm:$0xf] %v842_v2 }
  0x1c   : > { %845 = vst [vmem:[%s251_s17 + $0x14] sm:$0xf] %v844_v3 }
  0x1d PF: > { %308 = sbr.rel (%p1194_p7) target bundleno = 240 (0xf0), region = 62  ;;  %s311_s23 = sand.u32 (!%p1194_p7), 1, %s1103_s18  }
  0x1e   : > { %s992_s25 = smul.u32 (!%p1194_p7), 24, %s311_s23 }
  0x20   : > { %s1223_s26 = scalar_lea.vmem (!%p1194_p7), [#allocation2], %s992_s25 }
  0x22   : > { %1098 = dma.done.wait (%p1198_p8), [#allocation4], 16  }
  0x23   : > { %1100 = vsyncadd (%p1198_p8), [#allocation4], 4294967280  ;;  %s367_s27 = smul.u32 48, %s1111_s20  ;;  %p849_p13 = scmp.ne.s32.totalorder %s1111_s20, 0 }
  0x25   : > { %p368_p12 = scmp.lt.s32.totalorder %s367_s27, 431  ;;  %400 = sbr.rel (%p849_p13) target bundleno = 45 (0x2d), region = 74 }
  0x27   : > { %s1337_s27 = smov (!%p368_p12, %s367_s27), 431 }
  0x28   : > { %s848_s6 = sshll.u32 %s1337_s27, 2 }
  0x29   : > { %s1233_s28 = scalar_lea.vmem %s1322_s1, %s848_s6 }
  0x2a   : > { %v1122_v4 = vmov 0.0  }
  0x2b   : > { %401 = vst [vmem:[%s1326_s5] sm:$0xff] %v1122_v4 }
  0x2c   : > { %402 = vst [vmem:[%s1326_s5 + $0x8] sm:$0xff] %v1122_v4 }
  0x2d PF: > { %v974_v5 = vld [vmem:[%s1233_s28 + $0x38] sm:$0xff]  ;;  %v973_v8 = vld [vmem:[%s1233_s28 + $0x30] sm:$0xff]  ;;  %v972_v11 = vld [vmem:[%s1233_s28 + $0x28] sm:$0xff]  ;;  %p958_p0 = scmp.ne.s32.totalorder %s1111_s20, 8 }
  0x2e   : > { %v982_v6 = vld [vmem:[%s1233_s28 + $0x78] sm:$0xff]  ;;  %617 = vmatpush.bf16.msra.mxu0 %v974_v5  ;;  %v981_v9 = vld [vmem:[%s1233_s28 + $0x70] sm:$0xff]  ;;  %v980_v12 = vld [vmem:[%s1233_s28 + $0x68] sm:$0xff] }
  0x2f   : > { %v990_v7 = vld [vmem:[%s1233_s28 + $0xb8] sm:$0xff]  ;;  %631 = vmatpush.bf16.msra.mxu1 %v982_v6  ;;  %v989_v10 = vld [vmem:[%s1233_s28 + $0xb0] sm:$0xff]  ;;  %v988_v13 = vld [vmem:[%s1233_s28 + $0xa8] sm:$0xff] }
  0x30   : > { %645 = vmatpush.bf16.msra.mxu2 %v990_v7  ;;  %v971_v14 = vld [vmem:[%s1233_s28 + $0x20] sm:$0xff]  ;;  %v970_v17 = vld [vmem:[%s1233_s28 + $0x18] sm:$0xff]  ;;  %v969_v20 = vld [vmem:[%s1233_s28 + $0x10] sm:$0xff] }
  0x31   : > { %v979_v15 = vld [vmem:[%s1233_s28 + $0x60] sm:$0xff]  ;;  %v978_v18 = vld [vmem:[%s1233_s28 + $0x58] sm:$0xff]  ;;  %v977_v21 = vld [vmem:[%s1233_s28 + $0x50] sm:$0xff] }
  0x32   : > { %618 = vmatpush.bf16.msra.mxu0 %v973_v8  ;;  %v987_v16 = vld [vmem:[%s1233_s28 + $0xa0] sm:$0xff]  ;;  %v986_v19 = vld [vmem:[%s1233_s28 + $0x98] sm:$0xff]  ;;  %v985_v22 = vld [vmem:[%s1233_s28 + $0x90] sm:$0xff] }
  0x33   : > { %632 = vmatpush.bf16.msra.mxu1 %v981_v9  ;;  %v968_v23 = vld [vmem:[%s1233_s28 + $0x8] sm:$0xff]  ;;  %v967_v26 = vld [vmem:[%s1233_s28] sm:$0xff] }
  0x34   : > { %646 = vmatpush.bf16.msra.mxu2 %v989_v10  ;;  %v976_v24 = vld [vmem:[%s1233_s28 + $0x48] sm:$0xff]  ;;  %v975_v27 = vld [vmem:[%s1233_s28 + $0x40] sm:$0xff] }
  0x35   : > { %v984_v25 = vld [vmem:[%s1233_s28 + $0x88] sm:$0xff]  ;;  %v852_v28 = vld [vmem:[%s1223_s26] sm:$0xf]  ;;  %v964_v30 = vld [vmem:[%s1223_s26 + $0x4] sm:$0xf] }
  0x36   : > { %619 = vmatpush.bf16.msra.mxu0 %v972_v11  ;;  %v965_v29 = vld [vmem:[%s1223_s26 + $0x8] sm:$0xf0]  ;;  %v854_v31 = vld [vmem:[%s1223_s26 + $0xc] sm:$0xf0]  ;;  %v860_v33 = vld [vmem:[%s1223_s26 + $0x8] sm:$0xf] }
  0x37   : > { %633 = vmatpush.bf16.msra.mxu1 %v980_v12  ;;  %v983_v32 = vld [vmem:[%s1233_s28 + $0x80] sm:$0xff]  ;;  %v966_v34 = vld [vmem:[%s1223_s26 + $0x10] sm:$0xf0]  ;;  %v853_v35 = vor.u32 %v965_v29, %v852_v28  ;;  %v857_v36 = vor.u32 %v964_v30, %v854_v31 }
  0x38   : > { %647 = vmatpush.bf16.msra.mxu2 %v988_v13  ;;  %v861_v37 = vor.u32 %v966_v34, %v860_v33  ;;  %v403_v41 = vld [vmem:[%s1326_s5] sm:$0xff]  ;;  %v404_v48 = vld [vmem:[%s1326_s5 + $0x8] sm:$0xff] }
  0x3a   : > { %620 = vmatpush.bf16.msra.mxu0 %v971_v14 }
  0x3b   : > { %634 = vmatpush.bf16.msra.mxu1 %v979_v15 }
  0x3c   : > { %648 = vmatpush.bf16.msra.mxu2 %v987_v16 }
  0x3e   : > { %621 = vmatpush.bf16.msra.mxu0 %v970_v17 }
  0x3f   : > { %635 = vmatpush.bf16.msra.mxu1 %v978_v18 }
  0x40   : > { %649 = vmatpush.bf16.msra.mxu2 %v986_v19 }
  0x42   : > { %622 = vmatpush.bf16.msra.mxu0 %v969_v20 }
  0x43   : > { %636 = vmatpush.bf16.msra.mxu1 %v977_v21 }
  0x44   : > { %650 = vmatpush.bf16.msra.mxu2 %v985_v22 }
  0x46   : > { %623 = vmatpush.bf16.msra.mxu0 %v968_v23 }
  0x47   : > { %637 = vmatpush.bf16.msra.mxu1 %v976_v24 }
  0x48   : > { %651 = vmatpush.bf16.msra.mxu2 %v984_v25 }
  0x4a   : > { %624 = vmatpush.bf16.msra.mxu0 %v967_v26 }
  0x4b   : > { %638 = vmatpush.bf16.msra.mxu1 %v975_v27 }
  0x4c   : > { %652 = vmatpush.bf16.msra.mxu2 %v983_v32 }
  0x4d   : > { %625 = vmatmul.bf16.vlgmr.msra.gmra.mxu0 %v853_v35 }
  0x4e   : > { %639 = vmatmul.bf16.vlgmr.msra.gmra.mxu1 %v857_v36 }
  0x4f   : > { %653 = vmatmul.bf16.vlgmr.msra.gmra.mxu2 %v861_v37 }
  0xca   : > { %v626_v38 = vpop.f32.mrf.mxu0 }
  0xcb   : > { %v640_v39 = vpop.f32.mrf.mxu1 }
  0xcc   : > { %v641_v40 = vadd.f32 %v640_v39, %v626_v38 }
  0xd2   : > { %v654_v42 = vpop.f32.mrf.mxu2  ;;  %v628_v45 = vpop.f32.mrf.mxu0 }
  0xd3   : > { %v655_v43 = vadd.f32 %v654_v42, %v641_v40  ;;  %v642_v46 = vpop.f32.mrf.mxu1 }
  0xd4   : > { %v643_v47 = vadd.f32 %v642_v46, %v628_v45 }
  0xd5   : > { %v659_v44 = vadd.f32 %v655_v43, %v403_v41 }
  0xd7   : > { %661 = vst [vmem:[%s1326_s5] sm:$0xff] %v659_v44 }
  0xda   : > { %v656_v49 = vpop.f32.mrf.mxu2 }
  0xdb   : > { %v657_v50 = vadd.f32 %v656_v49, %v643_v47  ;;  %666 = sbr.rel (%p958_p0) target bundleno = 240 (0xf0), region = 78 }
  0xdd   : > { %v660_v51 = vadd.f32 %v657_v50, %v404_v48 }
  0xdf   : > { %662 = vst [vmem:[%s1326_s5 + $0x8] sm:$0xff] %v660_v51 }
  0xe0   : > { %v667_v52 = vld [vmem:[%s1326_s5] sm:$0xff]  ;;  %v1046_v54 = vld [vmem:[#allocation3] ss:$0 sm:$0xff]  ;;  %v682_v60 = vld [vmem:[%s1325_s4 + $0x8] sm:$0xff] }
  0xe1   : > { %v1045_v53 = vld [vmem:[%s1323_s2] ss:$0 sm:$0xff] }
  0xe2   : > { %v673_v55 = vmul.f32 %v1045_v53, %v667_v52  ;;  %v681_v57 = vld [vmem:[%s1325_s4] sm:$0xff] }
  0xe4   : > { %v679_v59 = vadd.f32 %v1046_v54, %v673_v55 }
  0xe6   : > { %v668_v56 = vld [vmem:[%s1326_s5 + $0x8] sm:$0xff]  ;;  %v683_v62 = vadd.f32 %v681_v57, %v679_v59 }
  0xe7   : > { %v674_v58 = vmul.f32 %v1045_v53, %v668_v56 }
  0xe8   : > { %v685_v0 = vmax.f32 %v683_v62, 0.0 }
  0xe9   : > { %v680_v61 = vadd.f32 %v1046_v54, %v674_v58 }
  0xea   : > { %687 = vst [vmem:[%s1326_s5] sm:$0xff] %v685_v0 }
  0xeb   : > { %v684_v63 = vadd.f32 %v682_v60, %v680_v61 }
  0xed   : > { %v686_v1 = vmax.f32 %v684_v63, 0.0 }
  0xef   : > { %688 = vst [vmem:[%s1326_s5 + $0x8] sm:$0xff] %v686_v1 }
  0xf0 PF: > { %s16_s22 = sadd.s32 1, %s1119_s22   ;;  %s1330_s18 = smov %s1107_s19 }
  0xf1   : > { %p13_p1 = scmp.ge.s32.totalorder %s16_s22, 11   ;;  %s1331_s19 = smov %s1203_s30 }
  0xf2   : > { %s1332_s20 = smov %s1115_s21  ;;  %s1333_s21 = smov %s1335_s24 }
  0xf3   :  { %15 = sbr.rel (!%p13_p1) target bundleno = 3 (0x3), region = 130 }
  0xf8   :  { %717 = vsyncpa [#allocation4], 1 }
  0xf9   :  { %719 = vsyncpa [#allocation4 + $0x1], 1 }

// kernel: resnet10_forward.19
= control target key start
LH: loop header
LB: loop body
LE: loop exit
PB: predicated region body
PF: predicated region fallthrough
CT: control target
= control target key end

     0   :  { %s250_s1 = inlined_call_operand.vmem [shape: bf16[128,128], index: 1, kind: input, shape index: {}]   ;;  %s251_s2 = inlined_call_operand.vmem [shape: f32[1,128], index: 2, kind: input, shape index: {}]   ;;  %s252_s3 = inlined_call_operand.vmem [shape: f32[1,128], index: 3, kind: input, shape index: {}]   ;;  %s253_s0 = inlined_call_operand.vmem [shape: bf16[16,128], index: 0, kind: input, shape index: {}]   ;;  %s254_s4 = inlined_call_operand.vmem [shape: f32[16,128], index: 4, kind: output, shape index: {}]  }
   0x1   :  { %v182_v0 = vld [vmem:[%s250_s1 + $0x38] sm:$0xff]  ;;  %v181_v1 = vld [vmem:[%s250_s1 + $0x30] sm:$0xff]  ;;  %v180_v2 = vld [vmem:[%s250_s1 + $0x28] sm:$0xff] }
   0x2   :  { %97 = vmatpush.bf16.msra.mxu0 %v182_v0  ;;  %v179_v3 = vld [vmem:[%s250_s1 + $0x20] sm:$0xff]  ;;  %v178_v4 = vld [vmem:[%s250_s1 + $0x18] sm:$0xff]  ;;  %v177_v5 = vld [vmem:[%s250_s1 + $0x10] sm:$0xff] }
   0x3   :  { %v176_v6 = vld [vmem:[%s250_s1 + $0x8] sm:$0xff]  ;;  %v175_v7 = vld [vmem:[%s250_s1] sm:$0xff] }
   0x4   :  { %v174_v8 = vld [vmem:[%s253_s0] sm:$0xff] }
   0x5   :  { %v184_v9 = vld [vmem:[%s251_s2] ss:$0 sm:$0xff] }
   0x6   :  { %98 = vmatpush.bf16.msra.mxu0 %v181_v1  ;;  %v185_v11 = vld [vmem:[%s252_s3] ss:$0 sm:$0xff] }
   0xa   :  { %99 = vmatpush.bf16.msra.mxu0 %v180_v2 }
   0xe   :  { %100 = vmatpush.bf16.msra.mxu0 %v179_v3 }
  0x12   :  { %101 = vmatpush.bf16.msra.mxu0 %v178_v4 }
  0x16   :  { %102 = vmatpush.bf16.msra.mxu0 %v177_v5 }
  0x1a   :  { %103 = vmatpush.bf16.msra.mxu0 %v176_v6 }
  0x1e   :  { %104 = vmatpush.bf16.msra.mxu0 %v175_v7 }
  0x21   :  { %105 = vmatmul.bf16.vlgmr.msra.gmra.mxu0 %v174_v8 }
  0x9e   :  { %v106_v10 = vpop.f32.mrf.mxu0 }
  0x9f   :  { %v124_v12 = vmul.f32 %v184_v9, %v106_v10 }
  0xa1   :  { %v130_v13 = vadd.f32 %v185_v11, %v124_v12 }
  0xa3   :  { %132 = vst [vmem:[%s254_s4] sm:$0xff] %v130_v13 }
  0xa6   :  { %v108_v14 = vpop.f32.mrf.mxu0 }
  0xa7   :  { %v125_v15 = vmul.f32 %v184_v9, %v108_v14 }
  0xa9   :  { %v131_v16 = vadd.f32 %v185_v11, %v125_v15 }
  0xab   :  { %133 = vst [vmem:[%s254_s4 + $0x8] sm:$0xff] %v131_v16 }

// kernel: resnet10_forward.21
= control target key start
LH: loop header
LB: loop body
LE: loop exit
PB: predicated region body
PF: predicated region fallthrough
CT: control target
= control target key end

     0   :  { %s1325_s15 = smov 0   ;;  %s1327_s16 = smov 0   ;;  %s1572_s0 = inlined_call_operand.vmem [shape: bf16[16,3456], index: 0, kind: input, shape index: {}]   ;;  %s1573_s1 = inlined_call_operand.vmem [shape: bf16[3456,256], index: 1, kind: input, shape index: {}]   ;;  %s1574_s2 = inlined_call_operand.vmem [shape: f32[1,256], index: 2, kind: input, shape index: {}]   ;;  %s1575_s3 = inlined_call_operand.vmem [shape: f32[1,256], index: 3, kind: input, shape index: {}]   ;;  %s1576_s4 = inlined_call_operand.vmem [shape: f32[16,256], index: 4, kind: output, shape index: {}]  }
   0x1   :  { %s1329_s17 = smov 0   ;;  %s1331_s18 = smov 0  }
   0x2   :  { %s1333_s19 = smov 0  }
   0x3 LB: > { %s26_s20 = sadd.s32 1, %s1293_s18  ;;  %p49_p1 = scmp.ne.s32.totalorder %s1285_s16, %s1281_s15  ;;  %s1297_s19 = sphi %s1333_s19, %s14_s19   ;;  %s1293_s18 = sphi %s1331_s18, %s1580_s18   ;;  %s1289_s17 = sphi %s1329_s17, %s1579_s17   ;;  %s1285_s16 = sphi %s1327_s16, %s1578_s16   ;;  %s1281_s15 = sphi %s1325_s15, %s1577_s15  }
   0x4   : > { %p27_p0 = scmp.ge.s32.totalorder %s26_s20, 9  ;;  %p50_p2 = scmp.eq.s32.totalorder %s1297_s19, 0 }
   0x5   : > { %s42_s22 = sadd.s32 1, %s1285_s16  ;;  %p944_p5 = scmp.ge.s32.totalorder %s1297_s19, 9 }
   0x6   : > { %s1582_s20 = smov (%p27_p0, %s26_s20), 0  ;;  %p51_p3 = por %p50_p2, %p49_p1 }
   0x7   : > { %s38_s21 = ssub.s32 %s1293_s18, %s1582_s20  ;;  %199 = sbr.rel (%p944_p5) target bundleno = 21 (0x15), region = 24 }
   0x8   : > { %p40_p4 = scmp.eq.s32.totalorder %s38_s21, 0 }
   0xa   : > { %s1360_s23 = scalar_select %p40_p4, %s1285_s16, %s42_s22  }
   0xc   : > { %202 = sbr.rel (!%p51_p3) target bundleno = 21 (0x15), region = 28  ;;  %s204_s24 = sand.u32 (%p51_p3), 1, %s1285_s16  }
   0xd   : > { %s1163_s25 = smul.u32 (%p51_p3), 12, %s1293_s18 }
   0xe   : > { %s1216_s26 = smul.u32 (%p51_p3), 24, %s204_s24 }
   0xf   : > { %s212_s29 = scalar_lea.vmem (%p51_p3), %s1572_s0, %s1163_s25 }
  0x10   : > { %v227_v0 = vld [vmem:[%s212_s29] sm:$0xff] (%p51_p3)  ;;  %v229_v1 = vld [vmem:[%s212_s29 + $0x6c] sm:$0xff] (%p51_p3)  ;;  %v946_v2 = vld [vmem:[%s212_s29 + $0x8] sm:$0xf] (%p51_p3)  ;;  %s206_s30 = scalar_lea.vmem (%p51_p3), [#allocation2], %s1216_s26 }
  0x11   : > { %228 = vst [vmem:[%s206_s30] sm:$0xff] %v227_v0  ;;  %v948_v3 = vld [vmem:[%s212_s29 + $0x74] sm:$0xf] }
  0x12   : > { %230 = vst [vmem:[%s206_s30 + $0xc] sm:$0xff] %v229_v1 }
  0x13   : > { %947 = vst [vmem:[%s206_s30 + $0x8] sm:$0xf] %v946_v2 }
  0x14   : > { %949 = vst [vmem:[%s206_s30 + $0x14] sm:$0xf] %v948_v3 }
  0x15 PF: > { %p950_p6 = scmp.ge.s32.totalorder %s1297_s19, 1  ;;  %p262_p7 = scmp.lt.s32.totalorder %s1297_s19, 10 }
  0x17   : > { %p263_p8 = pnand %p950_p6, %p262_p7 }
  0x18   : > { %s269_s5 = sand.u32 (!%p263_p8), 1, %s1281_s15   ;;  %s319_s6 = smul.u32 (!%p263_p8), 48, %s1289_s17 }
  0x19   : > { %266 = sbr.rel (%p263_p8) target bundleno = 261 (0x105), region = 58  ;;  %p953_p10 = scmp.ne.s32.totalorder (!%p263_p8), %s1289_s17, 0 }
  0x1a   : > { %s1217_s7 = smul.u32 (!%p263_p8), 24, %s269_s5  ;;  %p321_p9 = scmp.lt.s32.totalorder (!%p263_p8), %s319_s6, 431 }
  0x1c   : > { %s1377_s12 = scalar_lea.vmem (!%p263_p8), [#allocation2], %s1217_s7 }
  0x1e   : > { %s1584_s6 = smov (!%p321_p9, %s319_s6), 431  ;;  %356 = sbr.rel (%p953_p10) target bundleno = 40 (0x28), region = 66 }
  0x1f   : > { %s1164_s8 = sshll.u32 %s1584_s6, 3 }
  0x20   : > { %s1375_s11 = scalar_lea.vmem %s1573_s1, %s1164_s8 }
  0x23   : > { %v1299_v4 = vmov 0.0  }
  0x24   : > { %357 = vst [vmem:[%s1576_s4] sm:$0xff] %v1299_v4 }
  0x25   : > { %358 = vst [vmem:[%s1576_s4 + $0x8] sm:$0xff] %v1299_v4 }
  0x26   : > { %359 = vst [vmem:[%s1576_s4 + $0x10] sm:$0xff] %v1299_v4 }
  0x27   : > { %360 = vst [vmem:[%s1576_s4 + $0x18] sm:$0xff] %v1299_v4 }
  0x28 PF: > { %v1024_v5 = vld [vmem:[%s1375_s11 + $0x70] sm:$0xf]  ;;  %v1183_v6 = vld [vmem:[%s1375_s11 + $0x74] sm:$0xf0]  ;;  %v1016_v14 = vld [vmem:[%s1375_s11 + $0x60] sm:$0xf] }
  0x29   : > { %v1088_v7 = vld [vmem:[%s1375_s11 + $0xf0] sm:$0xf]  ;;  %v1025_v8 = vor.u32 %v1183_v6, %v1024_v5  ;;  %v1199_v9 = vld [vmem:[%s1375_s11 + $0xf4] sm:$0xf0]  ;;  %v1181_v15 = vld [vmem:[%s1375_s11 + $0x64] sm:$0xf0] }
  0x2a   : > { %v1152_v10 = vld [vmem:[%s1375_s11 + $0x170] sm:$0xf]  ;;  %v1215_v11 = vld [vmem:[%s1375_s11 + $0x174] sm:$0xf0]  ;;  %v1089_v12 = vor.u32 %v1199_v9, %v1088_v7  ;;  %v1080_v16 = vld [vmem:[%s1375_s11 + $0xe0] sm:$0xf]  ;;  %v1017_v17 = vor.u32 %v1181_v15, %v1016_v14 }
  0x2b   : > { %v1153_v13 = vor.u32 %v1215_v11, %v1152_v10  ;;  %673 = vmatpush.bf16.msra.mxu0 %v1025_v8  ;;  %v1197_v18 = vld [vmem:[%s1375_s11 + $0xe4] sm:$0xf0]  ;;  %v1144_v19 = vld [vmem:[%s1375_s11 + $0x160] sm:$0xf]  ;;  %v1008_v23 = vld [vmem:[%s1375_s11 + $0x50] sm:$0xf] }
  0x2c   : > { %v1213_v20 = vld [vmem:[%s1375_s11 + $0x164] sm:$0xf0]  ;;  %687 = vmatpush.bf16.msra.mxu1 %v1089_v12  ;;  %v1081_v21 = vor.u32 %v1197_v18, %v1080_v16  ;;  %v1179_v24 = vld [vmem:[%s1375_s11 + $0x54] sm:$0xf0]  ;;  %v1072_v25 = vld [vmem:[%s1375_s11 + $0xd0] sm:$0xf] }
  0x2d   : > { %701 = vmatpush.bf16.msra.mxu2 %v1153_v13  ;;  %v1145_v22 = vor.u32 %v1213_v20, %v1144_v19  ;;  %v1195_v26 = vld [vmem:[%s1375_s11 + $0xd4] sm:$0xf0]  ;;  %v1136_v27 = vld [vmem:[%s1375_s11 + $0x150] sm:$0xf]  ;;  %v1009_v29 = vor.u32 %v1179_v24, %v1008_v23  ;;  %v1000_v30 = vld [vmem:[%s1375_s11 + $0x40] sm:$0xf] }
  0x2e   : > { %v1211_v28 = vld [vmem:[%s1375_s11 + $0x154] sm:$0xf0]  ;;  %v1177_v31 = vld [vmem:[%s1375_s11 + $0x44] sm:$0xf0]  ;;  %v1073_v32 = vor.u32 %v1195_v26, %v1072_v25  ;;  %v1064_v34 = vld [vmem:[%s1375_s11 + $0xc0] sm:$0xf] }
  0x2f   : > { %674 = vmatpush.bf16.msra.mxu0 %v1017_v17  ;;  %v1137_v33 = vor.u32 %v1211_v28, %v1136_v27  ;;  %v1182_v35 = vld [vmem:[%s1375_s11 + $0x74] sm:$0xf]  ;;  %v1026_v36 = vld [vmem:[%s1375_s11 + $0x78] sm:$0xf0]  ;;  %v1193_v37 = vld [vmem:[%s1375_s11 + $0xc4] sm:$0xf0]  ;;  %v1001_v42 = vor.u32 %v1177_v31, %v1000_v30 }
  0x30   : > { %688 = vmatpush.bf16.msra.mxu1 %v1081_v21  ;;  %v1128_v38 = vld [vmem:[%s1375_s11 + $0x140] sm:$0xf]  ;;  %v1209_v39 = vld [vmem:[%s1375_s11 + $0x144] sm:$0xf0]  ;;  %v1029_v40 = vor.u32 %v1182_v35, %v1026_v36  ;;  %v1180_v41 = vld [vmem:[%s1375_s11 + $0x64] sm:$0xf]  ;;  %v1065_v46 = vor.u32 %v1193_v37, %v1064_v34 }
  0x31   : > { %702 = vmatpush.bf16.msra.mxu2 %v1145_v22  ;;  %v992_v43 = vld [vmem:[%s1375_s11 + $0x30] sm:$0xf]  ;;  %v1175_v44 = vld [vmem:[%s1375_s11 + $0x34] sm:$0xf0]  ;;  %v1018_v45 = vld [vmem:[%s1375_s11 + $0x68] sm:$0xf0]  ;;  %v1129_v47 = vor.u32 %v1209_v39, %v1128_v38 }
  0x32   : > { %715 = vmatpush.bf16.msra.mxu3 %v1029_v40  ;;  %v1056_v48 = vld [vmem:[%s1375_s11 + $0xb0] sm:$0xf]  ;;  %v1191_v49 = vld [vmem:[%s1375_s11 + $0xb4] sm:$0xf0]  ;;  %v1021_v51 = vor.u32 %v1180_v41, %v1018_v45  ;;  %v1178_v53 = vld [vmem:[%s1375_s11 + $0x54] sm:$0xf]  ;;  %v993_v55 = vor.u32 %v1175_v44, %v992_v43 }
  0x33   : > { %675 = vmatpush.bf16.msra.mxu0 %v1009_v29  ;;  %v1120_v50 = vld [vmem:[%s1375_s11 + $0x130] sm:$0xf]  ;;  %v1207_v52 = vld [vmem:[%s1375_s11 + $0x134] sm:$0xf0]  ;;  %v1010_v54 = vld [vmem:[%s1375_s11 + $0x58] sm:$0xf0]  ;;  %v1057_v59 = vor.u32 %v1191_v49, %v1056_v48 }
  0x34   : > { %689 = vmatpush.bf16.msra.mxu1 %v1073_v32  ;;  %v984_v56 = vld [vmem:[%s1375_s11 + $0x20] sm:$0xf]  ;;  %v1173_v57 = vld [vmem:[%s1375_s11 + $0x24] sm:$0xf0]  ;;  %v1013_v58 = vor.u32 %v1178_v53, %v1010_v54  ;;  %v1121_v60 = vor.u32 %v1207_v52, %v1120_v50  ;;  %v1176_v62 = vld [vmem:[%s1375_s11 + $0x44] sm:$0xf] }
  0x35   : > { %703 = vmatpush.bf16.msra.mxu2 %v1137_v33  ;;  %v1048_v61 = vld [vmem:[%s1375_s11 + $0xa0] sm:$0xf]  ;;  %v1002_v63 = vld [vmem:[%s1375_s11 + $0x48] sm:$0xf0]  ;;  %v1189_v0 = vld [vmem:[%s1375_s11 + $0xa4] sm:$0xf0]  ;;  %v985_v3 = vor.u32 %v1173_v57, %v984_v56 }
  0x36   : > { %716 = vmatpush.bf16.msra.mxu3 %v1021_v51  ;;  %v1112_v1 = vld [vmem:[%s1375_s11 + $0x120] sm:$0xf]  ;;  %v1205_v2 = vld [vmem:[%s1375_s11 + $0x124] sm:$0xf0]  ;;  %v976_v4 = vld [vmem:[%s1375_s11 + $0x10] sm:$0xf]  ;;  %v1005_v6 = vor.u32 %v1176_v62, %v1002_v63  ;;  %v1049_v7 = vor.u32 %v1189_v0, %v1048_v61 }
  0x37   : > { %676 = vmatpush.bf16.msra.mxu0 %v1001_v42  ;;  %v1171_v5 = vld [vmem:[%s1375_s11 + $0x14] sm:$0xf0]  ;;  %v1113_v8 = vor.u32 %v1205_v2, %v1112_v1  ;;  %v1040_v9 = vld [vmem:[%s1375_s11 + $0x90] sm:$0xf]  ;;  %v1174_v10 = vld [vmem:[%s1375_s11 + $0x34] sm:$0xf] }
  0x38   : > { %690 = vmatpush.bf16.msra.mxu1 %v1065_v46  ;;  %v994_v11 = vld [vmem:[%s1375_s11 + $0x38] sm:$0xf0]  ;;  %v1187_v12 = vld [vmem:[%s1375_s11 + $0x94] sm:$0xf0]  ;;  %v1104_v13 = vld [vmem:[%s1375_s11 + $0x110] sm:$0xf]  ;;  %v977_v15 = vor.u32 %v1171_v5, %v976_v4 }
  0x39   : > { %704 = vmatpush.bf16.msra.mxu2 %v1129_v47  ;;  %v1203_v14 = vld [vmem:[%s1375_s11 + $0x114] sm:$0xf0]  ;;  %v968_v16 = vld [vmem:[%s1375_s11] sm:$0xf]  ;;  %v1169_v17 = vld [vmem:[%s1375_s11 + $0x4] sm:$0xf0]  ;;  %v997_v19 = vor.u32 %v1174_v10, %v994_v11  ;;  %v1041_v20 = vor.u32 %v1187_v12, %v1040_v9 }
  0x3a   : > { %717 = vmatpush.bf16.msra.mxu3 %v1013_v58  ;;  %v1032_v18 = vld [vmem:[%s1375_s11 + $0x80] sm:$0xf]  ;;  %v1105_v21 = vor.u32 %v1203_v14, %v1104_v13  ;;  %v1185_v22 = vld [vmem:[%s1375_s11 + $0x84] sm:$0xf0]  ;;  %v1172_v23 = vld [vmem:[%s1375_s11 + $0x24] sm:$0xf]  ;;  %v969_v31 = vor.u32 %v1169_v17, %v968_v16 }
  0x3b   : > { %677 = vmatpush.bf16.msra.mxu0 %v993_v55  ;;  %v986_v24 = vld [vmem:[%s1375_s11 + $0x28] sm:$0xf0]  ;;  %v1096_v25 = vld [vmem:[%s1375_s11 + $0x100] sm:$0xf]  ;;  %v1201_v26 = vld [vmem:[%s1375_s11 + $0x104] sm:$0xf0]  ;;  %v1033_v36 = vor.u32 %v1185_v22, %v1032_v18 }
  0x3c   : > { %691 = vmatpush.bf16.msra.mxu1 %v1057_v59  ;;  %v1198_v27 = vld [vmem:[%s1375_s11 + $0xf4] sm:$0xf]  ;;  %v1090_v28 = vld [vmem:[%s1375_s11 + $0xf8] sm:$0xf0]  ;;  %v964_v32 = vld [vmem:[%s1377_s12 + $0x8] sm:$0xf]  ;;  %v989_v33 = vor.u32 %v1172_v23, %v986_v24  ;;  %v1097_v37 = vor.u32 %v1201_v26, %v1096_v25 }
  0x3d   : > { %705 = vmatpush.bf16.msra.mxu2 %v1121_v60  ;;  %v1214_v29 = vld [vmem:[%s1375_s11 + $0x174] sm:$0xf]  ;;  %v1154_v30 = vld [vmem:[%s1375_s11 + $0x178] sm:$0xf0]  ;;  %v956_v34 = vld [vmem:[%s1377_s12] sm:$0xf]  ;;  %v1093_v41 = vor.u32 %v1198_v27, %v1090_v28 }
  0x3e   : > { %718 = vmatpush.bf16.msra.mxu3 %v1005_v6  ;;  %v1166_v35 = vld [vmem:[%s1377_s12 + $0x8] sm:$0xf0]  ;;  %v1167_v38 = vld [vmem:[%s1377_s12 + $0x10] sm:$0xf0]  ;;  %v1165_v39 = vld [vmem:[%s1377_s12 + $0x4] sm:$0xf]  ;;  %v1157_v42 = vor.u32 %v1214_v29, %v1154_v30 }
  0x3f   : > { %678 = vmatpush.bf16.msra.mxu0 %v985_v3  ;;  %v958_v40 = vld [vmem:[%s1377_s12 + $0xc] sm:$0xf0]  ;;  %v1196_v43 = vld [vmem:[%s1375_s11 + $0xe4] sm:$0xf]  ;;  %v1170_v44 = vld [vmem:[%s1375_s11 + $0x14] sm:$0xf]  ;;  %v957_v49 = vor.u32 %v1166_v35, %v956_v34  ;;  %v1468_v50 = vor.u32 %v1167_v38, %v964_v32 }
  0x40   : > { %692 = vmatpush.bf16.msra.mxu1 %v1049_v7  ;;  %v978_v45 = vld [vmem:[%s1375_s11 + $0x18] sm:$0xf0]  ;;  %v1082_v46 = vld [vmem:[%s1375_s11 + $0xe8] sm:$0xf0]  ;;  %v1212_v47 = vld [vmem:[%s1375_s11 + $0x164] sm:$0xf]  ;;  %v1470_v51 = vor.u32 %v1165_v39, %v958_v40 }
  0x41   : > { %706 = vmatpush.bf16.msra.mxu2 %v1113_v8  ;;  %v1146_v48 = vld [vmem:[%s1375_s11 + $0x168] sm:$0xf0]  ;;  %v981_v52 = vor.u32 %v1170_v44, %v978_v45  ;;  %v1085_v53 = vor.u32 %v1196_v43, %v1082_v46  ;;  %v1194_v55 = vld [vmem:[%s1375_s11 + $0xd4] sm:$0xf]  ;;  %v1168_v56 = vld [vmem:[%s1375_s11 + $0x4] sm:$0xf] }
  0x42   : > { %719 = vmatpush.bf16.msra.mxu3 %v997_v19  ;;  %v1149_v54 = vor.u32 %v1212_v47, %v1146_v48  ;;  %v970_v57 = vld [vmem:[%s1375_s11 + $0x8] sm:$0xf0]  ;;  %v1074_v58 = vld [vmem:[%s1375_s11 + $0xd8] sm:$0xf0]  ;;  %v1210_v59 = vld [vmem:[%s1375_s11 + $0x154] sm:$0xf] }
  0x43   : > { %679 = vmatpush.bf16.msra.mxu0 %v977_v15  ;;  %v1138_v60 = vld [vmem:[%s1375_s11 + $0x158] sm:$0xf0]  ;;  %v973_v61 = vor.u32 %v1168_v56, %v970_v57  ;;  %v1077_v62 = vor.u32 %v1194_v55, %v1074_v58  ;;  %v1192_v0 = vld [vmem:[%s1375_s11 + $0xc4] sm:$0xf]  ;;  %v1066_v1 = vld [vmem:[%s1375_s11 + $0xc8] sm:$0xf0] }
  0x44   : > { %693 = vmatpush.bf16.msra.mxu1 %v1041_v20  ;;  %v1141_v63 = vor.u32 %v1210_v59, %v1138_v60  ;;  %v1208_v2 = vld [vmem:[%s1375_s11 + $0x144] sm:$0xf]  ;;  %v1130_v3 = vld [vmem:[%s1375_s11 + $0x148] sm:$0xf0]  ;;  %v1069_v4 = vor.u32 %v1192_v0, %v1066_v1  ;;  %v1190_v6 = vld [vmem:[%s1375_s11 + $0xb4] sm:$0xf] }
  0x45   : > { %707 = vmatpush.bf16.msra.mxu2 %v1105_v21  ;;  %v1133_v5 = vor.u32 %v1208_v2, %v1130_v3  ;;  %v1058_v7 = vld [vmem:[%s1375_s11 + $0xb8] sm:$0xf0]  ;;  %v1206_v8 = vld [vmem:[%s1375_s11 + $0x134] sm:$0xf]  ;;  %v1188_v12 = vld [vmem:[%s1375_s11 + $0xa4] sm:$0xf] }
  0x46   : > { %720 = vmatpush.bf16.msra.mxu3 %v989_v33  ;;  %v1122_v9 = vld [vmem:[%s1375_s11 + $0x138] sm:$0xf0]  ;;  %v1061_v10 = vor.u32 %v1190_v6, %v1058_v7  ;;  %v1050_v13 = vld [vmem:[%s1375_s11 + $0xa8] sm:$0xf0]  ;;  %v1204_v14 = vld [vmem:[%s1375_s11 + $0x124] sm:$0xf] }
  0x47   : > { %680 = vmatpush.bf16.msra.mxu0 %v969_v31  ;;  %v1125_v11 = vor.u32 %v1206_v8, %v1122_v9  ;;  %v1114_v15 = vld [vmem:[%s1375_s11 + $0x128] sm:$0xf0]  ;;  %v1053_v16 = vor.u32 %v1188_v12, %v1050_v13  ;;  %v1186_v18 = vld [vmem:[%s1375_s11 + $0x94] sm:$0xf]  ;;  %v1042_v19 = vld [vmem:[%s1375_s11 + $0x98] sm:$0xf0] }
  0x48   : > { %694 = vmatpush.bf16.msra.mxu1 %v1033_v36  ;;  %v1117_v17 = vor.u32 %v1204_v14, %v1114_v15  ;;  %v1202_v20 = vld [vmem:[%s1375_s11 + $0x114] sm:$0xf]  ;;  %v1106_v21 = vld [vmem:[%s1375_s11 + $0x118] sm:$0xf0]  ;;  %v1045_v22 = vor.u32 %v1186_v18, %v1042_v19  ;;  %v1184_v24 = vld [vmem:[%s1375_s11 + $0x84] sm:$0xf] }
  0x49   : > { %708 = vmatpush.bf16.msra.mxu2 %v1097_v37  ;;  %v1109_v23 = vor.u32 %v1202_v20, %v1106_v21  ;;  %v1034_v25 = vld [vmem:[%s1375_s11 + $0x88] sm:$0xf0]  ;;  %v1200_v26 = vld [vmem:[%s1375_s11 + $0x104] sm:$0xf]  ;;  %v363_v40 = vld [vmem:[%s1576_s4 + $0x10] sm:$0xff]  ;;  %p1158_p11 = scmp.ne.s32.totalorder %s1289_s17, 8 }
  0x4a   : > { %681 = vmatmul.bf16.vlgmr.msra.gmra.mxu0 %v957_v49  ;;  %721 = vmatpush.bf16.msra.mxu3 %v981_v52  ;;  %v1098_v27 = vld [vmem:[%s1375_s11 + $0x108] sm:$0xf0]  ;;  %v1037_v28 = vor.u32 %v1184_v24, %v1034_v25  ;;  %v361_v33 = vld [vmem:[%s1576_s4] sm:$0xff] }
  0x4b   : > { %729 = vmatpush.bf16.msrb.mxu0 %v1093_v41  ;;  %695 = vmatmul.bf16.vlgmr.msra.gmra.mxu1 %v1470_v51  ;;  %v1101_v29 = vor.u32 %v1200_v26, %v1098_v27  ;;  %v362_v48 = vld [vmem:[%s1576_s4 + $0x8] sm:$0xff] }
  0x4c   : > { %743 = vmatpush.bf16.msrb.mxu1 %v1157_v42  ;;  %709 = vmatmul.bf16.vlgmr.msra.gmra.mxu2 %v1468_v50 }
  0x4e   : > { %722 = vmatpush.bf16.msra.mxu3 %v973_v61 }
  0x4f   : > { %730 = vmatpush.bf16.msrb.mxu0 %v1085_v53 }
  0x50   : > { %744 = vmatpush.bf16.msrb.mxu1 %v1149_v54  ;;  %v364_v54 = vld [vmem:[%s1576_s4 + $0x18] sm:$0xff] }
  0x51   : > { %723 = vmatmul.bf16.vlgmr.msra.gmra.mxu3 %v957_v49 }
  0x53   : > { %731 = vmatpush.bf16.msrb.mxu0 %v1077_v62 }
  0x54   : > { %745 = vmatpush.bf16.msrb.mxu1 %v1141_v63 }
  0x57   : > { %732 = vmatpush.bf16.msrb.mxu0 %v1069_v4 }
  0x58   : > { %746 = vmatpush.bf16.msrb.mxu1 %v1133_v5 }
  0x5b   : > { %733 = vmatpush.bf16.msrb.mxu0 %v1061_v10 }
  0x5c   : > { %747 = vmatpush.bf16.msrb.mxu1 %v1125_v11 }
  0x5f   : > { %734 = vmatpush.bf16.msrb.mxu0 %v1053_v16 }
  0x60   : > { %748 = vmatpush.bf16.msrb.mxu1 %v1117_v17 }
  0x63   : > { %735 = vmatpush.bf16.msrb.mxu0 %v1045_v22 }
  0x64   : > { %749 = vmatpush.bf16.msrb.mxu1 %v1109_v23 }
  0x67   : > { %736 = vmatpush.bf16.msrb.mxu0 %v1037_v28 }
  0x68   : > { %750 = vmatpush.bf16.msrb.mxu1 %v1101_v29 }
  0x6a   : > { %737 = vmatmul.bf16.vlgmr.msrb.gmra.mxu0 %v1470_v51 }
  0x6b   : > { %751 = vmatmul.bf16.vlgmr.msrb.gmra.mxu1 %v1468_v50 }
  0xc7   : > { %v682_v30 = vpop.f32.mrf.mxu0 }
  0xc8   : > { %v696_v31 = vpop.f32.mrf.mxu1 }
  0xc9   : > { %v697_v32 = vadd.f32 %v696_v31, %v682_v30 }
  0xcf   : > { %v710_v34 = vpop.f32.mrf.mxu2  ;;  %v684_v36 = vpop.f32.mrf.mxu0 }
  0xd0   : > { %v711_v35 = vadd.f32 %v710_v34, %v697_v32  ;;  %v698_v37 = vpop.f32.mrf.mxu1 }
  0xd1   : > { %v699_v39 = vadd.f32 %v698_v37, %v684_v36 }
  0xd2   : > { %v757_v38 = vadd.f32 %v711_v35, %v361_v33 }
  0xd4   : > { %761 = vst [vmem:[%s1576_s4] sm:$0xff] %v757_v38  ;;  %v724_v44 = vpop.f32.mrf.mxu3 }
  0xd7   : > { %v712_v41 = vpop.f32.mrf.mxu2 }
  0xd8   : > { %v713_v42 = vadd.f32 %v712_v41, %v699_v39 }
  0xda   : > { %v759_v43 = vadd.f32 %v713_v42, %v363_v40 }
  0xdc   : > { %763 = vst [vmem:[%s1576_s4 + $0x10] sm:$0xff] %v759_v43  ;;  %v726_v51 = vpop.f32.mrf.mxu3 }
  0xe7   : > { %v738_v45 = vpop.f32.mrf.mxu0 }
  0xe8   : > { %v752_v46 = vpop.f32.mrf.mxu1  ;;  %v739_v47 = vadd.f32 %v738_v45, %v724_v44 }
  0xea   : > { %v753_v49 = vadd.f32 %v752_v46, %v739_v47 }
  0xec   : > { %v758_v50 = vadd.f32 %v753_v49, %v362_v48 }
  0xee   : > { %762 = vst [vmem:[%s1576_s4 + $0x8] sm:$0xff] %v758_v50 }
  0xef   : > { %v740_v52 = vpop.f32.mrf.mxu0 }
  0xf0   : > { %v741_v53 = vadd.f32 %v740_v52, %v726_v51  ;;  %v754_v55 = vpop.f32.mrf.mxu1 }
  0xf2   : > { %v755_v56 = vadd.f32 %v754_v55, %v741_v53  ;;  %768 = sbr.rel (%p1158_p11) target bundleno = 261 (0x105), region = 70 }
  0xf4   : > { %v760_v57 = vadd.f32 %v755_v56, %v364_v54 }
  0xf6   : > { %764 = vst [vmem:[%s1576_s4 + $0x18] sm:$0xff] %v760_v57 }
  0xf7   : > { %v769_v58 = vld [vmem:[%s1576_s4] sm:$0xff]  ;;  %v770_v63 = vld [vmem:[%s1576_s4 + $0x8] sm:$0xff]  ;;  %v771_v2 = vld [vmem:[%s1576_s4 + $0x10] sm:$0xff] }
  0xf8   : > { %v773_v59 = vld [vmem:[%s1574_s2] sm:$0x3] }
  0xf9   : > { %v783_v60 = vld [vmem:[%s1575_s3] sm:$0x3]  ;;  %v775_v61 = vperm.slane %v773_v59, 0  ;;  %v776_v0 = vperm.slane %v773_v59, 1 }
  0xfa   : > { %v785_v62 = vperm.slane %v783_v60, 0  ;;  %v786_v1 = vperm.slane %v783_v60, 1 }
  0xfb   : > { %v779_v4 = vmul.f32 %v775_v61, %v769_v58  ;;  %v780_v5 = vmul.f32 %v776_v0, %v770_v63  ;;  %v781_v6 = vmul.f32 %v775_v61, %v771_v2 }
  0xfd   : > { %v772_v3 = vld [vmem:[%s1576_s4 + $0x18] sm:$0xff]  ;;  %v789_v8 = vadd.f32 %v785_v62, %v779_v4  ;;  %v790_v9 = vadd.f32 %v786_v1, %v780_v5  ;;  %v791_v10 = vadd.f32 %v785_v62, %v781_v6 }
  0xfe   : > { %v782_v7 = vmul.f32 %v776_v0, %v772_v3 }
  0xff   : > { %v793_v12 = vmax.f32 %v789_v8, 0.0  ;;  %v794_v13 = vmax.f32 %v790_v9, 0.0  ;;  %v795_v14 = vmax.f32 %v791_v10, 0.0 }
 0x100   : > { %v792_v11 = vadd.f32 %v786_v1, %v782_v7 }
 0x101   : > { %797 = vst [vmem:[%s1576_s4] sm:$0xff] %v793_v12 }
 0x102   : > { %v796_v15 = vmax.f32 %v792_v11, 0.0  ;;  %798 = vst [vmem:[%s1576_s4 + $0x8] sm:$0xff] %v794_v13 }
 0x103   : > { %799 = vst [vmem:[%s1576_s4 + $0x10] sm:$0xff] %v795_v14 }
 0x104   : > { %800 = vst [vmem:[%s1576_s4 + $0x18] sm:$0xff] %v796_v15 }
 0x105 PF: > { %s14_s19 = sadd.s32 1, %s1297_s19   ;;  %s1577_s15 = smov %s1285_s16 }
 0x106   : > { %p11_p12 = scmp.ge.s32.totalorder %s14_s19, 11   ;;  %s1578_s16 = smov %s1360_s23 }
 0x107   : > { %s1579_s17 = smov %s1293_s18  ;;  %s1580_s18 = smov %s1582_s20 }
 0x108   :  { %13 = sbr.rel (!%p11_p12) target bundleno = 3 (0x3), region = 120 }

// kernel: resnet10_forward.22
= control target key start
LH: loop header
LB: loop body
LE: loop exit
PB: predicated region body
PF: predicated region fallthrough
CT: control target
= control target key end

     0   :  { %s432_s1 = inlined_call_operand.vmem [shape: bf16[128,256], index: 1, kind: input, shape index: {}]   ;;  %s433_s0 = inlined_call_operand.vmem [shape: bf16[16,128], index: 0, kind: input, shape index: {}]   ;;  %s434_s2 = inlined_call_operand.vmem [shape: f32[1,256], index: 2, kind: input, shape index: {}]   ;;  %s435_s3 = inlined_call_operand.vmem [shape: f32[1,256], index: 3, kind: input, shape index: {}]   ;;  %s436_s4 = inlined_call_operand.vmem [shape: f32[16,256], index: 4, kind: output, shape index: {}]  }
   0x1   :  { %v266_v0 = vld [vmem:[%s432_s1 + $0x70] sm:$0xf]  ;;  %v288_v1 = vld [vmem:[%s432_s1 + $0x74] sm:$0xf0]  ;;  %v287_v2 = vld [vmem:[%s432_s1 + $0x74] sm:$0xf] }
   0x2   :  { %v267_v3 = vor.u32 %v288_v1, %v266_v0  ;;  %v268_v4 = vld [vmem:[%s432_s1 + $0x78] sm:$0xf0]  ;;  %v258_v5 = vld [vmem:[%s432_s1 + $0x60] sm:$0xf]  ;;  %v286_v6 = vld [vmem:[%s432_s1 + $0x64] sm:$0xf0] }
   0x3   :  { %v271_v7 = vor.u32 %v287_v2, %v268_v4  ;;  %v285_v8 = vld [vmem:[%s432_s1 + $0x64] sm:$0xf]  ;;  %v260_v9 = vld [vmem:[%s432_s1 + $0x68] sm:$0xf0]  ;;  %v259_v10 = vor.u32 %v286_v6, %v258_v5  ;;  %v250_v12 = vld [vmem:[%s432_s1 + $0x50] sm:$0xf] }
   0x4   :  { %133 = vmatpush.bf16.msra.mxu0 %v267_v3  ;;  %v263_v11 = vor.u32 %v285_v8, %v260_v9  ;;  %v284_v13 = vld [vmem:[%s432_s1 + $0x54] sm:$0xf0]  ;;  %v283_v14 = vld [vmem:[%s432_s1 + $0x54] sm:$0xf]  ;;  %v252_v15 = vld [vmem:[%s432_s1 + $0x58] sm:$0xf0] }
   0x5   :  { %147 = vmatpush.bf16.msra.mxu1 %v271_v7  ;;  %v251_v16 = vor.u32 %v284_v13, %v250_v12  ;;  %v255_v17 = vor.u32 %v283_v14, %v252_v15  ;;  %v242_v18 = vld [vmem:[%s432_s1 + $0x40] sm:$0xf]  ;;  %v282_v19 = vld [vmem:[%s432_s1 + $0x44] sm:$0xf0]  ;;  %v281_v20 = vld [vmem:[%s432_s1 + $0x44] sm:$0xf] }
   0x6   :  { %v244_v21 = vld [vmem:[%s432_s1 + $0x48] sm:$0xf0]  ;;  %v243_v22 = vor.u32 %v282_v19, %v242_v18  ;;  %v234_v24 = vld [vmem:[%s432_s1 + $0x30] sm:$0xf]  ;;  %v280_v25 = vld [vmem:[%s432_s1 + $0x34] sm:$0xf0] }
   0x7   :  { %v247_v23 = vor.u32 %v281_v20, %v244_v21  ;;  %v279_v26 = vld [vmem:[%s432_s1 + $0x34] sm:$0xf]  ;;  %v236_v27 = vld [vmem:[%s432_s1 + $0x38] sm:$0xf0]  ;;  %v235_v28 = vor.u32 %v280_v25, %v234_v24  ;;  %v226_v30 = vld [vmem:[%s432_s1 + $0x20] sm:$0xf] }
   0x8   :  { %134 = vmatpush.bf16.msra.mxu0 %v259_v10  ;;  %v239_v29 = vor.u32 %v279_v26, %v236_v27  ;;  %v278_v31 = vld [vmem:[%s432_s1 + $0x24] sm:$0xf0]  ;;  %v277_v32 = vld [vmem:[%s432_s1 + $0x24] sm:$0xf]  ;;  %v228_v33 = vld [vmem:[%s432_s1 + $0x28] sm:$0xf0] }
   0x9   :  { %148 = vmatpush.bf16.msra.mxu1 %v263_v11  ;;  %v227_v34 = vor.u32 %v278_v31, %v226_v30  ;;  %v231_v35 = vor.u32 %v277_v32, %v228_v33  ;;  %v218_v36 = vld [vmem:[%s432_s1 + $0x10] sm:$0xf]  ;;  %v276_v37 = vld [vmem:[%s432_s1 + $0x14] sm:$0xf0]  ;;  %v275_v38 = vld [vmem:[%s432_s1 + $0x14] sm:$0xf] }
   0xa   :  { %v220_v39 = vld [vmem:[%s432_s1 + $0x18] sm:$0xf0]  ;;  %v219_v40 = vor.u32 %v276_v37, %v218_v36  ;;  %v210_v42 = vld [vmem:[%s432_s1] sm:$0xf]  ;;  %v274_v43 = vld [vmem:[%s432_s1 + $0x4] sm:$0xf0] }
   0xb   :  { %v223_v41 = vor.u32 %v275_v38, %v220_v39  ;;  %v273_v44 = vld [vmem:[%s432_s1 + $0x4] sm:$0xf]  ;;  %v212_v45 = vld [vmem:[%s432_s1 + $0x8] sm:$0xf0]  ;;  %v211_v46 = vor.u32 %v274_v43, %v210_v42  ;;  %v176_v49 = vld [vmem:[%s434_s2] sm:$0x3] }
   0xc   :  { %135 = vmatpush.bf16.msra.mxu0 %v251_v16  ;;  %v215_v47 = vor.u32 %v273_v44, %v212_v45  ;;  %v272_v48 = vld [vmem:[%s433_s0] sm:$0xff]  ;;  %v178_v51 = vperm.slane %v176_v49, 0  ;;  %v179_v53 = vperm.slane %v176_v49, 1 }
   0xd   :  { %149 = vmatpush.bf16.msra.mxu1 %v255_v17  ;;  %v186_v50 = vld [vmem:[%s435_s3] sm:$0x3] }
   0xe   :  { %v188_v54 = vperm.slane %v186_v50, 0  ;;  %v189_v56 = vperm.slane %v186_v50, 1 }
  0x10   :  { %136 = vmatpush.bf16.msra.mxu0 %v243_v22 }
  0x11   :  { %150 = vmatpush.bf16.msra.mxu1 %v247_v23 }
  0x14   :  { %137 = vmatpush.bf16.msra.mxu0 %v235_v28 }
  0x15   :  { %151 = vmatpush.bf16.msra.mxu1 %v239_v29 }
  0x18   :  { %138 = vmatpush.bf16.msra.mxu0 %v227_v34 }
  0x19   :  { %152 = vmatpush.bf16.msra.mxu1 %v231_v35 }
  0x1c   :  { %139 = vmatpush.bf16.msra.mxu0 %v219_v40 }
  0x1d   :  { %153 = vmatpush.bf16.msra.mxu1 %v223_v41 }
  0x20   :  { %140 = vmatpush.bf16.msra.mxu0 %v211_v46 }
  0x21   :  { %154 = vmatpush.bf16.msra.mxu1 %v215_v47 }
  0x23   :  { %141 = vmatmul.bf16.vlgmr.msra.gmra.mxu0 %v272_v48 }
  0x24   :  { %155 = vmatmul.bf16.vlgmr.msra.gmra.mxu1 %v272_v48 }
  0xa0   :  { %v142_v52 = vpop.f32.mrf.mxu0 }
  0xa1   :  { %v156_v55 = vpop.f32.mrf.mxu1  ;;  %v182_v57 = vmul.f32 %v178_v51, %v142_v52 }
  0xa2   :  { %v183_v58 = vmul.f32 %v179_v53, %v156_v55 }
  0xa3   :  { %v192_v59 = vadd.f32 %v188_v54, %v182_v57 }
  0xa4   :  { %v193_v60 = vadd.f32 %v189_v56, %v183_v58 }
  0xa5   :  { %196 = vst [vmem:[%s436_s4] sm:$0xff] %v192_v59 }
  0xa6   :  { %197 = vst [vmem:[%s436_s4 + $0x8] sm:$0xff] %v193_v60 }
  0xa8   :  { %v144_v61 = vpop.f32.mrf.mxu0 }
  0xa9   :  { %v158_v62 = vpop.f32.mrf.mxu1  ;;  %v184_v63 = vmul.f32 %v178_v51, %v144_v61 }
  0xaa   :  { %v185_v0 = vmul.f32 %v179_v53, %v158_v62 }
  0xab   :  { %v194_v1 = vadd.f32 %v188_v54, %v184_v63 }
  0xac   :  { %v195_v2 = vadd.f32 %v189_v56, %v185_v0 }
  0xad   :  { %198 = vst [vmem:[%s436_s4 + $0x10] sm:$0xff] %v194_v1 }
  0xae   :  { %199 = vst [vmem:[%s436_s4 + $0x18] sm:$0xff] %v195_v2 }

// kernel: resnet10_forward.23
= control target key start
LH: loop header
LB: loop body
LE: loop exit
PB: predicated region body
PF: predicated region fallthrough
CT: control target
= control target key end

     0   :  { %s1428_s18 = smov 0   ;;  %s1430_s19 = smov 0   ;;  %s1687_s0 = inlined_call_operand.vmem [shape: bf16[16,6912], index: 0, kind: input, shape index: {}]   ;;  %s1688_s1 = inlined_call_operand.vmem [shape: bf16[6912,256], index: 1, kind: input, shape index: {}]   ;;  %s1689_s2 = inlined_call_operand.vmem [shape: f32[1,256], index: 2, kind: input, shape index: {}]   ;;  %s1690_s3 = inlined_call_operand.vmem [shape: f32[1,256], index: 3, kind: input, shape index: {}]   ;;  %s1691_s4 = inlined_call_operand.vmem [shape: f32[16,256], index: 4, kind: input, shape index: {}]   ;;  %s1692_s5 = inlined_call_operand.vmem [shape: f32[16,256], index: 5, kind: output, shape index: {}]  }
   0x1   :  { %s1432_s20 = smov 0   ;;  %s1434_s21 = smov 0  }
   0x2   :  { %s1436_s22 = smov 0  }
   0x3 LB: > { %s27_s23 = sadd.s32 1, %s1391_s21  ;;  %p50_p1 = scmp.ne.s32.totalorder %s1383_s19, %s1379_s18  ;;  %s1395_s22 = sphi %s1436_s22, %s15_s22   ;;  %s1391_s21 = sphi %s1434_s21, %s1696_s21   ;;  %s1387_s20 = sphi %s1432_s20, %s1695_s20   ;;  %s1383_s19 = sphi %s1430_s19, %s1694_s19   ;;  %s1379_s18 = sphi %s1428_s18, %s1693_s18  }
   0x4   : > { %p28_p0 = scmp.ge.s32.totalorder %s27_s23, 18  ;;  %p51_p2 = scmp.eq.s32.totalorder %s1395_s22, 0 }
   0x5   : > { %s43_s25 = sadd.s32 1, %s1383_s19  ;;  %p1042_p5 = scmp.ge.s32.totalorder %s1395_s22, 18 }
   0x6   : > { %s1698_s23 = smov (%p28_p0, %s27_s23), 0  ;;  %p52_p3 = por %p51_p2, %p50_p1 }
   0x7   : > { %s39_s24 = ssub.s32 %s1391_s21, %s1698_s23  ;;  %243 = sbr.rel (%p1042_p5) target bundleno = 21 (0x15), region = 28 }
   0x8   : > { %p41_p4 = scmp.eq.s32.totalorder %s39_s24, 0 }
   0xa   : > { %s1463_s26 = scalar_select %p41_p4, %s1383_s19, %s43_s25  }
   0xc   : > { %246 = sbr.rel (!%p52_p3) target bundleno = 21 (0x15), region = 32  ;;  %s248_s27 = sand.u32 (%p52_p3), 1, %s1383_s19  }
   0xd   : > { %s1261_s28 = smul.u32 (%p52_p3), 12, %s1391_s21 }
   0xe   : > { %s1314_s29 = smul.u32 (%p52_p3), 24, %s248_s27 }
   0xf   : > { %s256_s7 = scalar_lea.vmem (%p52_p3), %s1687_s0, %s1261_s28 }
  0x10   : > { %v271_v0 = vld [vmem:[%s256_s7] sm:$0xff] (%p52_p3)  ;;  %v273_v1 = vld [vmem:[%s256_s7 + $0xd8] sm:$0xff] (%p52_p3)  ;;  %v1044_v2 = vld [vmem:[%s256_s7 + $0x8] sm:$0xf] (%p52_p3)  ;;  %s250_s8 = scalar_lea.vmem (%p52_p3), [#allocation2], %s1314_s29 }
  0x11   : > { %272 = vst [vmem:[%s250_s8] sm:$0xff] %v271_v0  ;;  %v1046_v3 = vld [vmem:[%s256_s7 + $0xe0] sm:$0xf] }
  0x12   : > { %274 = vst [vmem:[%s250_s8 + $0xc] sm:$0xff] %v273_v1 }
  0x13   : > { %1045 = vst [vmem:[%s250_s8 + $0x8] sm:$0xf] %v1044_v2 }
  0x14   : > { %1047 = vst [vmem:[%s250_s8 + $0x14] sm:$0xf] %v1046_v3 }
  0x15 PF: > { %p1048_p6 = scmp.ge.s32.totalorder %s1395_s22, 1  ;;  %p306_p7 = scmp.lt.s32.totalorder %s1395_s22, 19 }
  0x17   : > { %p307_p8 = pnand %p1048_p6, %p306_p7 }
  0x18   : > { %s313_s9 = sand.u32 (!%p307_p8), 1, %s1379_s18   ;;  %s375_s10 = smul.u32 (!%p307_p8), 48, %s1387_s20 }
  0x19   : > { %310 = sbr.rel (%p307_p8) target bundleno = 263 (0x107), region = 62  ;;  %p1051_p10 = scmp.ne.s32.totalorder (!%p307_p8), %s1387_s20, 0 }
  0x1a   : > { %s1315_s11 = smul.u32 (!%p307_p8), 24, %s313_s9  ;;  %p377_p9 = scmp.lt.s32.totalorder (!%p307_p8), %s375_s10, 863 }
  0x1c   : > { %s1480_s16 = scalar_lea.vmem (!%p307_p8), [#allocation2], %s1315_s11 }
  0x1e   : > { %s1700_s10 = smov (!%p377_p9, %s375_s10), 863  ;;  %424 = sbr.rel (%p1051_p10) target bundleno = 40 (0x28), region = 70 }
  0x1f   : > { %s1262_s12 = sshll.u32 %s1700_s10, 3 }
  0x20   : > { %s1478_s15 = scalar_lea.vmem %s1688_s1, %s1262_s12 }
  0x23   : > { %v1397_v4 = vmov 0.0  }
  0x24   : > { %425 = vst [vmem:[%s1692_s5] sm:$0xff] %v1397_v4 }
  0x25   : > { %426 = vst [vmem:[%s1692_s5 + $0x8] sm:$0xff] %v1397_v4 }
  0x26   : > { %427 = vst [vmem:[%s1692_s5 + $0x10] sm:$0xff] %v1397_v4 }
  0x27   : > { %428 = vst [vmem:[%s1692_s5 + $0x18] sm:$0xff] %v1397_v4 }
  0x28 PF: > { %v1122_v5 = vld [vmem:[%s1478_s15 + $0x70] sm:$0xf]  ;;  %v1281_v6 = vld [vmem:[%s1478_s15 + $0x74] sm:$0xf0]  ;;  %v1114_v14 = vld [vmem:[%s1478_s15 + $0x60] sm:$0xf] }
  0x29   : > { %v1186_v7 = vld [vmem:[%s1478_s15 + $0xf0] sm:$0xf]  ;;  %v1123_v8 = vor.u32 %v1281_v6, %v1122_v5  ;;  %v1297_v9 = vld [vmem:[%s1478_s15 + $0xf4] sm:$0xf0]  ;;  %v1279_v15 = vld [vmem:[%s1478_s15 + $0x64] sm:$0xf0] }
  0x2a   : > { %v1250_v10 = vld [vmem:[%s1478_s15 + $0x170] sm:$0xf]  ;;  %v1313_v11 = vld [vmem:[%s1478_s15 + $0x174] sm:$0xf0]  ;;  %v1187_v12 = vor.u32 %v1297_v9, %v1186_v7  ;;  %v1178_v16 = vld [vmem:[%s1478_s15 + $0xe0] sm:$0xf]  ;;  %v1115_v17 = vor.u32 %v1279_v15, %v1114_v14 }
  0x2b   : > { %v1251_v13 = vor.u32 %v1313_v11, %v1250_v10  ;;  %741 = vmatpush.bf16.msra.mxu0 %v1123_v8  ;;  %v1295_v18 = vld [vmem:[%s1478_s15 + $0xe4] sm:$0xf0]  ;;  %v1242_v19 = vld [vmem:[%s1478_s15 + $0x160] sm:$0xf]  ;;  %v1106_v23 = vld [vmem:[%s1478_s15 + $0x50] sm:$0xf] }
  0x2c   : > { %v1311_v20 = vld [vmem:[%s1478_s15 + $0x164] sm:$0xf0]  ;;  %755 = vmatpush.bf16.msra.mxu1 %v1187_v12  ;;  %v1179_v21 = vor.u32 %v1295_v18, %v1178_v16  ;;  %v1277_v24 = vld [vmem:[%s1478_s15 + $0x54] sm:$0xf0]  ;;  %v1170_v25 = vld [vmem:[%s1478_s15 + $0xd0] sm:$0xf] }
  0x2d   : > { %769 = vmatpush.bf16.msra.mxu2 %v1251_v13  ;;  %v1243_v22 = vor.u32 %v1311_v20, %v1242_v19  ;;  %v1293_v26 = vld [vmem:[%s1478_s15 + $0xd4] sm:$0xf0]  ;;  %v1234_v27 = vld [vmem:[%s1478_s15 + $0x150] sm:$0xf]  ;;  %v1107_v29 = vor.u32 %v1277_v24, %v1106_v23  ;;  %v1098_v30 = vld [vmem:[%s1478_s15 + $0x40] sm:$0xf] }
  0x2e   : > { %v1309_v28 = vld [vmem:[%s1478_s15 + $0x154] sm:$0xf0]  ;;  %v1275_v31 = vld [vmem:[%s1478_s15 + $0x44] sm:$0xf0]  ;;  %v1171_v32 = vor.u32 %v1293_v26, %v1170_v25  ;;  %v1162_v34 = vld [vmem:[%s1478_s15 + $0xc0] sm:$0xf] }
  0x2f   : > { %742 = vmatpush.bf16.msra.mxu0 %v1115_v17  ;;  %v1235_v33 = vor.u32 %v1309_v28, %v1234_v27  ;;  %v1280_v35 = vld [vmem:[%s1478_s15 + $0x74] sm:$0xf]  ;;  %v1124_v36 = vld [vmem:[%s1478_s15 + $0x78] sm:$0xf0]  ;;  %v1291_v37 = vld [vmem:[%s1478_s15 + $0xc4] sm:$0xf0]  ;;  %v1099_v42 = vor.u32 %v1275_v31, %v1098_v30 }
  0x30   : > { %756 = vmatpush.bf16.msra.mxu1 %v1179_v21  ;;  %v1226_v38 = vld [vmem:[%s1478_s15 + $0x140] sm:$0xf]  ;;  %v1307_v39 = vld [vmem:[%s1478_s15 + $0x144] sm:$0xf0]  ;;  %v1127_v40 = vor.u32 %v1280_v35, %v1124_v36  ;;  %v1278_v41 = vld [vmem:[%s1478_s15 + $0x64] sm:$0xf]  ;;  %v1163_v46 = vor.u32 %v1291_v37, %v1162_v34 }
  0x31   : > { %770 = vmatpush.bf16.msra.mxu2 %v1243_v22  ;;  %v1090_v43 = vld [vmem:[%s1478_s15 + $0x30] sm:$0xf]  ;;  %v1273_v44 = vld [vmem:[%s1478_s15 + $0x34] sm:$0xf0]  ;;  %v1116_v45 = vld [vmem:[%s1478_s15 + $0x68] sm:$0xf0]  ;;  %v1227_v47 = vor.u32 %v1307_v39, %v1226_v38 }
  0x32   : > { %783 = vmatpush.bf16.msra.mxu3 %v1127_v40  ;;  %v1154_v48 = vld [vmem:[%s1478_s15 + $0xb0] sm:$0xf]  ;;  %v1289_v49 = vld [vmem:[%s1478_s15 + $0xb4] sm:$0xf0]  ;;  %v1119_v51 = vor.u32 %v1278_v41, %v1116_v45  ;;  %v1276_v53 = vld [vmem:[%s1478_s15 + $0x54] sm:$0xf]  ;;  %v1091_v55 = vor.u32 %v1273_v44, %v1090_v43 }
  0x33   : > { %743 = vmatpush.bf16.msra.mxu0 %v1107_v29  ;;  %v1218_v50 = vld [vmem:[%s1478_s15 + $0x130] sm:$0xf]  ;;  %v1305_v52 = vld [vmem:[%s1478_s15 + $0x134] sm:$0xf0]  ;;  %v1108_v54 = vld [vmem:[%s1478_s15 + $0x58] sm:$0xf0]  ;;  %v1155_v59 = vor.u32 %v1289_v49, %v1154_v48 }
  0x34   : > { %757 = vmatpush.bf16.msra.mxu1 %v1171_v32  ;;  %v1082_v56 = vld [vmem:[%s1478_s15 + $0x20] sm:$0xf]  ;;  %v1271_v57 = vld [vmem:[%s1478_s15 + $0x24] sm:$0xf0]  ;;  %v1111_v58 = vor.u32 %v1276_v53, %v1108_v54  ;;  %v1219_v60 = vor.u32 %v1305_v52, %v1218_v50  ;;  %v1274_v62 = vld [vmem:[%s1478_s15 + $0x44] sm:$0xf] }
  0x35   : > { %771 = vmatpush.bf16.msra.mxu2 %v1235_v33  ;;  %v1146_v61 = vld [vmem:[%s1478_s15 + $0xa0] sm:$0xf]  ;;  %v1100_v63 = vld [vmem:[%s1478_s15 + $0x48] sm:$0xf0]  ;;  %v1287_v0 = vld [vmem:[%s1478_s15 + $0xa4] sm:$0xf0]  ;;  %v1083_v3 = vor.u32 %v1271_v57, %v1082_v56 }
  0x36   : > { %784 = vmatpush.bf16.msra.mxu3 %v1119_v51  ;;  %v1210_v1 = vld [vmem:[%s1478_s15 + $0x120] sm:$0xf]  ;;  %v1303_v2 = vld [vmem:[%s1478_s15 + $0x124] sm:$0xf0]  ;;  %v1074_v4 = vld [vmem:[%s1478_s15 + $0x10] sm:$0xf]  ;;  %v1103_v6 = vor.u32 %v1274_v62, %v1100_v63  ;;  %v1147_v7 = vor.u32 %v1287_v0, %v1146_v61 }
  0x37   : > { %744 = vmatpush.bf16.msra.mxu0 %v1099_v42  ;;  %v1269_v5 = vld [vmem:[%s1478_s15 + $0x14] sm:$0xf0]  ;;  %v1211_v8 = vor.u32 %v1303_v2, %v1210_v1  ;;  %v1138_v9 = vld [vmem:[%s1478_s15 + $0x90] sm:$0xf]  ;;  %v1272_v10 = vld [vmem:[%s1478_s15 + $0x34] sm:$0xf] }
  0x38   : > { %758 = vmatpush.bf16.msra.mxu1 %v1163_v46  ;;  %v1092_v11 = vld [vmem:[%s1478_s15 + $0x38] sm:$0xf0]  ;;  %v1285_v12 = vld [vmem:[%s1478_s15 + $0x94] sm:$0xf0]  ;;  %v1202_v13 = vld [vmem:[%s1478_s15 + $0x110] sm:$0xf]  ;;  %v1075_v15 = vor.u32 %v1269_v5, %v1074_v4 }
  0x39   : > { %772 = vmatpush.bf16.msra.mxu2 %v1227_v47  ;;  %v1301_v14 = vld [vmem:[%s1478_s15 + $0x114] sm:$0xf0]  ;;  %v1066_v16 = vld [vmem:[%s1478_s15] sm:$0xf]  ;;  %v1267_v17 = vld [vmem:[%s1478_s15 + $0x4] sm:$0xf0]  ;;  %v1095_v19 = vor.u32 %v1272_v10, %v1092_v11  ;;  %v1139_v20 = vor.u32 %v1285_v12, %v1138_v9 }
  0x3a   : > { %785 = vmatpush.bf16.msra.mxu3 %v1111_v58  ;;  %v1130_v18 = vld [vmem:[%s1478_s15 + $0x80] sm:$0xf]  ;;  %v1203_v21 = vor.u32 %v1301_v14, %v1202_v13  ;;  %v1283_v22 = vld [vmem:[%s1478_s15 + $0x84] sm:$0xf0]  ;;  %v1270_v23 = vld [vmem:[%s1478_s15 + $0x24] sm:$0xf]  ;;  %v1067_v31 = vor.u32 %v1267_v17, %v1066_v16 }
  0x3b   : > { %745 = vmatpush.bf16.msra.mxu0 %v1091_v55  ;;  %v1084_v24 = vld [vmem:[%s1478_s15 + $0x28] sm:$0xf0]  ;;  %v1194_v25 = vld [vmem:[%s1478_s15 + $0x100] sm:$0xf]  ;;  %v1299_v26 = vld [vmem:[%s1478_s15 + $0x104] sm:$0xf0]  ;;  %v1131_v36 = vor.u32 %v1283_v22, %v1130_v18 }
  0x3c   : > { %759 = vmatpush.bf16.msra.mxu1 %v1155_v59  ;;  %v1296_v27 = vld [vmem:[%s1478_s15 + $0xf4] sm:$0xf]  ;;  %v1188_v28 = vld [vmem:[%s1478_s15 + $0xf8] sm:$0xf0]  ;;  %v1062_v32 = vld [vmem:[%s1480_s16 + $0x8] sm:$0xf]  ;;  %v1087_v33 = vor.u32 %v1270_v23, %v1084_v24  ;;  %v1195_v37 = vor.u32 %v1299_v26, %v1194_v25 }
  0x3d   : > { %773 = vmatpush.bf16.msra.mxu2 %v1219_v60  ;;  %v1312_v29 = vld [vmem:[%s1478_s15 + $0x174] sm:$0xf]  ;;  %v1252_v30 = vld [vmem:[%s1478_s15 + $0x178] sm:$0xf0]  ;;  %v1054_v34 = vld [vmem:[%s1480_s16] sm:$0xf]  ;;  %v1191_v41 = vor.u32 %v1296_v27, %v1188_v28 }
  0x3e   : > { %786 = vmatpush.bf16.msra.mxu3 %v1103_v6  ;;  %v1264_v35 = vld [vmem:[%s1480_s16 + $0x8] sm:$0xf0]  ;;  %v1265_v38 = vld [vmem:[%s1480_s16 + $0x10] sm:$0xf0]  ;;  %v1263_v39 = vld [vmem:[%s1480_s16 + $0x4] sm:$0xf]  ;;  %v1255_v42 = vor.u32 %v1312_v29, %v1252_v30 }
  0x3f   : > { %746 = vmatpush.bf16.msra.mxu0 %v1083_v3  ;;  %v1056_v40 = vld [vmem:[%s1480_s16 + $0xc] sm:$0xf0]  ;;  %v1294_v43 = vld [vmem:[%s1478_s15 + $0xe4] sm:$0xf]  ;;  %v1268_v44 = vld [vmem:[%s1478_s15 + $0x14] sm:$0xf]  ;;  %v1055_v49 = vor.u32 %v1264_v35, %v1054_v34  ;;  %v1571_v50 = vor.u32 %v1265_v38, %v1062_v32 }
  0x40   : > { %760 = vmatpush.bf16.msra.mxu1 %v1147_v7  ;;  %v1076_v45 = vld [vmem:[%s1478_s15 + $0x18] sm:$0xf0]  ;;  %v1180_v46 = vld [vmem:[%s1478_s15 + $0xe8] sm:$0xf0]  ;;  %v1310_v47 = vld [vmem:[%s1478_s15 + $0x164] sm:$0xf]  ;;  %v1573_v51 = vor.u32 %v1263_v39, %v1056_v40 }
  0x41   : > { %774 = vmatpush.bf16.msra.mxu2 %v1211_v8  ;;  %v1244_v48 = vld [vmem:[%s1478_s15 + $0x168] sm:$0xf0]  ;;  %v1079_v52 = vor.u32 %v1268_v44, %v1076_v45  ;;  %v1183_v53 = vor.u32 %v1294_v43, %v1180_v46  ;;  %v1292_v55 = vld [vmem:[%s1478_s15 + $0xd4] sm:$0xf]  ;;  %v1266_v56 = vld [vmem:[%s1478_s15 + $0x4] sm:$0xf] }
  0x42   : > { %787 = vmatpush.bf16.msra.mxu3 %v1095_v19  ;;  %v1247_v54 = vor.u32 %v1310_v47, %v1244_v48  ;;  %v1068_v57 = vld [vmem:[%s1478_s15 + $0x8] sm:$0xf0]  ;;  %v1172_v58 = vld [vmem:[%s1478_s15 + $0xd8] sm:$0xf0]  ;;  %v1308_v59 = vld [vmem:[%s1478_s15 + $0x154] sm:$0xf] }
  0x43   : > { %747 = vmatpush.bf16.msra.mxu0 %v1075_v15  ;;  %v1236_v60 = vld [vmem:[%s1478_s15 + $0x158] sm:$0xf0]  ;;  %v1071_v61 = vor.u32 %v1266_v56, %v1068_v57  ;;  %v1175_v62 = vor.u32 %v1292_v55, %v1172_v58  ;;  %v1290_v0 = vld [vmem:[%s1478_s15 + $0xc4] sm:$0xf]  ;;  %v1164_v1 = vld [vmem:[%s1478_s15 + $0xc8] sm:$0xf0] }
  0x44   : > { %761 = vmatpush.bf16.msra.mxu1 %v1139_v20  ;;  %v1239_v63 = vor.u32 %v1308_v59, %v1236_v60  ;;  %v1306_v2 = vld [vmem:[%s1478_s15 + $0x144] sm:$0xf]  ;;  %v1228_v3 = vld [vmem:[%s1478_s15 + $0x148] sm:$0xf0]  ;;  %v1167_v4 = vor.u32 %v1290_v0, %v1164_v1  ;;  %v1288_v6 = vld [vmem:[%s1478_s15 + $0xb4] sm:$0xf] }
  0x45   : > { %775 = vmatpush.bf16.msra.mxu2 %v1203_v21  ;;  %v1231_v5 = vor.u32 %v1306_v2, %v1228_v3  ;;  %v1156_v7 = vld [vmem:[%s1478_s15 + $0xb8] sm:$0xf0]  ;;  %v1304_v8 = vld [vmem:[%s1478_s15 + $0x134] sm:$0xf]  ;;  %v1286_v12 = vld [vmem:[%s1478_s15 + $0xa4] sm:$0xf] }
  0x46   : > { %788 = vmatpush.bf16.msra.mxu3 %v1087_v33  ;;  %v1220_v9 = vld [vmem:[%s1478_s15 + $0x138] sm:$0xf0]  ;;  %v1159_v10 = vor.u32 %v1288_v6, %v1156_v7  ;;  %v1148_v13 = vld [vmem:[%s1478_s15 + $0xa8] sm:$0xf0]  ;;  %v1302_v14 = vld [vmem:[%s1478_s15 + $0x124] sm:$0xf] }
  0x47   : > { %748 = vmatpush.bf16.msra.mxu0 %v1067_v31  ;;  %v1223_v11 = vor.u32 %v1304_v8, %v1220_v9  ;;  %v1212_v15 = vld [vmem:[%s1478_s15 + $0x128] sm:$0xf0]  ;;  %v1151_v16 = vor.u32 %v1286_v12, %v1148_v13  ;;  %v1284_v18 = vld [vmem:[%s1478_s15 + $0x94] sm:$0xf]  ;;  %v1140_v19 = vld [vmem:[%s1478_s15 + $0x98] sm:$0xf0] }
  0x48   : > { %762 = vmatpush.bf16.msra.mxu1 %v1131_v36  ;;  %v1215_v17 = vor.u32 %v1302_v14, %v1212_v15  ;;  %v1300_v20 = vld [vmem:[%s1478_s15 + $0x114] sm:$0xf]  ;;  %v1204_v21 = vld [vmem:[%s1478_s15 + $0x118] sm:$0xf0]  ;;  %v1143_v22 = vor.u32 %v1284_v18, %v1140_v19  ;;  %v1282_v24 = vld [vmem:[%s1478_s15 + $0x84] sm:$0xf] }
  0x49   : > { %776 = vmatpush.bf16.msra.mxu2 %v1195_v37  ;;  %v1207_v23 = vor.u32 %v1300_v20, %v1204_v21  ;;  %v1132_v25 = vld [vmem:[%s1478_s15 + $0x88] sm:$0xf0]  ;;  %v1298_v26 = vld [vmem:[%s1478_s15 + $0x104] sm:$0xf]  ;;  %v431_v40 = vld [vmem:[%s1692_s5 + $0x10] sm:$0xff]  ;;  %p1256_p11 = scmp.ne.s32.totalorder %s1387_s20, 17 }
  0x4a   : > { %749 = vmatmul.bf16.vlgmr.msra.gmra.mxu0 %v1055_v49  ;;  %789 = vmatpush.bf16.msra.mxu3 %v1079_v52  ;;  %v1196_v27 = vld [vmem:[%s1478_s15 + $0x108] sm:$0xf0]  ;;  %v1135_v28 = vor.u32 %v1282_v24, %v1132_v25  ;;  %v429_v33 = vld [vmem:[%s1692_s5] sm:$0xff] }
  0x4b   : > { %797 = vmatpush.bf16.msrb.mxu0 %v1191_v41  ;;  %763 = vmatmul.bf16.vlgmr.msra.gmra.mxu1 %v1573_v51  ;;  %v1199_v29 = vor.u32 %v1298_v26, %v1196_v27  ;;  %v430_v48 = vld [vmem:[%s1692_s5 + $0x8] sm:$0xff] }
  0x4c   : > { %811 = vmatpush.bf16.msrb.mxu1 %v1255_v42  ;;  %777 = vmatmul.bf16.vlgmr.msra.gmra.mxu2 %v1571_v50 }
  0x4e   : > { %790 = vmatpush.bf16.msra.mxu3 %v1071_v61 }
  0x4f   : > { %798 = vmatpush.bf16.msrb.mxu0 %v1183_v53 }
  0x50   : > { %812 = vmatpush.bf16.msrb.mxu1 %v1247_v54  ;;  %v432_v54 = vld [vmem:[%s1692_s5 + $0x18] sm:$0xff] }
  0x51   : > { %791 = vmatmul.bf16.vlgmr.msra.gmra.mxu3 %v1055_v49 }
  0x53   : > { %799 = vmatpush.bf16.msrb.mxu0 %v1175_v62 }
  0x54   : > { %813 = vmatpush.bf16.msrb.mxu1 %v1239_v63 }
  0x57   : > { %800 = vmatpush.bf16.msrb.mxu0 %v1167_v4 }
  0x58   : > { %814 = vmatpush.bf16.msrb.mxu1 %v1231_v5 }
  0x5b   : > { %801 = vmatpush.bf16.msrb.mxu0 %v1159_v10 }
  0x5c   : > { %815 = vmatpush.bf16.msrb.mxu1 %v1223_v11 }
  0x5f   : > { %802 = vmatpush.bf16.msrb.mxu0 %v1151_v16 }
  0x60   : > { %816 = vmatpush.bf16.msrb.mxu1 %v1215_v17 }
  0x63   : > { %803 = vmatpush.bf16.msrb.mxu0 %v1143_v22 }
  0x64   : > { %817 = vmatpush.bf16.msrb.mxu1 %v1207_v23 }
  0x67   : > { %804 = vmatpush.bf16.msrb.mxu0 %v1135_v28 }
  0x68   : > { %818 = vmatpush.bf16.msrb.mxu1 %v1199_v29 }
  0x6a   : > { %805 = vmatmul.bf16.vlgmr.msrb.gmra.mxu0 %v1573_v51 }
  0x6b   : > { %819 = vmatmul.bf16.vlgmr.msrb.gmra.mxu1 %v1571_v50 }
  0xc7   : > { %v750_v30 = vpop.f32.mrf.mxu0 }
  0xc8   : > { %v764_v31 = vpop.f32.mrf.mxu1 }
  0xc9   : > { %v765_v32 = vadd.f32 %v764_v31, %v750_v30 }
  0xcf   : > { %v778_v34 = vpop.f32.mrf.mxu2  ;;  %v752_v36 = vpop.f32.mrf.mxu0 }
  0xd0   : > { %v779_v35 = vadd.f32 %v778_v34, %v765_v32  ;;  %v766_v37 = vpop.f32.mrf.mxu1 }
  0xd1   : > { %v767_v39 = vadd.f32 %v766_v37, %v752_v36 }
  0xd2   : > { %v825_v38 = vadd.f32 %v779_v35, %v429_v33 }
  0xd4   : > { %829 = vst [vmem:[%s1692_s5] sm:$0xff] %v825_v38  ;;  %v792_v44 = vpop.f32.mrf.mxu3 }
  0xd7   : > { %v780_v41 = vpop.f32.mrf.mxu2 }
  0xd8   : > { %v781_v42 = vadd.f32 %v780_v41, %v767_v39 }
  0xda   : > { %v827_v43 = vadd.f32 %v781_v42, %v431_v40 }
  0xdc   : > { %831 = vst [vmem:[%s1692_s5 + $0x10] sm:$0xff] %v827_v43  ;;  %v794_v51 = vpop.f32.mrf.mxu3 }
  0xe7   : > { %v806_v45 = vpop.f32.mrf.mxu0 }
  0xe8   : > { %v820_v46 = vpop.f32.mrf.mxu1  ;;  %v807_v47 = vadd.f32 %v806_v45, %v792_v44 }
  0xea   : > { %v821_v49 = vadd.f32 %v820_v46, %v807_v47 }
  0xec   : > { %v826_v50 = vadd.f32 %v821_v49, %v430_v48 }
  0xee   : > { %830 = vst [vmem:[%s1692_s5 + $0x8] sm:$0xff] %v826_v50 }
  0xef   : > { %v808_v52 = vpop.f32.mrf.mxu0 }
  0xf0   : > { %v809_v53 = vadd.f32 %v808_v52, %v794_v51  ;;  %v822_v55 = vpop.f32.mrf.mxu1 }
  0xf2   : > { %v823_v56 = vadd.f32 %v822_v55, %v809_v53  ;;  %836 = sbr.rel (%p1256_p11) target bundleno = 263 (0x107), region = 74 }
  0xf4   : > { %v828_v57 = vadd.f32 %v823_v56, %v432_v54 }
  0xf6   : > { %832 = vst [vmem:[%s1692_s5 + $0x18] sm:$0xff] %v828_v57 }
  0xf7   : > { %v837_v58 = vld [vmem:[%s1692_s5] sm:$0xff]  ;;  %v838_v63 = vld [vmem:[%s1692_s5 + $0x8] sm:$0xff]  ;;  %v839_v2 = vld [vmem:[%s1692_s5 + $0x10] sm:$0xff] }
  0xf8   : > { %v841_v59 = vld [vmem:[%s1689_s2] sm:$0x3]  ;;  %v862_v8 = vld [vmem:[%s1691_s4 + $0x8] sm:$0xff]  ;;  %v863_v9 = vld [vmem:[%s1691_s4 + $0x10] sm:$0xff] }
  0xf9   : > { %v851_v60 = vld [vmem:[%s1690_s3] sm:$0x3]  ;;  %v843_v61 = vperm.slane %v841_v59, 0  ;;  %v844_v0 = vperm.slane %v841_v59, 1  ;;  %v864_v14 = vld [vmem:[%s1691_s4 + $0x18] sm:$0xff] }
  0xfa   : > { %v853_v62 = vperm.slane %v851_v60, 0  ;;  %v854_v1 = vperm.slane %v851_v60, 1  ;;  %v861_v7 = vld [vmem:[%s1691_s4] sm:$0xff] }
  0xfb   : > { %v847_v3 = vmul.f32 %v843_v61, %v837_v58  ;;  %v848_v4 = vmul.f32 %v844_v0, %v838_v63  ;;  %v849_v5 = vmul.f32 %v843_v61, %v839_v2 }
  0xfd   : > { %v840_v6 = vld [vmem:[%s1692_s5 + $0x18] sm:$0xff]  ;;  %v857_v11 = vadd.f32 %v853_v62, %v847_v3  ;;  %v858_v12 = vadd.f32 %v854_v1, %v848_v4  ;;  %v859_v13 = vadd.f32 %v853_v62, %v849_v5 }
  0xfe   : > { %v850_v10 = vmul.f32 %v844_v0, %v840_v6 }
  0xff   : > { %v865_v16 = vadd.f32 %v861_v7, %v857_v11  ;;  %v866_v17 = vadd.f32 %v862_v8, %v858_v12  ;;  %v867_v18 = vadd.f32 %v863_v9, %v859_v13 }
 0x100   : > { %v860_v15 = vadd.f32 %v854_v1, %v850_v10 }
 0x101   : > { %v869_v20 = vmax.f32 %v865_v16, 0.0  ;;  %v870_v21 = vmax.f32 %v866_v17, 0.0  ;;  %v871_v22 = vmax.f32 %v867_v18, 0.0 }
 0x102   : > { %v868_v19 = vadd.f32 %v864_v14, %v860_v15 }
 0x103   : > { %873 = vst [vmem:[%s1692_s5] sm:$0xff] %v869_v20 }
 0x104   : > { %v872_v23 = vmax.f32 %v868_v19, 0.0  ;;  %874 = vst [vmem:[%s1692_s5 + $0x8] sm:$0xff] %v870_v21 }
 0x105   : > { %875 = vst [vmem:[%s1692_s5 + $0x10] sm:$0xff] %v871_v22 }
 0x106   : > { %876 = vst [vmem:[%s1692_s5 + $0x18] sm:$0xff] %v872_v23 }
 0x107 PF: > { %s15_s22 = sadd.s32 1, %s1395_s22   ;;  %s1693_s18 = smov %s1383_s19 }
 0x108   : > { %p12_p12 = scmp.ge.s32.totalorder %s15_s22, 20   ;;  %s1694_s19 = smov %s1463_s26 }
 0x109   : > { %s1695_s20 = smov %s1391_s21  ;;  %s1696_s21 = smov %s1698_s23 }
 0x10a   :  { %14 = sbr.rel (!%p12_p12) target bundleno = 3 (0x3), region = 127 }

// kernel: resnet10_forward.24
= control target key start
LH: loop header
LB: loop body
LE: loop exit
PB: predicated region body
PF: predicated region fallthrough
CT: control target
= control target key end

     0   :  { %s2060_s0 = inlined_call_operand.vmem [shape: bf16[16,6912], index: 0, kind: input, shape index: {}]   ;;  %s2061_s1 = inlined_call_operand.vmem [shape: bf16[6912,512], index: 1, kind: input, shape index: {}]   ;;  %s2062_s2 = inlined_call_operand.vmem [shape: f32[1,512], index: 2, kind: input, shape index: {}]   ;;  %s2063_s3 = inlined_call_operand.vmem [shape: f32[1,512], index: 3, kind: input, shape index: {}]   ;;  %s2064_s4 = inlined_call_operand.vmem [shape: f32[16,512], index: 4, kind: output, shape index: {}]  }
   0x1   :  { %2067 = sst [smem:[#allocation7_spill]] %s2060_s0 }
   0x2   :  { %2068 = sst [smem:[#allocation8_spill]] %s2061_s1 }
   0x3   :  { %s1639_s15 = smov 0   ;;  %s1641_s16 = smov 0  }
   0x4   :  { %s1643_s17 = smov 0   ;;  %s1645_s18 = smov 0  }
   0x5   :  { %s1647_s19 = smov 0   ;;  %s1649_s20 = smov 0  }
   0x6   :  { %s1651_s21 = smov 0   ;;  %s1653_s22 = smov 0  }
   0x7   :  { %s1655_s23 = smov 0   ;;  %s1657_s24 = smov 0  }
   0x8   :  { %s1659_s25 = smov 0  }
   0x9 LB: > { %s1151_s26 = sadd.s32 4294967295, %s1611_s25   ;;  %s26_s27 = sadd.s32 1, %s1603_s23  ;;  %s1611_s25 = sphi %s1659_s25, %s14_s25   ;;  %s1607_s24 = sphi %s1657_s24, %s2087_s24   ;;  %s1603_s23 = sphi %s1655_s23, %s2086_s23   ;;  %s1599_s22 = sphi %s1653_s22, %s2085_s22   ;;  %s1595_s21 = sphi %s1651_s21, %s2084_s21   ;;  %s1591_s20 = sphi %s1649_s20, %s2083_s20   ;;  %s1587_s19 = sphi %s1647_s19, %s2082_s19   ;;  %s1583_s18 = sphi %s1645_s18, %s2081_s18   ;;  %s1579_s17 = sphi %s1643_s17, %s2080_s17   ;;  %s1575_s16 = sphi %s1641_s16, %s2079_s16   ;;  %s1571_s15 = sphi %s1639_s15, %s2078_s15  }
   0xa   : > { %p27_p0 = scmp.ge.s32.totalorder %s26_s27, 18  ;;  %s29_s28 = sadd.s32 1, %s1607_s24 }
   0xb   : > { %s42_s29 = sadd.s32 1, %s1591_s20  ;;  %p49_p1 = scmp.ne.s32.totalorder %s1591_s20, %s1587_s19 }
   0xc   : > { %s2089_s27 = smov (%p27_p0, %s26_s27), 0  ;;  %s2091_s28 = smov (!%p27_p0, %s29_s28), %s1607_s24 }
   0xd   : > { %2069 = sst [smem:[#allocation5_spill]] %s2089_s27  ;;  %s38_s30 = ssub.s32 %s1603_s23, %s2089_s27 }
   0xe   : > { %p50_p2 = scmp.eq.s32.totalorder %s1611_s25, 0  ;;  %p31_p3 = scmp.ge.s32.totalorder %s2091_s28, 2 }
   0xf   : > { %p40_p4 = scmp.eq.s32.totalorder %s38_s30, 0  ;;  %s70_s6 = sadd.s32 1, %s1583_s18 }
  0x10   : > { %p1706_p5 = por %p50_p2, %p49_p1  ;;  %s2093_s28 = smov (%p31_p3, %s2091_s28), 0 }
  0x11   : > { %2071 = sst [smem:[#allocation6_spill]] %s2093_s28  ;;  %s66_s8 = ssub.s32 %s1607_s24, %s2093_s28 }
  0x12   : > { %s1714_s7 = scalar_select %p40_p4, %s1591_s20, %s42_s29  }
  0x13   : > { %p77_p6 = scmp.ne.s32.totalorder %s1583_s18, %s1579_s17  ;;  %s67_s9 = sor.u32 %s66_s8, %s38_s30 }
  0x14   : > { %p148_p7 = scmp.eq.s32.totalorder %s66_s8, 0  ;;  %p68_p8 = scmp.eq.s32.totalorder %s67_s9, 0 }
  0x15   : > { %p1720_p9 = por %p77_p6, %p50_p2  ;;  %s150_s11 = sadd.s32 1, %s1575_s16 }
  0x16   : > { %p160_p10 = scmp.ne.s32.totalorder %s1575_s16, %s1571_s15  ;;  %p161_p11 = scmp.eq.s32.totalorder %s1151_s26, 35 }
  0x17   : > { %s1728_s12 = scalar_select %p68_p8, %s1583_s18, %s70_s6  }
  0x18   : > { %s1731_s13 = scalar_select %p148_p7, %s1575_s16, %s150_s11  }
  0x19   : > { %p1733_p12 = por %p161_p11, %p160_p10  ;;  %p1154_p13 = scmp.ge.s32.totalorder %s1611_s25, 36 }
  0x1b   : > { %183 = sbr.rel (%p1154_p13) target bundleno = 103 (0x67), region = 16 }
  0x20   : > { %186 = sbr.rel (!%p1706_p5) target bundleno = 45 (0x2d), region = 20  ;;  %s188_s29 = sand.u32 (%p1706_p5), 1, %s1591_s20  }
  0x21   : > { %s1378_s30 = smul.u32 (%p1706_p5), 12, %s1603_s23  ;;  %s2074_s0 = sld [smem:[#allocation7_spill]] (%p1706_p5) }
  0x22   : > { %s1432_s8 = smul.u32 (%p1706_p5), 24, %s188_s29 }
  0x24   : > { %s190_s26 = scalar_lea.vmem (%p1706_p5), [#allocation2], %s1432_s8 }
  0x27   : > { %s196_s11 = scalar_lea.vmem %s2074_s0, %s1378_s30 }
  0x28   : > { %v211_v0 = vld [vmem:[%s196_s11] sm:$0xff]  ;;  %v213_v1 = vld [vmem:[%s196_s11 + $0xd8] sm:$0xff]  ;;  %v1156_v2 = vld [vmem:[%s196_s11 + $0x8] sm:$0xf] }
  0x29   : > { %212 = vst [vmem:[%s190_s26] sm:$0xff] %v211_v0  ;;  %v1158_v3 = vld [vmem:[%s196_s11 + $0xe0] sm:$0xf] }
  0x2a   : > { %214 = vst [vmem:[%s190_s26 + $0xc] sm:$0xff] %v213_v1 }
  0x2b   : > { %1157 = vst [vmem:[%s190_s26 + $0x8] sm:$0xf] %v1156_v2 }
  0x2c   : > { %1159 = vst [vmem:[%s190_s26 + $0x14] sm:$0xf] %v1158_v3 }
  0x2d PF: > { %232 = sbr.rel (!%p1720_p9) target bundleno = 103 (0x67), region = 46  ;;  %s234_s5 = sand.u32 (%p1720_p9), 1, %s1583_s18  }
  0x2e   : > { %s1433_s29 = smul.u32 (%p1720_p9), 384, %s234_s5  ;;  %s1160_s6 = sshll.u32 (%p1720_p9), %s1607_s24, 1 }
  0x2f   : > { %s1379_s30 = smul.u32 (%p1720_p9), 192, %s1603_s23  ;;  %s2075_s1 = sld [smem:[#allocation8_spill]] (%p1720_p9) }
  0x30   : > { %s1758_s10 = scalar_lea.vmem (%p1720_p9), [#allocation3], %s1433_s29 }
  0x31   : > { %s240_s9 = sadd.s32 (%p1720_p9), %s1379_s30, %s1160_s6 }
  0x32   : > { %s1162_s0 = sshll.u32 %s240_s9, 2 }
  0x35   : > { %s1753_s11 = scalar_lea.vmem %s2075_s1, %s1162_s0 }
  0x36   : > { %v365_v4 = vld [vmem:[%s1753_s11] sm:$0xff]  ;;  %v367_v5 = vld [vmem:[%s1753_s11 + $0x10] sm:$0xff] }
  0x37   : > { %v369_v6 = vld [vmem:[%s1753_s11 + $0x20] sm:$0xff]  ;;  %366 = vst [vmem:[%s1758_s10] sm:$0xff] %v365_v4  ;;  %v371_v7 = vld [vmem:[%s1753_s11 + $0x30] sm:$0xff] }
  0x38   : > { %368 = vst [vmem:[%s1758_s10 + $0x8] sm:$0xff] %v367_v5  ;;  %v373_v8 = vld [vmem:[%s1753_s11 + $0x40] sm:$0xff]  ;;  %v375_v9 = vld [vmem:[%s1753_s11 + $0x50] sm:$0xff] }
  0x39   : > { %370 = vst [vmem:[%s1758_s10 + $0x10] sm:$0xff] %v369_v6  ;;  %v377_v10 = vld [vmem:[%s1753_s11 + $0x60] sm:$0xff]  ;;  %v379_v11 = vld [vmem:[%s1753_s11 + $0x70] sm:$0xff] }
  0x3a   : > { %372 = vst [vmem:[%s1758_s10 + $0x18] sm:$0xff] %v371_v7  ;;  %v381_v12 = vld [vmem:[%s1753_s11 + $0x80] sm:$0xff]  ;;  %v383_v13 = vld [vmem:[%s1753_s11 + $0x90] sm:$0xff] }
  0x3b   : > { %374 = vst [vmem:[%s1758_s10 + $0x20] sm:$0xff] %v373_v8  ;;  %v385_v14 = vld [vmem:[%s1753_s11 + $0xa0] sm:$0xff]  ;;  %v387_v15 = vld [vmem:[%s1753_s11 + $0xb0] sm:$0xff] }
  0x3c   : > { %376 = vst [vmem:[%s1758_s10 + $0x28] sm:$0xff] %v375_v9  ;;  %v389_v16 = vld [vmem:[%s1753_s11 + $0xc0] sm:$0xff]  ;;  %v391_v17 = vld [vmem:[%s1753_s11 + $0xd0] sm:$0xff] }
  0x3d   : > { %378 = vst [vmem:[%s1758_s10 + $0x30] sm:$0xff] %v377_v10  ;;  %v393_v18 = vld [vmem:[%s1753_s11 + $0xe0] sm:$0xff]  ;;  %v395_v19 = vld [vmem:[%s1753_s11 + $0xf0] sm:$0xff] }
  0x3e   : > { %380 = vst [vmem:[%s1758_s10 + $0x38] sm:$0xff] %v379_v11  ;;  %v397_v20 = vld [vmem:[%s1753_s11 + $0x100] sm:$0xff]  ;;  %v399_v21 = vld [vmem:[%s1753_s11 + $0x110] sm:$0xff] }
  0x3f   : > { %382 = vst [vmem:[%s1758_s10 + $0x40] sm:$0xff] %v381_v12  ;;  %v401_v22 = vld [vmem:[%s1753_s11 + $0x120] sm:$0xff]  ;;  %v403_v23 = vld [vmem:[%s1753_s11 + $0x130] sm:$0xff] }
  0x40   : > { %384 = vst [vmem:[%s1758_s10 + $0x48] sm:$0xff] %v383_v13  ;;  %v405_v24 = vld [vmem:[%s1753_s11 + $0x140] sm:$0xff]  ;;  %v407_v25 = vld [vmem:[%s1753_s11 + $0x150] sm:$0xff] }
  0x41   : > { %386 = vst [vmem:[%s1758_s10 + $0x50] sm:$0xff] %v385_v14  ;;  %v409_v26 = vld [vmem:[%s1753_s11 + $0x160] sm:$0xff]  ;;  %v411_v27 = vld [vmem:[%s1753_s11 + $0x170] sm:$0xff] }
  0x42   : > { %388 = vst [vmem:[%s1758_s10 + $0x58] sm:$0xff] %v387_v15  ;;  %v413_v28 = vld [vmem:[%s1753_s11 + $0x180] sm:$0xff]  ;;  %v415_v29 = vld [vmem:[%s1753_s11 + $0x190] sm:$0xff] }
  0x43   : > { %390 = vst [vmem:[%s1758_s10 + $0x60] sm:$0xff] %v389_v16  ;;  %v417_v30 = vld [vmem:[%s1753_s11 + $0x1a0] sm:$0xff]  ;;  %v419_v31 = vld [vmem:[%s1753_s11 + $0x1b0] sm:$0xff] }
  0x44   : > { %392 = vst [vmem:[%s1758_s10 + $0x68] sm:$0xff] %v391_v17  ;;  %v421_v32 = vld [vmem:[%s1753_s11 + $0x1c0] sm:$0xff]  ;;  %v423_v33 = vld [vmem:[%s1753_s11 + $0x1d0] sm:$0xff] }
  0x45   : > { %394 = vst [vmem:[%s1758_s10 + $0x70] sm:$0xff] %v393_v18  ;;  %v425_v34 = vld [vmem:[%s1753_s11 + $0x1e0] sm:$0xff]  ;;  %v427_v35 = vld [vmem:[%s1753_s11 + $0x1f0] sm:$0xff] }
  0x46   : > { %396 = vst [vmem:[%s1758_s10 + $0x78] sm:$0xff] %v395_v19  ;;  %v429_v36 = vld [vmem:[%s1753_s11 + $0x200] sm:$0xff]  ;;  %v431_v37 = vld [vmem:[%s1753_s11 + $0x210] sm:$0xff] }
  0x47   : > { %398 = vst [vmem:[%s1758_s10 + $0x80] sm:$0xff] %v397_v20  ;;  %v433_v38 = vld [vmem:[%s1753_s11 + $0x220] sm:$0xff]  ;;  %v435_v39 = vld [vmem:[%s1753_s11 + $0x230] sm:$0xff] }
  0x48   : > { %400 = vst [vmem:[%s1758_s10 + $0x88] sm:$0xff] %v399_v21  ;;  %v437_v40 = vld [vmem:[%s1753_s11 + $0x240] sm:$0xff]  ;;  %v439_v41 = vld [vmem:[%s1753_s11 + $0x250] sm:$0xff] }
  0x49   : > { %402 = vst [vmem:[%s1758_s10 + $0x90] sm:$0xff] %v401_v22  ;;  %v441_v42 = vld [vmem:[%s1753_s11 + $0x260] sm:$0xff]  ;;  %v443_v43 = vld [vmem:[%s1753_s11 + $0x270] sm:$0xff] }
  0x4a   : > { %404 = vst [vmem:[%s1758_s10 + $0x98] sm:$0xff] %v403_v23  ;;  %v445_v44 = vld [vmem:[%s1753_s11 + $0x280] sm:$0xff]  ;;  %v447_v45 = vld [vmem:[%s1753_s11 + $0x290] sm:$0xff] }
  0x4b   : > { %406 = vst [vmem:[%s1758_s10 + $0xa0] sm:$0xff] %v405_v24  ;;  %v449_v46 = vld [vmem:[%s1753_s11 + $0x2a0] sm:$0xff]  ;;  %v451_v47 = vld [vmem:[%s1753_s11 + $0x2b0] sm:$0xff] }
  0x4c   : > { %408 = vst [vmem:[%s1758_s10 + $0xa8] sm:$0xff] %v407_v25  ;;  %v453_v48 = vld [vmem:[%s1753_s11 + $0x2c0] sm:$0xff]  ;;  %v455_v49 = vld [vmem:[%s1753_s11 + $0x2d0] sm:$0xff] }
  0x4d   : > { %410 = vst [vmem:[%s1758_s10 + $0xb0] sm:$0xff] %v409_v26  ;;  %v457_v50 = vld [vmem:[%s1753_s11 + $0x2e0] sm:$0xff]  ;;  %v459_v51 = vld [vmem:[%s1753_s11 + $0x2f0] sm:$0xff] }
  0x4e   : > { %412 = vst [vmem:[%s1758_s10 + $0xb8] sm:$0xff] %v411_v27 }
  0x4f   : > { %414 = vst [vmem:[%s1758_s10 + $0xc0] sm:$0xff] %v413_v28 }
  0x50   : > { %416 = vst [vmem:[%s1758_s10 + $0xc8] sm:$0xff] %v415_v29 }
  0x51   : > { %418 = vst [vmem:[%s1758_s10 + $0xd0] sm:$0xff] %v417_v30 }
  0x52   : > { %420 = vst [vmem:[%s1758_s10 + $0xd8] sm:$0xff] %v419_v31 }
  0x53   : > { %422 = vst [vmem:[%s1758_s10 + $0xe0] sm:$0xff] %v421_v32 }
  0x54   : > { %424 = vst [vmem:[%s1758_s10 + $0xe8] sm:$0xff] %v423_v33 }
  0x55   : > { %426 = vst [vmem:[%s1758_s10 + $0xf0] sm:$0xff] %v425_v34 }
  0x56   : > { %428 = vst [vmem:[%s1758_s10 + $0xf8] sm:$0xff] %v427_v35 }
  0x57   : > { %430 = vst [vmem:[%s1758_s10 + $0x100] sm:$0xff] %v429_v36 }
  0x58   : > { %432 = vst [vmem:[%s1758_s10 + $0x108] sm:$0xff] %v431_v37 }
  0x59   : > { %434 = vst [vmem:[%s1758_s10 + $0x110] sm:$0xff] %v433_v38 }
  0x5a   : > { %436 = vst [vmem:[%s1758_s10 + $0x118] sm:$0xff] %v435_v39 }
  0x5b   : > { %438 = vst [vmem:[%s1758_s10 + $0x120] sm:$0xff] %v437_v40 }
  0x5c   : > { %440 = vst [vmem:[%s1758_s10 + $0x128] sm:$0xff] %v439_v41 }
  0x5d   : > { %442 = vst [vmem:[%s1758_s10 + $0x130] sm:$0xff] %v441_v42 }
  0x5e   : > { %444 = vst [vmem:[%s1758_s10 + $0x138] sm:$0xff] %v443_v43 }
  0x5f   : > { %446 = vst [vmem:[%s1758_s10 + $0x140] sm:$0xff] %v445_v44 }
  0x60   : > { %448 = vst [vmem:[%s1758_s10 + $0x148] sm:$0xff] %v447_v45 }
  0x61   : > { %450 = vst [vmem:[%s1758_s10 + $0x150] sm:$0xff] %v449_v46 }
  0x62   : > { %452 = vst [vmem:[%s1758_s10 + $0x158] sm:$0xff] %v451_v47 }
  0x63   : > { %454 = vst [vmem:[%s1758_s10 + $0x160] sm:$0xff] %v453_v48 }
  0x64   : > { %456 = vst [vmem:[%s1758_s10 + $0x168] sm:$0xff] %v455_v49 }
  0x65   : > { %458 = vst [vmem:[%s1758_s10 + $0x170] sm:$0xff] %v457_v50 }
  0x66   : > { %460 = vst [vmem:[%s1758_s10 + $0x178] sm:$0xff] %v459_v51 }
  0x67 PF: > { %p1163_p0 = scmp.ge.s32.totalorder %s1611_s25, 1  ;;  %p481_p1 = scmp.lt.s32.totalorder %s1611_s25, 37 }
  0x69   : > { %p482_p2 = pnand %p1163_p0, %p481_p1 }
  0x6a   : > { %s488_s0 = sand.u32 (!%p482_p2), 1, %s1587_s19   ;;  %s495_s28 = sand.u32 (!%p482_p2), 1, %s1579_s17  }
  0x6b   : > { %485 = sbr.rel (%p482_p2) target bundleno = 353 (0x161), region = 92  ;;  %s528_s5 = sand.u32 (!%p482_p2), 1, %s1571_s15  }
  0x6c   : > { %s1434_s26 = smul.u32 (!%p482_p2), 24, %s488_s0  ;;  %s1164_s6 = sshll.u32 (!%p482_p2), %s528_s5, 5 }
  0x6d   : > { %s1435_s29 = smul.u32 (!%p482_p2), 384, %s495_s28  ;;  %s1165_s30 = sshll.u32 (!%p482_p2), %s1599_s22, 1 }
  0x6e   : > { %p536_p3 = scmp.lt.s32.totalorder (!%p482_p2), %s1165_s30, 3  ;;  %s1869_s19 = scalar_lea.vmem (!%p482_p2), [#allocation2], %s1434_s26 }
  0x6f   : > { %s1871_s17 = scalar_lea.vmem (!%p482_p2), [#allocation3], %s1435_s29  ;;  %s1873_s15 = scalar_lea.vmem (!%p482_p2), [#allocation4], %s1164_s6 }
  0x70   : > { %s2095_s30 = smov (!%p536_p3, %s1165_s30), 3  ;;  %p1167_p4 = scmp.ne.s32.totalorder %s1595_s21, 0 }
  0x71   : > { %s538_s11 = scalar_lea.vmem %s2062_s2, %s2095_s30  ;;  %s543_s27 = scalar_lea.vmem %s2063_s3, %s2095_s30 }
  0x72   : > { %550 = sbr.rel (%p1167_p4) target bundleno = 124 (0x7c), region = 104 }
  0x77   : > { %v1613_v52 = vmov 0.0  }
  0x78   : > { %551 = vst [vmem:[%s1873_s15] sm:$0xff] %v1613_v52 }
  0x79   : > { %552 = vst [vmem:[%s1873_s15 + $0x8] sm:$0xff] %v1613_v52 }
  0x7a   : > { %553 = vst [vmem:[%s1873_s15 + $0x10] sm:$0xff] %v1613_v52 }
  0x7b   : > { %554 = vst [vmem:[%s1873_s15 + $0x18] sm:$0xff] %v1613_v52 }
  0x7c PF: > { %v1238_v53 = vld [vmem:[%s1871_s17 + $0x70] sm:$0xf]  ;;  %v1398_v54 = vld [vmem:[%s1871_s17 + $0x74] sm:$0xf0]  ;;  %v1230_v62 = vld [vmem:[%s1871_s17 + $0x60] sm:$0xf] }
  0x7d   : > { %v1302_v55 = vld [vmem:[%s1871_s17 + $0xf0] sm:$0xf]  ;;  %v1239_v56 = vor.u32 %v1398_v54, %v1238_v53  ;;  %v1414_v57 = vld [vmem:[%s1871_s17 + $0xf4] sm:$0xf0]  ;;  %v1396_v63 = vld [vmem:[%s1871_s17 + $0x64] sm:$0xf0] }
  0x7e   : > { %v1366_v58 = vld [vmem:[%s1871_s17 + $0x170] sm:$0xf]  ;;  %v1430_v59 = vld [vmem:[%s1871_s17 + $0x174] sm:$0xf0]  ;;  %v1303_v60 = vor.u32 %v1414_v57, %v1302_v55  ;;  %v1294_v0 = vld [vmem:[%s1871_s17 + $0xe0] sm:$0xf]  ;;  %v1231_v1 = vor.u32 %v1396_v63, %v1230_v62 }
  0x7f   : > { %v1367_v61 = vor.u32 %v1430_v59, %v1366_v58  ;;  %867 = vmatpush.bf16.msra.mxu0 %v1239_v56  ;;  %v1412_v2 = vld [vmem:[%s1871_s17 + $0xe4] sm:$0xf0]  ;;  %v1358_v3 = vld [vmem:[%s1871_s17 + $0x160] sm:$0xf]  ;;  %v1222_v7 = vld [vmem:[%s1871_s17 + $0x50] sm:$0xf] }
  0x80   : > { %v1428_v4 = vld [vmem:[%s1871_s17 + $0x164] sm:$0xf0]  ;;  %881 = vmatpush.bf16.msra.mxu1 %v1303_v60  ;;  %v1295_v5 = vor.u32 %v1412_v2, %v1294_v0  ;;  %v1394_v8 = vld [vmem:[%s1871_s17 + $0x54] sm:$0xf0]  ;;  %v1286_v9 = vld [vmem:[%s1871_s17 + $0xd0] sm:$0xf] }
  0x81   : > { %895 = vmatpush.bf16.msra.mxu2 %v1367_v61  ;;  %v1359_v6 = vor.u32 %v1428_v4, %v1358_v3  ;;  %v1410_v10 = vld [vmem:[%s1871_s17 + $0xd4] sm:$0xf0]  ;;  %v1350_v11 = vld [vmem:[%s1871_s17 + $0x150] sm:$0xf]  ;;  %v1223_v13 = vor.u32 %v1394_v8, %v1222_v7  ;;  %v1214_v14 = vld [vmem:[%s1871_s17 + $0x40] sm:$0xf] }
  0x82   : > { %v1426_v12 = vld [vmem:[%s1871_s17 + $0x154] sm:$0xf0]  ;;  %v1392_v15 = vld [vmem:[%s1871_s17 + $0x44] sm:$0xf0]  ;;  %v1287_v16 = vor.u32 %v1410_v10, %v1286_v9  ;;  %v1278_v18 = vld [vmem:[%s1871_s17 + $0xc0] sm:$0xf] }
  0x83   : > { %868 = vmatpush.bf16.msra.mxu0 %v1231_v1  ;;  %v1351_v17 = vor.u32 %v1426_v12, %v1350_v11  ;;  %v1397_v19 = vld [vmem:[%s1871_s17 + $0x74] sm:$0xf]  ;;  %v1240_v20 = vld [vmem:[%s1871_s17 + $0x78] sm:$0xf0]  ;;  %v1408_v21 = vld [vmem:[%s1871_s17 + $0xc4] sm:$0xf0]  ;;  %v1215_v26 = vor.u32 %v1392_v15, %v1214_v14 }
  0x84   : > { %882 = vmatpush.bf16.msra.mxu1 %v1295_v5  ;;  %v1342_v22 = vld [vmem:[%s1871_s17 + $0x140] sm:$0xf]  ;;  %v1424_v23 = vld [vmem:[%s1871_s17 + $0x144] sm:$0xf0]  ;;  %v1243_v24 = vor.u32 %v1397_v19, %v1240_v20  ;;  %v1395_v25 = vld [vmem:[%s1871_s17 + $0x64] sm:$0xf]  ;;  %v1279_v30 = vor.u32 %v1408_v21, %v1278_v18 }
  0x85   : > { %896 = vmatpush.bf16.msra.mxu2 %v1359_v6  ;;  %v1206_v27 = vld [vmem:[%s1871_s17 + $0x30] sm:$0xf]  ;;  %v1390_v28 = vld [vmem:[%s1871_s17 + $0x34] sm:$0xf0]  ;;  %v1232_v29 = vld [vmem:[%s1871_s17 + $0x68] sm:$0xf0]  ;;  %v1343_v31 = vor.u32 %v1424_v23, %v1342_v22 }
  0x86   : > { %909 = vmatpush.bf16.msra.mxu3 %v1243_v24  ;;  %v1270_v32 = vld [vmem:[%s1871_s17 + $0xb0] sm:$0xf]  ;;  %v1406_v33 = vld [vmem:[%s1871_s17 + $0xb4] sm:$0xf0]  ;;  %v1235_v35 = vor.u32 %v1395_v25, %v1232_v29  ;;  %v1393_v37 = vld [vmem:[%s1871_s17 + $0x54] sm:$0xf]  ;;  %v1207_v39 = vor.u32 %v1390_v28, %v1206_v27 }
  0x87   : > { %869 = vmatpush.bf16.msra.mxu0 %v1223_v13  ;;  %v1334_v34 = vld [vmem:[%s1871_s17 + $0x130] sm:$0xf]  ;;  %v1422_v36 = vld [vmem:[%s1871_s17 + $0x134] sm:$0xf0]  ;;  %v1224_v38 = vld [vmem:[%s1871_s17 + $0x58] sm:$0xf0]  ;;  %v1271_v43 = vor.u32 %v1406_v33, %v1270_v32 }
  0x88   : > { %883 = vmatpush.bf16.msra.mxu1 %v1287_v16  ;;  %v1198_v40 = vld [vmem:[%s1871_s17 + $0x20] sm:$0xf]  ;;  %v1388_v41 = vld [vmem:[%s1871_s17 + $0x24] sm:$0xf0]  ;;  %v1227_v42 = vor.u32 %v1393_v37, %v1224_v38  ;;  %v1335_v44 = vor.u32 %v1422_v36, %v1334_v34  ;;  %v1391_v46 = vld [vmem:[%s1871_s17 + $0x44] sm:$0xf] }
  0x89   : > { %897 = vmatpush.bf16.msra.mxu2 %v1351_v17  ;;  %v1262_v45 = vld [vmem:[%s1871_s17 + $0xa0] sm:$0xf]  ;;  %v1216_v47 = vld [vmem:[%s1871_s17 + $0x48] sm:$0xf0]  ;;  %v1404_v48 = vld [vmem:[%s1871_s17 + $0xa4] sm:$0xf0]  ;;  %v1199_v51 = vor.u32 %v1388_v41, %v1198_v40 }
  0x8a   : > { %910 = vmatpush.bf16.msra.mxu3 %v1235_v35  ;;  %v1326_v49 = vld [vmem:[%s1871_s17 + $0x120] sm:$0xf]  ;;  %v1420_v50 = vld [vmem:[%s1871_s17 + $0x124] sm:$0xf0]  ;;  %v1190_v52 = vld [vmem:[%s1871_s17 + $0x10] sm:$0xf]  ;;  %v1219_v54 = vor.u32 %v1391_v46, %v1216_v47  ;;  %v1263_v55 = vor.u32 %v1404_v48, %v1262_v45 }
  0x8b   : > { %870 = vmatpush.bf16.msra.mxu0 %v1215_v26  ;;  %v1386_v53 = vld [vmem:[%s1871_s17 + $0x14] sm:$0xf0]  ;;  %v1327_v56 = vor.u32 %v1420_v50, %v1326_v49  ;;  %v1254_v57 = vld [vmem:[%s1871_s17 + $0x90] sm:$0xf]  ;;  %v1389_v58 = vld [vmem:[%s1871_s17 + $0x34] sm:$0xf] }
  0x8c   : > { %884 = vmatpush.bf16.msra.mxu1 %v1279_v30  ;;  %v1208_v59 = vld [vmem:[%s1871_s17 + $0x38] sm:$0xf0]  ;;  %v1402_v60 = vld [vmem:[%s1871_s17 + $0x94] sm:$0xf0]  ;;  %v1318_v61 = vld [vmem:[%s1871_s17 + $0x110] sm:$0xf]  ;;  %v1191_v63 = vor.u32 %v1386_v53, %v1190_v52 }
  0x8d   : > { %898 = vmatpush.bf16.msra.mxu2 %v1343_v31  ;;  %v1418_v62 = vld [vmem:[%s1871_s17 + $0x114] sm:$0xf0]  ;;  %v1182_v0 = vld [vmem:[%s1871_s17] sm:$0xf]  ;;  %v1384_v1 = vld [vmem:[%s1871_s17 + $0x4] sm:$0xf0]  ;;  %v1211_v3 = vor.u32 %v1389_v58, %v1208_v59  ;;  %v1255_v4 = vor.u32 %v1402_v60, %v1254_v57 }
  0x8e   : > { %911 = vmatpush.bf16.msra.mxu3 %v1227_v42  ;;  %v1246_v2 = vld [vmem:[%s1871_s17 + $0x80] sm:$0xf]  ;;  %v1319_v5 = vor.u32 %v1418_v62, %v1318_v61  ;;  %v1400_v6 = vld [vmem:[%s1871_s17 + $0x84] sm:$0xf0]  ;;  %v1387_v7 = vld [vmem:[%s1871_s17 + $0x24] sm:$0xf]  ;;  %v1183_v15 = vor.u32 %v1384_v1, %v1182_v0 }
  0x8f   : > { %871 = vmatpush.bf16.msra.mxu0 %v1207_v39  ;;  %v1200_v8 = vld [vmem:[%s1871_s17 + $0x28] sm:$0xf0]  ;;  %v1310_v9 = vld [vmem:[%s1871_s17 + $0x100] sm:$0xf]  ;;  %v1416_v10 = vld [vmem:[%s1871_s17 + $0x104] sm:$0xf0]  ;;  %v1247_v20 = vor.u32 %v1400_v6, %v1246_v2 }
  0x90   : > { %885 = vmatpush.bf16.msra.mxu1 %v1271_v43  ;;  %v1413_v11 = vld [vmem:[%s1871_s17 + $0xf4] sm:$0xf]  ;;  %v1304_v12 = vld [vmem:[%s1871_s17 + $0xf8] sm:$0xf0]  ;;  %v1178_v16 = vld [vmem:[%s1869_s19 + $0x8] sm:$0xf]  ;;  %v1203_v17 = vor.u32 %v1387_v7, %v1200_v8  ;;  %v1311_v21 = vor.u32 %v1416_v10, %v1310_v9 }
  0x91   : > { %899 = vmatpush.bf16.msra.mxu2 %v1335_v44  ;;  %v1429_v13 = vld [vmem:[%s1871_s17 + $0x174] sm:$0xf]  ;;  %v1368_v14 = vld [vmem:[%s1871_s17 + $0x178] sm:$0xf0]  ;;  %v1170_v18 = vld [vmem:[%s1869_s19] sm:$0xf]  ;;  %v1307_v25 = vor.u32 %v1413_v11, %v1304_v12 }
  0x92   : > { %912 = vmatpush.bf16.msra.mxu3 %v1219_v54  ;;  %v1381_v19 = vld [vmem:[%s1869_s19 + $0x8] sm:$0xf0]  ;;  %v1382_v22 = vld [vmem:[%s1869_s19 + $0x10] sm:$0xf0]  ;;  %v1380_v23 = vld [vmem:[%s1869_s19 + $0x4] sm:$0xf]  ;;  %v1371_v26 = vor.u32 %v1429_v13, %v1368_v14 }
  0x93   : > { %872 = vmatpush.bf16.msra.mxu0 %v1199_v51  ;;  %v1172_v24 = vld [vmem:[%s1869_s19 + $0xc] sm:$0xf0]  ;;  %v1411_v27 = vld [vmem:[%s1871_s17 + $0xe4] sm:$0xf]  ;;  %v1385_v28 = vld [vmem:[%s1871_s17 + $0x14] sm:$0xf]  ;;  %v1171_v33 = vor.u32 %v1381_v19, %v1170_v18  ;;  %v1956_v34 = vor.u32 %v1382_v22, %v1178_v16 }
  0x94   : > { %886 = vmatpush.bf16.msra.mxu1 %v1263_v55  ;;  %v1192_v29 = vld [vmem:[%s1871_s17 + $0x18] sm:$0xf0]  ;;  %v1296_v30 = vld [vmem:[%s1871_s17 + $0xe8] sm:$0xf0]  ;;  %v1427_v31 = vld [vmem:[%s1871_s17 + $0x164] sm:$0xf]  ;;  %v1958_v35 = vor.u32 %v1380_v23, %v1172_v24 }
  0x95   : > { %900 = vmatpush.bf16.msra.mxu2 %v1327_v56  ;;  %v1360_v32 = vld [vmem:[%s1871_s17 + $0x168] sm:$0xf0]  ;;  %v1195_v36 = vor.u32 %v1385_v28, %v1192_v29  ;;  %v1299_v37 = vor.u32 %v1411_v27, %v1296_v30  ;;  %v1409_v39 = vld [vmem:[%s1871_s17 + $0xd4] sm:$0xf]  ;;  %v1383_v40 = vld [vmem:[%s1871_s17 + $0x4] sm:$0xf] }
  0x96   : > { %913 = vmatpush.bf16.msra.mxu3 %v1211_v3  ;;  %v1363_v38 = vor.u32 %v1427_v31, %v1360_v32  ;;  %v1184_v41 = vld [vmem:[%s1871_s17 + $0x8] sm:$0xf0]  ;;  %v1288_v42 = vld [vmem:[%s1871_s17 + $0xd8] sm:$0xf0]  ;;  %v1425_v43 = vld [vmem:[%s1871_s17 + $0x154] sm:$0xf] }
  0x97   : > { %873 = vmatpush.bf16.msra.mxu0 %v1191_v63  ;;  %v1352_v44 = vld [vmem:[%s1871_s17 + $0x158] sm:$0xf0]  ;;  %v1187_v45 = vor.u32 %v1383_v40, %v1184_v41  ;;  %v1291_v46 = vor.u32 %v1409_v39, %v1288_v42  ;;  %v1407_v48 = vld [vmem:[%s1871_s17 + $0xc4] sm:$0xf]  ;;  %v1280_v49 = vld [vmem:[%s1871_s17 + $0xc8] sm:$0xf0] }
  0x98   : > { %887 = vmatpush.bf16.msra.mxu1 %v1255_v4  ;;  %v1355_v47 = vor.u32 %v1425_v43, %v1352_v44  ;;  %v1423_v50 = vld [vmem:[%s1871_s17 + $0x144] sm:$0xf]  ;;  %v1344_v51 = vld [vmem:[%s1871_s17 + $0x148] sm:$0xf0]  ;;  %v1283_v52 = vor.u32 %v1407_v48, %v1280_v49  ;;  %v1405_v54 = vld [vmem:[%s1871_s17 + $0xb4] sm:$0xf] }
  0x99   : > { %901 = vmatpush.bf16.msra.mxu2 %v1319_v5  ;;  %v1347_v53 = vor.u32 %v1423_v50, %v1344_v51  ;;  %v1272_v55 = vld [vmem:[%s1871_s17 + $0xb8] sm:$0xf0]  ;;  %v1421_v56 = vld [vmem:[%s1871_s17 + $0x134] sm:$0xf]  ;;  %v1403_v60 = vld [vmem:[%s1871_s17 + $0xa4] sm:$0xf] }
  0x9a   : > { %914 = vmatpush.bf16.msra.mxu3 %v1203_v17  ;;  %v1336_v57 = vld [vmem:[%s1871_s17 + $0x138] sm:$0xf0]  ;;  %v1275_v58 = vor.u32 %v1405_v54, %v1272_v55  ;;  %v1264_v61 = vld [vmem:[%s1871_s17 + $0xa8] sm:$0xf0]  ;;  %v1419_v62 = vld [vmem:[%s1871_s17 + $0x124] sm:$0xf] }
  0x9b   : > { %874 = vmatpush.bf16.msra.mxu0 %v1183_v15  ;;  %v1339_v59 = vor.u32 %v1421_v56, %v1336_v57  ;;  %v1328_v63 = vld [vmem:[%s1871_s17 + $0x128] sm:$0xf0]  ;;  %v1267_v0 = vor.u32 %v1403_v60, %v1264_v61  ;;  %v1401_v2 = vld [vmem:[%s1871_s17 + $0x94] sm:$0xf]  ;;  %v1256_v3 = vld [vmem:[%s1871_s17 + $0x98] sm:$0xf0] }
  0x9c   : > { %888 = vmatpush.bf16.msra.mxu1 %v1247_v20  ;;  %v1331_v1 = vor.u32 %v1419_v62, %v1328_v63  ;;  %v1417_v4 = vld [vmem:[%s1871_s17 + $0x114] sm:$0xf]  ;;  %v1320_v5 = vld [vmem:[%s1871_s17 + $0x118] sm:$0xf0]  ;;  %v1259_v6 = vor.u32 %v1401_v2, %v1256_v3  ;;  %v1399_v8 = vld [vmem:[%s1871_s17 + $0x84] sm:$0xf] }
  0x9d   : > { %902 = vmatpush.bf16.msra.mxu2 %v1311_v21  ;;  %v1323_v7 = vor.u32 %v1417_v4, %v1320_v5  ;;  %v1248_v9 = vld [vmem:[%s1871_s17 + $0x88] sm:$0xf0]  ;;  %v1415_v10 = vld [vmem:[%s1871_s17 + $0x104] sm:$0xf]  ;;  %v557_v24 = vld [vmem:[%s1873_s15 + $0x10] sm:$0xff]  ;;  %p1372_p5 = scmp.ne.s32.totalorder %s1595_s21, 17 }
  0x9e   : > { %875 = vmatmul.bf16.vlgmr.msra.gmra.mxu0 %v1171_v33  ;;  %915 = vmatpush.bf16.msra.mxu3 %v1195_v36  ;;  %v1312_v11 = vld [vmem:[%s1871_s17 + $0x108] sm:$0xf0]  ;;  %v1251_v12 = vor.u32 %v1399_v8, %v1248_v9  ;;  %v555_v17 = vld [vmem:[%s1873_s15] sm:$0xff] }
  0x9f   : > { %923 = vmatpush.bf16.msrb.mxu0 %v1307_v25  ;;  %889 = vmatmul.bf16.vlgmr.msra.gmra.mxu1 %v1958_v35  ;;  %v1315_v13 = vor.u32 %v1415_v10, %v1312_v11  ;;  %v556_v32 = vld [vmem:[%s1873_s15 + $0x8] sm:$0xff] }
  0xa0   : > { %937 = vmatpush.bf16.msrb.mxu1 %v1371_v26  ;;  %903 = vmatmul.bf16.vlgmr.msra.gmra.mxu2 %v1956_v34 }
  0xa2   : > { %916 = vmatpush.bf16.msra.mxu3 %v1187_v45 }
  0xa3   : > { %924 = vmatpush.bf16.msrb.mxu0 %v1299_v37 }
  0xa4   : > { %938 = vmatpush.bf16.msrb.mxu1 %v1363_v38  ;;  %v558_v38 = vld [vmem:[%s1873_s15 + $0x18] sm:$0xff] }
  0xa5   : > { %917 = vmatmul.bf16.vlgmr.msra.gmra.mxu3 %v1171_v33 }
  0xa7   : > { %925 = vmatpush.bf16.msrb.mxu0 %v1291_v46 }
  0xa8   : > { %939 = vmatpush.bf16.msrb.mxu1 %v1355_v47 }
  0xab   : > { %926 = vmatpush.bf16.msrb.mxu0 %v1283_v52 }
  0xac   : > { %940 = vmatpush.bf16.msrb.mxu1 %v1347_v53 }
  0xaf   : > { %927 = vmatpush.bf16.msrb.mxu0 %v1275_v58 }
  0xb0   : > { %941 = vmatpush.bf16.msrb.mxu1 %v1339_v59 }
  0xb3   : > { %928 = vmatpush.bf16.msrb.mxu0 %v1267_v0 }
  0xb4   : > { %942 = vmatpush.bf16.msrb.mxu1 %v1331_v1 }
  0xb7   : > { %929 = vmatpush.bf16.msrb.mxu0 %v1259_v6 }
  0xb8   : > { %943 = vmatpush.bf16.msrb.mxu1 %v1323_v7 }
  0xbb   : > { %930 = vmatpush.bf16.msrb.mxu0 %v1251_v12 }
  0xbc   : > { %944 = vmatpush.bf16.msrb.mxu1 %v1315_v13 }
  0xbe   : > { %931 = vmatmul.bf16.vlgmr.msrb.gmra.mxu0 %v1958_v35 }
  0xbf   : > { %945 = vmatmul.bf16.vlgmr.msrb.gmra.mxu1 %v1956_v34 }
 0x11b   : > { %v876_v14 = vpop.f32.mrf.mxu0 }
 0x11c   : > { %v890_v15 = vpop.f32.mrf.mxu1 }
 0x11d   : > { %v891_v16 = vadd.f32 %v890_v15, %v876_v14 }
 0x123   : > { %v904_v18 = vpop.f32.mrf.mxu2  ;;  %v878_v20 = vpop.f32.mrf.mxu0 }
 0x124   : > { %v905_v19 = vadd.f32 %v904_v18, %v891_v16  ;;  %v892_v21 = vpop.f32.mrf.mxu1 }
 0x125   : > { %v893_v23 = vadd.f32 %v892_v21, %v878_v20 }
 0x126   : > { %v951_v22 = vadd.f32 %v905_v19, %v555_v17 }
 0x128   : > { %955 = vst [vmem:[%s1873_s15] sm:$0xff] %v951_v22  ;;  %v918_v28 = vpop.f32.mrf.mxu3 }
 0x12b   : > { %v906_v25 = vpop.f32.mrf.mxu2 }
 0x12c   : > { %v907_v26 = vadd.f32 %v906_v25, %v893_v23 }
 0x12e   : > { %v953_v27 = vadd.f32 %v907_v26, %v557_v24 }
 0x130   : > { %957 = vst [vmem:[%s1873_s15 + $0x10] sm:$0xff] %v953_v27  ;;  %v920_v35 = vpop.f32.mrf.mxu3 }
 0x13b   : > { %v932_v29 = vpop.f32.mrf.mxu0 }
 0x13c   : > { %v946_v30 = vpop.f32.mrf.mxu1  ;;  %v933_v31 = vadd.f32 %v932_v29, %v918_v28 }
 0x13e   : > { %v947_v33 = vadd.f32 %v946_v30, %v933_v31 }
 0x140   : > { %v952_v34 = vadd.f32 %v947_v33, %v556_v32 }
 0x142   : > { %956 = vst [vmem:[%s1873_s15 + $0x8] sm:$0xff] %v952_v34 }
 0x143   : > { %v934_v36 = vpop.f32.mrf.mxu0 }
 0x144   : > { %v935_v37 = vadd.f32 %v934_v36, %v920_v35  ;;  %v948_v39 = vpop.f32.mrf.mxu1 }
 0x146   : > { %v949_v40 = vadd.f32 %v948_v39, %v935_v37  ;;  %962 = sbr.rel (%p1372_p5) target bundleno = 345 (0x159), region = 108 }
 0x148   : > { %v954_v41 = vadd.f32 %v949_v40, %v558_v38 }
 0x14a   : > { %958 = vst [vmem:[%s1873_s15 + $0x18] sm:$0xff] %v954_v41 }
 0x14b   : > { %v963_v42 = vld [vmem:[%s1873_s15] sm:$0xff]  ;;  %v967_v43 = vld [vmem:[%s538_s11] sm:$0x3]  ;;  %v964_v47 = vld [vmem:[%s1873_s15 + $0x8] sm:$0xff] }
 0x14c   : > { %v977_v44 = vld [vmem:[%s543_s27] sm:$0x3]  ;;  %v969_v45 = vperm.slane %v967_v43, 0  ;;  %v970_v48 = vperm.slane %v967_v43, 1 }
 0x14d   : > { %v979_v46 = vperm.slane %v977_v44, 0  ;;  %v980_v49 = vperm.slane %v977_v44, 1  ;;  %v965_v50 = vld [vmem:[%s1873_s15 + $0x10] sm:$0xff] }
 0x14e   : > { %v973_v52 = vmul.f32 %v969_v45, %v963_v42  ;;  %v974_v53 = vmul.f32 %v970_v48, %v964_v47  ;;  %v975_v54 = vmul.f32 %v969_v45, %v965_v50 }
 0x150   : > { %v983_v56 = vadd.f32 %v979_v46, %v973_v52  ;;  %v984_v57 = vadd.f32 %v980_v49, %v974_v53  ;;  %v985_v58 = vadd.f32 %v979_v46, %v975_v54 }
 0x151   : > { %v966_v51 = vld [vmem:[%s1873_s15 + $0x18] sm:$0xff] }
 0x152   : > { %v976_v55 = vmul.f32 %v970_v48, %v966_v51  ;;  %v987_v60 = vmax.f32 %v983_v56, 0.0  ;;  %v988_v61 = vmax.f32 %v984_v57, 0.0  ;;  %v989_v62 = vmax.f32 %v985_v58, 0.0 }
 0x154   : > { %v986_v59 = vadd.f32 %v980_v49, %v976_v55  ;;  %991 = vst [vmem:[%s1873_s15] sm:$0xff] %v987_v60 }
 0x155   : > { %992 = vst [vmem:[%s1873_s15 + $0x8] sm:$0xff] %v988_v61 }
 0x156   : > { %v990_v63 = vmax.f32 %v986_v59, 0.0  ;;  %993 = vst [vmem:[%s1873_s15 + $0x10] sm:$0xff] %v989_v62 }
 0x158   : > { %994 = vst [vmem:[%s1873_s15 + $0x18] sm:$0xff] %v990_v63 }
 0x159 PF: > { %1001 = sbr.rel (!%p1733_p12) target bundleno = 353 (0x161), region = 112  ;;  %s1431_s21 = sshll.u32 (%p1733_p12), %s1599_s22, 4 }
 0x15a   : > { %s1007_s29 = scalar_lea.vmem (%p1733_p12), %s2064_s4, %s1431_s21 }
 0x15b   : > { %v1020_v0 = vld [vmem:[%s1873_s15] sm:$0xff] (%p1733_p12) }
 0x15c   : > { %v1022_v1 = vld [vmem:[%s1873_s15 + $0x8] sm:$0xff] (%p1733_p12)  ;;  %1021 = vst [vmem:[%s1007_s29] sm:$0xff] (%p1733_p12), %v1020_v0 }
 0x15d   : > { %v1024_v2 = vld [vmem:[%s1873_s15 + $0x10] sm:$0xff] (%p1733_p12)  ;;  %1023 = vst [vmem:[%s1007_s29 + $0x8] sm:$0xff] (%p1733_p12), %v1022_v1 }
 0x15e   : > { %1025 = vst [vmem:[%s1007_s29 + $0x20] sm:$0xff] %v1024_v2 }
 0x15f   : > { %v1026_v3 = vld [vmem:[%s1873_s15 + $0x18] sm:$0xff] }
 0x160   : > { %1027 = vst [vmem:[%s1007_s29 + $0x28] sm:$0xff] %v1026_v3 }
 0x161 PF: > { %s14_s25 = sadd.s32 1, %s1611_s25   ;;  %s2076_s14 = sld [smem:[#allocation5_spill]] }
 0x162   : > { %p11_p6 = scmp.ge.s32.totalorder %s14_s25, 38   ;;  %s2077_s6 = sld [smem:[#allocation6_spill]] }
 0x163   : > { %s2078_s15 = smov %s1575_s16  ;;  %s2079_s16 = smov %s1731_s13 }
 0x164   : > { %s2080_s17 = smov %s1583_s18  ;;  %s2081_s18 = smov %s1728_s12 }
 0x165   : > { %s2082_s19 = smov %s1591_s20  ;;  %s2083_s20 = smov %s1714_s7 }
 0x166   : > { %s2084_s21 = smov %s1603_s23  ;;  %s2085_s22 = smov %s1607_s24 }
 0x167   : > { %s2086_s23 = smov %s2076_s14  ;;  %13 = sbr.rel (!%p11_p6) target bundleno = 9 (0x9), region = 186 }
 0x168   : > { %s2087_s24 = smov %s2077_s6 }

// kernel: resnet10_forward.27
= control target key start
LH: loop header
LB: loop body
LE: loop exit
PB: predicated region body
PF: predicated region fallthrough
CT: control target
= control target key end

     0   :  { %s267_s6 = smov 0   ;;  %s288_s0 = inlined_call_operand.vmem [shape: f32[2,8,512], index: 0, kind: input, shape index: {}]   ;;  %s289_s1 = inlined_call_operand.vmem [shape: f32[2,1,512], index: 1, kind: output, shape index: {}]  }
   0x1 LB: > { %s226_s7 = sadd.s32 4294967295, %s254_s6   ;;  %p230_p0 = scmp.ge.s32.totalorder %s254_s6, 1  ;;  %s254_s6 = sphi %s267_s6, %s11_s6  }
   0x2   : > { %p87_p1 = scmp.lt.s32.totalorder %s254_s6, 3 }
   0x4   : > { %p88_p2 = pnand %p230_p0, %p87_p1 }
   0x5   : > { %p106_p3 = scmp.lt.s32.totalorder (!%p88_p2), %s226_s7, 1 }
   0x6   : > { %91 = sbr.rel (%p88_p2) target bundleno = 35 (0x23), region = 24 }
   0xb   : > { %v256_v0 = vmov 8.0   ;;  %s291_s7 = smov (!%p106_p3, %s226_s7), 1  ;;  %v168_v38 = vlaneseq  ;;  %vm161_vm1 = vcmask 1040384   ;;  %vm163_vm2 = vcmask 1042434  }
   0xc   : > { %246 = vrcp.f32 %v256_v0  ;;  %s236_s8 = sshll.u32 %s291_s7, 5  ;;  %s233_s12 = sshll.u32 %s291_s7, 2  ;;  %vm165_vm3 = vcmask 1041408  }
   0xd   : > { %s110_s11 = scalar_lea.vmem %s288_s0, %s236_s8  ;;  %s114_s15 = scalar_lea.vmem %s289_s1, %s233_s12  ;;  %vm170_vm4 = vcmp.lt.s32.totalorder %v168_v38, 512 }
   0xe   : > { %v115_v1 = vld [vmem:[%s110_s11] sm:$0xff]  ;;  %v116_v2 = vld [vmem:[%s110_s11 + $0x8] sm:$0xff]  ;;  %v117_v3 = vld [vmem:[%s110_s11 + $0x10] sm:$0xff] }
   0xf   : > { %v118_v5 = vld [vmem:[%s110_s11 + $0x18] sm:$0xff]  ;;  %v119_v6 = vrot.slane %v115_v1, 4  ;;  %v125_v7 = vrot.slane %v116_v2, 4  ;;  %v131_v8 = vrot.slane %v117_v3, 4 }
  0x10   : > { %v137_v9 = vrot.slane %v118_v5, 4 }
  0x11   : > { %v120_v11 = vadd.f32 %v119_v6, %v115_v1  ;;  %v126_v12 = vadd.f32 %v125_v7, %v116_v2  ;;  %v132_v13 = vadd.f32 %v131_v8, %v117_v3 }
  0x12   : > { %v247_v4 = vpop.eup %246  ;;  %v138_v14 = vadd.f32 %v137_v9, %v118_v5 }
  0x13   : > { %v144_v10 = vmul.f32 8.0, %v247_v4  ;;  %v121_v16 = vrot.slane %v120_v11, 2  ;;  %v127_v17 = vrot.slane %v126_v12, 2  ;;  %v133_v18 = vrot.slane %v132_v13, 2 }
  0x14   : > { %v139_v19 = vrot.slane %v138_v14, 2  ;;  %vm148_vm0 = vweird.f32 %v247_v4 }
  0x15   : > { %v145_v15 = vsub.f32 1.0, %v144_v10  ;;  %v122_v21 = vadd.f32 %v121_v16, %v120_v11  ;;  %v128_v22 = vadd.f32 %v127_v17, %v126_v12  ;;  %v134_v23 = vadd.f32 %v133_v18, %v132_v13 }
  0x16   : > { %v140_v24 = vadd.f32 %v139_v19, %v138_v14 }
  0x17   : > { %v146_v20 = vmul.f32 %v247_v4, %v145_v15  ;;  %v123_v26 = vrot.slane %v122_v21, 1  ;;  %v129_v27 = vrot.slane %v128_v22, 1  ;;  %v135_v28 = vrot.slane %v134_v23, 1 }
  0x18   : > { %v141_v29 = vrot.slane %v140_v24, 1 }
  0x19   : > { %v147_v25 = vadd.f32 %v247_v4, %v146_v20  ;;  %v124_v31 = vadd.f32 %v123_v26, %v122_v21  ;;  %v130_v32 = vadd.f32 %v129_v27, %v128_v22  ;;  %v136_v33 = vadd.f32 %v135_v28, %v134_v23 }
  0x1a   : > { %v142_v34 = vadd.f32 %v141_v29, %v140_v24 }
  0x1b   : > { %v149_v30 = vsel %vm148_vm0, %v247_v4, %v147_v25 }
  0x1c   : > { %v150_v35 = vmul.f32 %v149_v30, %v124_v31  ;;  %v151_v36 = vmul.f32 %v149_v30, %v130_v32  ;;  %v152_v37 = vmul.f32 %v149_v30, %v136_v33  ;;  %v153_v39 = vmul.f32 %v149_v30, %v142_v34 }
  0x1e   : > { %v158_v40 = vrot.slane %v151_v36, 7  ;;  %v159_v41 = vrot.slane %v152_v37, 6  ;;  %v160_v42 = vrot.slane %v153_v39, 5 }
  0x20   : > { %v162_v43 = vsel %vm161_vm1, %v150_v35, %v158_v40  ;;  %v164_v44 = vsel %vm163_vm2, %v159_v41, %v160_v42 }
  0x21   : > { %v166_v45 = vsel %vm165_vm3, %v162_v43, %v164_v44 }
  0x22   : > { %172 = vst.msk [vmem:[%s114_s15] sm:$0xf] %vm170_vm4, %v166_v45 }
  0x23 PF: > { %s11_s6 = sadd.s32 1, %s254_s6  }
  0x24   : > { %p8_p4 = scmp.ge.s32.totalorder %s11_s6, 4  }
  0x26   :  { %10 = sbr.rel (!%p8_p4) target bundleno = 1 (0x1), region = 54 }

// kernel: resnet10_forward.26
= control target key start
LH: loop header
LB: loop body
LE: loop exit
PB: predicated region body
PF: predicated region fallthrough
CT: control target
= control target key end

     0   :  { %s2537_s0 = inlined_call_operand.vmem [shape: bf16[16,13824], index: 0, kind: input, shape index: {}]   ;;  %s2538_s1 = inlined_call_operand.vmem [shape: bf16[13824,512], index: 1, kind: input, shape index: {}]   ;;  %s2539_s2 = inlined_call_operand.vmem [shape: f32[1,512], index: 2, kind: input, shape index: {}]   ;;  %s2540_s3 = inlined_call_operand.vmem [shape: f32[1,512], index: 3, kind: input, shape index: {}]   ;;  %s2541_s4 = inlined_call_operand.vmem [shape: f32[16,512], index: 4, kind: input, shape index: {}]   ;;  %s2542_s5 = inlined_call_operand.vmem [shape: f32[16,512], index: 5, kind: output, shape index: {}]  }
   0x1   :  { %2545 = sst [smem:[#allocation9_spill]] %s2537_s0 }
   0x2   :  { %2546 = sst [smem:[#allocation10_spill]] %s2538_s1 }
   0x3   :  { %s2019_s18 = smov 0   ;;  %s2021_s19 = smov 0  }
   0x4   :  { %s2023_s20 = smov 0   ;;  %s2025_s21 = smov 0  }
   0x5   :  { %s2027_s22 = smov 0   ;;  %s2029_s23 = smov 0  }
   0x6   :  { %s2031_s24 = smov 0   ;;  %s2033_s25 = smov 0  }
   0x7   :  { %s2035_s26 = smov 0   ;;  %s2037_s27 = smov 0  }
   0x8   :  { %s2039_s28 = smov 0  }
   0x9 LB: > { %s1438_s29 = sadd.s32 4294967295, %s1986_s28   ;;  %s27_s30 = sadd.s32 1, %s1978_s26  ;;  %s1986_s28 = sphi %s2039_s28, %s15_s28   ;;  %s1982_s27 = sphi %s2037_s27, %s2568_s27   ;;  %s1978_s26 = sphi %s2035_s26, %s2567_s26   ;;  %s1974_s25 = sphi %s2033_s25, %s2566_s25   ;;  %s1970_s24 = sphi %s2031_s24, %s2565_s24   ;;  %s1966_s23 = sphi %s2029_s23, %s2564_s23   ;;  %s1962_s22 = sphi %s2027_s22, %s2563_s22   ;;  %s1958_s21 = sphi %s2025_s21, %s2562_s21   ;;  %s1954_s20 = sphi %s2023_s20, %s2561_s20   ;;  %s1950_s19 = sphi %s2021_s19, %s2560_s19   ;;  %s1946_s18 = sphi %s2019_s18, %s2559_s18  }
   0xa   : > { %p28_p0 = scmp.ge.s32.totalorder %s27_s30, 27  ;;  %s30_s6 = sadd.s32 1, %s1982_s27 }
   0xb   : > { %s43_s7 = sadd.s32 1, %s1966_s23  ;;  %p50_p1 = scmp.ne.s32.totalorder %s1966_s23, %s1962_s22 }
   0xc   : > { %s2570_s30 = smov (%p28_p0, %s27_s30), 0  ;;  %s2572_s6 = smov (!%p28_p0, %s30_s6), %s1982_s27 }
   0xd   : > { %2547 = sst [smem:[#allocation6_spill]] %s2570_s30  ;;  %s39_s8 = ssub.s32 %s1978_s26, %s2570_s30 }
   0xe   : > { %p51_p2 = scmp.eq.s32.totalorder %s1986_s28, 0  ;;  %p32_p3 = scmp.ge.s32.totalorder %s2572_s6, 2 }
   0xf   : > { %p41_p4 = scmp.eq.s32.totalorder %s39_s8, 0  ;;  %s71_s10 = sadd.s32 1, %s1958_s21 }
  0x10   : > { %p2088_p5 = por %p51_p2, %p50_p1  ;;  %s2574_s6 = smov (%p32_p3, %s2572_s6), 0 }
  0x11   : > { %2549 = sst [smem:[#allocation7_spill]] %s2574_s6  ;;  %s67_s12 = ssub.s32 %s1982_s27, %s2574_s6 }
  0x12   : > { %s2096_s11 = scalar_select %p41_p4, %s1966_s23, %s43_s7  }
  0x13   : > { %p78_p6 = scmp.ne.s32.totalorder %s1958_s21, %s1954_s20  ;;  %s68_s13 = sor.u32 %s67_s12, %s39_s8 }
  0x14   : > { %2550 = sst [smem:[#allocation8_spill]] %s2096_s11  ;;  %p149_p7 = scmp.eq.s32.totalorder %s67_s12, 0 }
  0x15   : > { %p69_p8 = scmp.eq.s32.totalorder %s68_s13, 0  ;;  %p2104_p9 = por %p78_p6, %p51_p2 }
  0x16   : > { %s151_s15 = sadd.s32 1, %s1950_s19  ;;  %p158_p10 = scmp.ne.s32.totalorder %s1950_s19, %s1946_s18 }
  0x17   : > { %s2112_s16 = scalar_select %p69_p8, %s1958_s21, %s71_s10  }
  0x18   : > { %s2115_s17 = scalar_select %p149_p7, %s1950_s19, %s151_s15  }
  0x19   : > { %p2119_p11 = por %p158_p10, %p51_p2  ;;  %p190_p12 = scmp.eq.s32.totalorder %s1438_s29, 53 }
  0x1a   : > { %p1441_p0 = scmp.ge.s32.totalorder %s1986_s28, 54 }
  0x1b   : > { %p2123_p13 = por %p190_p12, %p158_p10 }
  0x1c   : > { %212 = sbr.rel (%p1441_p0) target bundleno = 129 (0x81), region = 16 }
  0x21   : > { %215 = sbr.rel (!%p2088_p5) target bundleno = 47 (0x2f), region = 20  ;;  %s217_s10 = sand.u32 (%p2088_p5), 1, %s1966_s23  }
  0x22   : > { %s1739_s12 = sshll.u32 (%p2088_p5), %s1978_s26, 4  ;;  %s1442_s13 = sshll.u32 (%p2088_p5), %s217_s10, 5 }
  0x23   : > { %s2554_s0 = sld [smem:[#allocation9_spill]] (%p2088_p5)  ;;  %s219_s29 = scalar_lea.vmem (%p2088_p5), [#allocation2], %s1442_s13 }
  0x29   : > { %s225_s30 = scalar_lea.vmem %s2554_s0, %s1739_s12 }
  0x2a   : > { %v238_v0 = vld [vmem:[%s225_s30] sm:$0xff]  ;;  %v240_v1 = vld [vmem:[%s225_s30 + $0x8] sm:$0xff]  ;;  %v242_v2 = vld [vmem:[%s225_s30 + $0x1b0] sm:$0xff] }
  0x2b   : > { %239 = vst [vmem:[%s219_s29] sm:$0xff] %v238_v0  ;;  %v244_v3 = vld [vmem:[%s225_s30 + $0x1b8] sm:$0xff] }
  0x2c   : > { %241 = vst [vmem:[%s219_s29 + $0x8] sm:$0xff] %v240_v1 }
  0x2d   : > { %243 = vst [vmem:[%s219_s29 + $0x10] sm:$0xff] %v242_v2 }
  0x2e   : > { %245 = vst [vmem:[%s219_s29 + $0x18] sm:$0xff] %v244_v3 }
  0x2f PF: > { %251 = sbr.rel (!%p2104_p9) target bundleno = 121 (0x79), region = 43  ;;  %s253_s9 = sand.u32 (%p2104_p9), 1, %s1958_s21  }
  0x30   : > { %s1447_s10 = sshll.u32 (%p2104_p9), %s1982_s27, 1  ;;  %s1445_s6 = sshll.u32 (%p2104_p9), %s253_s9, 9 }
  0x31   : > { %s1740_s12 = sshll.u32 (%p2104_p9), %s1978_s26, 8  ;;  %s2555_s1 = sld [smem:[#allocation10_spill]] (%p2104_p9) }
  0x32   : > { %s259_s15 = sadd.s32 (%p2104_p9), %s1740_s12, %s1447_s10  ;;  %s2148_s14 = scalar_lea.vmem (%p2104_p9), [#allocation3], %s1445_s6 }
  0x33   : > { %s1449_s0 = sshll.u32 (%p2104_p9), %s259_s15, 2 }
  0x37   : > { %s2143_s30 = scalar_lea.vmem %s2555_s1, %s1449_s0 }
  0x38   : > { %v416_v4 = vld [vmem:[%s2143_s30] sm:$0xff]  ;;  %v418_v5 = vld [vmem:[%s2143_s30 + $0x10] sm:$0xff] }
  0x39   : > { %v420_v6 = vld [vmem:[%s2143_s30 + $0x20] sm:$0xff]  ;;  %417 = vst [vmem:[%s2148_s14] sm:$0xff] %v416_v4  ;;  %v422_v7 = vld [vmem:[%s2143_s30 + $0x30] sm:$0xff] }
  0x3a   : > { %419 = vst [vmem:[%s2148_s14 + $0x8] sm:$0xff] %v418_v5  ;;  %v424_v8 = vld [vmem:[%s2143_s30 + $0x40] sm:$0xff]  ;;  %v426_v9 = vld [vmem:[%s2143_s30 + $0x50] sm:$0xff] }
  0x3b   : > { %421 = vst [vmem:[%s2148_s14 + $0x10] sm:$0xff] %v420_v6  ;;  %v428_v10 = vld [vmem:[%s2143_s30 + $0x60] sm:$0xff]  ;;  %v430_v11 = vld [vmem:[%s2143_s30 + $0x70] sm:$0xff] }
  0x3c   : > { %423 = vst [vmem:[%s2148_s14 + $0x18] sm:$0xff] %v422_v7  ;;  %v432_v12 = vld [vmem:[%s2143_s30 + $0x80] sm:$0xff]  ;;  %v434_v13 = vld [vmem:[%s2143_s30 + $0x90] sm:$0xff] }
  0x3d   : > { %425 = vst [vmem:[%s2148_s14 + $0x20] sm:$0xff] %v424_v8  ;;  %v436_v14 = vld [vmem:[%s2143_s30 + $0xa0] sm:$0xff]  ;;  %v438_v15 = vld [vmem:[%s2143_s30 + $0xb0] sm:$0xff] }
  0x3e   : > { %427 = vst [vmem:[%s2148_s14 + $0x28] sm:$0xff] %v426_v9  ;;  %v440_v16 = vld [vmem:[%s2143_s30 + $0xc0] sm:$0xff]  ;;  %v442_v17 = vld [vmem:[%s2143_s30 + $0xd0] sm:$0xff] }
  0x3f   : > { %429 = vst [vmem:[%s2148_s14 + $0x30] sm:$0xff] %v428_v10  ;;  %v444_v18 = vld [vmem:[%s2143_s30 + $0xe0] sm:$0xff]  ;;  %v446_v19 = vld [vmem:[%s2143_s30 + $0xf0] sm:$0xff] }
  0x40   : > { %431 = vst [vmem:[%s2148_s14 + $0x38] sm:$0xff] %v430_v11  ;;  %v448_v20 = vld [vmem:[%s2143_s30 + $0x100] sm:$0xff]  ;;  %v450_v21 = vld [vmem:[%s2143_s30 + $0x110] sm:$0xff] }
  0x41   : > { %433 = vst [vmem:[%s2148_s14 + $0x40] sm:$0xff] %v432_v12  ;;  %v452_v22 = vld [vmem:[%s2143_s30 + $0x120] sm:$0xff]  ;;  %v454_v23 = vld [vmem:[%s2143_s30 + $0x130] sm:$0xff] }
  0x42   : > { %435 = vst [vmem:[%s2148_s14 + $0x48] sm:$0xff] %v434_v13  ;;  %v456_v24 = vld [vmem:[%s2143_s30 + $0x140] sm:$0xff]  ;;  %v458_v25 = vld [vmem:[%s2143_s30 + $0x150] sm:$0xff] }
  0x43   : > { %437 = vst [vmem:[%s2148_s14 + $0x50] sm:$0xff] %v436_v14  ;;  %v460_v26 = vld [vmem:[%s2143_s30 + $0x160] sm:$0xff]  ;;  %v462_v27 = vld [vmem:[%s2143_s30 + $0x170] sm:$0xff] }
  0x44   : > { %439 = vst [vmem:[%s2148_s14 + $0x58] sm:$0xff] %v438_v15  ;;  %v464_v28 = vld [vmem:[%s2143_s30 + $0x180] sm:$0xff]  ;;  %v466_v29 = vld [vmem:[%s2143_s30 + $0x190] sm:$0xff] }
  0x45   : > { %441 = vst [vmem:[%s2148_s14 + $0x60] sm:$0xff] %v440_v16  ;;  %v468_v30 = vld [vmem:[%s2143_s30 + $0x1a0] sm:$0xff]  ;;  %v470_v31 = vld [vmem:[%s2143_s30 + $0x1b0] sm:$0xff] }
  0x46   : > { %443 = vst [vmem:[%s2148_s14 + $0x68] sm:$0xff] %v442_v17  ;;  %v472_v32 = vld [vmem:[%s2143_s30 + $0x1c0] sm:$0xff]  ;;  %v474_v33 = vld [vmem:[%s2143_s30 + $0x1d0] sm:$0xff] }
  0x47   : > { %445 = vst [vmem:[%s2148_s14 + $0x70] sm:$0xff] %v444_v18  ;;  %v476_v34 = vld [vmem:[%s2143_s30 + $0x1e0] sm:$0xff]  ;;  %v478_v35 = vld [vmem:[%s2143_s30 + $0x1f0] sm:$0xff] }
  0x48   : > { %447 = vst [vmem:[%s2148_s14 + $0x78] sm:$0xff] %v446_v19  ;;  %v480_v36 = vld [vmem:[%s2143_s30 + $0x200] sm:$0xff]  ;;  %v482_v37 = vld [vmem:[%s2143_s30 + $0x210] sm:$0xff] }
  0x49   : > { %449 = vst [vmem:[%s2148_s14 + $0x80] sm:$0xff] %v448_v20  ;;  %v484_v38 = vld [vmem:[%s2143_s30 + $0x220] sm:$0xff]  ;;  %v486_v39 = vld [vmem:[%s2143_s30 + $0x230] sm:$0xff] }
  0x4a   : > { %451 = vst [vmem:[%s2148_s14 + $0x88] sm:$0xff] %v450_v21  ;;  %v488_v40 = vld [vmem:[%s2143_s30 + $0x240] sm:$0xff]  ;;  %v490_v41 = vld [vmem:[%s2143_s30 + $0x250] sm:$0xff] }
  0x4b   : > { %453 = vst [vmem:[%s2148_s14 + $0x90] sm:$0xff] %v452_v22  ;;  %v492_v42 = vld [vmem:[%s2143_s30 + $0x260] sm:$0xff]  ;;  %v494_v43 = vld [vmem:[%s2143_s30 + $0x270] sm:$0xff] }
  0x4c   : > { %455 = vst [vmem:[%s2148_s14 + $0x98] sm:$0xff] %v454_v23  ;;  %v496_v44 = vld [vmem:[%s2143_s30 + $0x280] sm:$0xff]  ;;  %v498_v45 = vld [vmem:[%s2143_s30 + $0x290] sm:$0xff] }
  0x4d   : > { %457 = vst [vmem:[%s2148_s14 + $0xa0] sm:$0xff] %v456_v24  ;;  %v500_v46 = vld [vmem:[%s2143_s30 + $0x2a0] sm:$0xff]  ;;  %v502_v47 = vld [vmem:[%s2143_s30 + $0x2b0] sm:$0xff] }
  0x4e   : > { %459 = vst [vmem:[%s2148_s14 + $0xa8] sm:$0xff] %v458_v25  ;;  %v504_v48 = vld [vmem:[%s2143_s30 + $0x2c0] sm:$0xff]  ;;  %v506_v49 = vld [vmem:[%s2143_s30 + $0x2d0] sm:$0xff] }
  0x4f   : > { %461 = vst [vmem:[%s2148_s14 + $0xb0] sm:$0xff] %v460_v26  ;;  %v508_v50 = vld [vmem:[%s2143_s30 + $0x2e0] sm:$0xff]  ;;  %v510_v51 = vld [vmem:[%s2143_s30 + $0x2f0] sm:$0xff] }
  0x50   : > { %463 = vst [vmem:[%s2148_s14 + $0xb8] sm:$0xff] %v462_v27  ;;  %v512_v52 = vld [vmem:[%s2143_s30 + $0x300] sm:$0xff]  ;;  %v514_v53 = vld [vmem:[%s2143_s30 + $0x310] sm:$0xff] }
  0x51   : > { %465 = vst [vmem:[%s2148_s14 + $0xc0] sm:$0xff] %v464_v28  ;;  %v516_v54 = vld [vmem:[%s2143_s30 + $0x320] sm:$0xff]  ;;  %v518_v55 = vld [vmem:[%s2143_s30 + $0x330] sm:$0xff] }
  0x52   : > { %467 = vst [vmem:[%s2148_s14 + $0xc8] sm:$0xff] %v466_v29  ;;  %v520_v56 = vld [vmem:[%s2143_s30 + $0x340] sm:$0xff]  ;;  %v522_v57 = vld [vmem:[%s2143_s30 + $0x350] sm:$0xff] }
  0x53   : > { %469 = vst [vmem:[%s2148_s14 + $0xd0] sm:$0xff] %v468_v30  ;;  %v524_v58 = vld [vmem:[%s2143_s30 + $0x360] sm:$0xff]  ;;  %v526_v59 = vld [vmem:[%s2143_s30 + $0x370] sm:$0xff] }
  0x54   : > { %471 = vst [vmem:[%s2148_s14 + $0xd8] sm:$0xff] %v470_v31  ;;  %v528_v60 = vld [vmem:[%s2143_s30 + $0x380] sm:$0xff]  ;;  %v530_v61 = vld [vmem:[%s2143_s30 + $0x390] sm:$0xff] }
  0x55   : > { %473 = vst [vmem:[%s2148_s14 + $0xe0] sm:$0xff] %v472_v32  ;;  %v532_v62 = vld [vmem:[%s2143_s30 + $0x3a0] sm:$0xff]  ;;  %v534_v63 = vld [vmem:[%s2143_s30 + $0x3b0] sm:$0xff] }
  0x56   : > { %475 = vst [vmem:[%s2148_s14 + $0xe8] sm:$0xff] %v474_v33  ;;  %v536_v0 = vld [vmem:[%s2143_s30 + $0x3c0] sm:$0xff]  ;;  %v538_v1 = vld [vmem:[%s2143_s30 + $0x3d0] sm:$0xff] }
  0x57   : > { %477 = vst [vmem:[%s2148_s14 + $0xf0] sm:$0xff] %v476_v34  ;;  %v540_v2 = vld [vmem:[%s2143_s30 + $0x3e0] sm:$0xff]  ;;  %v542_v3 = vld [vmem:[%s2143_s30 + $0x3f0] sm:$0xff] }
  0x58   : > { %479 = vst [vmem:[%s2148_s14 + $0xf8] sm:$0xff] %v478_v35 }
  0x59   : > { %481 = vst [vmem:[%s2148_s14 + $0x100] sm:$0xff] %v480_v36 }
  0x5a   : > { %483 = vst [vmem:[%s2148_s14 + $0x108] sm:$0xff] %v482_v37 }
  0x5b   : > { %485 = vst [vmem:[%s2148_s14 + $0x110] sm:$0xff] %v484_v38 }
  0x5c   : > { %487 = vst [vmem:[%s2148_s14 + $0x118] sm:$0xff] %v486_v39 }
  0x5d   : > { %489 = vst [vmem:[%s2148_s14 + $0x120] sm:$0xff] %v488_v40 }
  0x5e   : > { %491 = vst [vmem:[%s2148_s14 + $0x128] sm:$0xff] %v490_v41 }
  0x5f   : > { %493 = vst [vmem:[%s2148_s14 + $0x130] sm:$0xff] %v492_v42 }
  0x60   : > { %495 = vst [vmem:[%s2148_s14 + $0x138] sm:$0xff] %v494_v43 }
  0x61   : > { %497 = vst [vmem:[%s2148_s14 + $0x140] sm:$0xff] %v496_v44 }
  0x62   : > { %499 = vst [vmem:[%s2148_s14 + $0x148] sm:$0xff] %v498_v45 }
  0x63   : > { %501 = vst [vmem:[%s2148_s14 + $0x150] sm:$0xff] %v500_v46 }
  0x64   : > { %503 = vst [vmem:[%s2148_s14 + $0x158] sm:$0xff] %v502_v47 }
  0x65   : > { %505 = vst [vmem:[%s2148_s14 + $0x160] sm:$0xff] %v504_v48 }
  0x66   : > { %507 = vst [vmem:[%s2148_s14 + $0x168] sm:$0xff] %v506_v49 }
  0x67   : > { %509 = vst [vmem:[%s2148_s14 + $0x170] sm:$0xff] %v508_v50 }
  0x68   : > { %511 = vst [vmem:[%s2148_s14 + $0x178] sm:$0xff] %v510_v51 }
  0x69   : > { %513 = vst [vmem:[%s2148_s14 + $0x180] sm:$0xff] %v512_v52 }
  0x6a   : > { %515 = vst [vmem:[%s2148_s14 + $0x188] sm:$0xff] %v514_v53 }
  0x6b   : > { %517 = vst [vmem:[%s2148_s14 + $0x190] sm:$0xff] %v516_v54 }
  0x6c   : > { %519 = vst [vmem:[%s2148_s14 + $0x198] sm:$0xff] %v518_v55 }
  0x6d   : > { %521 = vst [vmem:[%s2148_s14 + $0x1a0] sm:$0xff] %v520_v56 }
  0x6e   : > { %523 = vst [vmem:[%s2148_s14 + $0x1a8] sm:$0xff] %v522_v57 }
  0x6f   : > { %525 = vst [vmem:[%s2148_s14 + $0x1b0] sm:$0xff] %v524_v58 }
  0x70   : > { %527 = vst [vmem:[%s2148_s14 + $0x1b8] sm:$0xff] %v526_v59 }
  0x71   : > { %529 = vst [vmem:[%s2148_s14 + $0x1c0] sm:$0xff] %v528_v60 }
  0x72   : > { %531 = vst [vmem:[%s2148_s14 + $0x1c8] sm:$0xff] %v530_v61 }
  0x73   : > { %533 = vst [vmem:[%s2148_s14 + $0x1d0] sm:$0xff] %v532_v62 }
  0x74   : > { %535 = vst [vmem:[%s2148_s14 + $0x1d8] sm:$0xff] %v534_v63 }
  0x75   : > { %537 = vst [vmem:[%s2148_s14 + $0x1e0] sm:$0xff] %v536_v0 }
  0x76   : > { %539 = vst [vmem:[%s2148_s14 + $0x1e8] sm:$0xff] %v538_v1 }
  0x77   : > { %541 = vst [vmem:[%s2148_s14 + $0x1f0] sm:$0xff] %v540_v2 }
  0x78   : > { %543 = vst [vmem:[%s2148_s14 + $0x1f8] sm:$0xff] %v542_v3 }
  0x79 PF: > { %565 = sbr.rel (!%p2119_p11) target bundleno = 129 (0x81), region = 89  ;;  %s567_s0 = sand.u32 (%p2119_p11), 1, %s1950_s19  }
  0x7a   : > { %s1741_s11 = sshll.u32 (%p2119_p11), %s1982_s27, 4  ;;  %s1450_s29 = sshll.u32 (%p2119_p11), %s567_s0, 5 }
  0x7b   : > { %s575_s6 = scalar_lea.vmem (%p2119_p11), %s2541_s4, %s1741_s11  ;;  %s569_s12 = scalar_lea.vmem (%p2119_p11), [#allocation4], %s1450_s29 }
  0x7c   : > { %v588_v4 = vld [vmem:[%s575_s6] sm:$0xff] (%p2119_p11)  ;;  %v590_v5 = vld [vmem:[%s575_s6 + $0x8] sm:$0xff] (%p2119_p11) }
  0x7d   : > { %v592_v6 = vld [vmem:[%s575_s6 + $0x20] sm:$0xff] (%p2119_p11)  ;;  %589 = vst [vmem:[%s569_s12] sm:$0xff] (%p2119_p11), %v588_v4  ;;  %v594_v7 = vld [vmem:[%s575_s6 + $0x28] sm:$0xff] (%p2119_p11) }
  0x7e   : > { %591 = vst [vmem:[%s569_s12 + $0x8] sm:$0xff] %v590_v5 }
  0x7f   : > { %593 = vst [vmem:[%s569_s12 + $0x10] sm:$0xff] %v592_v6 }
  0x80   : > { %595 = vst [vmem:[%s569_s12 + $0x18] sm:$0xff] %v594_v7 }
  0x81 PF: > { %p1453_p1 = scmp.ge.s32.totalorder %s1986_s28, 1  ;;  %p600_p2 = scmp.lt.s32.totalorder %s1986_s28, 55 }
  0x83   : > { %p601_p3 = pnand %p1453_p1, %p600_p2 }
  0x84   : > { %s607_s7 = sand.u32 (!%p601_p3), 1, %s1962_s22   ;;  %s614_s15 = sand.u32 (!%p601_p3), 1, %s1954_s20  }
  0x85   : > { %604 = sbr.rel (%p601_p3) target bundleno = 391 (0x187), region = 112  ;;  %s1454_s13 = sshll.u32 (!%p601_p3), %s607_s7, 5 }
  0x86   : > { %s1455_s30 = sshll.u32 (!%p601_p3), %s614_s15, 9  ;;  %s621_s14 = sand.u32 (!%p601_p3), 1, %s1946_s18  }
  0x87   : > { %s1458_s0 = sshll.u32 (!%p601_p3), %s1974_s25, 1  ;;  %s1456_s11 = sshll.u32 (!%p601_p3), %s621_s14, 5 }
  0x88   : > { %p668_p4 = scmp.lt.s32.totalorder (!%p601_p3), %s1458_s0, 3  ;;  %s2298_s22 = scalar_lea.vmem (!%p601_p3), [#allocation2], %s1454_s13 }
  0x89   : > { %s2300_s20 = scalar_lea.vmem (!%p601_p3), [#allocation3], %s1455_s30  ;;  %s2302_s18 = scalar_lea.vmem (!%p601_p3), [#allocation4], %s1456_s11 }
  0x8a   : > { %s2576_s0 = smov (!%p668_p4, %s1458_s0), 3  ;;  %s2304_s7 = scalar_lea.vmem [#allocation5], %s1456_s11 }
  0x8b   : > { %s670_s10 = scalar_lea.vmem %s2539_s2, %s2576_s0  ;;  %s675_s1 = scalar_lea.vmem %s2540_s3, %s2576_s0 }
  0x8c   : > { %p1460_p5 = scmp.ne.s32.totalorder %s1970_s24, 0 }
  0x8e   : > { %684 = sbr.rel (%p1460_p5) target bundleno = 152 (0x98), region = 128 }
  0x93   : > { %v1988_v8 = vmov 0.0  }
  0x94   : > { %685 = vst [vmem:[%s2304_s7] sm:$0xff] %v1988_v8 }
  0x95   : > { %686 = vst [vmem:[%s2304_s7 + $0x8] sm:$0xff] %v1988_v8 }
  0x96   : > { %687 = vst [vmem:[%s2304_s7 + $0x10] sm:$0xff] %v1988_v8 }
  0x97   : > { %688 = vst [vmem:[%s2304_s7 + $0x18] sm:$0xff] %v1988_v8 }
  0x98 PF: > { %v1535_v9 = vld [vmem:[%s2300_s20 + $0x70] sm:$0xf]  ;;  %v1761_v10 = vld [vmem:[%s2300_s20 + $0x74] sm:$0xf0]  ;;  %v1527_v20 = vld [vmem:[%s2300_s20 + $0x60] sm:$0xf] }
  0x99   : > { %v1599_v11 = vld [vmem:[%s2300_s20 + $0xf0] sm:$0xf]  ;;  %v1536_v12 = vor.u32 %v1761_v10, %v1535_v9  ;;  %v1777_v13 = vld [vmem:[%s2300_s20 + $0xf4] sm:$0xf0]  ;;  %v1759_v22 = vld [vmem:[%s2300_s20 + $0x64] sm:$0xf0] }
  0x9a   : > { %v1663_v14 = vld [vmem:[%s2300_s20 + $0x170] sm:$0xf]  ;;  %v1793_v15 = vld [vmem:[%s2300_s20 + $0x174] sm:$0xf0]  ;;  %v1600_v16 = vor.u32 %v1777_v13, %v1599_v11  ;;  %v1591_v23 = vld [vmem:[%s2300_s20 + $0xe0] sm:$0xf]  ;;  %v1528_v25 = vor.u32 %v1759_v22, %v1527_v20 }
  0x9b   : > { %v1664_v17 = vor.u32 %v1793_v15, %v1663_v14  ;;  %v1727_v18 = vld [vmem:[%s2300_s20 + $0x1f0] sm:$0xf]  ;;  %v1809_v19 = vld [vmem:[%s2300_s20 + $0x1f4] sm:$0xf0]  ;;  %1101 = vmatpush.bf16.msra.mxu0 %v1536_v12  ;;  %v1775_v24 = vld [vmem:[%s2300_s20 + $0xe4] sm:$0xf0] }
  0x9c   : > { %v1728_v21 = vor.u32 %v1809_v19, %v1727_v18  ;;  %1115 = vmatpush.bf16.msra.mxu1 %v1600_v16  ;;  %v1592_v26 = vor.u32 %v1775_v24, %v1591_v23  ;;  %v1655_v27 = vld [vmem:[%s2300_s20 + $0x160] sm:$0xf]  ;;  %v1791_v28 = vld [vmem:[%s2300_s20 + $0x164] sm:$0xf0]  ;;  %v1519_v32 = vld [vmem:[%s2300_s20 + $0x50] sm:$0xf] }
  0x9d   : > { %1129 = vmatpush.bf16.msra.mxu2 %v1664_v17  ;;  %v1719_v29 = vld [vmem:[%s2300_s20 + $0x1e0] sm:$0xf]  ;;  %v1656_v30 = vor.u32 %v1791_v28, %v1655_v27  ;;  %v1807_v31 = vld [vmem:[%s2300_s20 + $0x1e4] sm:$0xf0]  ;;  %v1757_v33 = vld [vmem:[%s2300_s20 + $0x54] sm:$0xf0] }
  0x9e   : > { %1143 = vmatpush.bf16.msra.mxu3 %v1728_v21  ;;  %v1720_v34 = vor.u32 %v1807_v31, %v1719_v29  ;;  %v1583_v35 = vld [vmem:[%s2300_s20 + $0xd0] sm:$0xf]  ;;  %v1773_v36 = vld [vmem:[%s2300_s20 + $0xd4] sm:$0xf0]  ;;  %v1520_v38 = vor.u32 %v1757_v33, %v1519_v32  ;;  %v1511_v44 = vld [vmem:[%s2300_s20 + $0x40] sm:$0xf] }
  0x9f   : > { %v1647_v37 = vld [vmem:[%s2300_s20 + $0x150] sm:$0xf]  ;;  %1102 = vmatpush.bf16.msra.mxu0 %v1528_v25  ;;  %v1789_v39 = vld [vmem:[%s2300_s20 + $0x154] sm:$0xf0]  ;;  %v1584_v42 = vor.u32 %v1773_v36, %v1583_v35  ;;  %v1755_v45 = vld [vmem:[%s2300_s20 + $0x44] sm:$0xf0] }
  0xa0   : > { %v1711_v40 = vld [vmem:[%s2300_s20 + $0x1d0] sm:$0xf]  ;;  %v1805_v41 = vld [vmem:[%s2300_s20 + $0x1d4] sm:$0xf0]  ;;  %1116 = vmatpush.bf16.msra.mxu1 %v1592_v26  ;;  %v1648_v43 = vor.u32 %v1789_v39, %v1647_v37  ;;  %v1575_v46 = vld [vmem:[%s2300_s20 + $0xc0] sm:$0xf]  ;;  %v1512_v53 = vor.u32 %v1755_v45, %v1511_v44 }
  0xa1   : > { %1130 = vmatpush.bf16.msra.mxu2 %v1656_v30  ;;  %v1712_v47 = vor.u32 %v1805_v41, %v1711_v40  ;;  %v1771_v48 = vld [vmem:[%s2300_s20 + $0xc4] sm:$0xf0]  ;;  %v1639_v49 = vld [vmem:[%s2300_s20 + $0x140] sm:$0xf]  ;;  %v1503_v56 = vld [vmem:[%s2300_s20 + $0x30] sm:$0xf] }
  0xa2   : > { %1144 = vmatpush.bf16.msra.mxu3 %v1720_v34  ;;  %v1787_v50 = vld [vmem:[%s2300_s20 + $0x144] sm:$0xf0]  ;;  %v1703_v51 = vld [vmem:[%s2300_s20 + $0x1c0] sm:$0xf]  ;;  %v1576_v54 = vor.u32 %v1771_v48, %v1575_v46  ;;  %v1753_v57 = vld [vmem:[%s2300_s20 + $0x34] sm:$0xf0] }
  0xa3   : > { %v1803_v52 = vld [vmem:[%s2300_s20 + $0x1c4] sm:$0xf0]  ;;  %1103 = vmatpush.bf16.msra.mxu0 %v1520_v38  ;;  %v1640_v55 = vor.u32 %v1787_v50, %v1639_v49  ;;  %v1567_v58 = vld [vmem:[%s2300_s20 + $0xb0] sm:$0xf]  ;;  %v1769_v60 = vld [vmem:[%s2300_s20 + $0xb4] sm:$0xf0]  ;;  %v1504_v1 = vor.u32 %v1753_v57, %v1503_v56 }
  0xa4   : > { %1117 = vmatpush.bf16.msra.mxu1 %v1584_v42  ;;  %v1704_v59 = vor.u32 %v1803_v52, %v1703_v51  ;;  %v1631_v61 = vld [vmem:[%s2300_s20 + $0x130] sm:$0xf]  ;;  %v1785_v62 = vld [vmem:[%s2300_s20 + $0x134] sm:$0xf0]  ;;  %v1568_v2 = vor.u32 %v1769_v60, %v1567_v58  ;;  %v1495_v4 = vld [vmem:[%s2300_s20 + $0x20] sm:$0xf] }
  0xa5   : > { %1131 = vmatpush.bf16.msra.mxu2 %v1648_v43  ;;  %v1695_v63 = vld [vmem:[%s2300_s20 + $0x1b0] sm:$0xf]  ;;  %v1801_v0 = vld [vmem:[%s2300_s20 + $0x1b4] sm:$0xf0]  ;;  %v1632_v3 = vor.u32 %v1785_v62, %v1631_v61  ;;  %v1751_v5 = vld [vmem:[%s2300_s20 + $0x24] sm:$0xf0] }
  0xa6   : > { %1145 = vmatpush.bf16.msra.mxu3 %v1712_v47  ;;  %v1559_v6 = vld [vmem:[%s2300_s20 + $0xa0] sm:$0xf]  ;;  %v1696_v7 = vor.u32 %v1801_v0, %v1695_v63  ;;  %v1767_v8 = vld [vmem:[%s2300_s20 + $0xa4] sm:$0xf0]  ;;  %v1496_v13 = vor.u32 %v1751_v5, %v1495_v4  ;;  %v1487_v16 = vld [vmem:[%s2300_s20 + $0x10] sm:$0xf] }
  0xa7   : > { %1104 = vmatpush.bf16.msra.mxu0 %v1512_v53  ;;  %v1623_v9 = vld [vmem:[%s2300_s20 + $0x120] sm:$0xf]  ;;  %v1783_v10 = vld [vmem:[%s2300_s20 + $0x124] sm:$0xf0]  ;;  %v1560_v14 = vor.u32 %v1767_v8, %v1559_v6  ;;  %v1749_v17 = vld [vmem:[%s2300_s20 + $0x14] sm:$0xf0] }
  0xa8   : > { %1118 = vmatpush.bf16.msra.mxu1 %v1576_v54  ;;  %v1687_v11 = vld [vmem:[%s2300_s20 + $0x1a0] sm:$0xf]  ;;  %v1799_v12 = vld [vmem:[%s2300_s20 + $0x1a4] sm:$0xf0]  ;;  %v1624_v15 = vor.u32 %v1783_v10, %v1623_v9  ;;  %v1551_v18 = vld [vmem:[%s2300_s20 + $0x90] sm:$0xf]  ;;  %v1488_v26 = vor.u32 %v1749_v17, %v1487_v16 }
  0xa9   : > { %1132 = vmatpush.bf16.msra.mxu2 %v1640_v55  ;;  %v1688_v19 = vor.u32 %v1799_v12, %v1687_v11  ;;  %v1765_v20 = vld [vmem:[%s2300_s20 + $0x94] sm:$0xf0]  ;;  %v1615_v21 = vld [vmem:[%s2300_s20 + $0x110] sm:$0xf]  ;;  %v1479_v25 = vld [vmem:[%s2300_s20] sm:$0xf] }
  0xaa   : > { %1146 = vmatpush.bf16.msra.mxu3 %v1704_v59  ;;  %v1781_v22 = vld [vmem:[%s2300_s20 + $0x114] sm:$0xf0]  ;;  %v1679_v23 = vld [vmem:[%s2300_s20 + $0x190] sm:$0xf]  ;;  %v1747_v27 = vld [vmem:[%s2300_s20 + $0x4] sm:$0xf0]  ;;  %v1552_v30 = vor.u32 %v1765_v20, %v1551_v18 }
  0xab   : > { %1105 = vmatpush.bf16.msra.mxu0 %v1504_v1  ;;  %v1797_v24 = vld [vmem:[%s2300_s20 + $0x194] sm:$0xf0]  ;;  %v1543_v28 = vld [vmem:[%s2300_s20 + $0x80] sm:$0xf]  ;;  %v1763_v29 = vld [vmem:[%s2300_s20 + $0x84] sm:$0xf0]  ;;  %v1616_v31 = vor.u32 %v1781_v22, %v1615_v21  ;;  %v1480_v42 = vor.u32 %v1747_v27, %v1479_v25 }
  0xac   : > { %1119 = vmatpush.bf16.msra.mxu1 %v1568_v2  ;;  %v1607_v32 = vld [vmem:[%s2300_s20 + $0x100] sm:$0xf]  ;;  %v1779_v33 = vld [vmem:[%s2300_s20 + $0x104] sm:$0xf0]  ;;  %v1680_v35 = vor.u32 %v1797_v24, %v1679_v23  ;;  %v1760_v37 = vld [vmem:[%s2300_s20 + $0x74] sm:$0xf]  ;;  %v1544_v46 = vor.u32 %v1763_v29, %v1543_v28 }
  0xad   : > { %1133 = vmatpush.bf16.msra.mxu2 %v1632_v3  ;;  %v1671_v34 = vld [vmem:[%s2300_s20 + $0x180] sm:$0xf]  ;;  %v1795_v36 = vld [vmem:[%s2300_s20 + $0x184] sm:$0xf0]  ;;  %v1537_v38 = vld [vmem:[%s2300_s20 + $0x78] sm:$0xf0]  ;;  %v1608_v47 = vor.u32 %v1779_v33, %v1607_v32 }
  0xae   : > { %1147 = vmatpush.bf16.msra.mxu3 %v1696_v7  ;;  %v1776_v39 = vld [vmem:[%s2300_s20 + $0xf4] sm:$0xf]  ;;  %v1601_v40 = vld [vmem:[%s2300_s20 + $0xf8] sm:$0xf0]  ;;  %v1758_v48 = vld [vmem:[%s2300_s20 + $0x64] sm:$0xf]  ;;  %v1672_v52 = vor.u32 %v1795_v36, %v1671_v34  ;;  %v1540_v53 = vor.u32 %v1760_v37, %v1537_v38 }
  0xaf   : > { %1106 = vmatpush.bf16.msra.mxu0 %v1496_v13  ;;  %v1792_v41 = vld [vmem:[%s2300_s20 + $0x174] sm:$0xf]  ;;  %v1665_v43 = vld [vmem:[%s2300_s20 + $0x178] sm:$0xf0]  ;;  %v1529_v49 = vld [vmem:[%s2300_s20 + $0x68] sm:$0xf0]  ;;  %v1604_v58 = vor.u32 %v1776_v39, %v1601_v40 }
  0xb0   : > { %1120 = vmatpush.bf16.msra.mxu1 %v1560_v14  ;;  %v1808_v44 = vld [vmem:[%s2300_s20 + $0x1f4] sm:$0xf]  ;;  %v1729_v45 = vld [vmem:[%s2300_s20 + $0x1f8] sm:$0xf0]  ;;  %v1471_v50 = vld [vmem:[%s2298_s22 + $0x8] sm:$0xf]  ;;  %v1668_v59 = vor.u32 %v1792_v41, %v1665_v43  ;;  %v1532_v8 = vor.u32 %v1758_v48, %v1529_v49 }
  0xb1   : > { %1134 = vmatpush.bf16.msra.mxu2 %v1624_v15  ;;  %v1745_v51 = vld [vmem:[%s2298_s22 + $0x14] sm:$0xf0]  ;;  %v1774_v54 = vld [vmem:[%s2300_s20 + $0xe4] sm:$0xf]  ;;  %v1593_v55 = vld [vmem:[%s2300_s20 + $0xe8] sm:$0xf0]  ;;  %v1732_v63 = vor.u32 %v1808_v44, %v1729_v45 }
  0xb2   : > { %1148 = vmatpush.bf16.msra.mxu3 %v1688_v19  ;;  %v1790_v56 = vld [vmem:[%s2300_s20 + $0x164] sm:$0xf]  ;;  %v1657_v57 = vld [vmem:[%s2300_s20 + $0x168] sm:$0xf0]  ;;  %v1473_v61 = vld [vmem:[%s2298_s22 + $0x18] sm:$0xf0]  ;;  %v2394_v0 = vor.u32 %v1745_v51, %v1471_v50  ;;  %v1596_v10 = vor.u32 %v1774_v54, %v1593_v55 }
  0xb3   : > { %1107 = vmatpush.bf16.msra.mxu0 %v1488_v26  ;;  %v1743_v60 = vld [vmem:[%s2298_s22 + $0xc] sm:$0xf]  ;;  %v1463_v62 = vld [vmem:[%s2298_s22] sm:$0xf]  ;;  %v1744_v1 = vld [vmem:[%s2298_s22 + $0xc] sm:$0xf0]  ;;  %v1660_v11 = vor.u32 %v1790_v56, %v1657_v57 }
  0xb4   : > { %1121 = vmatpush.bf16.msra.mxu1 %v1552_v30  ;;  %v1742_v2 = vld [vmem:[%s2298_s22 + $0x4] sm:$0xf]  ;;  %v1465_v3 = vld [vmem:[%s2298_s22 + $0x10] sm:$0xf0]  ;;  %v1721_v5 = vld [vmem:[%s2300_s20 + $0x1e8] sm:$0xf0]  ;;  %v2401_v6 = vor.u32 %v1743_v60, %v1473_v61  ;;  %v2403_v7 = vor.u32 %v1744_v1, %v1463_v62 }
  0xb5   : > { %1135 = vmatpush.bf16.msra.mxu2 %v1616_v31  ;;  %v1806_v4 = vld [vmem:[%s2300_s20 + $0x1e4] sm:$0xf]  ;;  %v2405_v9 = vor.u32 %v1742_v2, %v1465_v3  ;;  %v1756_v12 = vld [vmem:[%s2300_s20 + $0x54] sm:$0xf]  ;;  %v1521_v13 = vld [vmem:[%s2300_s20 + $0x58] sm:$0xf0] }
  0xb6   : > { %1149 = vmatpush.bf16.msra.mxu3 %v1680_v35  ;;  %v1772_v14 = vld [vmem:[%s2300_s20 + $0xd4] sm:$0xf]  ;;  %v1724_v15 = vor.u32 %v1806_v4, %v1721_v5  ;;  %v1585_v16 = vld [vmem:[%s2300_s20 + $0xd8] sm:$0xf0]  ;;  %v1524_v21 = vor.u32 %v1756_v12, %v1521_v13  ;;  %v1754_v24 = vld [vmem:[%s2300_s20 + $0x44] sm:$0xf] }
  0xb7   : > { %1108 = vmatpush.bf16.msra.mxu0 %v1480_v42  ;;  %v1788_v17 = vld [vmem:[%s2300_s20 + $0x154] sm:$0xf]  ;;  %v1649_v18 = vld [vmem:[%s2300_s20 + $0x158] sm:$0xf0]  ;;  %v1588_v22 = vor.u32 %v1772_v14, %v1585_v16  ;;  %v1513_v25 = vld [vmem:[%s2300_s20 + $0x48] sm:$0xf0] }
  0xb8   : > { %1122 = vmatpush.bf16.msra.mxu1 %v1544_v46  ;;  %v1804_v19 = vld [vmem:[%s2300_s20 + $0x1d4] sm:$0xf]  ;;  %v1713_v20 = vld [vmem:[%s2300_s20 + $0x1d8] sm:$0xf0]  ;;  %v1652_v23 = vor.u32 %v1788_v17, %v1649_v18  ;;  %v1770_v26 = vld [vmem:[%s2300_s20 + $0xc4] sm:$0xf]  ;;  %v1516_v33 = vor.u32 %v1754_v24, %v1513_v25 }
  0xb9   : > { %1136 = vmatpush.bf16.msra.mxu2 %v1608_v47  ;;  %v1716_v27 = vor.u32 %v1804_v19, %v1713_v20  ;;  %v1577_v28 = vld [vmem:[%s2300_s20 + $0xc8] sm:$0xf0]  ;;  %v1786_v29 = vld [vmem:[%s2300_s20 + $0x144] sm:$0xf]  ;;  %v1752_v36 = vld [vmem:[%s2300_s20 + $0x34] sm:$0xf] }
  0xba   : > { %1150 = vmatpush.bf16.msra.mxu3 %v1672_v52  ;;  %1109 = vmatmul.bf16.vlgmr.msra.gmra.mxu0 %v2403_v7  ;;  %v1641_v30 = vld [vmem:[%s2300_s20 + $0x148] sm:$0xf0]  ;;  %v1802_v31 = vld [vmem:[%s2300_s20 + $0x1c4] sm:$0xf]  ;;  %v1580_v34 = vor.u32 %v1770_v26, %v1577_v28  ;;  %v1505_v37 = vld [vmem:[%s2300_s20 + $0x38] sm:$0xf0] }
  0xbb   : > { %1157 = vmatpush.bf16.msrb.mxu0 %v1540_v53  ;;  %1123 = vmatmul.bf16.vlgmr.msra.gmra.mxu1 %v2405_v9  ;;  %v1705_v32 = vld [vmem:[%s2300_s20 + $0x1c8] sm:$0xf0]  ;;  %v1644_v35 = vor.u32 %v1786_v29, %v1641_v30  ;;  %v1768_v38 = vld [vmem:[%s2300_s20 + $0xb4] sm:$0xf]  ;;  %v1569_v40 = vld [vmem:[%s2300_s20 + $0xb8] sm:$0xf0]  ;;  %v1508_v45 = vor.u32 %v1752_v36, %v1505_v37 }
  0xbc   : > { %1171 = vmatpush.bf16.msrb.mxu1 %v1604_v58  ;;  %1137 = vmatmul.bf16.vlgmr.msra.gmra.mxu2 %v2394_v0  ;;  %v1708_v39 = vor.u32 %v1802_v31, %v1705_v32  ;;  %v1784_v41 = vld [vmem:[%s2300_s20 + $0x134] sm:$0xf]  ;;  %v1633_v42 = vld [vmem:[%s2300_s20 + $0x138] sm:$0xf0]  ;;  %v1572_v46 = vor.u32 %v1768_v38, %v1569_v40  ;;  %v1750_v48 = vld [vmem:[%s2300_s20 + $0x24] sm:$0xf] }
  0xbd   : > { %1185 = vmatpush.bf16.msrb.mxu2 %v1668_v59  ;;  %1151 = vmatmul.bf16.vlgmr.msra.gmra.mxu3 %v2401_v6  ;;  %v1800_v43 = vld [vmem:[%s2300_s20 + $0x1b4] sm:$0xf]  ;;  %v1697_v44 = vld [vmem:[%s2300_s20 + $0x1b8] sm:$0xf0]  ;;  %v1636_v47 = vor.u32 %v1784_v41, %v1633_v42  ;;  %v1497_v49 = vld [vmem:[%s2300_s20 + $0x28] sm:$0xf0] }
  0xbe   : > { %1199 = vmatpush.bf16.msrb.mxu3 %v1732_v63  ;;  %v1766_v50 = vld [vmem:[%s2300_s20 + $0xa4] sm:$0xf]  ;;  %v1700_v51 = vor.u32 %v1800_v43, %v1697_v44  ;;  %v1561_v52 = vld [vmem:[%s2300_s20 + $0xa8] sm:$0xf0]  ;;  %v1500_v57 = vor.u32 %v1750_v48, %v1497_v49  ;;  %v1748_v60 = vld [vmem:[%s2300_s20 + $0x14] sm:$0xf] }
  0xbf   : > { %1158 = vmatpush.bf16.msrb.mxu0 %v1532_v8  ;;  %v1782_v53 = vld [vmem:[%s2300_s20 + $0x124] sm:$0xf]  ;;  %v1625_v54 = vld [vmem:[%s2300_s20 + $0x128] sm:$0xf0]  ;;  %v1564_v58 = vor.u32 %v1766_v50, %v1561_v52  ;;  %v1489_v61 = vld [vmem:[%s2300_s20 + $0x18] sm:$0xf0] }
  0xc0   : > { %1172 = vmatpush.bf16.msrb.mxu1 %v1596_v10  ;;  %v1798_v55 = vld [vmem:[%s2300_s20 + $0x1a4] sm:$0xf]  ;;  %v1689_v56 = vld [vmem:[%s2300_s20 + $0x1a8] sm:$0xf0]  ;;  %v1628_v59 = vor.u32 %v1782_v53, %v1625_v54  ;;  %v1764_v62 = vld [vmem:[%s2300_s20 + $0x94] sm:$0xf]  ;;  %v1492_v8 = vor.u32 %v1748_v60, %v1489_v61 }
  0xc1   : > { %1186 = vmatpush.bf16.msrb.mxu2 %v1660_v11  ;;  %v1692_v63 = vor.u32 %v1798_v55, %v1689_v56  ;;  %v1553_v1 = vld [vmem:[%s2300_s20 + $0x98] sm:$0xf0]  ;;  %v1780_v2 = vld [vmem:[%s2300_s20 + $0x114] sm:$0xf]  ;;  %v1746_v12 = vld [vmem:[%s2300_s20 + $0x4] sm:$0xf] }
  0xc2   : > { %1200 = vmatpush.bf16.msrb.mxu3 %v1724_v15  ;;  %v1617_v3 = vld [vmem:[%s2300_s20 + $0x118] sm:$0xf0]  ;;  %v1796_v4 = vld [vmem:[%s2300_s20 + $0x194] sm:$0xf]  ;;  %v1556_v10 = vor.u32 %v1764_v62, %v1553_v1  ;;  %v1481_v13 = vld [vmem:[%s2300_s20 + $0x8] sm:$0xf0] }
  0xc3   : > { %1159 = vmatpush.bf16.msrb.mxu0 %v1524_v21  ;;  %v1681_v5 = vld [vmem:[%s2300_s20 + $0x198] sm:$0xf0]  ;;  %v1620_v11 = vor.u32 %v1780_v2, %v1617_v3  ;;  %v1762_v14 = vld [vmem:[%s2300_s20 + $0x84] sm:$0xf]  ;;  %v1545_v16 = vld [vmem:[%s2300_s20 + $0x88] sm:$0xf0]  ;;  %v1484_v21 = vor.u32 %v1746_v12, %v1481_v13 }
  0xc4   : > { %1173 = vmatpush.bf16.msrb.mxu1 %v1588_v22  ;;  %v1684_v15 = vor.u32 %v1796_v4, %v1681_v5  ;;  %v1778_v17 = vld [vmem:[%s2300_s20 + $0x104] sm:$0xf]  ;;  %v1609_v18 = vld [vmem:[%s2300_s20 + $0x108] sm:$0xf0]  ;;  %v1548_v22 = vor.u32 %v1762_v14, %v1545_v16  ;;  %v692_v53 = vld [vmem:[%s2304_s7 + $0x18] sm:$0xff]  ;;  %p1733_p6 = scmp.ne.s32.totalorder %s1970_s24, 26 }
  0xc5   : > { %1187 = vmatpush.bf16.msrb.mxu2 %v1652_v23  ;;  %v1794_v19 = vld [vmem:[%s2300_s20 + $0x184] sm:$0xf]  ;;  %v1673_v20 = vld [vmem:[%s2300_s20 + $0x188] sm:$0xf0]  ;;  %v1612_v23 = vor.u32 %v1778_v17, %v1609_v18 }
  0xc6   : > { %1201 = vmatpush.bf16.msrb.mxu3 %v1716_v27  ;;  %v1676_v24 = vor.u32 %v1794_v19, %v1673_v20  ;;  %v689_v31 = vld [vmem:[%s2304_s7] sm:$0xff] }
  0xc7   : > { %1160 = vmatpush.bf16.msrb.mxu0 %v1516_v33 }
  0xc8   : > { %1174 = vmatpush.bf16.msrb.mxu1 %v1580_v34 }
  0xc9   : > { %1188 = vmatpush.bf16.msrb.mxu2 %v1644_v35 }
  0xca   : > { %1202 = vmatpush.bf16.msrb.mxu3 %v1708_v39 }
  0xcb   : > { %1161 = vmatpush.bf16.msrb.mxu0 %v1508_v45  ;;  %v690_v45 = vld [vmem:[%s2304_s7 + $0x8] sm:$0xff] }
  0xcc   : > { %1175 = vmatpush.bf16.msrb.mxu1 %v1572_v46 }
  0xcd   : > { %1189 = vmatpush.bf16.msrb.mxu2 %v1636_v47 }
  0xce   : > { %1203 = vmatpush.bf16.msrb.mxu3 %v1700_v51 }
  0xcf   : > { %1162 = vmatpush.bf16.msrb.mxu0 %v1500_v57 }
  0xd0   : > { %1176 = vmatpush.bf16.msrb.mxu1 %v1564_v58 }
  0xd1   : > { %1190 = vmatpush.bf16.msrb.mxu2 %v1628_v59 }
  0xd2   : > { %1204 = vmatpush.bf16.msrb.mxu3 %v1692_v63 }
  0xd3   : > { %1163 = vmatpush.bf16.msrb.mxu0 %v1492_v8 }
  0xd4   : > { %1177 = vmatpush.bf16.msrb.mxu1 %v1556_v10 }
  0xd5   : > { %1191 = vmatpush.bf16.msrb.mxu2 %v1620_v11 }
  0xd6   : > { %1205 = vmatpush.bf16.msrb.mxu3 %v1684_v15 }
  0xd7   : > { %1164 = vmatpush.bf16.msrb.mxu0 %v1484_v21 }
  0xd8   : > { %1178 = vmatpush.bf16.msrb.mxu1 %v1548_v22 }
  0xd9   : > { %1192 = vmatpush.bf16.msrb.mxu2 %v1612_v23 }
  0xda   : > { %1206 = vmatpush.bf16.msrb.mxu3 %v1676_v24  ;;  %1165 = vmatmul.bf16.vlgmr.msrb.gmra.mxu0 %v2403_v7 }
  0xdb   : > { %1179 = vmatmul.bf16.vlgmr.msrb.gmra.mxu1 %v2405_v9 }
  0xdc   : > { %1193 = vmatmul.bf16.vlgmr.msrb.gmra.mxu2 %v2394_v0 }
  0xdd   : > { %1207 = vmatmul.bf16.vlgmr.msrb.gmra.mxu3 %v2401_v6  ;;  %v691_v6 = vld [vmem:[%s2304_s7 + $0x10] sm:$0xff] }
 0x137   : > { %v1110_v25 = vpop.f32.mrf.mxu0 }
 0x138   : > { %v1124_v26 = vpop.f32.mrf.mxu1 }
 0x139   : > { %v1125_v27 = vadd.f32 %v1124_v26, %v1110_v25 }
 0x13f   : > { %v1138_v28 = vpop.f32.mrf.mxu2  ;;  %v1112_v33 = vpop.f32.mrf.mxu0 }
 0x140   : > { %v1139_v29 = vadd.f32 %v1138_v28, %v1125_v27  ;;  %v1152_v30 = vpop.f32.mrf.mxu3  ;;  %v1126_v34 = vpop.f32.mrf.mxu1 }
 0x141   : > { %v1127_v35 = vadd.f32 %v1126_v34, %v1112_v33 }
 0x142   : > { %v1153_v32 = vadd.f32 %v1152_v30, %v1139_v29 }
 0x144   : > { %v1213_v7 = vadd.f32 %v1153_v32, %v689_v31 }
 0x146   : > { %1217 = vst [vmem:[%s2304_s7] sm:$0xff] %v1213_v7 }
 0x147   : > { %v1140_v9 = vpop.f32.mrf.mxu2 }
 0x148   : > { %v1141_v0 = vadd.f32 %v1140_v9, %v1127_v35  ;;  %v1154_v36 = vpop.f32.mrf.mxu3 }
 0x14a   : > { %v1155_v37 = vadd.f32 %v1154_v36, %v1141_v0 }
 0x14c   : > { %v1215_v38 = vadd.f32 %v1155_v37, %v691_v6 }
 0x14e   : > { %1219 = vst [vmem:[%s2304_s7 + $0x10] sm:$0xff] %v1215_v38 }
 0x157   : > { %v1166_v39 = vpop.f32.mrf.mxu0 }
 0x158   : > { %v1180_v40 = vpop.f32.mrf.mxu1 }
 0x159   : > { %v1181_v41 = vadd.f32 %v1180_v40, %v1166_v39 }
 0x15f   : > { %v1194_v42 = vpop.f32.mrf.mxu2  ;;  %v1168_v47 = vpop.f32.mrf.mxu0 }
 0x160   : > { %v1195_v43 = vadd.f32 %v1194_v42, %v1181_v41  ;;  %v1208_v44 = vpop.f32.mrf.mxu3  ;;  %v1182_v48 = vpop.f32.mrf.mxu1 }
 0x161   : > { %v1183_v50 = vadd.f32 %v1182_v48, %v1168_v47 }
 0x162   : > { %v1209_v46 = vadd.f32 %v1208_v44, %v1195_v43 }
 0x164   : > { %v1214_v49 = vadd.f32 %v1209_v46, %v690_v45 }
 0x166   : > { %1218 = vst [vmem:[%s2304_s7 + $0x8] sm:$0xff] %v1214_v49 }
 0x167   : > { %v1196_v51 = vpop.f32.mrf.mxu2 }
 0x168   : > { %v1197_v52 = vadd.f32 %v1196_v51, %v1183_v50  ;;  %v1210_v54 = vpop.f32.mrf.mxu3 }
 0x16a   : > { %v1211_v55 = vadd.f32 %v1210_v54, %v1197_v52  ;;  %1224 = sbr.rel (%p1733_p6) target bundleno = 383 (0x17f), region = 132 }
 0x16c   : > { %v1216_v56 = vadd.f32 %v1211_v55, %v692_v53 }
 0x16e   : > { %1220 = vst [vmem:[%s2304_s7 + $0x18] sm:$0xff] %v1216_v56 }
 0x16f   : > { %v1225_v57 = vld [vmem:[%s2304_s7] sm:$0xff]  ;;  %v1226_v62 = vld [vmem:[%s2304_s7 + $0x8] sm:$0xff]  ;;  %v1227_v2 = vld [vmem:[%s2304_s7 + $0x10] sm:$0xff] }
 0x170   : > { %v1229_v58 = vld [vmem:[%s670_s10] sm:$0x3]  ;;  %v1250_v11 = vld [vmem:[%s2302_s18 + $0x8] sm:$0xff]  ;;  %v1251_v12 = vld [vmem:[%s2302_s18 + $0x10] sm:$0xff] }
 0x171   : > { %v1239_v59 = vld [vmem:[%s675_s1] sm:$0x3]  ;;  %v1231_v60 = vperm.slane %v1229_v58, 0  ;;  %v1232_v63 = vperm.slane %v1229_v58, 1  ;;  %v1252_v17 = vld [vmem:[%s2302_s18 + $0x18] sm:$0xff] }
 0x172   : > { %v1241_v61 = vperm.slane %v1239_v59, 0  ;;  %v1242_v1 = vperm.slane %v1239_v59, 1  ;;  %v1249_v10 = vld [vmem:[%s2302_s18] sm:$0xff] }
 0x173   : > { %v1235_v3 = vmul.f32 %v1231_v60, %v1225_v57  ;;  %v1236_v4 = vmul.f32 %v1232_v63, %v1226_v62  ;;  %v1237_v5 = vmul.f32 %v1231_v60, %v1227_v2 }
 0x175   : > { %v1228_v8 = vld [vmem:[%s2304_s7 + $0x18] sm:$0xff]  ;;  %v1245_v14 = vadd.f32 %v1241_v61, %v1235_v3  ;;  %v1246_v15 = vadd.f32 %v1242_v1, %v1236_v4  ;;  %v1247_v16 = vadd.f32 %v1241_v61, %v1237_v5 }
 0x176   : > { %v1238_v13 = vmul.f32 %v1232_v63, %v1228_v8 }
 0x177   : > { %v1253_v19 = vadd.f32 %v1249_v10, %v1245_v14  ;;  %v1254_v20 = vadd.f32 %v1250_v11, %v1246_v15  ;;  %v1255_v21 = vadd.f32 %v1251_v12, %v1247_v16 }
 0x178   : > { %v1248_v18 = vadd.f32 %v1242_v1, %v1238_v13 }
 0x179   : > { %v1257_v23 = vmax.f32 %v1253_v19, 0.0  ;;  %v1258_v24 = vmax.f32 %v1254_v20, 0.0  ;;  %v1259_v25 = vmax.f32 %v1255_v21, 0.0 }
 0x17a   : > { %v1256_v22 = vadd.f32 %v1252_v17, %v1248_v18 }
 0x17b   : > { %1261 = vst [vmem:[%s2304_s7] sm:$0xff] %v1257_v23 }
 0x17c   : > { %v1260_v26 = vmax.f32 %v1256_v22, 0.0  ;;  %1262 = vst [vmem:[%s2304_s7 + $0x8] sm:$0xff] %v1258_v24 }
 0x17d   : > { %1263 = vst [vmem:[%s2304_s7 + $0x10] sm:$0xff] %v1259_v25 }
 0x17e   : > { %1264 = vst [vmem:[%s2304_s7 + $0x18] sm:$0xff] %v1260_v26 }
 0x17f PF: > { %1271 = sbr.rel (!%p2123_p13) target bundleno = 391 (0x187), region = 136  ;;  %s1810_s1 = sshll.u32 (%p2123_p13), %s1974_s25, 4 }
 0x180   : > { %s1277_s11 = scalar_lea.vmem (%p2123_p13), %s2542_s5, %s1810_s1 }
 0x182   : > { %v1290_v27 = vld [vmem:[%s2304_s7] sm:$0xff] (%p2123_p13) }
 0x183   : > { %v1292_v28 = vld [vmem:[%s2304_s7 + $0x8] sm:$0xff] (%p2123_p13)  ;;  %1291 = vst [vmem:[%s1277_s11] sm:$0xff] (%p2123_p13), %v1290_v27 }
 0x184   : > { %v1294_v29 = vld [vmem:[%s2304_s7 + $0x10] sm:$0xff]  ;;  %1293 = vst [vmem:[%s1277_s11 + $0x8] sm:$0xff] %v1292_v28 }
 0x185   : > { %v1296_v30 = vld [vmem:[%s2304_s7 + $0x18] sm:$0xff]  ;;  %1295 = vst [vmem:[%s1277_s11 + $0x20] sm:$0xff] %v1294_v29 }
 0x186   : > { %1297 = vst [vmem:[%s1277_s11 + $0x28] sm:$0xff] %v1296_v30 }
 0x187 PF: > { %s15_s28 = sadd.s32 1, %s1986_s28   ;;  %s2556_s25 = sld [smem:[#allocation8_spill]] }
 0x188   : > { %p12_p7 = scmp.ge.s32.totalorder %s15_s28, 56   ;;  %s2557_s8 = sld [smem:[#allocation6_spill]] }
 0x189   : > { %s2558_s29 = sld [smem:[#allocation7_spill]]  ;;  %s2559_s18 = smov %s1950_s19 }
 0x18a   : > { %s2560_s19 = smov %s2115_s17  ;;  %s2561_s20 = smov %s1958_s21 }
 0x18b   : > { %s2562_s21 = smov %s2112_s16  ;;  %s2563_s22 = smov %s1966_s23 }
 0x18c   : > { %s2565_s24 = smov %s1978_s26  ;;  %14 = sbr.rel (!%p12_p7) target bundleno = 9 (0x9), region = 212 }
 0x18d   : > { %s2564_s23 = smov %s2556_s25  ;;  %s2566_s25 = smov %s1982_s27 }
 0x18e   : > { %s2567_s26 = smov %s2557_s8 }
 0x18f   : > { %s2568_s27 = smov %s2558_s29 }

// kernel: resnet10_forward.25
= control target key start
LH: loop header
LB: loop body
LE: loop exit
PB: predicated region body
PF: predicated region fallthrough
CT: control target
= control target key end

     0   :  { %s1217_s15 = smov 0   ;;  %s1219_s16 = smov 0   ;;  %s1446_s0 = inlined_call_operand.vmem [shape: bf16[16,256], index: 0, kind: input, shape index: {}]   ;;  %s1447_s1 = inlined_call_operand.vmem [shape: bf16[256,512], index: 1, kind: input, shape index: {}]   ;;  %s1448_s2 = inlined_call_operand.vmem [shape: f32[1,512], index: 2, kind: input, shape index: {}]   ;;  %s1449_s3 = inlined_call_operand.vmem [shape: f32[1,512], index: 3, kind: input, shape index: {}]   ;;  %s1450_s4 = inlined_call_operand.vmem [shape: f32[16,512], index: 4, kind: output, shape index: {}]  }
   0x1   :  { %s1221_s17 = smov 0   ;;  %s1223_s18 = smov 0  }
   0x2   :  { %s1225_s19 = smov 0  }
   0x3 LB: > { %s29_s20 = sadd.s32 1, %s1186_s18  ;;  %s921_s21 = sadd.s32 4294967295, %s1190_s19   ;;  %s1190_s19 = sphi %s1225_s19, %s14_s19   ;;  %s1186_s18 = sphi %s1223_s18, %s1455_s18   ;;  %s1182_s17 = sphi %s1221_s17, %s1454_s17   ;;  %s1178_s16 = sphi %s1219_s16, %s1453_s16   ;;  %s1174_s15 = sphi %s1217_s15, %s1452_s15  }
   0x4   : > { %p31_p0 = scmp.ge.s32.totalorder %s29_s20, 2  ;;  %p77_p1 = scmp.ne.s32.totalorder %s1178_s16, %s1174_s15 }
   0x5   : > { %p78_p2 = scmp.eq.s32.totalorder %s1190_s19, 0  ;;  %p161_p4 = scmp.eq.s32.totalorder %s921_s21, 1 }
   0x6   : > { %s1457_s20 = smov (%p31_p0, %s29_s20), 0  ;;  %s70_s23 = sadd.s32 1, %s1178_s16 }
   0x7   : > { %p79_p3 = por %p78_p2, %p77_p1  ;;  %s66_s22 = ssub.s32 %s1186_s18, %s1457_s20 }
   0x8   : > { %p68_p5 = scmp.eq.s32.totalorder %s66_s22, 0  ;;  %p1252_p6 = por %p161_p4, %p77_p1 }
   0x9   : > { %p925_p7 = scmp.ge.s32.totalorder %s1190_s19, 2 }
   0xa   : > { %s1257_s25 = scalar_select %p68_p5, %s1178_s16, %s70_s23  }
   0xb   : > { %198 = sbr.rel (%p925_p7) target bundleno = 52 (0x34), region = 20 }
  0x10   : > { %201 = sbr.rel (!%p79_p3) target bundleno = 52 (0x34), region = 24  ;;  %s203_s26 = sand.u32 (%p79_p3), 1, %s1178_s16  }
  0x11   : > { %s1075_s27 = sshll.u32 (%p79_p3), %s1186_s18, 3  ;;  %s926_s28 = sshll.u32 (%p79_p3), %s203_s26, 8 }
  0x12   : > { %s1265_s5 = scalar_lea.vmem (%p79_p3), %s1447_s1, %s1075_s27  ;;  %s1270_s6 = scalar_lea.vmem (%p79_p3), [#allocation2], %s926_s28 }
  0x13   : > { %v302_v0 = vld [vmem:[%s1265_s5] sm:$0xff] (%p79_p3)  ;;  %v304_v1 = vld [vmem:[%s1265_s5 + $0x10] sm:$0xff] (%p79_p3) }
  0x14   : > { %v306_v2 = vld [vmem:[%s1265_s5 + $0x20] sm:$0xff] (%p79_p3)  ;;  %303 = vst [vmem:[%s1270_s6] sm:$0xff] (%p79_p3), %v302_v0  ;;  %v308_v3 = vld [vmem:[%s1265_s5 + $0x30] sm:$0xff] (%p79_p3) }
  0x15   : > { %305 = vst [vmem:[%s1270_s6 + $0x8] sm:$0xff] %v304_v1  ;;  %v310_v4 = vld [vmem:[%s1265_s5 + $0x40] sm:$0xff]  ;;  %v312_v5 = vld [vmem:[%s1265_s5 + $0x50] sm:$0xff] }
  0x16   : > { %307 = vst [vmem:[%s1270_s6 + $0x10] sm:$0xff] %v306_v2  ;;  %v314_v6 = vld [vmem:[%s1265_s5 + $0x60] sm:$0xff]  ;;  %v316_v7 = vld [vmem:[%s1265_s5 + $0x70] sm:$0xff] }
  0x17   : > { %309 = vst [vmem:[%s1270_s6 + $0x18] sm:$0xff] %v308_v3  ;;  %v318_v8 = vld [vmem:[%s1265_s5 + $0x80] sm:$0xff]  ;;  %v320_v9 = vld [vmem:[%s1265_s5 + $0x90] sm:$0xff] }
  0x18   : > { %311 = vst [vmem:[%s1270_s6 + $0x20] sm:$0xff] %v310_v4  ;;  %v322_v10 = vld [vmem:[%s1265_s5 + $0xa0] sm:$0xff]  ;;  %v324_v11 = vld [vmem:[%s1265_s5 + $0xb0] sm:$0xff] }
  0x19   : > { %313 = vst [vmem:[%s1270_s6 + $0x28] sm:$0xff] %v312_v5  ;;  %v326_v12 = vld [vmem:[%s1265_s5 + $0xc0] sm:$0xff]  ;;  %v328_v13 = vld [vmem:[%s1265_s5 + $0xd0] sm:$0xff] }
  0x1a   : > { %315 = vst [vmem:[%s1270_s6 + $0x30] sm:$0xff] %v314_v6  ;;  %v330_v14 = vld [vmem:[%s1265_s5 + $0xe0] sm:$0xff]  ;;  %v332_v15 = vld [vmem:[%s1265_s5 + $0xf0] sm:$0xff] }
  0x1b   : > { %317 = vst [vmem:[%s1270_s6 + $0x38] sm:$0xff] %v316_v7  ;;  %v334_v16 = vld [vmem:[%s1265_s5 + $0x100] sm:$0xff]  ;;  %v336_v17 = vld [vmem:[%s1265_s5 + $0x110] sm:$0xff] }
  0x1c   : > { %319 = vst [vmem:[%s1270_s6 + $0x40] sm:$0xff] %v318_v8  ;;  %v338_v18 = vld [vmem:[%s1265_s5 + $0x120] sm:$0xff]  ;;  %v340_v19 = vld [vmem:[%s1265_s5 + $0x130] sm:$0xff] }
  0x1d   : > { %321 = vst [vmem:[%s1270_s6 + $0x48] sm:$0xff] %v320_v9  ;;  %v342_v20 = vld [vmem:[%s1265_s5 + $0x140] sm:$0xff]  ;;  %v344_v21 = vld [vmem:[%s1265_s5 + $0x150] sm:$0xff] }
  0x1e   : > { %323 = vst [vmem:[%s1270_s6 + $0x50] sm:$0xff] %v322_v10  ;;  %v346_v22 = vld [vmem:[%s1265_s5 + $0x160] sm:$0xff]  ;;  %v348_v23 = vld [vmem:[%s1265_s5 + $0x170] sm:$0xff] }
  0x1f   : > { %325 = vst [vmem:[%s1270_s6 + $0x58] sm:$0xff] %v324_v11  ;;  %v350_v24 = vld [vmem:[%s1265_s5 + $0x180] sm:$0xff]  ;;  %v352_v25 = vld [vmem:[%s1265_s5 + $0x190] sm:$0xff] }
  0x20   : > { %327 = vst [vmem:[%s1270_s6 + $0x60] sm:$0xff] %v326_v12  ;;  %v354_v26 = vld [vmem:[%s1265_s5 + $0x1a0] sm:$0xff]  ;;  %v356_v27 = vld [vmem:[%s1265_s5 + $0x1b0] sm:$0xff] }
  0x21   : > { %329 = vst [vmem:[%s1270_s6 + $0x68] sm:$0xff] %v328_v13  ;;  %v358_v28 = vld [vmem:[%s1265_s5 + $0x1c0] sm:$0xff]  ;;  %v360_v29 = vld [vmem:[%s1265_s5 + $0x1d0] sm:$0xff] }
  0x22   : > { %331 = vst [vmem:[%s1270_s6 + $0x70] sm:$0xff] %v330_v14  ;;  %v362_v30 = vld [vmem:[%s1265_s5 + $0x1e0] sm:$0xff]  ;;  %v364_v31 = vld [vmem:[%s1265_s5 + $0x1f0] sm:$0xff] }
  0x23   : > { %333 = vst [vmem:[%s1270_s6 + $0x78] sm:$0xff] %v332_v15 }
  0x24   : > { %335 = vst [vmem:[%s1270_s6 + $0x80] sm:$0xff] %v334_v16 }
  0x25   : > { %337 = vst [vmem:[%s1270_s6 + $0x88] sm:$0xff] %v336_v17 }
  0x26   : > { %339 = vst [vmem:[%s1270_s6 + $0x90] sm:$0xff] %v338_v18 }
  0x27   : > { %341 = vst [vmem:[%s1270_s6 + $0x98] sm:$0xff] %v340_v19 }
  0x28   : > { %343 = vst [vmem:[%s1270_s6 + $0xa0] sm:$0xff] %v342_v20 }
  0x29   : > { %345 = vst [vmem:[%s1270_s6 + $0xa8] sm:$0xff] %v344_v21 }
  0x2a   : > { %347 = vst [vmem:[%s1270_s6 + $0xb0] sm:$0xff] %v346_v22 }
  0x2b   : > { %349 = vst [vmem:[%s1270_s6 + $0xb8] sm:$0xff] %v348_v23 }
  0x2c   : > { %351 = vst [vmem:[%s1270_s6 + $0xc0] sm:$0xff] %v350_v24 }
  0x2d   : > { %353 = vst [vmem:[%s1270_s6 + $0xc8] sm:$0xff] %v352_v25 }
  0x2e   : > { %355 = vst [vmem:[%s1270_s6 + $0xd0] sm:$0xff] %v354_v26 }
  0x2f   : > { %357 = vst [vmem:[%s1270_s6 + $0xd8] sm:$0xff] %v356_v27 }
  0x30   : > { %359 = vst [vmem:[%s1270_s6 + $0xe0] sm:$0xff] %v358_v28 }
  0x31   : > { %361 = vst [vmem:[%s1270_s6 + $0xe8] sm:$0xff] %v360_v29 }
  0x32   : > { %363 = vst [vmem:[%s1270_s6 + $0xf0] sm:$0xff] %v362_v30 }
  0x33   : > { %365 = vst [vmem:[%s1270_s6 + $0xf8] sm:$0xff] %v364_v31 }
  0x34 PF: > { %p929_p8 = scmp.ge.s32.totalorder %s1190_s19, 1  ;;  %p386_p9 = scmp.lt.s32.totalorder %s1190_s19, 3 }
  0x36   : > { %p387_p10 = pnand %p929_p8, %p386_p9 }
  0x37   : > { %s393_s7 = sand.u32 (!%p387_p10), 1, %s1174_s15   ;;  %s932_s26 = sshll.u32 (!%p387_p10), %s1182_s17, 1 }
  0x38   : > { %390 = sbr.rel (%p387_p10) target bundleno = 252 (0xfc), region = 70  ;;  %s930_s8 = sshll.u32 (!%p387_p10), %s393_s7, 8 }
  0x39   : > { %s1338_s9 = scalar_lea.vmem (!%p387_p10), [#allocation2], %s930_s8  ;;  %p450_p11 = scmp.lt.s32.totalorder (!%p387_p10), %s932_s26, 3 }
  0x3a   : > { %s931_s8 = sshll.u32 (!%p387_p10), %s393_s7, 5 }
  0x3d   : > { %v1000_v32 = vld [vmem:[%s1338_s9 + $0x70] sm:$0xf]  ;;  %v1093_v33 = vld [vmem:[%s1338_s9 + $0x74] sm:$0xf0]  ;;  %v1092_v37 = vld [vmem:[%s1338_s9 + $0x74] sm:$0xf] }
  0x3e   : > { %v1064_v34 = vld [vmem:[%s1338_s9 + $0xf0] sm:$0xf]  ;;  %v1001_v35 = vor.u32 %v1093_v33, %v1000_v32  ;;  %v1109_v36 = vld [vmem:[%s1338_s9 + $0xf4] sm:$0xf0]  ;;  %v1002_v38 = vld [vmem:[%s1338_s9 + $0x78] sm:$0xf0] }
  0x3f   : > { %v1065_v39 = vor.u32 %v1109_v36, %v1064_v34  ;;  %v1005_v40 = vor.u32 %v1092_v37, %v1002_v38  ;;  %v1108_v41 = vld [vmem:[%s1338_s9 + $0xf4] sm:$0xf]  ;;  %v1066_v42 = vld [vmem:[%s1338_s9 + $0xf8] sm:$0xf0]  ;;  %v992_v43 = vld [vmem:[%s1338_s9 + $0x60] sm:$0xf] }
  0x40   : > { %677 = vmatpush.bf16.msra.mxu0 %v1001_v35  ;;  %v1069_v44 = vor.u32 %v1108_v41, %v1066_v42  ;;  %v1091_v45 = vld [vmem:[%s1338_s9 + $0x64] sm:$0xf0]  ;;  %v1056_v46 = vld [vmem:[%s1338_s9 + $0xe0] sm:$0xf]  ;;  %v1090_v50 = vld [vmem:[%s1338_s9 + $0x64] sm:$0xf] }
  0x41   : > { %v1107_v47 = vld [vmem:[%s1338_s9 + $0xe4] sm:$0xf0]  ;;  %691 = vmatpush.bf16.msra.mxu1 %v1065_v39  ;;  %705 = vmatpush.bf16.msra.mxu2 %v1005_v40  ;;  %v993_v48 = vor.u32 %v1091_v45, %v992_v43  ;;  %v994_v51 = vld [vmem:[%s1338_s9 + $0x68] sm:$0xf0]  ;;  %v1106_v52 = vld [vmem:[%s1338_s9 + $0xe4] sm:$0xf] }
  0x42   : > { %v1057_v49 = vor.u32 %v1107_v47, %v1056_v46  ;;  %719 = vmatpush.bf16.msra.mxu3 %v1069_v44  ;;  %v997_v53 = vor.u32 %v1090_v50, %v994_v51  ;;  %v1058_v54 = vld [vmem:[%s1338_s9 + $0xe8] sm:$0xf0]  ;;  %v984_v55 = vld [vmem:[%s1338_s9 + $0x50] sm:$0xf]  ;;  %v1089_v56 = vld [vmem:[%s1338_s9 + $0x54] sm:$0xf0] }
  0x43   : > { %v1061_v57 = vor.u32 %v1106_v52, %v1058_v54  ;;  %v1048_v58 = vld [vmem:[%s1338_s9 + $0xd0] sm:$0xf]  ;;  %v1105_v59 = vld [vmem:[%s1338_s9 + $0xd4] sm:$0xf0]  ;;  %v1088_v60 = vld [vmem:[%s1338_s9 + $0x54] sm:$0xf]  ;;  %v985_v61 = vor.u32 %v1089_v56, %v984_v55 }
  0x44   : > { %678 = vmatpush.bf16.msra.mxu0 %v993_v48  ;;  %v986_v62 = vld [vmem:[%s1338_s9 + $0x58] sm:$0xf0]  ;;  %v1104_v63 = vld [vmem:[%s1338_s9 + $0xd4] sm:$0xf]  ;;  %v1049_v1 = vor.u32 %v1105_v59, %v1048_v58  ;;  %v976_v3 = vld [vmem:[%s1338_s9 + $0x40] sm:$0xf] }
  0x45   : > { %v1050_v0 = vld [vmem:[%s1338_s9 + $0xd8] sm:$0xf0]  ;;  %692 = vmatpush.bf16.msra.mxu1 %v1057_v49  ;;  %706 = vmatpush.bf16.msra.mxu2 %v997_v53  ;;  %v989_v2 = vor.u32 %v1088_v60, %v986_v62  ;;  %v1087_v4 = vld [vmem:[%s1338_s9 + $0x44] sm:$0xf0]  ;;  %v1040_v5 = vld [vmem:[%s1338_s9 + $0xc0] sm:$0xf] }
  0x46   : > { %720 = vmatpush.bf16.msra.mxu3 %v1061_v57  ;;  %v1053_v6 = vor.u32 %v1104_v63, %v1050_v0  ;;  %v1103_v7 = vld [vmem:[%s1338_s9 + $0xc4] sm:$0xf0]  ;;  %v1086_v8 = vld [vmem:[%s1338_s9 + $0x44] sm:$0xf]  ;;  %v978_v9 = vld [vmem:[%s1338_s9 + $0x48] sm:$0xf0]  ;;  %v977_v12 = vor.u32 %v1087_v4, %v976_v3 }
  0x47   : > { %v1102_v10 = vld [vmem:[%s1338_s9 + $0xc4] sm:$0xf]  ;;  %v1042_v11 = vld [vmem:[%s1338_s9 + $0xc8] sm:$0xf0]  ;;  %v1041_v13 = vor.u32 %v1103_v7, %v1040_v5  ;;  %v981_v14 = vor.u32 %v1086_v8, %v978_v9  ;;  %v968_v15 = vld [vmem:[%s1338_s9 + $0x30] sm:$0xf] }
  0x48   : > { %679 = vmatpush.bf16.msra.mxu0 %v985_v61  ;;  %v1085_v16 = vld [vmem:[%s1338_s9 + $0x34] sm:$0xf0]  ;;  %v1032_v17 = vld [vmem:[%s1338_s9 + $0xb0] sm:$0xf]  ;;  %v1045_v18 = vor.u32 %v1102_v10, %v1042_v11  ;;  %v1084_v20 = vld [vmem:[%s1338_s9 + $0x34] sm:$0xf] }
  0x49   : > { %693 = vmatpush.bf16.msra.mxu1 %v1049_v1  ;;  %707 = vmatpush.bf16.msra.mxu2 %v989_v2  ;;  %v1101_v19 = vld [vmem:[%s1338_s9 + $0xb4] sm:$0xf0]  ;;  %v970_v21 = vld [vmem:[%s1338_s9 + $0x38] sm:$0xf0]  ;;  %v1100_v22 = vld [vmem:[%s1338_s9 + $0xb4] sm:$0xf]  ;;  %v969_v24 = vor.u32 %v1085_v16, %v968_v15 }
  0x4a   : > { %721 = vmatpush.bf16.msra.mxu3 %v1053_v6  ;;  %v1034_v23 = vld [vmem:[%s1338_s9 + $0xb8] sm:$0xf0]  ;;  %v1033_v25 = vor.u32 %v1101_v19, %v1032_v17  ;;  %v973_v26 = vor.u32 %v1084_v20, %v970_v21  ;;  %v960_v27 = vld [vmem:[%s1338_s9 + $0x20] sm:$0xf]  ;;  %v1083_v28 = vld [vmem:[%s1338_s9 + $0x24] sm:$0xf0] }
  0x4b   : > { %v1024_v29 = vld [vmem:[%s1338_s9 + $0xa0] sm:$0xf]  ;;  %v1037_v30 = vor.u32 %v1100_v22, %v1034_v23  ;;  %v1099_v31 = vld [vmem:[%s1338_s9 + $0xa4] sm:$0xf0]  ;;  %v1082_v32 = vld [vmem:[%s1338_s9 + $0x24] sm:$0xf]  ;;  %v961_v36 = vor.u32 %v1083_v28, %v960_v27 }
  0x4c   : > { %680 = vmatpush.bf16.msra.mxu0 %v977_v12  ;;  %v962_v33 = vld [vmem:[%s1338_s9 + $0x28] sm:$0xf0]  ;;  %v1098_v34 = vld [vmem:[%s1338_s9 + $0xa4] sm:$0xf]  ;;  %v1025_v37 = vor.u32 %v1099_v31, %v1024_v29  ;;  %v952_v39 = vld [vmem:[%s1338_s9 + $0x10] sm:$0xf] }
  0x4d   : > { %694 = vmatpush.bf16.msra.mxu1 %v1041_v13  ;;  %708 = vmatpush.bf16.msra.mxu2 %v981_v14  ;;  %v1026_v35 = vld [vmem:[%s1338_s9 + $0xa8] sm:$0xf0]  ;;  %v965_v38 = vor.u32 %v1082_v32, %v962_v33  ;;  %v1081_v40 = vld [vmem:[%s1338_s9 + $0x14] sm:$0xf0]  ;;  %v1016_v41 = vld [vmem:[%s1338_s9 + $0x90] sm:$0xf] }
  0x4e   : > { %722 = vmatpush.bf16.msra.mxu3 %v1045_v18  ;;  %v1029_v42 = vor.u32 %v1098_v34, %v1026_v35  ;;  %v1097_v43 = vld [vmem:[%s1338_s9 + $0x94] sm:$0xf0]  ;;  %v1080_v44 = vld [vmem:[%s1338_s9 + $0x14] sm:$0xf]  ;;  %v954_v45 = vld [vmem:[%s1338_s9 + $0x18] sm:$0xf0]  ;;  %v953_v48 = vor.u32 %v1081_v40, %v952_v39 }
  0x4f   : > { %v1096_v46 = vld [vmem:[%s1338_s9 + $0x94] sm:$0xf]  ;;  %v1018_v47 = vld [vmem:[%s1338_s9 + $0x98] sm:$0xf0]  ;;  %v1017_v49 = vor.u32 %v1097_v43, %v1016_v41  ;;  %v957_v50 = vor.u32 %v1080_v44, %v954_v45  ;;  %v944_v51 = vld [vmem:[%s1338_s9] sm:$0xf] }
  0x50   : > { %681 = vmatpush.bf16.msra.mxu0 %v969_v24  ;;  %v1079_v52 = vld [vmem:[%s1338_s9 + $0x4] sm:$0xf0]  ;;  %v1008_v53 = vld [vmem:[%s1338_s9 + $0x80] sm:$0xf]  ;;  %v1021_v54 = vor.u32 %v1096_v46, %v1018_v47  ;;  %v1078_v56 = vld [vmem:[%s1338_s9 + $0x4] sm:$0xf] }
  0x51   : > { %695 = vmatpush.bf16.msra.mxu1 %v1033_v25  ;;  %709 = vmatpush.bf16.msra.mxu2 %v973_v26  ;;  %v1095_v55 = vld [vmem:[%s1338_s9 + $0x84] sm:$0xf0]  ;;  %v946_v57 = vld [vmem:[%s1338_s9 + $0x8] sm:$0xf0]  ;;  %v1094_v58 = vld [vmem:[%s1338_s9 + $0x84] sm:$0xf]  ;;  %v945_v60 = vor.u32 %v1079_v52, %v944_v51 }
  0x52   : > { %723 = vmatpush.bf16.msra.mxu3 %v1037_v30  ;;  %v1010_v59 = vld [vmem:[%s1338_s9 + $0x88] sm:$0xf0]  ;;  %v936_v61 = vld [vmem:[%s1446_s0] sm:$0xf]  ;;  %v1077_v62 = vld [vmem:[%s1446_s0 + $0x4] sm:$0xf0]  ;;  %v1009_v63 = vor.u32 %v1095_v55, %v1008_v53  ;;  %v949_v0 = vor.u32 %v1078_v56, %v946_v57 }
  0x53   : > { %v1076_v1 = vld [vmem:[%s1446_s0 + $0x4] sm:$0xf]  ;;  %v938_v2 = vld [vmem:[%s1446_s0 + $0x8] sm:$0xf0]  ;;  %v1013_v3 = vor.u32 %v1094_v58, %v1010_v59  ;;  %v937_v4 = vor.u32 %v1077_v62, %v936_v61  ;;  %s1459_s26 = smov (!%p450_p11, %s932_s26), 3  ;;  %s434_s9 = scalar_lea.vmem [#allocation3], %s931_s8 }
  0x54   : > { %682 = vmatpush.bf16.msra.mxu0 %v961_v36  ;;  %v941_v5 = vor.u32 %v1076_v1, %v938_v2  ;;  %s452_s29 = scalar_lea.vmem %s1448_s2, %s1459_s26  ;;  %s457_s6 = scalar_lea.vmem %s1449_s3, %s1459_s26 }
  0x55   : > { %696 = vmatpush.bf16.msra.mxu1 %v1025_v37  ;;  %710 = vmatpush.bf16.msra.mxu2 %v965_v38  ;;  %v748_v6 = vld [vmem:[%s452_s29] sm:$0x3]  ;;  %s1110_s15 = sshll.u32 (%p1252_p6), %s1182_s17, 4 }
  0x56   : > { %724 = vmatpush.bf16.msra.mxu3 %v1029_v42  ;;  %v758_v9 = vld [vmem:[%s457_s6] sm:$0x3]  ;;  %v750_v11 = vperm.slane %v748_v6, 0  ;;  %v751_v19 = vperm.slane %v748_v6, 1  ;;  %s784_s11 = scalar_lea.vmem (%p1252_p6), %s1450_s4, %s1110_s15 }
  0x57   : > { %v760_v12 = vperm.slane %v758_v9, 0  ;;  %v761_v22 = vperm.slane %v758_v9, 1 }
  0x58   : > { %683 = vmatpush.bf16.msra.mxu0 %v953_v48 }
  0x59   : > { %697 = vmatpush.bf16.msra.mxu1 %v1017_v49  ;;  %711 = vmatpush.bf16.msra.mxu2 %v957_v50 }
  0x5a   : > { %725 = vmatpush.bf16.msra.mxu3 %v1021_v54 }
  0x5c   : > { %684 = vmatpush.bf16.msra.mxu0 %v945_v60 }
  0x5d   : > { %698 = vmatpush.bf16.msra.mxu1 %v1009_v63  ;;  %712 = vmatpush.bf16.msra.mxu2 %v949_v0 }
  0x5e   : > { %726 = vmatpush.bf16.msra.mxu3 %v1013_v3 }
  0x5f   : > { %685 = vmatmul.bf16.vlgmr.msra.gmra.mxu0 %v937_v4 }
  0x60   : > { %699 = vmatmul.bf16.vlgmr.msra.gmra.mxu1 %v941_v5  ;;  %713 = vmatmul.bf16.vlgmr.msra.gmra.mxu2 %v937_v4 }
  0x61   : > { %727 = vmatmul.bf16.vlgmr.msra.gmra.mxu3 %v941_v5 }
  0xdc   : > { %v686_v7 = vpop.f32.mrf.mxu0 }
  0xdd   : > { %v700_v8 = vpop.f32.mrf.mxu1 }
  0xde   : > { %v701_v10 = vadd.f32 %v700_v8, %v686_v7 }
  0xe0   : > { %v754_v13 = vmul.f32 %v750_v11, %v701_v10 }
  0xe2   : > { %v764_v15 = vadd.f32 %v760_v12, %v754_v13 }
  0xe3   : > { %v714_v14 = vpop.f32.mrf.mxu2 }
  0xe4   : > { %v728_v16 = vpop.f32.mrf.mxu3  ;;  %v688_v17 = vpop.f32.mrf.mxu0  ;;  %768 = vst [vmem:[%s434_s9] sm:$0xff] %v764_v15 }
  0xe5   : > { %v729_v18 = vadd.f32 %v728_v16, %v714_v14  ;;  %v702_v20 = vpop.f32.mrf.mxu1 }
  0xe6   : > { %v703_v21 = vadd.f32 %v702_v20, %v688_v17 }
  0xe7   : > { %v755_v23 = vmul.f32 %v751_v19, %v729_v18 }
  0xe8   : > { %v756_v24 = vmul.f32 %v750_v11, %v703_v21 }
  0xe9   : > { %v765_v25 = vadd.f32 %v761_v22, %v755_v23 }
  0xea   : > { %v766_v27 = vadd.f32 %v760_v12, %v756_v24 }
  0xeb   : > { %v716_v26 = vpop.f32.mrf.mxu2  ;;  %769 = vst [vmem:[%s434_s9 + $0x8] sm:$0xff] %v765_v25  ;;  %v797_v32 = vld [vmem:[%s434_s9] sm:$0xff] (%p1252_p6) }
  0xec   : > { %v730_v28 = vpop.f32.mrf.mxu3  ;;  %770 = vst [vmem:[%s434_s9 + $0x10] sm:$0xff] %v766_v27 }
  0xed   : > { %v731_v29 = vadd.f32 %v730_v28, %v716_v26  ;;  %798 = vst [vmem:[%s784_s11] sm:$0xff] (%p1252_p6), %v797_v32 }
  0xef   : > { %v757_v30 = vmul.f32 %v751_v19, %v731_v29  ;;  %778 = sbr.rel (!%p1252_p6) target bundleno = 252 (0xfc), region = 86 }
  0xf1   : > { %v767_v31 = vadd.f32 %v761_v22, %v757_v30 }
  0xf2   : > { %v799_v33 = vld [vmem:[%s434_s9 + $0x8] sm:$0xff] (%p1252_p6) }
  0xf3   : > { %771 = vst [vmem:[%s434_s9 + $0x18] sm:$0xff] %v767_v31  ;;  %v801_v34 = vld [vmem:[%s434_s9 + $0x10] sm:$0xff] (%p1252_p6) }
  0xf4   : > { %800 = vst [vmem:[%s784_s11 + $0x8] sm:$0xff] %v799_v33 }
  0xf5   : > { %802 = vst [vmem:[%s784_s11 + $0x20] sm:$0xff] %v801_v34 }
  0xfa   : > { %v803_v35 = vld [vmem:[%s434_s9 + $0x18] sm:$0xff] }
  0xfb   : > { %804 = vst [vmem:[%s784_s11 + $0x28] sm:$0xff] %v803_v35 }
  0xfc PF: > { %s14_s19 = sadd.s32 1, %s1190_s19   ;;  %s1452_s15 = smov %s1178_s16 }
  0xfd   : > { %p11_p12 = scmp.ge.s32.totalorder %s14_s19, 4   ;;  %s1453_s16 = smov %s1257_s25 }
  0xfe   : > { %s1454_s17 = smov %s1186_s18  ;;  %s1455_s18 = smov %s1457_s20 }
  0xff   :  { %13 = sbr.rel (!%p11_p12) target bundleno = 3 (0x3), region = 149 }

</bundles_post_ra>
